<compile_context>
chip_gen: v7x
topology: tpu7x:2x2x1
jax: 0.10.0
libtpu: 0.0.40
codegen_flags: <defaults>
</compile_context>

<pallas_src>
import jax
import jax.numpy as jnp
from jax.experimental import pallas as pl
from jax.experimental.pallas import tpu as pltpu

EPS = 1e-5
_LANE = 128
_VMEM_LIMIT = 48 * 1024 * 1024  # well above the 16/32 MiB defaults, < 64 MiB (v7x)


def _round_up(x, m):
    return (x + m - 1) // m * m


# --------------------------------------------------------------------------- #
# Pass 1 / 3: per-channel sum and sum-of-squares (batch-norm statistics).      #
# --------------------------------------------------------------------------- #
def _stats_kernel(x_ref, sum_ref, ssq_ref):
    @pl.when(pl.program_id(0) == 0)
    def _():
        sum_ref[...] = jnp.zeros_like(sum_ref)
        ssq_ref[...] = jnp.zeros_like(ssq_ref)

    x = x_ref[0].astype(jnp.float32)              # (H, Wp, C); pad cols/chans are 0
    flat = x.reshape(-1, x.shape[-1])             # Wp % 8 == 0 -> aligned reshape
    sum_ref[...] += jnp.sum(flat, axis=0, keepdims=True)
    ssq_ref[...] += jnp.sum(flat * flat, axis=0, keepdims=True)


def _channel_stats(a):
    """a: (N, H, Wp, C) 'wide' layout with zero padding columns/channels."""
    N, H, Wp, C = a.shape
    return pl.pallas_call(
        _stats_kernel,
        grid=(N,),
        in_specs=[pl.BlockSpec((1, H, Wp, C), lambda n: (n, 0, 0, 0))],
        out_specs=(pl.BlockSpec((1, C), lambda n: (0, 0)),
                   pl.BlockSpec((1, C), lambda n: (0, 0))),
        out_shape=(jax.ShapeDtypeStruct((1, C), jnp.float32),
                   jax.ShapeDtypeStruct((1, C), jnp.float32)),
        compiler_params=pltpu.CompilerParams(
            dimension_semantics=("arbitrary",),   # grid-reduced accumulator outputs
            vmem_limit_bytes=_VMEM_LIMIT),
    )(a)


# --------------------------------------------------------------------------- #
# Pass 2 / 4: BN(folded) + ReLU + 3x3 conv (+ optional fused 1x1 shortcut).    #
# --------------------------------------------------------------------------- #
def _make_conv_kernel(H, Wp, Wv, base, has_sc):
    """Wide layout: valid image columns are [0, Wv) of the Wp-wide rows.

    q scratch is a flattened zero-padded activation buffer of (L + 2*base) rows,
    L = H*Wp; image element (r, j) lives at flat row base + r*Wp + j.  Tap (dy, dx)
    of the 3x3 conv is then the contiguous row window starting at
    base + (dy-1)*Wp + (dx-1)  -> a plain row-offset matmul LHS (no slice+reshape
    copies, dy shifts are sublane-tile aligned since Wp % 8 == 0).
    """
    L = H * Wp

    def kernel(*refs):
        if has_sc:
            (src_ref, xsc_ref, scale_ref, shift_ref, w_ref, b_ref,
             wsc_ref, bsc_ref, out_ref, q_ref, acc_ref) = refs
        else:
            (src_ref, scale_ref, shift_ref, w_ref, b_ref,
             out_ref, q_ref, acc_ref) = refs

        Ci = q_ref.shape[-1]
        Co = acc_ref.shape[-1]

        # ---- BN (pre-folded scale/shift, f32 math) + ReLU --------------------
        x = src_ref[0].astype(jnp.float32)                         # (H, Wp, Ci)
        scale = scale_ref[...].reshape(1, 1, Ci)
        shift = shift_ref[...].reshape(1, 1, Ci)
        act = jnp.maximum(x * scale + shift, 0.0)
        col = jax.lax.broadcasted_iota(jnp.int32, (H, Wp, 1), 1)
        act = jnp.where(col < Wv, act, 0.0)        # zero the width-padding columns

        # ---- halo: zero only the thin top/bottom strips; write interior once -
        q_ref[pl.ds(0, base), :] = jnp.zeros((base, Ci), q_ref.dtype)
        q_ref[pl.ds(base + L, base), :] = jnp.zeros((base, Ci), q_ref.dtype)
        q_ref[pl.ds(base, L), :] = act.astype(q_ref.dtype).reshape(L, Ci)  # bf16

        # ---- fused 1x1 learnable shortcut on raw x (initializes accumulator) -
        if has_sc:
            xs = xsc_ref[0].astype(jnp.bfloat16).reshape(L, xsc_ref.shape[-1])
            acc_ref[...] = jnp.dot(xs, wsc_ref[...],
                                   preferred_element_type=jnp.float32)

        # ---- 3x3 conv: nine row-shifted windows -> nine MXU matmuls ----------
        first = not has_sc
        for dy in range(3):
            for dx in range(3):
                start = base + (dy - 1) * Wp + (dx - 1)
                win = q_ref[pl.ds(start, L), :]                    # (L, Ci) bf16
                part = jnp.dot(win, w_ref[dy, dx],
                               preferred_element_type=jnp.float32)
                if first:
                    acc_ref[...] = part
                    first = False
                else:
                    acc_ref[...] += part

        # ---- bias once, zero junk columns, lane-dense store ------------------
        res = acc_ref[...] + b_ref[...]
        if has_sc:
            res = res + bsc_ref[...]
        res = jnp.where(col < Wv, res.reshape(H, Wp, Co), 0.0)
        out_ref[0] = res.astype(out_ref.dtype)

    return kernel


def _conv3x3_pass(src, scale, shift, w, b, Wv, shortcut=None):
    """src: (N, H, Wp, Ci) wide-layout activations (pre-BN).  Returns (N, H, Wp, Co)
    f32 = conv3x3(relu(bn(src))) [+ conv1x1(shortcut_x)] with zero junk columns."""
    N, H, Wp, Ci = src.shape
    Co = w.shape[-1]
    L = H * Wp
    base = Wp + 8                 # aligned interior offset; covers the -Wp-1 tap
    qrows = L + 2 * base

    kernel = _make_conv_kernel(H, Wp, Wv, base, shortcut is not None)

    img4 = lambda n: (n, 0, 0, 0)
    const2 = lambda n: (0, 0)
    const4 = lambda n: (0, 0, 0, 0)

    in_specs = [pl.BlockSpec((1, H, Wp, Ci), img4)]
    inputs = [src]
    if shortcut is not None:
        xsc, wsc, bsc = shortcut
        in_specs.append(pl.BlockSpec((1, H, Wp, xsc.shape[-1]), img4))
        inputs.append(xsc)
    in_specs += [pl.BlockSpec((1, Ci), const2),
                 pl.BlockSpec((1, Ci), const2),
                 pl.BlockSpec((3, 3, Ci, Co), const4),
                 pl.BlockSpec((1, Co), const2)]
    inputs += [scale, shift, w, b]
    if shortcut is not None:
        in_specs += [pl.BlockSpec((wsc.shape[0], Co), const2),
                     pl.BlockSpec((1, Co), const2)]
        inputs += [wsc, bsc]

    return pl.pallas_call(
        kernel,
        grid=(N,),
        in_specs=in_specs,
        out_specs=pl.BlockSpec((1, H, Wp, Co), img4),
        out_shape=jax.ShapeDtypeStruct((N, H, Wp, Co), jnp.float32),
        scratch_shapes=[pltpu.VMEM((qrows, Ci), jnp.bfloat16),   # padded activations
                        pltpu.VMEM((L, Co), jnp.float32)],       # conv accumulator
        compiler_params=pltpu.CompilerParams(
            dimension_semantics=("parallel",),    # shard images across TCs (v7x)
            vmem_limit_bytes=_VMEM_LIMIT),
    )(*inputs)


# --------------------------------------------------------------------------- #
# Wrapper: NCHW <-> lane-dense NHWC 'wide' layout plumbing + tiny BN folds.    #
# --------------------------------------------------------------------------- #
@jax.jit
def gblock_pallas(x_nchw, params):
    """x_nchw: (N, Cin, H, W) float32 -> (N, Cout, H, W) float32."""
    (g1, b1, w1, c1b, g2, b2, w2, c2b, wsc, bsc) = params
    N, Cin, H, W = x_nchw.shape
    Cout = w1.shape[-1]
    Ci = _round_up(Cin, _LANE)          # lane-dense channel counts
    Co = _round_up(Cout, _LANE)
    Wp = _round_up(W + 2, 8)            # sublane-aligned padded width

    x_nhwc = jnp.transpose(x_nchw, (0, 2, 3, 1)).astype(jnp.float32)
    x_wide = jnp.pad(x_nhwc, ((0, 0), (0, 0), (0, Wp - W), (0, Ci - Cin)))

    # zero-pad parameters to lane-dense channels; conv weights -> bf16 (MXU operands)
    g1p = jnp.pad(g1, ((0, 0), (0, Ci - Cin)))
    b1p = jnp.pad(b1, ((0, 0), (0, Ci - Cin)))
    g2p = jnp.pad(g2, ((0, 0), (0, Co - Cout)))
    b2p = jnp.pad(b2, ((0, 0), (0, Co - Cout)))
    w1p = jnp.pad(w1, ((0, 0), (0, 0), (0, Ci - Cin), (0, Co - Cout))).astype(jnp.bfloat16)
    w2p = jnp.pad(w2, ((0, 0), (0, 0), (0, Co - Cout), (0, Co - Cout))).astype(jnp.bfloat16)
    c1bp = jnp.pad(c1b, ((0, 0), (0, Co - Cout)))
    c2bp = jnp.pad(c2b, ((0, 0), (0, Co - Cout)))
    wscp = jnp.pad(wsc, ((0, Ci - Cin), (0, Co - Cout))).astype(jnp.bfloat16)
    bscp = jnp.pad(bsc, ((0, 0), (0, Co - Cout)))

    cnt = float(N * H * W)              # true element count (pad cols/chans are 0)

    def fold(gain, bias, s, ss):
        mean = s / cnt
        var = jnp.maximum(ss / cnt - mean * mean, 0.0)   # biased (training-mode BN)
        scale = gain * jax.lax.rsqrt(var + EPS)
        return scale, bias - mean * scale

    # h = conv1(relu(bn1(x)))
    s1, ss1 = _channel_stats(x_wide)
    scale1, shift1 = fold(g1p, b1p, s1, ss1)
    h1 = _conv3x3_pass(x_wide, scale1, shift1, w1p, c1bp, W)

    # y = conv2(relu(bn2(h))) + conv_sc(x)
    s2, ss2 = _channel_stats(h1)
    scale2, shift2 = fold(g2p, b2p, s2, ss2)
    y = _conv3x3_pass(h1, scale2, shift2, w2p, c2bp, W,
                      shortcut=(x_wide, wscp, bscp))

    out = y[:, :, :W, :Cout]
    return jnp.transpose(out, (0, 3, 1, 2))


# --------------------------------------------------------------------------- #
# Pure-JAX (XLA) reference.  mxu_dtype=bf16 mirrors the kernel's MXU numerics  #
# (bf16 operands, f32 accumulation); mxu_dtype=None is the strict f32 module.  #
# --------------------------------------------------------------------------- #
def gblock_reference(x, params, mxu_dtype=jnp.bfloat16):
    (g1, b1, w1, c1b, g2, b2, w2, c2b, wsc, bsc) = params

    def rnd(v):
        if mxu_dtype is None:
            return v
        return v.astype(mxu_dtype).astype(jnp.float32)

    def bn_relu(v, gain, bias):
        mean = v.mean(axis=(0, 2, 3), keepdims=True)
        var = ((v - mean) ** 2).mean(axis=(0, 2, 3), keepdims=True)
        scale = gain.reshape(1, -1, 1, 1) * jax.lax.rsqrt(var + EPS)
        shift = bias.reshape(1, -1, 1, 1) - mean * scale
        return jnp.maximum(v * scale + shift, 0.0)

    def conv(v, w_hwio, bias, pad):
        y = jax.lax.conv_general_dilated(
            rnd(v), rnd(w_hwio), window_strides=(1, 1),
            padding=[(pad, pad), (pad, pad)],
            dimension_numbers=("NCHW", "HWIO", "NCHW"),
            precision=jax.lax.Precision.HIGHEST)
        return y + bias.reshape(1, -1, 1, 1)

    h = bn_relu(x, g1, b1)
    h = conv(h, w1, c1b, 1)
    h = bn_relu(h, g2, b2)
    h = conv(h, w2, c2b, 1)
    xsc = conv(x, wsc[None, None, :, :], bsc, 0)
    return h + xsc


def make_params(key, cin, cout):
    ks = jax.random.split(key, 6)
    g1 = jnp.ones((1, cin), jnp.float32)            # bn1 gain (module init: ones)
    b1 = jnp.zeros((1, cin), jnp.float32)           # bn1 bias (module init: zeros)
    g2 = jnp.ones((1, cout), jnp.float32)
    b2 = jnp.zeros((1, cout), jnp.float32)
    w1 = 0.1 * jax.random.normal(ks[0], (3, 3, cin, cout), jnp.float32)
    c1b = 0.1 * jax.random.normal(ks[1], (1, cout), jnp.float32)
    w2 = 0.1 * jax.random.normal(ks[2], (3, 3, cout, cout), jnp.float32)
    c2b = 0.1 * jax.random.normal(ks[3], (1, cout), jnp.float32)
    wsc = 0.1 * jax.random.normal(ks[4], (cin, cout), jnp.float32)
    bsc = 0.1 * jax.random.normal(ks[5], (1, cout), jnp.float32)
    return (g1, b1, w1, c1b, g2, b2, w2, c2b, wsc, bsc)


if __name__ == "__main__":
    key = jax.random.PRNGKey(0)
    kx, kp = jax.random.split(key)

    N, Cin, Cout, H, W = 2, 4, 8, 16, 16
    x = jax.random.normal(kx, (N, Cin, H, W), jnp.float32)
    # `y` is accepted by GBlock.forward but ignored by this plain `bn`; unused.
    params = make_params(kp, Cin, Cout)

    out = jax.block_until_ready(gblock_pallas(x, params))
    assert out.shape == (N, Cout, H, W), out.shape

    # Tight check vs a reference that mirrors the kernel's MXU numerics
    # (bf16 operands, f32 accumulation).
    ref_mxu = jax.block_until_ready(gblock_reference(x, params, mxu_dtype=jnp.bfloat16))
    assert jnp.allclose(out, ref_mxu, rtol=1e-2, atol=1e-2), (
        float(jnp.max(jnp.abs(out - ref_mxu))))

    # Loose sanity check vs the strict f32 module semantics.
    ref_f32 = jax.block_until_ready(gblock_reference(x, params, mxu_dtype=None))
    assert jnp.allclose(out, ref_f32, rtol=5e-2, atol=5e-2), (
        float(jnp.max(jnp.abs(out - ref_f32))))

    print("KERNEL_OK")
</pallas_src>

<mosaic_0001>
module attributes {stable_mosaic.version = 11 : i64} {
  func.func @_stats_kernel(%arg0: i32, %arg1: memref<1x16x24x128xf32, #tpu.memory_space<vmem>>, %arg2: memref<1x128xf32, #tpu.memory_space<vmem>>, %arg3: memref<1x128xf32, #tpu.memory_space<vmem>>) attributes {dimension_semantics = [#tpu.dimension_semantics<arbitrary>], iteration_bounds = array<i64: 2>, scalar_prefetch = 0 : i64, scratch_operands = 0 : i64, tpu.core_type = #tpu.core_type<tc>, window_params = [{transform_indices = @transform_0, window_bounds = array<i64: 1, 16, 24, 128>}, {pipeline_mode = #tpu.pipeline_mode<synchronous>, transform_indices = @transform_1, window_bounds = array<i64: 1, 128>}, {pipeline_mode = #tpu.pipeline_mode<synchronous>, transform_indices = @transform_2, window_bounds = array<i64: 1, 128>}]} {
    %c0_i32 = arith.constant 0 : i32
    %0 = arith.cmpi eq, %arg0, %c0_i32 : i32
    %1 = arith.extui %0 : i1 to i32
    %c0_i32_0 = arith.constant 0 : i32
    %2 = arith.cmpi ne, %1, %c0_i32_0 : i32
    scf.if %2 {
      %cst_13 = arith.constant 0.000000e+00 : f32
      %17 = vector.broadcast %cst_13 : f32 to vector<1x128xf32>
      %c0_14 = arith.constant 0 : index
      %c0_15 = arith.constant 0 : index
      %18 = vector.load %arg2[%c0_14, %c0_15] : memref<1x128xf32, #tpu.memory_space<vmem>>, vector<1x128xf32>
      tpu.vector_store %arg2[%c0_14, %c0_15], %17 {strides = array<i32>} : memref<1x128xf32, #tpu.memory_space<vmem>>, vector<1x128xf32>,
      %cst_16 = arith.constant 0.000000e+00 : f32
      %19 = vector.broadcast %cst_16 : f32 to vector<1x128xf32>
      %c0_17 = arith.constant 0 : index
      %c0_18 = arith.constant 0 : index
      %20 = vector.load %arg3[%c0_17, %c0_18] : memref<1x128xf32, #tpu.memory_space<vmem>>, vector<1x128xf32>
      tpu.vector_store %arg3[%c0_17, %c0_18], %19 {strides = array<i32>} : memref<1x128xf32, #tpu.memory_space<vmem>>, vector<1x128xf32>,
    } else {
    }
    %c0 = arith.constant 0 : index
    %c0_1 = arith.constant 0 : index
    %c0_2 = arith.constant 0 : index
    %c0_3 = arith.constant 0 : index
    %3 = vector.load %arg1[%c0, %c0_1, %c0_2, %c0_3] : memref<1x16x24x128xf32, #tpu.memory_space<vmem>>, vector<1x16x24x128xf32>
    %4 = vector.shape_cast %3 : vector<1x16x24x128xf32> to vector<16x24x128xf32>
    %5 = vector.shape_cast %4 : vector<16x24x128xf32> to vector<384x128xf32>
    %c0_4 = arith.constant 0 : index
    %c0_5 = arith.constant 0 : index
    %6 = vector.load %arg2[%c0_4, %c0_5] : memref<1x128xf32, #tpu.memory_space<vmem>>, vector<1x128xf32>
    %cst = arith.constant dense<0.000000e+00> : vector<128xf32>
    %7 = vector.multi_reduction <add>, %5, %cst [0] : vector<384x128xf32> to vector<128xf32>
    %8 = vector.shape_cast %7 : vector<128xf32> to vector<1x128xf32>
    %9 = arith.addf %6, %8 : vector<1x128xf32>
    %c0_6 = arith.constant 0 : index
    %c0_7 = arith.constant 0 : index
    %10 = vector.load %arg2[%c0_6, %c0_7] : memref<1x128xf32, #tpu.memory_space<vmem>>, vector<1x128xf32>
    tpu.vector_store %arg2[%c0_6, %c0_7], %9 {strides = array<i32>} : memref<1x128xf32, #tpu.memory_space<vmem>>, vector<1x128xf32>,
    %c0_8 = arith.constant 0 : index
    %c0_9 = arith.constant 0 : index
    %11 = vector.load %arg3[%c0_8, %c0_9] : memref<1x128xf32, #tpu.memory_space<vmem>>, vector<1x128xf32>
    %12 = arith.mulf %5, %5 : vector<384x128xf32>
    %cst_10 = arith.constant dense<0.000000e+00> : vector<128xf32>
    %13 = vector.multi_reduction <add>, %12, %cst_10 [0] : vector<384x128xf32> to vector<128xf32>
    %14 = vector.shape_cast %13 : vector<128xf32> to vector<1x128xf32>
    %15 = arith.addf %11, %14 : vector<1x128xf32>
    %c0_11 = arith.constant 0 : index
    %c0_12 = arith.constant 0 : index
    %16 = vector.load %arg3[%c0_11, %c0_12] : memref<1x128xf32, #tpu.memory_space<vmem>>, vector<1x128xf32>
    tpu.vector_store %arg3[%c0_11, %c0_12], %15 {strides = array<i32>} : memref<1x128xf32, #tpu.memory_space<vmem>>, vector<1x128xf32>,
    return
  }
  func.func @transform_0(%arg0: i32) -> (i32, i32, i32, i32) {
    %c0_i32 = arith.constant 0 : i32
    %c0_i32_0 = arith.constant 0 : i32
    %c0_i32_1 = arith.constant 0 : i32
    %c0_i32_2 = arith.constant 0 : i32
    return %arg0, %c0_i32, %c0_i32_0, %c0_i32_1 : i32, i32, i32, i32
  }
  func.func @transform_1(%arg0: i32) -> (i32, i32) {
    %c0_i32 = arith.constant 0 : i32
    %c0_i32_0 = arith.constant 0 : i32
    %c0_i32_1 = arith.constant 0 : i32
    return %c0_i32, %c0_i32_0 : i32, i32
  }
  func.func @transform_2(%arg0: i32) -> (i32, i32) {
    %c0_i32 = arith.constant 0 : i32
    %c0_i32_0 = arith.constant 0 : i32
    %c0_i32_1 = arith.constant 0 : i32
    return %c0_i32, %c0_i32_0 : i32, i32
  }
}

module attributes {stable_mosaic.version = 11 : i64} {
  func.func @kernel(%arg0: i32, %arg1: memref<1x16x24x128xf32, #tpu.memory_space<vmem>>, %arg2: memref<1x128xf32, #tpu.memory_space<vmem>>, %arg3: memref<1x128xf32, #tpu.memory_space<vmem>>, %arg4: memref<3x3x128x128xbf16, #tpu.memory_space<vmem>>, %arg5: memref<1x128xf32, #tpu.memory_space<vmem>>, %arg6: memref<1x16x24x128xf32, #tpu.memory_space<vmem>>, %arg7: memref<448x128xbf16, #tpu.memory_space<vmem>>, %arg8: memref<384x128xf32, #tpu.memory_space<vmem>>) attributes {dimension_semantics = [#tpu.dimension_semantics<parallel>], iteration_bounds = array<i64: 2>, scalar_prefetch = 0 : i64, scratch_operands = 2 : i64, tpu.core_type = #tpu.core_type<tc>, window_params = [{transform_indices = @transform_0, window_bounds = array<i64: 1, 16, 24, 128>}, {pipeline_mode = #tpu.pipeline_mode<synchronous>, transform_indices = @transform_1, window_bounds = array<i64: 1, 128>}, {pipeline_mode = #tpu.pipeline_mode<synchronous>, transform_indices = @transform_2, window_bounds = array<i64: 1, 128>}, {pipeline_mode = #tpu.pipeline_mode<synchronous>, transform_indices = @transform_3, window_bounds = array<i64: 3, 3, 128, 128>}, {pipeline_mode = #tpu.pipeline_mode<synchronous>, transform_indices = @transform_4, window_bounds = array<i64: 1, 128>}, {transform_indices = @transform_5, window_bounds = array<i64: 1, 16, 24, 128>}]} {
    %c0 = arith.constant 0 : index
    %c0_0 = arith.constant 0 : index
    %c0_1 = arith.constant 0 : index
    %c0_2 = arith.constant 0 : index
    %0 = vector.load %arg1[%c0, %c0_0, %c0_1, %c0_2] : memref<1x16x24x128xf32, #tpu.memory_space<vmem>>, vector<1x16x24x128xf32>
    %1 = vector.shape_cast %0 : vector<1x16x24x128xf32> to vector<16x24x128xf32>
    %c0_3 = arith.constant 0 : index
    %c0_4 = arith.constant 0 : index
    %2 = vector.load %arg2[%c0_3, %c0_4] : memref<1x128xf32, #tpu.memory_space<vmem>>, vector<1x128xf32>
    %3 = vector.shape_cast %2 : vector<1x128xf32> to vector<1x1x128xf32>
    %c0_5 = arith.constant 0 : index
    %c0_6 = arith.constant 0 : index
    %4 = vector.load %arg3[%c0_5, %c0_6] : memref<1x128xf32, #tpu.memory_space<vmem>>, vector<1x128xf32>
    %5 = vector.shape_cast %4 : vector<1x128xf32> to vector<1x1x128xf32>
    %6 = vector.broadcast %3 : vector<1x1x128xf32> to vector<16x24x128xf32>
    %7 = arith.mulf %1, %6 : vector<16x24x128xf32>
    %8 = vector.broadcast %5 : vector<1x1x128xf32> to vector<16x24x128xf32>
    %9 = arith.addf %7, %8 : vector<16x24x128xf32>
    %cst = arith.constant 0.000000e+00 : f32
    %10 = vector.broadcast %cst : f32 to vector<16x24x128xf32>
    %11 = arith.maximumf %9, %10 : vector<16x24x128xf32>
    %12 = tpu.iota {dimensions = array<i32: 1>} : vector<16x24x1xi32>
    %c16_i32 = arith.constant 16 : i32
    %13 = vector.broadcast %c16_i32 : i32 to vector<16x24x1xi32>
    %14 = arith.cmpi slt, %12, %13 : vector<16x24x1xi32>
    %cst_7 = arith.constant 0.000000e+00 : f32
    %15 = vector.shape_cast %14 : vector<16x24x1xi1> to vector<16x24x1xi1>
    %16 = vector.broadcast %15 : vector<16x24x1xi1> to vector<16x24x128xi1>
    %17 = vector.broadcast %cst_7 : f32 to vector<16x24x128xf32>
    %18 = arith.select %16, %11, %17 : vector<16x24x128xi1>, vector<16x24x128xf32>
    %cst_8 = arith.constant 0.000000e+00 : bf16
    %19 = vector.broadcast %cst_8 : bf16 to vector<32x128xbf16>
    %c0_9 = arith.constant 0 : index
    %c0_10 = arith.constant 0 : index
    %20 = vector.load %arg7[%c0_9, %c0_10] : memref<448x128xbf16, #tpu.memory_space<vmem>>, vector<32x128xbf16>
    tpu.vector_store %arg7[%c0_9, %c0_10], %19 {strides = array<i32>} : memref<448x128xbf16, #tpu.memory_space<vmem>>, vector<32x128xbf16>,
    %cst_11 = arith.constant 0.000000e+00 : bf16
    %21 = vector.broadcast %cst_11 : bf16 to vector<32x128xbf16>
    %c416 = arith.constant 416 : index
    %c0_12 = arith.constant 0 : index
    %22 = vector.load %arg7[%c416, %c0_12] : memref<448x128xbf16, #tpu.memory_space<vmem>>, vector<32x128xbf16>
    tpu.vector_store %arg7[%c416, %c0_12], %21 {strides = array<i32>} : memref<448x128xbf16, #tpu.memory_space<vmem>>, vector<32x128xbf16>,
    %23 = arith.truncf %18 : vector<16x24x128xf32> to vector<16x24x128xbf16>
    %24 = vector.shape_cast %23 : vector<16x24x128xbf16> to vector<384x128xbf16>
    %c32 = arith.constant 32 : index
    %c0_13 = arith.constant 0 : index
    %25 = vector.load %arg7[%c32, %c0_13] : memref<448x128xbf16, #tpu.memory_space<vmem>>, vector<384x128xbf16>
    tpu.vector_store %arg7[%c32, %c0_13], %24 {strides = array<i32>} : memref<448x128xbf16, #tpu.memory_space<vmem>>, vector<384x128xbf16>,
    %c7 = arith.constant 7 : index
    %c0_14 = arith.constant 0 : index
    %26 = vector.load %arg7[%c7, %c0_14] : memref<448x128xbf16, #tpu.memory_space<vmem>>, vector<384x128xbf16>
    %c0_15 = arith.constant 0 : index
    %c0_16 = arith.constant 0 : index
    %c0_17 = arith.constant 0 : index
    %c0_18 = arith.constant 0 : index
    %27 = vector.load %arg4[%c0_15, %c0_16, %c0_17, %c0_18] : memref<3x3x128x128xbf16, #tpu.memory_space<vmem>>, vector<1x1x128x128xbf16>
    %28 = vector.shape_cast %27 : vector<1x1x128x128xbf16> to vector<128x128xbf16>
    %cst_19 = arith.constant dense<0.000000e+00> : vector<384x128xf32>
    %29 = tpu.matmul %26, %28, %cst_19 {dimension_numbers = #tpu.dot_dimension_numbers<[1], [0], [0], [1], [0, 0, 1, 1], [], []>} : vector<384x128xbf16>, vector<128x128xbf16>, vector<384x128xf32> -> vector<384x128xf32>
    %c0_20 = arith.constant 0 : index
    %c0_21 = arith.constant 0 : index
    %30 = vector.load %arg8[%c0_20, %c0_21] : memref<384x128xf32, #tpu.memory_space<vmem>>, vector<384x128xf32>
    tpu.vector_store %arg8[%c0_20, %c0_21], %29 {strides = array<i32>} : memref<384x128xf32, #tpu.memory_space<vmem>>, vector<384x128xf32>,
    %c8 = arith.constant 8 : index
    %c0_22 = arith.constant 0 : index
    %31 = vector.load %arg7[%c8, %c0_22] : memref<448x128xbf16, #tpu.memory_space<vmem>>, vector<384x128xbf16>
    %c0_23 = arith.constant 0 : index
    %c1 = arith.constant 1 : index
    %c0_24 = arith.constant 0 : index
    %c0_25 = arith.constant 0 : index
    %32 = vector.load %arg4[%c0_23, %c1, %c0_24, %c0_25] : memref<3x3x128x128xbf16, #tpu.memory_space<vmem>>, vector<1x1x128x128xbf16>
    %33 = vector.shape_cast %32 : vector<1x1x128x128xbf16> to vector<128x128xbf16>
    %cst_26 = arith.constant dense<0.000000e+00> : vector<384x128xf32>
    %34 = tpu.matmul %31, %33, %cst_26 {dimension_numbers = #tpu.dot_dimension_numbers<[1], [0], [0], [1], [0, 0, 1, 1], [], []>} : vector<384x128xbf16>, vector<128x128xbf16>, vector<384x128xf32> -> vector<384x128xf32>
    %c0_27 = arith.constant 0 : index
    %c0_28 = arith.constant 0 : index
    %35 = vector.load %arg8[%c0_27, %c0_28] : memref<384x128xf32, #tpu.memory_space<vmem>>, vector<384x128xf32>
    %36 = arith.addf %35, %34 : vector<384x128xf32>
    %c0_29 = arith.constant 0 : index
    %c0_30 = arith.constant 0 : index
    %37 = vector.load %arg8[%c0_29, %c0_30] : memref<384x128xf32, #tpu.memory_space<vmem>>, vector<384x128xf32>
    tpu.vector_store %arg8[%c0_29, %c0_30], %36 {strides = array<i32>} : memref<384x128xf32, #tpu.memory_space<vmem>>, vector<384x128xf32>,
    %c9 = arith.constant 9 : index
    %c0_31 = arith.constant 0 : index
    %38 = vector.load %arg7[%c9, %c0_31] : memref<448x128xbf16, #tpu.memory_space<vmem>>, vector<384x128xbf16>
    %c0_32 = arith.constant 0 : index
    %c2 = arith.constant 2 : index
    %c0_33 = arith.constant 0 : index
    %c0_34 = arith.constant 0 : index
    %39 = vector.load %arg4[%c0_32, %c2, %c0_33, %c0_34] : memref<3x3x128x128xbf16, #tpu.memory_space<vmem>>, vector<1x1x128x128xbf16>
    %40 = vector.shape_cast %39 : vector<1x1x128x128xbf16> to vector<128x128xbf16>
    %cst_35 = arith.constant dense<0.000000e+00> : vector<384x128xf32>
    %41 = tpu.matmul %38, %40, %cst_35 {dimension_numbers = #tpu.dot_dimension_numbers<[1], [0], [0], [1], [0, 0, 1, 1], [], []>} : vector<384x128xbf16>, vector<128x128xbf16>, vector<384x128xf32> -> vector<384x128xf32>
    %c0_36 = arith.constant 0 : index
    %c0_37 = arith.constant 0 : index
    %42 = vector.load %arg8[%c0_36, %c0_37] : memref<384x128xf32, #tpu.memory_space<vmem>>, vector<384x128xf32>
    %43 = arith.addf %42, %41 : vector<384x128xf32>
    %c0_38 = arith.constant 0 : index
    %c0_39 = arith.constant 0 : index
    %44 = vector.load %arg8[%c0_38, %c0_39] : memref<384x128xf32, #tpu.memory_space<vmem>>, vector<384x128xf32>
    tpu.vector_store %arg8[%c0_38, %c0_39], %43 {strides = array<i32>} : memref<384x128xf32, #tpu.memory_space<vmem>>, vector<384x128xf32>,
    %c31 = arith.constant 31 : index
    %c0_40 = arith.constant 0 : index
    %45 = vector.load %arg7[%c31, %c0_40] : memref<448x128xbf16, #tpu.memory_space<vmem>>, vector<384x128xbf16>
    %c1_41 = arith.constant 1 : index
    %c0_42 = arith.constant 0 : index
    %c0_43 = arith.constant 0 : index
    %c0_44 = arith.constant 0 : index
    %46 = vector.load %arg4[%c1_41, %c0_42, %c0_43, %c0_44] : memref<3x3x128x128xbf16, #tpu.memory_space<vmem>>, vector<1x1x128x128xbf16>
    %47 = vector.shape_cast %46 : vector<1x1x128x128xbf16> to vector<128x128xbf16>
    %cst_45 = arith.constant dense<0.000000e+00> : vector<384x128xf32>
    %48 = tpu.matmul %45, %47, %cst_45 {dimension_numbers = #tpu.dot_dimension_numbers<[1], [0], [0], [1], [0, 0, 1, 1], [], []>} : vector<384x128xbf16>, vector<128x128xbf16>, vector<384x128xf32> -> vector<384x128xf32>
    %c0_46 = arith.constant 0 : index
    %c0_47 = arith.constant 0 : index
    %49 = vector.load %arg8[%c0_46, %c0_47] : memref<384x128xf32, #tpu.memory_space<vmem>>, vector<384x128xf32>
    %50 = arith.addf %49, %48 : vector<384x128xf32>
    %c0_48 = arith.constant 0 : index
    %c0_49 = arith.constant 0 : index
    %51 = vector.load %arg8[%c0_48, %c0_49] : memref<384x128xf32, #tpu.memory_space<vmem>>, vector<384x128xf32>
    tpu.vector_store %arg8[%c0_48, %c0_49], %50 {strides = array<i32>} : memref<384x128xf32, #tpu.memory_space<vmem>>, vector<384x128xf32>,
    %c32_50 = arith.constant 32 : index
    %c0_51 = arith.constant 0 : index
    %52 = vector.load %arg7[%c32_50, %c0_51] : memref<448x128xbf16, #tpu.memory_space<vmem>>, vector<384x128xbf16>
    %c1_52 = arith.constant 1 : index
    %c1_53 = arith.constant 1 : index
    %c0_54 = arith.constant 0 : index
    %c0_55 = arith.constant 0 : index
    %53 = vector.load %arg4[%c1_52, %c1_53, %c0_54, %c0_55] : memref<3x3x128x128xbf16, #tpu.memory_space<vmem>>, vector<1x1x128x128xbf16>
    %54 = vector.shape_cast %53 : vector<1x1x128x128xbf16> to vector<128x128xbf16>
    %cst_56 = arith.constant dense<0.000000e+00> : vector<384x128xf32>
    %55 = tpu.matmul %52, %54, %cst_56 {dimension_numbers = #tpu.dot_dimension_numbers<[1], [0], [0], [1], [0, 0, 1, 1], [], []>} : vector<384x128xbf16>, vector<128x128xbf16>, vector<384x128xf32> -> vector<384x128xf32>
    %c0_57 = arith.constant 0 : index
    %c0_58 = arith.constant 0 : index
    %56 = vector.load %arg8[%c0_57, %c0_58] : memref<384x128xf32, #tpu.memory_space<vmem>>, vector<384x128xf32>
    %57 = arith.addf %56, %55 : vector<384x128xf32>
    %c0_59 = arith.constant 0 : index
    %c0_60 = arith.constant 0 : index
    %58 = vector.load %arg8[%c0_59, %c0_60] : memref<384x128xf32, #tpu.memory_space<vmem>>, vector<384x128xf32>
    tpu.vector_store %arg8[%c0_59, %c0_60], %57 {strides = array<i32>} : memref<384x128xf32, #tpu.memory_space<vmem>>, vector<384x128xf32>,
    %c33 = arith.constant 33 : index
    %c0_61 = arith.constant 0 : index
    %59 = vector.load %arg7[%c33, %c0_61] : memref<448x128xbf16, #tpu.memory_space<vmem>>, vector<384x128xbf16>
    %c1_62 = arith.constant 1 : index
    %c2_63 = arith.constant 2 : index
    %c0_64 = arith.constant 0 : index
    %c0_65 = arith.constant 0 : index
    %60 = vector.load %arg4[%c1_62, %c2_63, %c0_64, %c0_65] : memref<3x3x128x128xbf16, #tpu.memory_space<vmem>>, vector<1x1x128x128xbf16>
    %61 = vector.shape_cast %60 : vector<1x1x128x128xbf16> to vector<128x128xbf16>
    %cst_66 = arith.constant dense<0.000000e+00> : vector<384x128xf32>
    %62 = tpu.matmul %59, %61, %cst_66 {dimension_numbers = #tpu.dot_dimension_numbers<[1], [0], [0], [1], [0, 0, 1, 1], [], []>} : vector<384x128xbf16>, vector<128x128xbf16>, vector<384x128xf32> -> vector<384x128xf32>
    %c0_67 = arith.constant 0 : index
    %c0_68 = arith.constant 0 : index
    %63 = vector.load %arg8[%c0_67, %c0_68] : memref<384x128xf32, #tpu.memory_space<vmem>>, vector<384x128xf32>
    %64 = arith.addf %63, %62 : vector<384x128xf32>
    %c0_69 = arith.constant 0 : index
    %c0_70 = arith.constant 0 : index
    %65 = vector.load %arg8[%c0_69, %c0_70] : memref<384x128xf32, #tpu.memory_space<vmem>>, vector<384x128xf32>
    tpu.vector_store %arg8[%c0_69, %c0_70], %64 {strides = array<i32>} : memref<384x128xf32, #tpu.memory_space<vmem>>, vector<384x128xf32>,
    %c55 = arith.constant 55 : index
    %c0_71 = arith.constant 0 : index
    %66 = vector.load %arg7[%c55, %c0_71] : memref<448x128xbf16, #tpu.memory_space<vmem>>, vector<384x128xbf16>
    %c2_72 = arith.constant 2 : index
    %c0_73 = arith.constant 0 : index
    %c0_74 = arith.constant 0 : index
    %c0_75 = arith.constant 0 : index
    %67 = vector.load %arg4[%c2_72, %c0_73, %c0_74, %c0_75] : memref<3x3x128x128xbf16, #tpu.memory_space<vmem>>, vector<1x1x128x128xbf16>
    %68 = vector.shape_cast %67 : vector<1x1x128x128xbf16> to vector<128x128xbf16>
    %cst_76 = arith.constant dense<0.000000e+00> : vector<384x128xf32>
    %69 = tpu.matmul %66, %68, %cst_76 {dimension_numbers = #tpu.dot_dimension_numbers<[1], [0], [0], [1], [0, 0, 1, 1], [], []>} : vector<384x128xbf16>, vector<128x128xbf16>, vector<384x128xf32> -> vector<384x128xf32>
    %c0_77 = arith.constant 0 : index
    %c0_78 = arith.constant 0 : index
    %70 = vector.load %arg8[%c0_77, %c0_78] : memref<384x128xf32, #tpu.memory_space<vmem>>, vector<384x128xf32>
    %71 = arith.addf %70, %69 : vector<384x128xf32>
    %c0_79 = arith.constant 0 : index
    %c0_80 = arith.constant 0 : index
    %72 = vector.load %arg8[%c0_79, %c0_80] : memref<384x128xf32, #tpu.memory_space<vmem>>, vector<384x128xf32>
    tpu.vector_store %arg8[%c0_79, %c0_80], %71 {strides = array<i32>} : memref<384x128xf32, #tpu.memory_space<vmem>>, vector<384x128xf32>,
    %c56 = arith.constant 56 : index
    %c0_81 = arith.constant 0 : index
    %73 = vector.load %arg7[%c56, %c0_81] : memref<448x128xbf16, #tpu.memory_space<vmem>>, vector<384x128xbf16>
    %c2_82 = arith.constant 2 : index
    %c1_83 = arith.constant 1 : index
    %c0_84 = arith.constant 0 : index
    %c0_85 = arith.constant 0 : index
    %74 = vector.load %arg4[%c2_82, %c1_83, %c0_84, %c0_85] : memref<3x3x128x128xbf16, #tpu.memory_space<vmem>>, vector<1x1x128x128xbf16>
    %75 = vector.shape_cast %74 : vector<1x1x128x128xbf16> to vector<128x128xbf16>
    %cst_86 = arith.constant dense<0.000000e+00> : vector<384x128xf32>
    %76 = tpu.matmul %73, %75, %cst_86 {dimension_numbers = #tpu.dot_dimension_numbers<[1], [0], [0], [1], [0, 0, 1, 1], [], []>} : vector<384x128xbf16>, vector<128x128xbf16>, vector<384x128xf32> -> vector<384x128xf32>
    %c0_87 = arith.constant 0 : index
    %c0_88 = arith.constant 0 : index
    %77 = vector.load %arg8[%c0_87, %c0_88] : memref<384x128xf32, #tpu.memory_space<vmem>>, vector<384x128xf32>
    %78 = arith.addf %77, %76 : vector<384x128xf32>
    %c0_89 = arith.constant 0 : index
    %c0_90 = arith.constant 0 : index
    %79 = vector.load %arg8[%c0_89, %c0_90] : memref<384x128xf32, #tpu.memory_space<vmem>>, vector<384x128xf32>
    tpu.vector_store %arg8[%c0_89, %c0_90], %78 {strides = array<i32>} : memref<384x128xf32, #tpu.memory_space<vmem>>, vector<384x128xf32>,
    %c57 = arith.constant 57 : index
    %c0_91 = arith.constant 0 : index
    %80 = vector.load %arg7[%c57, %c0_91] : memref<448x128xbf16, #tpu.memory_space<vmem>>, vector<384x128xbf16>
    %c2_92 = arith.constant 2 : index
    %c2_93 = arith.constant 2 : index
    %c0_94 = arith.constant 0 : index
    %c0_95 = arith.constant 0 : index
    %81 = vector.load %arg4[%c2_92, %c2_93, %c0_94, %c0_95] : memref<3x3x128x128xbf16, #tpu.memory_space<vmem>>, vector<1x1x128x128xbf16>
    %82 = vector.shape_cast %81 : vector<1x1x128x128xbf16> to vector<128x128xbf16>
    %cst_96 = arith.constant dense<0.000000e+00> : vector<384x128xf32>
    %83 = tpu.matmul %80, %82, %cst_96 {dimension_numbers = #tpu.dot_dimension_numbers<[1], [0], [0], [1], [0, 0, 1, 1], [], []>} : vector<384x128xbf16>, vector<128x128xbf16>, vector<384x128xf32> -> vector<384x128xf32>
    %c0_97 = arith.constant 0 : index
    %c0_98 = arith.constant 0 : index
    %84 = vector.load %arg8[%c0_97, %c0_98] : memref<384x128xf32, #tpu.memory_space<vmem>>, vector<384x128xf32>
    %85 = arith.addf %84, %83 : vector<384x128xf32>
    %c0_99 = arith.constant 0 : index
    %c0_100 = arith.constant 0 : index
    %86 = vector.load %arg8[%c0_99, %c0_100] : memref<384x128xf32, #tpu.memory_space<vmem>>, vector<384x128xf32>
    tpu.vector_store %arg8[%c0_99, %c0_100], %85 {strides = array<i32>} : memref<384x128xf32, #tpu.memory_space<vmem>>, vector<384x128xf32>,
    %c0_101 = arith.constant 0 : index
    %c0_102 = arith.constant 0 : index
    %87 = vector.load %arg8[%c0_101, %c0_102] : memref<384x128xf32, #tpu.memory_space<vmem>>, vector<384x128xf32>
    %c0_103 = arith.constant 0 : index
    %c0_104 = arith.constant 0 : index
    %88 = vector.load %arg5[%c0_103, %c0_104] : memref<1x128xf32, #tpu.memory_space<vmem>>, vector<1x128xf32>
    %89 = vector.broadcast %88 : vector<1x128xf32> to vector<384x128xf32>
    %90 = arith.addf %87, %89 : vector<384x128xf32>
    %c16_i32_105 = arith.constant 16 : i32
    %91 = vector.broadcast %c16_i32_105 : i32 to vector<16x24x1xi32>
    %92 = arith.cmpi slt, %12, %91 : vector<16x24x1xi32>
    %93 = vector.shape_cast %90 : vector<384x128xf32> to vector<16x24x128xf32>
    %cst_106 = arith.constant 0.000000e+00 : f32
    %94 = vector.shape_cast %92 : vector<16x24x1xi1> to vector<16x24x1xi1>
    %95 = vector.broadcast %94 : vector<16x24x1xi1> to vector<16x24x128xi1>
    %96 = vector.broadcast %cst_106 : f32 to vector<16x24x128xf32>
    %97 = arith.select %95, %93, %96 : vector<16x24x128xi1>, vector<16x24x128xf32>
    %c0_107 = arith.constant 0 : index
    %c0_108 = arith.constant 0 : index
    %c0_109 = arith.constant 0 : index
    %c0_110 = arith.constant 0 : index
    %98 = vector.load %arg6[%c0_107, %c0_108, %c0_109, %c0_110] : memref<1x16x24x128xf32, #tpu.memory_space<vmem>>, vector<1x16x24x128xf32>
    %99 = vector.shape_cast %98 : vector<1x16x24x128xf32> to vector<16x24x128xf32>
    %100 = vector.shape_cast %97 : vector<16x24x128xf32> to vector<1x16x24x128xf32>
    tpu.vector_store %arg6[%c0_107, %c0_108, %c0_109, %c0_110], %100 {strides = array<i32>} : memref<1x16x24x128xf32, #tpu.memory_space<vmem>>, vector<1x16x24x128xf32>,
    return
  }
  func.func @transform_0(%arg0: i32) -> (i32, i32, i32, i32) {
    %c0_i32 = arith.constant 0 : i32
    %c0_i32_0 = arith.constant 0 : i32
    %c0_i32_1 = arith.constant 0 : i32
    %c0_i32_2 = arith.constant 0 : i32
    return %arg0, %c0_i32, %c0_i32_0, %c0_i32_1 : i32, i32, i32, i32
  }
  func.func @transform_1(%arg0: i32) -> (i32, i32) {
    %c0_i32 = arith.constant 0 : i32
    %c0_i32_0 = arith.constant 0 : i32
    %c0_i32_1 = arith.constant 0 : i32
    return %c0_i32, %c0_i32_0 : i32, i32
  }
  func.func @transform_2(%arg0: i32) -> (i32, i32) {
    %c0_i32 = arith.constant 0 : i32
    %c0_i32_0 = arith.constant 0 : i32
    %c0_i32_1 = arith.constant 0 : i32
    return %c0_i32, %c0_i32_0 : i32, i32
  }
  func.func @transform_3(%arg0: i32) -> (i32, i32, i32, i32) {
    %c0_i32 = arith.constant 0 : i32
    %c0_i32_0 = arith.constant 0 : i32
    %c0_i32_1 = arith.constant 0 : i32
    %c0_i32_2 = arith.constant 0 : i32
    %c0_i32_3 = arith.constant 0 : i32
    return %c0_i32, %c0_i32_0, %c0_i32_1, %c0_i32_2 : i32, i32, i32, i32
  }
  func.func @transform_4(%arg0: i32) -> (i32, i32) {
    %c0_i32 = arith.constant 0 : i32
    %c0_i32_0 = arith.constant 0 : i32
    %c0_i32_1 = arith.constant 0 : i32
    return %c0_i32, %c0_i32_0 : i32, i32
  }
  func.func @transform_5(%arg0: i32) -> (i32, i32, i32, i32) {
    %c0_i32 = arith.constant 0 : i32
    %c0_i32_0 = arith.constant 0 : i32
    %c0_i32_1 = arith.constant 0 : i32
    %c0_i32_2 = arith.constant 0 : i32
    return %arg0, %c0_i32, %c0_i32_0, %c0_i32_1 : i32, i32, i32, i32
  }
}

module attributes {stable_mosaic.version = 11 : i64} {
  func.func @kernel(%arg0: i32, %arg1: memref<1x16x24x128xf32, #tpu.memory_space<vmem>>, %arg2: memref<1x16x24x128xf32, #tpu.memory_space<vmem>>, %arg3: memref<1x128xf32, #tpu.memory_space<vmem>>, %arg4: memref<1x128xf32, #tpu.memory_space<vmem>>, %arg5: memref<3x3x128x128xbf16, #tpu.memory_space<vmem>>, %arg6: memref<1x128xf32, #tpu.memory_space<vmem>>, %arg7: memref<128x128xbf16, #tpu.memory_space<vmem>>, %arg8: memref<1x128xf32, #tpu.memory_space<vmem>>, %arg9: memref<1x16x24x128xf32, #tpu.memory_space<vmem>>, %arg10: memref<448x128xbf16, #tpu.memory_space<vmem>>, %arg11: memref<384x128xf32, #tpu.memory_space<vmem>>) attributes {dimension_semantics = [#tpu.dimension_semantics<parallel>], iteration_bounds = array<i64: 2>, scalar_prefetch = 0 : i64, scratch_operands = 2 : i64, tpu.core_type = #tpu.core_type<tc>, window_params = [{transform_indices = @transform_0, window_bounds = array<i64: 1, 16, 24, 128>}, {transform_indices = @transform_1, window_bounds = array<i64: 1, 16, 24, 128>}, {pipeline_mode = #tpu.pipeline_mode<synchronous>, transform_indices = @transform_2, window_bounds = array<i64: 1, 128>}, {pipeline_mode = #tpu.pipeline_mode<synchronous>, transform_indices = @transform_3, window_bounds = array<i64: 1, 128>}, {pipeline_mode = #tpu.pipeline_mode<synchronous>, transform_indices = @transform_4, window_bounds = array<i64: 3, 3, 128, 128>}, {pipeline_mode = #tpu.pipeline_mode<synchronous>, transform_indices = @transform_5, window_bounds = array<i64: 1, 128>}, {pipeline_mode = #tpu.pipeline_mode<synchronous>, transform_indices = @transform_6, window_bounds = array<i64: 128, 128>}, {pipeline_mode = #tpu.pipeline_mode<synchronous>, transform_indices = @transform_7, window_bounds = array<i64: 1, 128>}, {transform_indices = @transform_8, window_bounds = array<i64: 1, 16, 24, 128>}]} {
    %c0 = arith.constant 0 : index
    %c0_0 = arith.constant 0 : index
    %c0_1 = arith.constant 0 : index
    %c0_2 = arith.constant 0 : index
    %0 = vector.load %arg1[%c0, %c0_0, %c0_1, %c0_2] : memref<1x16x24x128xf32, #tpu.memory_space<vmem>>, vector<1x16x24x128xf32>
    %1 = vector.shape_cast %0 : vector<1x16x24x128xf32> to vector<16x24x128xf32>
    %c0_3 = arith.constant 0 : index
    %c0_4 = arith.constant 0 : index
    %2 = vector.load %arg3[%c0_3, %c0_4] : memref<1x128xf32, #tpu.memory_space<vmem>>, vector<1x128xf32>
    %3 = vector.shape_cast %2 : vector<1x128xf32> to vector<1x1x128xf32>
    %c0_5 = arith.constant 0 : index
    %c0_6 = arith.constant 0 : index
    %4 = vector.load %arg4[%c0_5, %c0_6] : memref<1x128xf32, #tpu.memory_space<vmem>>, vector<1x128xf32>
    %5 = vector.shape_cast %4 : vector<1x128xf32> to vector<1x1x128xf32>
    %6 = vector.broadcast %3 : vector<1x1x128xf32> to vector<16x24x128xf32>
    %7 = arith.mulf %1, %6 : vector<16x24x128xf32>
    %8 = vector.broadcast %5 : vector<1x1x128xf32> to vector<16x24x128xf32>
    %9 = arith.addf %7, %8 : vector<16x24x128xf32>
    %cst = arith.constant 0.000000e+00 : f32
    %10 = vector.broadcast %cst : f32 to vector<16x24x128xf32>
    %11 = arith.maximumf %9, %10 : vector<16x24x128xf32>
    %12 = tpu.iota {dimensions = array<i32: 1>} : vector<16x24x1xi32>
    %c16_i32 = arith.constant 16 : i32
    %13 = vector.broadcast %c16_i32 : i32 to vector<16x24x1xi32>
    %14 = arith.cmpi slt, %12, %13 : vector<16x24x1xi32>
    %cst_7 = arith.constant 0.000000e+00 : f32
    %15 = vector.shape_cast %14 : vector<16x24x1xi1> to vector<16x24x1xi1>
    %16 = vector.broadcast %15 : vector<16x24x1xi1> to vector<16x24x128xi1>
    %17 = vector.broadcast %cst_7 : f32 to vector<16x24x128xf32>
    %18 = arith.select %16, %11, %17 : vector<16x24x128xi1>, vector<16x24x128xf32>
    %cst_8 = arith.constant 0.000000e+00 : bf16
    %19 = vector.broadcast %cst_8 : bf16 to vector<32x128xbf16>
    %c0_9 = arith.constant 0 : index
    %c0_10 = arith.constant 0 : index
    %20 = vector.load %arg10[%c0_9, %c0_10] : memref<448x128xbf16, #tpu.memory_space<vmem>>, vector<32x128xbf16>
    tpu.vector_store %arg10[%c0_9, %c0_10], %19 {strides = array<i32>} : memref<448x128xbf16, #tpu.memory_space<vmem>>, vector<32x128xbf16>,
    %cst_11 = arith.constant 0.000000e+00 : bf16
    %21 = vector.broadcast %cst_11 : bf16 to vector<32x128xbf16>
    %c416 = arith.constant 416 : index
    %c0_12 = arith.constant 0 : index
    %22 = vector.load %arg10[%c416, %c0_12] : memref<448x128xbf16, #tpu.memory_space<vmem>>, vector<32x128xbf16>
    tpu.vector_store %arg10[%c416, %c0_12], %21 {strides = array<i32>} : memref<448x128xbf16, #tpu.memory_space<vmem>>, vector<32x128xbf16>,
    %23 = arith.truncf %18 : vector<16x24x128xf32> to vector<16x24x128xbf16>
    %24 = vector.shape_cast %23 : vector<16x24x128xbf16> to vector<384x128xbf16>
    %c32 = arith.constant 32 : index
    %c0_13 = arith.constant 0 : index
    %25 = vector.load %arg10[%c32, %c0_13] : memref<448x128xbf16, #tpu.memory_space<vmem>>, vector<384x128xbf16>
    tpu.vector_store %arg10[%c32, %c0_13], %24 {strides = array<i32>} : memref<448x128xbf16, #tpu.memory_space<vmem>>, vector<384x128xbf16>,
    %c0_14 = arith.constant 0 : index
    %c0_15 = arith.constant 0 : index
    %c0_16 = arith.constant 0 : index
    %c0_17 = arith.constant 0 : index
    %26 = vector.load %arg2[%c0_14, %c0_15, %c0_16, %c0_17] : memref<1x16x24x128xf32, #tpu.memory_space<vmem>>, vector<1x16x24x128xf32>
    %27 = vector.shape_cast %26 : vector<1x16x24x128xf32> to vector<16x24x128xf32>
    %28 = arith.truncf %27 : vector<16x24x128xf32> to vector<16x24x128xbf16>
    %29 = vector.shape_cast %28 : vector<16x24x128xbf16> to vector<384x128xbf16>
    %c0_18 = arith.constant 0 : index
    %c0_19 = arith.constant 0 : index
    %30 = vector.load %arg7[%c0_18, %c0_19] : memref<128x128xbf16, #tpu.memory_space<vmem>>, vector<128x128xbf16>
    %cst_20 = arith.constant dense<0.000000e+00> : vector<384x128xf32>
    %31 = tpu.matmul %29, %30, %cst_20 {dimension_numbers = #tpu.dot_dimension_numbers<[1], [0], [0], [1], [0, 0, 1, 1], [], []>} : vector<384x128xbf16>, vector<128x128xbf16>, vector<384x128xf32> -> vector<384x128xf32>
    %c0_21 = arith.constant 0 : index
    %c0_22 = arith.constant 0 : index
    %32 = vector.load %arg11[%c0_21, %c0_22] : memref<384x128xf32, #tpu.memory_space<vmem>>, vector<384x128xf32>
    tpu.vector_store %arg11[%c0_21, %c0_22], %31 {strides = array<i32>} : memref<384x128xf32, #tpu.memory_space<vmem>>, vector<384x128xf32>,
    %c7 = arith.constant 7 : index
    %c0_23 = arith.constant 0 : index
    %33 = vector.load %arg10[%c7, %c0_23] : memref<448x128xbf16, #tpu.memory_space<vmem>>, vector<384x128xbf16>
    %c0_24 = arith.constant 0 : index
    %c0_25 = arith.constant 0 : index
    %c0_26 = arith.constant 0 : index
    %c0_27 = arith.constant 0 : index
    %34 = vector.load %arg5[%c0_24, %c0_25, %c0_26, %c0_27] : memref<3x3x128x128xbf16, #tpu.memory_space<vmem>>, vector<1x1x128x128xbf16>
    %35 = vector.shape_cast %34 : vector<1x1x128x128xbf16> to vector<128x128xbf16>
    %cst_28 = arith.constant dense<0.000000e+00> : vector<384x128xf32>
    %36 = tpu.matmul %33, %35, %cst_28 {dimension_numbers = #tpu.dot_dimension_numbers<[1], [0], [0], [1], [0, 0, 1, 1], [], []>} : vector<384x128xbf16>, vector<128x128xbf16>, vector<384x128xf32> -> vector<384x128xf32>
    %c0_29 = arith.constant 0 : index
    %c0_30 = arith.constant 0 : index
    %37 = vector.load %arg11[%c0_29, %c0_30] : memref<384x128xf32, #tpu.memory_space<vmem>>, vector<384x128xf32>
    %38 = arith.addf %37, %36 : vector<384x128xf32>
    %c0_31 = arith.constant 0 : index
    %c0_32 = arith.constant 0 : index
    %39 = vector.load %arg11[%c0_31, %c0_32] : memref<384x128xf32, #tpu.memory_space<vmem>>, vector<384x128xf32>
    tpu.vector_store %arg11[%c0_31, %c0_32], %38 {strides = array<i32>} : memref<384x128xf32, #tpu.memory_space<vmem>>, vector<384x128xf32>,
    %c8 = arith.constant 8 : index
    %c0_33 = arith.constant 0 : index
    %40 = vector.load %arg10[%c8, %c0_33] : memref<448x128xbf16, #tpu.memory_space<vmem>>, vector<384x128xbf16>
    %c0_34 = arith.constant 0 : index
    %c1 = arith.constant 1 : index
    %c0_35 = arith.constant 0 : index
    %c0_36 = arith.constant 0 : index
    %41 = vector.load %arg5[%c0_34, %c1, %c0_35, %c0_36] : memref<3x3x128x128xbf16, #tpu.memory_space<vmem>>, vector<1x1x128x128xbf16>
    %42 = vector.shape_cast %41 : vector<1x1x128x128xbf16> to vector<128x128xbf16>
    %cst_37 = arith.constant dense<0.000000e+00> : vector<384x128xf32>
    %43 = tpu.matmul %40, %42, %cst_37 {dimension_numbers = #tpu.dot_dimension_numbers<[1], [0], [0], [1], [0, 0, 1, 1], [], []>} : vector<384x128xbf16>, vector<128x128xbf16>, vector<384x128xf32> -> vector<384x128xf32>
    %c0_38 = arith.constant 0 : index
    %c0_39 = arith.constant 0 : index
    %44 = vector.load %arg11[%c0_38, %c0_39] : memref<384x128xf32, #tpu.memory_space<vmem>>, vector<384x128xf32>
    %45 = arith.addf %44, %43 : vector<384x128xf32>
    %c0_40 = arith.constant 0 : index
    %c0_41 = arith.constant 0 : index
    %46 = vector.load %arg11[%c0_40, %c0_41] : memref<384x128xf32, #tpu.memory_space<vmem>>, vector<384x128xf32>
    tpu.vector_store %arg11[%c0_40, %c0_41], %45 {strides = array<i32>} : memref<384x128xf32, #tpu.memory_space<vmem>>, vector<384x128xf32>,
    %c9 = arith.constant 9 : index
    %c0_42 = arith.constant 0 : index
    %47 = vector.load %arg10[%c9, %c0_42] : memref<448x128xbf16, #tpu.memory_space<vmem>>, vector<384x128xbf16>
    %c0_43 = arith.constant 0 : index
    %c2 = arith.constant 2 : index
    %c0_44 = arith.constant 0 : index
    %c0_45 = arith.constant 0 : index
    %48 = vector.load %arg5[%c0_43, %c2, %c0_44, %c0_45] : memref<3x3x128x128xbf16, #tpu.memory_space<vmem>>, vector<1x1x128x128xbf16>
    %49 = vector.shape_cast %48 : vector<1x1x128x128xbf16> to vector<128x128xbf16>
    %cst_46 = arith.constant dense<0.000000e+00> : vector<384x128xf32>
    %50 = tpu.matmul %47, %49, %cst_46 {dimension_numbers = #tpu.dot_dimension_numbers<[1], [0], [0], [1], [0, 0, 1, 1], [], []>} : vector<384x128xbf16>, vector<128x128xbf16>, vector<384x128xf32> -> vector<384x128xf32>
    %c0_47 = arith.constant 0 : index
    %c0_48 = arith.constant 0 : index
    %51 = vector.load %arg11[%c0_47, %c0_48] : memref<384x128xf32, #tpu.memory_space<vmem>>, vector<384x128xf32>
    %52 = arith.addf %51, %50 : vector<384x128xf32>
    %c0_49 = arith.constant 0 : index
    %c0_50 = arith.constant 0 : index
    %53 = vector.load %arg11[%c0_49, %c0_50] : memref<384x128xf32, #tpu.memory_space<vmem>>, vector<384x128xf32>
    tpu.vector_store %arg11[%c0_49, %c0_50], %52 {strides = array<i32>} : memref<384x128xf32, #tpu.memory_space<vmem>>, vector<384x128xf32>,
    %c31 = arith.constant 31 : index
    %c0_51 = arith.constant 0 : index
    %54 = vector.load %arg10[%c31, %c0_51] : memref<448x128xbf16, #tpu.memory_space<vmem>>, vector<384x128xbf16>
    %c1_52 = arith.constant 1 : index
    %c0_53 = arith.constant 0 : index
    %c0_54 = arith.constant 0 : index
    %c0_55 = arith.constant 0 : index
    %55 = vector.load %arg5[%c1_52, %c0_53, %c0_54, %c0_55] : memref<3x3x128x128xbf16, #tpu.memory_space<vmem>>, vector<1x1x128x128xbf16>
    %56 = vector.shape_cast %55 : vector<1x1x128x128xbf16> to vector<128x128xbf16>
    %cst_56 = arith.constant dense<0.000000e+00> : vector<384x128xf32>
    %57 = tpu.matmul %54, %56, %cst_56 {dimension_numbers = #tpu.dot_dimension_numbers<[1], [0], [0], [1], [0, 0, 1, 1], [], []>} : vector<384x128xbf16>, vector<128x128xbf16>, vector<384x128xf32> -> vector<384x128xf32>
    %c0_57 = arith.constant 0 : index
    %c0_58 = arith.constant 0 : index
    %58 = vector.load %arg11[%c0_57, %c0_58] : memref<384x128xf32, #tpu.memory_space<vmem>>, vector<384x128xf32>
    %59 = arith.addf %58, %57 : vector<384x128xf32>
    %c0_59 = arith.constant 0 : index
    %c0_60 = arith.constant 0 : index
    %60 = vector.load %arg11[%c0_59, %c0_60] : memref<384x128xf32, #tpu.memory_space<vmem>>, vector<384x128xf32>
    tpu.vector_store %arg11[%c0_59, %c0_60], %59 {strides = array<i32>} : memref<384x128xf32, #tpu.memory_space<vmem>>, vector<384x128xf32>,
    %c32_61 = arith.constant 32 : index
    %c0_62 = arith.constant 0 : index
    %61 = vector.load %arg10[%c32_61, %c0_62] : memref<448x128xbf16, #tpu.memory_space<vmem>>, vector<384x128xbf16>
    %c1_63 = arith.constant 1 : index
    %c1_64 = arith.constant 1 : index
    %c0_65 = arith.constant 0 : index
    %c0_66 = arith.constant 0 : index
    %62 = vector.load %arg5[%c1_63, %c1_64, %c0_65, %c0_66] : memref<3x3x128x128xbf16, #tpu.memory_space<vmem>>, vector<1x1x128x128xbf16>
    %63 = vector.shape_cast %62 : vector<1x1x128x128xbf16> to vector<128x128xbf16>
    %cst_67 = arith.constant dense<0.000000e+00> : vector<384x128xf32>
    %64 = tpu.matmul %61, %63, %cst_67 {dimension_numbers = #tpu.dot_dimension_numbers<[1], [0], [0], [1], [0, 0, 1, 1], [], []>} : vector<384x128xbf16>, vector<128x128xbf16>, vector<384x128xf32> -> vector<384x128xf32>
    %c0_68 = arith.constant 0 : index
    %c0_69 = arith.constant 0 : index
    %65 = vector.load %arg11[%c0_68, %c0_69] : memref<384x128xf32, #tpu.memory_space<vmem>>, vector<384x128xf32>
    %66 = arith.addf %65, %64 : vector<384x128xf32>
    %c0_70 = arith.constant 0 : index
    %c0_71 = arith.constant 0 : index
    %67 = vector.load %arg11[%c0_70, %c0_71] : memref<384x128xf32, #tpu.memory_space<vmem>>, vector<384x128xf32>
    tpu.vector_store %arg11[%c0_70, %c0_71], %66 {strides = array<i32>} : memref<384x128xf32, #tpu.memory_space<vmem>>, vector<384x128xf32>,
    %c33 = arith.constant 33 : index
    %c0_72 = arith.constant 0 : index
    %68 = vector.load %arg10[%c33, %c0_72] : memref<448x128xbf16, #tpu.memory_space<vmem>>, vector<384x128xbf16>
    %c1_73 = arith.constant 1 : index
    %c2_74 = arith.constant 2 : index
    %c0_75 = arith.constant 0 : index
    %c0_76 = arith.constant 0 : index
    %69 = vector.load %arg5[%c1_73, %c2_74, %c0_75, %c0_76] : memref<3x3x128x128xbf16, #tpu.memory_space<vmem>>, vector<1x1x128x128xbf16>
    %70 = vector.shape_cast %69 : vector<1x1x128x128xbf16> to vector<128x128xbf16>
    %cst_77 = arith.constant dense<0.000000e+00> : vector<384x128xf32>
    %71 = tpu.matmul %68, %70, %cst_77 {dimension_numbers = #tpu.dot_dimension_numbers<[1], [0], [0], [1], [0, 0, 1, 1], [], []>} : vector<384x128xbf16>, vector<128x128xbf16>, vector<384x128xf32> -> vector<384x128xf32>
    %c0_78 = arith.constant 0 : index
    %c0_79 = arith.constant 0 : index
    %72 = vector.load %arg11[%c0_78, %c0_79] : memref<384x128xf32, #tpu.memory_space<vmem>>, vector<384x128xf32>
    %73 = arith.addf %72, %71 : vector<384x128xf32>
    %c0_80 = arith.constant 0 : index
    %c0_81 = arith.constant 0 : index
    %74 = vector.load %arg11[%c0_80, %c0_81] : memref<384x128xf32, #tpu.memory_space<vmem>>, vector<384x128xf32>
    tpu.vector_store %arg11[%c0_80, %c0_81], %73 {strides = array<i32>} : memref<384x128xf32, #tpu.memory_space<vmem>>, vector<384x128xf32>,
    %c55 = arith.constant 55 : index
    %c0_82 = arith.constant 0 : index
    %75 = vector.load %arg10[%c55, %c0_82] : memref<448x128xbf16, #tpu.memory_space<vmem>>, vector<384x128xbf16>
    %c2_83 = arith.constant 2 : index
    %c0_84 = arith.constant 0 : index
    %c0_85 = arith.constant 0 : index
    %c0_86 = arith.constant 0 : index
    %76 = vector.load %arg5[%c2_83, %c0_84, %c0_85, %c0_86] : memref<3x3x128x128xbf16, #tpu.memory_space<vmem>>, vector<1x1x128x128xbf16>
    %77 = vector.shape_cast %76 : vector<1x1x128x128xbf16> to vector<128x128xbf16>
    %cst_87 = arith.constant dense<0.000000e+00> : vector<384x128xf32>
    %78 = tpu.matmul %75, %77, %cst_87 {dimension_numbers = #tpu.dot_dimension_numbers<[1], [0], [0], [1], [0, 0, 1, 1], [], []>} : vector<384x128xbf16>, vector<128x128xbf16>, vector<384x128xf32> -> vector<384x128xf32>
    %c0_88 = arith.constant 0 : index
    %c0_89 = arith.constant 0 : index
    %79 = vector.load %arg11[%c0_88, %c0_89] : memref<384x128xf32, #tpu.memory_space<vmem>>, vector<384x128xf32>
    %80 = arith.addf %79, %78 : vector<384x128xf32>
    %c0_90 = arith.constant 0 : index
    %c0_91 = arith.constant 0 : index
    %81 = vector.load %arg11[%c0_90, %c0_91] : memref<384x128xf32, #tpu.memory_space<vmem>>, vector<384x128xf32>
    tpu.vector_store %arg11[%c0_90, %c0_91], %80 {strides = array<i32>} : memref<384x128xf32, #tpu.memory_space<vmem>>, vector<384x128xf32>,
    %c56 = arith.constant 56 : index
    %c0_92 = arith.constant 0 : index
    %82 = vector.load %arg10[%c56, %c0_92] : memref<448x128xbf16, #tpu.memory_space<vmem>>, vector<384x128xbf16>
    %c2_93 = arith.constant 2 : index
    %c1_94 = arith.constant 1 : index
    %c0_95 = arith.constant 0 : index
    %c0_96 = arith.constant 0 : index
    %83 = vector.load %arg5[%c2_93, %c1_94, %c0_95, %c0_96] : memref<3x3x128x128xbf16, #tpu.memory_space<vmem>>, vector<1x1x128x128xbf16>
    %84 = vector.shape_cast %83 : vector<1x1x128x128xbf16> to vector<128x128xbf16>
    %cst_97 = arith.constant dense<0.000000e+00> : vector<384x128xf32>
    %85 = tpu.matmul %82, %84, %cst_97 {dimension_numbers = #tpu.dot_dimension_numbers<[1], [0], [0], [1], [0, 0, 1, 1], [], []>} : vector<384x128xbf16>, vector<128x128xbf16>, vector<384x128xf32> -> vector<384x128xf32>
    %c0_98 = arith.constant 0 : index
    %c0_99 = arith.constant 0 : index
    %86 = vector.load %arg11[%c0_98, %c0_99] : memref<384x128xf32, #tpu.memory_space<vmem>>, vector<384x128xf32>
    %87 = arith.addf %86, %85 : vector<384x128xf32>
    %c0_100 = arith.constant 0 : index
    %c0_101 = arith.constant 0 : index
    %88 = vector.load %arg11[%c0_100, %c0_101] : memref<384x128xf32, #tpu.memory_space<vmem>>, vector<384x128xf32>
    tpu.vector_store %arg11[%c0_100, %c0_101], %87 {strides = array<i32>} : memref<384x128xf32, #tpu.memory_space<vmem>>, vector<384x128xf32>,
    %c57 = arith.constant 57 : index
    %c0_102 = arith.constant 0 : index
    %89 = vector.load %arg10[%c57, %c0_102] : memref<448x128xbf16, #tpu.memory_space<vmem>>, vector<384x128xbf16>
    %c2_103 = arith.constant 2 : index
    %c2_104 = arith.constant 2 : index
    %c0_105 = arith.constant 0 : index
    %c0_106 = arith.constant 0 : index
    %90 = vector.load %arg5[%c2_103, %c2_104, %c0_105, %c0_106] : memref<3x3x128x128xbf16, #tpu.memory_space<vmem>>, vector<1x1x128x128xbf16>
    %91 = vector.shape_cast %90 : vector<1x1x128x128xbf16> to vector<128x128xbf16>
    %cst_107 = arith.constant dense<0.000000e+00> : vector<384x128xf32>
    %92 = tpu.matmul %89, %91, %cst_107 {dimension_numbers = #tpu.dot_dimension_numbers<[1], [0], [0], [1], [0, 0, 1, 1], [], []>} : vector<384x128xbf16>, vector<128x128xbf16>, vector<384x128xf32> -> vector<384x128xf32>
    %c0_108 = arith.constant 0 : index
    %c0_109 = arith.constant 0 : index
    %93 = vector.load %arg11[%c0_108, %c0_109] : memref<384x128xf32, #tpu.memory_space<vmem>>, vector<384x128xf32>
    %94 = arith.addf %93, %92 : vector<384x128xf32>
    %c0_110 = arith.constant 0 : index
    %c0_111 = arith.constant 0 : index
    %95 = vector.load %arg11[%c0_110, %c0_111] : memref<384x128xf32, #tpu.memory_space<vmem>>, vector<384x128xf32>
    tpu.vector_store %arg11[%c0_110, %c0_111], %94 {strides = array<i32>} : memref<384x128xf32, #tpu.memory_space<vmem>>, vector<384x128xf32>,
    %c0_112 = arith.constant 0 : index
    %c0_113 = arith.constant 0 : index
    %96 = vector.load %arg11[%c0_112, %c0_113] : memref<384x128xf32, #tpu.memory_space<vmem>>, vector<384x128xf32>
    %c0_114 = arith.constant 0 : index
    %c0_115 = arith.constant 0 : index
    %97 = vector.load %arg6[%c0_114, %c0_115] : memref<1x128xf32, #tpu.memory_space<vmem>>, vector<1x128xf32>
    %98 = vector.broadcast %97 : vector<1x128xf32> to vector<384x128xf32>
    %99 = arith.addf %96, %98 : vector<384x128xf32>
    %c0_116 = arith.constant 0 : index
    %c0_117 = arith.constant 0 : index
    %100 = vector.load %arg8[%c0_116, %c0_117] : memref<1x128xf32, #tpu.memory_space<vmem>>, vector<1x128xf32>
    %101 = vector.broadcast %100 : vector<1x128xf32> to vector<384x128xf32>
    %102 = arith.addf %99, %101 : vector<384x128xf32>
    %c16_i32_118 = arith.constant 16 : i32
    %103 = vector.broadcast %c16_i32_118 : i32 to vector<16x24x1xi32>
    %104 = arith.cmpi slt, %12, %103 : vector<16x24x1xi32>
    %105 = vector.shape_cast %102 : vector<384x128xf32> to vector<16x24x128xf32>
    %cst_119 = arith.constant 0.000000e+00 : f32
    %106 = vector.shape_cast %104 : vector<16x24x1xi1> to vector<16x24x1xi1>
    %107 = vector.broadcast %106 : vector<16x24x1xi1> to vector<16x24x128xi1>
    %108 = vector.broadcast %cst_119 : f32 to vector<16x24x128xf32>
    %109 = arith.select %107, %105, %108 : vector<16x24x128xi1>, vector<16x24x128xf32>
    %c0_120 = arith.constant 0 : index
    %c0_121 = arith.constant 0 : index
    %c0_122 = arith.constant 0 : index
    %c0_123 = arith.constant 0 : index
    %110 = vector.load %arg9[%c0_120, %c0_121, %c0_122, %c0_123] : memref<1x16x24x128xf32, #tpu.memory_space<vmem>>, vector<1x16x24x128xf32>
    %111 = vector.shape_cast %110 : vector<1x16x24x128xf32> to vector<16x24x128xf32>
    %112 = vector.shape_cast %109 : vector<16x24x128xf32> to vector<1x16x24x128xf32>
    tpu.vector_store %arg9[%c0_120, %c0_121, %c0_122, %c0_123], %112 {strides = array<i32>} : memref<1x16x24x128xf32, #tpu.memory_space<vmem>>, vector<1x16x24x128xf32>,
    return
  }
  func.func @transform_0(%arg0: i32) -> (i32, i32, i32, i32) {
    %c0_i32 = arith.constant 0 : i32
    %c0_i32_0 = arith.constant 0 : i32
    %c0_i32_1 = arith.constant 0 : i32
    %c0_i32_2 = arith.constant 0 : i32
    return %arg0, %c0_i32, %c0_i32_0, %c0_i32_1 : i32, i32, i32, i32
  }
  func.func @transform_1(%arg0: i32) -> (i32, i32, i32, i32) {
    %c0_i32 = arith.constant 0 : i32
    %c0_i32_0 = arith.constant 0 : i32
    %c0_i32_1 = arith.constant 0 : i32
    %c0_i32_2 = arith.constant 0 : i32
    return %arg0, %c0_i32, %c0_i32_0, %c0_i32_1 : i32, i32, i32, i32
  }
  func.func @transform_2(%arg0: i32) -> (i32, i32) {
    %c0_i32 = arith.constant 0 : i32
    %c0_i32_0 = arith.constant 0 : i32
    %c0_i32_1 = arith.constant 0 : i32
    return %c0_i32, %c0_i32_0 : i32, i32
  }
  func.func @transform_3(%arg0: i32) -> (i32, i32) {
    %c0_i32 = arith.constant 0 : i32
    %c0_i32_0 = arith.constant 0 : i32
    %c0_i32_1 = arith.constant 0 : i32
    return %c0_i32, %c0_i32_0 : i32, i32
  }
  func.func @transform_4(%arg0: i32) -> (i32, i32, i32, i32) {
    %c0_i32 = arith.constant 0 : i32
    %c0_i32_0 = arith.constant 0 : i32
    %c0_i32_1 = arith.constant 0 : i32
    %c0_i32_2 = arith.constant 0 : i32
    %c0_i32_3 = arith.constant 0 : i32
    return %c0_i32, %c0_i32_0, %c0_i32_1, %c0_i32_2 : i32, i32, i32, i32
  }
  func.func @transform_5(%arg0: i32) -> (i32, i32) {
    %c0_i32 = arith.constant 0 : i32
    %c0_i32_0 = arith.constant 0 : i32
    %c0_i32_1 = arith.constant 0 : i32
    return %c0_i32, %c0_i32_0 : i32, i32
  }
  func.func @transform_6(%arg0: i32) -> (i32, i32) {
    %c0_i32 = arith.constant 0 : i32
    %c0_i32_0 = arith.constant 0 : i32
    %c0_i32_1 = arith.constant 0 : i32
    return %c0_i32, %c0_i32_0 : i32, i32
  }
  func.func @transform_7(%arg0: i32) -> (i32, i32) {
    %c0_i32 = arith.constant 0 : i32
    %c0_i32_0 = arith.constant 0 : i32
    %c0_i32_1 = arith.constant 0 : i32
    return %c0_i32, %c0_i32_0 : i32, i32
  }
  func.func @transform_8(%arg0: i32) -> (i32, i32, i32, i32) {
    %c0_i32 = arith.constant 0 : i32
    %c0_i32_0 = arith.constant 0 : i32
    %c0_i32_1 = arith.constant 0 : i32
    %c0_i32_2 = arith.constant 0 : i32
    return %arg0, %c0_i32, %c0_i32_0, %c0_i32_1 : i32, i32, i32, i32
  }
}

</mosaic_0001>

<bundles_post_ra>
// kernel: gblock_pallas.4
= control target key start
LH: loop header
LB: loop body
LE: loop exit
PB: predicated region body
PF: predicated region fallthrough
CT: control target
= control target key end

     0   :  { %s417_s9 = smov 0   ;;  %s499_s0 = inlined_call_operand.vmem [shape: f32[2,16,24,128], index: 0, kind: input, shape index: {}]   ;;  %s500_s1 = inlined_call_operand.vmem [shape: f32[1,128], index: 1, kind: output, shape index: {0}]   ;;  %s501_s2 = inlined_call_operand.vmem [shape: f32[1,128], index: 2, kind: output, shape index: {1}]  }
   0x1 LB: > { %s375_s10 = sadd.s32 4294967295, %s399_s9   ;;  %p378_p0 = scmp.ge.s32.totalorder %s399_s9, 1  ;;  %s399_s9 = sphi %s417_s9, %s13_s9  }
   0x2   : > { %p105_p1 = scmp.lt.s32.totalorder %s399_s9, 3 }
   0x4   : > { %p106_p2 = pnand %p378_p0, %p105_p1 }
   0x5   : > { %p122_p3 = scmp.lt.s32.totalorder (!%p106_p2), %s375_s10, 1  ;;  %p380_p4 = scmp.ne.s32.totalorder (!%p106_p2), %s375_s10, 0 }
   0x6   : > { %109 = sbr.rel (%p106_p2) target bundleno = 133 (0x85), region = 24 }
   0xd   : > { %s123_s11 = scalar_select %p122_p3, %s375_s10, 1 }
   0xe   : > { %130 = sbr.rel (%p380_p4) target bundleno = 21 (0x15), region = 28  ;;  %v401_v0 = vmov (!%p380_p4), 0.0  }
   0xf   : > { %s383_s12 = smul.u32 384, %s123_s11  ;;  %131 = vst [vmem:[%s500_s1] sm:$0x1] (!%p380_p4), %v401_v0  ;;  %132 = vst [vmem:[%s501_s2] sm:$0x1] (!%p380_p4), %v401_v0 }
  0x11   : > { %s428_s15 = scalar_lea.vmem %s499_s0, %s383_s12 }
  0x15 PF: > { %v133_v1 = vld [vmem:[%s428_s15] sm:$0xff]  ;;  %v134_v2 = vld [vmem:[%s428_s15 + $0x8] sm:$0xff]  ;;  %v135_v3 = vld [vmem:[%s428_s15 + $0x10] sm:$0xff] }
  0x16   : > { %v136_v4 = vld [vmem:[%s428_s15 + $0x18] sm:$0xff]  ;;  %v182_v5 = vadd.f32 %v134_v2, %v133_v1  ;;  %v238_v6 = vmul.f32 %v133_v1, %v133_v1  ;;  %v239_v7 = vmul.f32 %v134_v2, %v134_v2  ;;  %v240_v8 = vmul.f32 %v135_v3, %v135_v3  ;;  %v137_v9 = vld [vmem:[%s428_s15 + $0x20] sm:$0xff]  ;;  %v138_v13 = vld [vmem:[%s428_s15 + $0x28] sm:$0xff] }
  0x17   : > { %v241_v11 = vmul.f32 %v136_v4, %v136_v4  ;;  %v242_v15 = vmul.f32 %v137_v9, %v137_v9  ;;  %v139_v17 = vld [vmem:[%s428_s15 + $0x30] sm:$0xff]  ;;  %v243_v19 = vmul.f32 %v138_v13, %v138_v13  ;;  %v140_v21 = vld [vmem:[%s428_s15 + $0x38] sm:$0xff]  ;;  %v141_v25 = vld [vmem:[%s428_s15 + $0x40] sm:$0xff] }
  0x18   : > { %v183_v10 = vadd.f32 %v182_v5, %v135_v3  ;;  %v286_v12 = vadd.f32 %v239_v7, %v238_v6  ;;  %v244_v23 = vmul.f32 %v139_v17, %v139_v17  ;;  %v245_v27 = vmul.f32 %v140_v21, %v140_v21  ;;  %v142_v29 = vld [vmem:[%s428_s15 + $0x48] sm:$0xff]  ;;  %v143_v33 = vld [vmem:[%s428_s15 + $0x50] sm:$0xff]  ;;  %v144_v37 = vld [vmem:[%s428_s15 + $0x58] sm:$0xff] }
  0x19   : > { %v246_v31 = vmul.f32 %v141_v25, %v141_v25  ;;  %v247_v35 = vmul.f32 %v142_v29, %v142_v29  ;;  %v248_v39 = vmul.f32 %v143_v33, %v143_v33  ;;  %v145_v41 = vld [vmem:[%s428_s15 + $0x60] sm:$0xff]  ;;  %v249_v43 = vmul.f32 %v144_v37, %v144_v37  ;;  %v146_v45 = vld [vmem:[%s428_s15 + $0x68] sm:$0xff]  ;;  %v147_v49 = vld [vmem:[%s428_s15 + $0x70] sm:$0xff] }
  0x1a   : > { %v184_v14 = vadd.f32 %v183_v10, %v136_v4  ;;  %v287_v16 = vadd.f32 %v286_v12, %v240_v8  ;;  %v250_v47 = vmul.f32 %v145_v41, %v145_v41  ;;  %v251_v51 = vmul.f32 %v146_v45, %v146_v45  ;;  %v148_v53 = vld [vmem:[%s428_s15 + $0x78] sm:$0xff]  ;;  %v149_v57 = vld [vmem:[%s428_s15 + $0x80] sm:$0xff]  ;;  %v150_v61 = vld [vmem:[%s428_s15 + $0x88] sm:$0xff] }
  0x1b   : > { %v252_v55 = vmul.f32 %v147_v49, %v147_v49  ;;  %v253_v59 = vmul.f32 %v148_v53, %v148_v53  ;;  %v254_v63 = vmul.f32 %v149_v57, %v149_v57  ;;  %v151_v1 = vld [vmem:[%s428_s15 + $0x90] sm:$0xff]  ;;  %v255_v3 = vmul.f32 %v150_v61, %v150_v61  ;;  %v152_v5 = vld [vmem:[%s428_s15 + $0x98] sm:$0xff] }
  0x1c   : > { %v185_v18 = vadd.f32 %v184_v14, %v137_v9  ;;  %v288_v20 = vadd.f32 %v287_v16, %v241_v11  ;;  %v256_v7 = vmul.f32 %v151_v1, %v151_v1  ;;  %v153_v9 = vld [vmem:[%s428_s15 + $0xa0] sm:$0xff]  ;;  %v257_v11 = vmul.f32 %v152_v5, %v152_v5 }
  0x1e   : > { %v186_v22 = vadd.f32 %v185_v18, %v138_v13  ;;  %v289_v24 = vadd.f32 %v288_v20, %v242_v15  ;;  %v154_v13 = vld [vmem:[%s428_s15 + $0xa8] sm:$0xff]  ;;  %v258_v15 = vmul.f32 %v153_v9, %v153_v9 }
  0x20   : > { %v187_v26 = vadd.f32 %v186_v22, %v139_v17  ;;  %v290_v28 = vadd.f32 %v289_v24, %v243_v19  ;;  %v155_v17 = vld [vmem:[%s428_s15 + $0xb0] sm:$0xff]  ;;  %v259_v19 = vmul.f32 %v154_v13, %v154_v13 }
  0x22   : > { %v188_v30 = vadd.f32 %v187_v26, %v140_v21  ;;  %v291_v32 = vadd.f32 %v290_v28, %v244_v23  ;;  %v156_v21 = vld [vmem:[%s428_s15 + $0xb8] sm:$0xff]  ;;  %v260_v23 = vmul.f32 %v155_v17, %v155_v17 }
  0x24   : > { %v189_v34 = vadd.f32 %v188_v30, %v141_v25  ;;  %v292_v36 = vadd.f32 %v291_v32, %v245_v27  ;;  %v157_v25 = vld [vmem:[%s428_s15 + $0xc0] sm:$0xff]  ;;  %v261_v27 = vmul.f32 %v156_v21, %v156_v21 }
  0x26   : > { %v190_v38 = vadd.f32 %v189_v34, %v142_v29  ;;  %v293_v40 = vadd.f32 %v292_v36, %v246_v31  ;;  %v158_v29 = vld [vmem:[%s428_s15 + $0xc8] sm:$0xff]  ;;  %v262_v31 = vmul.f32 %v157_v25, %v157_v25 }
  0x28   : > { %v191_v42 = vadd.f32 %v190_v38, %v143_v33  ;;  %v294_v44 = vadd.f32 %v293_v40, %v247_v35  ;;  %v159_v33 = vld [vmem:[%s428_s15 + $0xd0] sm:$0xff]  ;;  %v263_v35 = vmul.f32 %v158_v29, %v158_v29 }
  0x2a   : > { %v192_v46 = vadd.f32 %v191_v42, %v144_v37  ;;  %v295_v48 = vadd.f32 %v294_v44, %v248_v39  ;;  %v160_v37 = vld [vmem:[%s428_s15 + $0xd8] sm:$0xff]  ;;  %v264_v39 = vmul.f32 %v159_v33, %v159_v33 }
  0x2c   : > { %v193_v50 = vadd.f32 %v192_v46, %v145_v41  ;;  %v296_v52 = vadd.f32 %v295_v48, %v249_v43  ;;  %v161_v41 = vld [vmem:[%s428_s15 + $0xe0] sm:$0xff]  ;;  %v265_v43 = vmul.f32 %v160_v37, %v160_v37 }
  0x2e   : > { %v194_v54 = vadd.f32 %v193_v50, %v146_v45  ;;  %v297_v56 = vadd.f32 %v296_v52, %v250_v47  ;;  %v162_v45 = vld [vmem:[%s428_s15 + $0xe8] sm:$0xff]  ;;  %v266_v47 = vmul.f32 %v161_v41, %v161_v41 }
  0x30   : > { %v195_v58 = vadd.f32 %v194_v54, %v147_v49  ;;  %v298_v60 = vadd.f32 %v297_v56, %v251_v51  ;;  %v163_v49 = vld [vmem:[%s428_s15 + $0xf0] sm:$0xff]  ;;  %v267_v51 = vmul.f32 %v162_v45, %v162_v45 }
  0x32   : > { %v196_v62 = vadd.f32 %v195_v58, %v148_v53  ;;  %v299_v0 = vadd.f32 %v298_v60, %v252_v55  ;;  %v164_v53 = vld [vmem:[%s428_s15 + $0xf8] sm:$0xff]  ;;  %v268_v55 = vmul.f32 %v163_v49, %v163_v49 }
  0x34   : > { %v197_v2 = vadd.f32 %v196_v62, %v149_v57  ;;  %v300_v4 = vadd.f32 %v299_v0, %v253_v59  ;;  %v165_v57 = vld [vmem:[%s428_s15 + $0x100] sm:$0xff]  ;;  %v269_v59 = vmul.f32 %v164_v53, %v164_v53 }
  0x36   : > { %v198_v6 = vadd.f32 %v197_v2, %v150_v61  ;;  %v301_v8 = vadd.f32 %v300_v4, %v254_v63  ;;  %v166_v61 = vld [vmem:[%s428_s15 + $0x108] sm:$0xff]  ;;  %v270_v63 = vmul.f32 %v165_v57, %v165_v57 }
  0x38   : > { %v199_v10 = vadd.f32 %v198_v6, %v151_v1  ;;  %v302_v12 = vadd.f32 %v301_v8, %v255_v3  ;;  %v167_v1 = vld [vmem:[%s428_s15 + $0x110] sm:$0xff]  ;;  %v271_v3 = vmul.f32 %v166_v61, %v166_v61 }
  0x3a   : > { %v200_v14 = vadd.f32 %v199_v10, %v152_v5  ;;  %v303_v16 = vadd.f32 %v302_v12, %v256_v7  ;;  %v168_v5 = vld [vmem:[%s428_s15 + $0x118] sm:$0xff]  ;;  %v272_v7 = vmul.f32 %v167_v1, %v167_v1 }
  0x3c   : > { %v201_v18 = vadd.f32 %v200_v14, %v153_v9  ;;  %v304_v20 = vadd.f32 %v303_v16, %v257_v11  ;;  %v169_v9 = vld [vmem:[%s428_s15 + $0x120] sm:$0xff]  ;;  %v273_v11 = vmul.f32 %v168_v5, %v168_v5 }
  0x3e   : > { %v202_v22 = vadd.f32 %v201_v18, %v154_v13  ;;  %v305_v24 = vadd.f32 %v304_v20, %v258_v15  ;;  %v170_v13 = vld [vmem:[%s428_s15 + $0x128] sm:$0xff]  ;;  %v274_v15 = vmul.f32 %v169_v9, %v169_v9 }
  0x40   : > { %v203_v26 = vadd.f32 %v202_v22, %v155_v17  ;;  %v306_v28 = vadd.f32 %v305_v24, %v259_v19  ;;  %v171_v17 = vld [vmem:[%s428_s15 + $0x130] sm:$0xff]  ;;  %v275_v19 = vmul.f32 %v170_v13, %v170_v13 }
  0x42   : > { %v204_v30 = vadd.f32 %v203_v26, %v156_v21  ;;  %v307_v32 = vadd.f32 %v306_v28, %v260_v23  ;;  %v172_v21 = vld [vmem:[%s428_s15 + $0x138] sm:$0xff]  ;;  %v276_v23 = vmul.f32 %v171_v17, %v171_v17 }
  0x44   : > { %v205_v34 = vadd.f32 %v204_v30, %v157_v25  ;;  %v308_v36 = vadd.f32 %v307_v32, %v261_v27  ;;  %v173_v25 = vld [vmem:[%s428_s15 + $0x140] sm:$0xff]  ;;  %v277_v27 = vmul.f32 %v172_v21, %v172_v21 }
  0x46   : > { %v206_v38 = vadd.f32 %v205_v34, %v158_v29  ;;  %v309_v40 = vadd.f32 %v308_v36, %v262_v31  ;;  %v174_v29 = vld [vmem:[%s428_s15 + $0x148] sm:$0xff]  ;;  %v278_v31 = vmul.f32 %v173_v25, %v173_v25 }
  0x48   : > { %v207_v42 = vadd.f32 %v206_v38, %v159_v33  ;;  %v310_v44 = vadd.f32 %v309_v40, %v263_v35  ;;  %v175_v33 = vld [vmem:[%s428_s15 + $0x150] sm:$0xff]  ;;  %v279_v35 = vmul.f32 %v174_v29, %v174_v29 }
  0x4a   : > { %v208_v46 = vadd.f32 %v207_v42, %v160_v37  ;;  %v311_v48 = vadd.f32 %v310_v44, %v264_v39  ;;  %v176_v37 = vld [vmem:[%s428_s15 + $0x158] sm:$0xff]  ;;  %v280_v39 = vmul.f32 %v175_v33, %v175_v33 }
  0x4c   : > { %v209_v50 = vadd.f32 %v208_v46, %v161_v41  ;;  %v312_v52 = vadd.f32 %v311_v48, %v265_v43  ;;  %v177_v41 = vld [vmem:[%s428_s15 + $0x160] sm:$0xff]  ;;  %v281_v43 = vmul.f32 %v176_v37, %v176_v37 }
  0x4e   : > { %v210_v54 = vadd.f32 %v209_v50, %v162_v45  ;;  %v313_v56 = vadd.f32 %v312_v52, %v266_v47  ;;  %v178_v45 = vld [vmem:[%s428_s15 + $0x168] sm:$0xff]  ;;  %v282_v47 = vmul.f32 %v177_v41, %v177_v41 }
  0x50   : > { %v211_v58 = vadd.f32 %v210_v54, %v163_v49  ;;  %v314_v60 = vadd.f32 %v313_v56, %v267_v51  ;;  %v179_v49 = vld [vmem:[%s428_s15 + $0x170] sm:$0xff]  ;;  %v283_v51 = vmul.f32 %v178_v45, %v178_v45 }
  0x52   : > { %v212_v62 = vadd.f32 %v211_v58, %v164_v53  ;;  %v315_v0 = vadd.f32 %v314_v60, %v268_v55  ;;  %v180_v53 = vld [vmem:[%s428_s15 + $0x178] sm:$0xff]  ;;  %v284_v55 = vmul.f32 %v179_v49, %v179_v49 }
  0x53   : > { %v285_v58 = vmul.f32 %v180_v53, %v180_v53 }
  0x54   : > { %v213_v2 = vadd.f32 %v212_v62, %v165_v57  ;;  %v316_v4 = vadd.f32 %v315_v0, %v269_v59 }
  0x56   : > { %v214_v6 = vadd.f32 %v213_v2, %v166_v61  ;;  %v317_v8 = vadd.f32 %v316_v4, %v270_v63 }
  0x58   : > { %v215_v10 = vadd.f32 %v214_v6, %v167_v1  ;;  %v318_v12 = vadd.f32 %v317_v8, %v271_v3 }
  0x5a   : > { %v216_v14 = vadd.f32 %v215_v10, %v168_v5  ;;  %v319_v16 = vadd.f32 %v318_v12, %v272_v7  ;;  %v181_v7 = vld [vmem:[%s500_s1] sm:$0x1] }
  0x5b   : > { %v237_v12 = vld [vmem:[%s501_s2] sm:$0x1] }
  0x5c   : > { %v217_v18 = vadd.f32 %v216_v14, %v169_v9  ;;  %v320_v20 = vadd.f32 %v319_v16, %v273_v11 }
  0x5e   : > { %v218_v22 = vadd.f32 %v217_v18, %v170_v13  ;;  %v321_v24 = vadd.f32 %v320_v20, %v274_v15 }
  0x60   : > { %v219_v26 = vadd.f32 %v218_v22, %v171_v17  ;;  %v322_v28 = vadd.f32 %v321_v24, %v275_v19 }
  0x62   : > { %v220_v30 = vadd.f32 %v219_v26, %v172_v21  ;;  %v323_v32 = vadd.f32 %v322_v28, %v276_v23 }
  0x64   : > { %v221_v34 = vadd.f32 %v220_v30, %v173_v25  ;;  %v324_v36 = vadd.f32 %v323_v32, %v277_v27 }
  0x66   : > { %v222_v38 = vadd.f32 %v221_v34, %v174_v29  ;;  %v325_v40 = vadd.f32 %v324_v36, %v278_v31 }
  0x68   : > { %v223_v42 = vadd.f32 %v222_v38, %v175_v33  ;;  %v326_v44 = vadd.f32 %v325_v40, %v279_v35 }
  0x6a   : > { %v224_v46 = vadd.f32 %v223_v42, %v176_v37  ;;  %v327_v48 = vadd.f32 %v326_v44, %v280_v39 }
  0x6c   : > { %v225_v50 = vadd.f32 %v224_v46, %v177_v41  ;;  %v328_v52 = vadd.f32 %v327_v48, %v281_v43 }
  0x6e   : > { %v226_v54 = vadd.f32 %v225_v50, %v178_v45  ;;  %v329_v56 = vadd.f32 %v328_v52, %v282_v47 }
  0x70   : > { %v227_v57 = vadd.f32 %v226_v54, %v179_v49  ;;  %v330_v59 = vadd.f32 %v329_v56, %v283_v51 }
  0x72   : > { %v228_v60 = vadd.f32 %v227_v57, %v180_v53  ;;  %v331_v61 = vadd.f32 %v330_v59, %v284_v55 }
  0x74   : > { %v229_v62 = vrot.slane %v228_v60, 4  ;;  %v332_v63 = vadd.f32 %v331_v61, %v285_v58 }
  0x76   : > { %v230_v0 = vadd.f32 %v229_v62, %v228_v60  ;;  %v333_v1 = vrot.slane %v332_v63, 4 }
  0x78   : > { %v231_v2 = vrot.slane %v230_v0, 2  ;;  %v334_v3 = vadd.f32 %v333_v1, %v332_v63 }
  0x7a   : > { %v232_v4 = vadd.f32 %v231_v2, %v230_v0  ;;  %v335_v5 = vrot.slane %v334_v3, 2 }
  0x7c   : > { %v233_v6 = vrot.slane %v232_v4, 1  ;;  %v336_v8 = vadd.f32 %v335_v5, %v334_v3 }
  0x7e   : > { %v234_v9 = vadd.f32 %v233_v6, %v232_v4  ;;  %v337_v10 = vrot.slane %v336_v8, 1 }
  0x80   : > { %v235_v11 = vadd.f32 %v234_v9, %v181_v7  ;;  %v338_v13 = vadd.f32 %v337_v10, %v336_v8 }
  0x82   : > { %236 = vst [vmem:[%s500_s1] sm:$0x1] %v235_v11  ;;  %v339_v14 = vadd.f32 %v338_v13, %v237_v12 }
  0x84   : > { %340 = vst [vmem:[%s501_s2] sm:$0x1] %v339_v14 }
  0x85 PF: > { %s13_s9 = sadd.s32 1, %s399_s9  }
  0x86   : > { %p10_p5 = scmp.ge.s32.totalorder %s13_s9, 4  }
  0x88   :  { %12 = sbr.rel (!%p10_p5) target bundleno = 1 (0x1), region = 62 }

// kernel: gblock_pallas.5
= control target key start
LH: loop header
LB: loop body
LE: loop exit
PB: predicated region body
PF: predicated region fallthrough
CT: control target
= control target key end

     0   :  { %s7830_s18 = smov 0   ;;  %s10011_s0 = inlined_call_operand.vmem [shape: f32[2,16,24,128], index: 0, kind: input, shape index: {}]   ;;  %s10012_s1 = inlined_call_operand.vmem [shape: f32[1,128], index: 1, kind: input, shape index: {}]   ;;  %s10013_s2 = inlined_call_operand.vmem [shape: f32[1,128], index: 2, kind: input, shape index: {}]   ;;  %s10014_s3 = inlined_call_operand.vmem [shape: bf16[3,3,128,128], index: 3, kind: input, shape index: {}]   ;;  %s10015_s4 = inlined_call_operand.vmem [shape: f32[1,128], index: 4, kind: input, shape index: {}]   ;;  %s10016_s5 = inlined_call_operand.vmem [shape: f32[2,16,24,128], index: 5, kind: output, shape index: {}]  }
   0x1 LB: > { %s6601_s19 = sadd.s32 4294967295, %s7795_s18   ;;  %p6605_p0 = scmp.ge.s32.totalorder %s7795_s18, 1  ;;  %s7795_s18 = sphi %s7830_s18, %s15_s18  }
   0x2   : > { %p187_p1 = scmp.lt.s32.totalorder %s7795_s18, 3 }
   0x4   : > { %p188_p2 = pnand %p6605_p0, %p187_p1 }
   0x6   : > { %191 = sbr.rel (%p188_p2) target bundleno = 716 (0x2cc), region = 40 }
   0xd   : > { %v7713_v0 = vld [vmem:[%s10014_s3] sm:$0xff]   ;;  %v7714_v1 = vld [vmem:[%s10014_s3 + $0x8] sm:$0xff]   ;;  %v7797_v2 = vmov 0   ;;  %v7715_v3 = vld [vmem:[%s10014_s3 + $0x10] sm:$0xff]   ;;  %p215_p3 = scmp.lt.s32.totalorder %s6601_s19, 1  ;;  %v7798_v34 = vmov 0.0|0.0  }
   0xe   : > { %493 = vst [vmem:[#allocation2] sm:$0xff] %v7797_v2  ;;  %494 = vst [vmem:[#allocation2 + $0x8] sm:$0xff] %v7797_v2  ;;  %7109 = vmatprep.subr.bf16.mxu0 %v7713_v0  ;;  %7685 = vmatprep.subr.bf16.mxu1 %v7713_v0  ;;  %v734_v4 = vrot.slane %v7797_v2, 3  ;;  %v7853_v5 = vrot.slane %v7797_v2, 4  ;;  %v7716_v6 = vld [vmem:[%s10014_s3 + $0x18] sm:$0xff]   ;;  %v7717_v11 = vld [vmem:[%s10014_s3 + $0x20] sm:$0xff]   ;;  %v7905_v35 = vunpack.c.l.b16 %v7798_v34 }
   0xf   : > { %495 = vst [vmem:[#allocation2 + $0xd0] sm:$0xff] %v7797_v2  ;;  %496 = vst [vmem:[#allocation2 + $0xd8] sm:$0xff] %v7797_v2  ;;  %7110 = vmatpush3.bf16.msra.mxu0 %v7713_v0  ;;  %7693 = vmatpush3.bf16.msra.mxu1 %v7713_v0  ;;  %s10226_s19 = smov (!%p215_p3, %s6601_s19), 1  ;;  %v7864_v10 = vld [vmem:[%s10012_s1] ss:$0 sm:$0xff]  ;;  %v7718_v30 = vld [vmem:[%s10014_s3 + $0x28] sm:$0xff]  }
  0x10   : > { %7111 = vmatprep.subr.bf16.mxu0 %v7714_v1  ;;  %7686 = vmatprep.subr.bf16.mxu1 %v7714_v1  ;;  %s7701_s28 = smul.u32 384, %s10226_s19  ;;  %v7870_v14 = vor.u32 %v7853_v5, %v734_v4  ;;  %v7882_v15 = vld [vmem:[%s10013_s2] ss:$0 sm:$0xff]  ;;  %vm722_vm0 = vsmask.f32 4352  ;;  %v7719_v54 = vld [vmem:[%s10014_s3 + $0x30] sm:$0xff]  }
  0x11   : > { %v7926_v58 = vrot.slane %v7797_v2, 5  ;;  %v7720_v2 = vld [vmem:[%s10014_s3 + $0x38] sm:$0xff]   ;;  %vm1892_vm1 = vsmask.f32 3328  ;;  %vm1359_vm2 = vcmask 1043456  }
  0x12   : > { %s7877_s10 = scalar_lea.vmem %s10011_s0, %s7701_s28  ;;  %vm2600_vm3 = vsmask.f32 256  ;;  %vm3738_vm4 = vsmask.f32 7424  ;;  %s9859_s20 = scalar_lea.vmem %s10016_s5, %s7701_s28 }
  0x13   : > { %7112 = vmatpush3.bf16.msra.mxu0 %v7714_v1  ;;  %7694 = vmatpush3.bf16.msra.mxu1 %v7714_v1  ;;  %v226_v16 = vld [vmem:[%s7877_s10] sm:$0xff]  ;;  %v227_v17 = vld [vmem:[%s7877_s10 + $0x8] sm:$0xff]  ;;  %v248_v22 = vld [vmem:[%s7877_s10 + $0xb0] sm:$0xff] }
  0x14   : > { %7113 = vmatprep.subr.bf16.mxu0 %v7715_v3  ;;  %7687 = vmatprep.subr.bf16.mxu1 %v7715_v3  ;;  %v247_v18 = vld [vmem:[%s7877_s10 + $0xa8] sm:$0xff]  ;;  %v282_v20 = vmul.f32 %v7864_v10, %v226_v16  ;;  %v283_v21 = vmul.f32 %v7864_v10, %v227_v17  ;;  %v250_v24 = vld [vmem:[%s7877_s10 + $0xc0] sm:$0xff]  ;;  %v304_v26 = vmul.f32 %v7864_v10, %v248_v22  ;;  %v229_v29 = vld [vmem:[%s7877_s10 + $0x18] sm:$0xff] }
  0x15   : > { %v681_v7 = vld [vmem:[#allocation2] sm:$0xf8]  ;;  %v303_v23 = vmul.f32 %v7864_v10, %v247_v18  ;;  %v251_v25 = vld [vmem:[%s7877_s10 + $0xc8] sm:$0xff]  ;;  %v306_v27 = vmul.f32 %v7864_v10, %v250_v24  ;;  %v253_v37 = vld [vmem:[%s7877_s10 + $0xd8] sm:$0xff]  ;;  %v285_v45 = vmul.f32 %v7864_v10, %v229_v29 }
  0x16   : > { %v724_v8 = vshrl.u32 %v681_v7, 16  ;;  %v727_v9 = vshll.u32 %v681_v7, 16  ;;  %v307_v28 = vmul.f32 %v7864_v10, %v251_v25  ;;  %v336_v32 = vadd.f32 %v7882_v15, %v282_v20  ;;  %v230_v36 = vld [vmem:[%s7877_s10 + $0x20] sm:$0xff]  ;;  %v232_v29 = vld [vmem:[%s7877_s10 + $0x30] sm:$0xff] }
  0x17   : > { %7114 = vmatpush3.bf16.msra.mxu0 %v7715_v3  ;;  %7695 = vmatpush3.bf16.msra.mxu1 %v7715_v3  ;;  %v337_v33 = vadd.f32 %v7882_v15, %v283_v21  ;;  %v357_v38 = vadd.f32 %v7882_v15, %v303_v23  ;;  %v358_v39 = vadd.f32 %v7882_v15, %v304_v26  ;;  %v254_v41 = vld [vmem:[%s7877_s10 + $0xe0] sm:$0xff] }
  0x18   : > { %v726_v12 = vrot.slane %v724_v8, 3  ;;  %v729_v13 = vrot.slane %v727_v9, 4  ;;  %7115 = vmatprep.subr.bf16.mxu0 %v7716_v6  ;;  %7688 = vmatprep.subr.bf16.mxu1 %v7716_v6  ;;  %v360_v40 = vadd.f32 %v7882_v15, %v306_v27  ;;  %v384_v42 = vmax.f32 %v336_v32, 0.0  ;;  %v7721_v24 = vld [vmem:[%s10014_s3 + $0x40] sm:$0xff]  }
  0x19   : > { %v385_v43 = vmax.f32 %v337_v33, 0.0  ;;  %v361_v44 = vadd.f32 %v7882_v15, %v307_v28  ;;  %v405_v46 = vmax.f32 %v357_v38, 0.0  ;;  %v406_v47 = vmax.f32 %v358_v39, 0.0 }
  0x1a   : > { %v730_v19 = vor.u32 %v729_v13, %v726_v12  ;;  %v408_v48 = vmax.f32 %v360_v40, 0.0  ;;  %v286_v49 = vmul.f32 %v7864_v10, %v230_v36  ;;  %v339_v52 = vadd.f32 %v7882_v15, %v285_v45 }
  0x1b   : > { %7116 = vmatpush3.bf16.msra.mxu0 %v7716_v6  ;;  %7696 = vmatpush3.bf16.msra.mxu1 %v7716_v6  ;;  %v7916_v50 = vpack.c.bf16 %v385_v43, %v384_v42  ;;  %v409_v51 = vmax.f32 %v361_v44, 0.0  ;;  %v309_v53 = vmul.f32 %v7864_v10, %v253_v37  ;;  %v511_v55 = vpack.c.bf16 %v406_v47, %v405_v46  ;;  %v7722_v37 = vld [vmem:[%s10014_s3 + $0x80] sm:$0xff]  }
  0x1c   : > { %v739_v31 = vsel %vm722_vm0, %v730_v19, %v7870_v14  ;;  %7117 = vmatprep.subr.bf16.mxu0 %v7717_v11  ;;  %7689 = vmatprep.subr.bf16.mxu1 %v7717_v11  ;;  %v340_v56 = vadd.f32 %v7882_v15, %v286_v49  ;;  %v310_v57 = vmul.f32 %v7864_v10, %v254_v41  ;;  %v387_v62 = vmax.f32 %v339_v52, 0.0 }
  0x1d   : > { %7125 = vmatprep.mubr.bf16.mxu0 %v739_v31  ;;  %657 = vst [vmem:[#allocation2 + $0x10] sm:$0xff] %v7916_v50  ;;  %v741_v59 = vshrl.u32 %v7916_v50, 16  ;;  %v744_v60 = vshll.u32 %v7916_v50, 16  ;;  %v513_v61 = vpack.c.bf16 %v409_v51, %v408_v48  ;;  %v583_v63 = vunpack.c.h.b16 %v511_v55  ;;  %v235_v31 = vld [vmem:[%s7877_s10 + $0x48] sm:$0xff]  ;;  %v236_v51 = vld [vmem:[%s7877_s10 + $0x50] sm:$0xff] }
  0x1e   : > { %v6613_v0 = vcombine.low %v7798_v34, %v511_v55  ;;  %v388_v1 = vmax.f32 %v340_v56, 0.0  ;;  %v7933_v3 = vadd.f32 %v7882_v15, %v309_v53  ;;  %v364_v19 = vadd.f32 %v7882_v15, %v310_v57 }
  0x1f   : > { %7118 = vmatpush3.bf16.msra.mxu0 %v7717_v11  ;;  %7697 = vmatpush3.bf16.msra.mxu1 %v7717_v11  ;;  %v743_v4 = vrot.slane %v741_v59, 3  ;;  %v746_v6 = vrot.slane %v744_v60, 4  ;;  %669 = vst [vmem:[#allocation2 + $0x70] sm:$0xff] %v513_v61  ;;  %v849_v7 = vshrl.u32 %v513_v61, 16  ;;  %v852_v8 = vshll.u32 %v513_v61, 16 }
  0x20   : > { %7119 = vmatprep.subr.bf16.mxu0 %v7718_v30  ;;  %7690 = vmatprep.subr.bf16.mxu1 %v7718_v30  ;;  %v620_v9 = vpack.c.b16 %v7905_v35, %v583_v63  ;;  %667 = vst [vmem:[#allocation2 + $0x60] sm:$0xff] %v6613_v0  ;;  %v831_v11 = vshrl.u32 %v6613_v0, 16  ;;  %v834_v12 = vshll.u32 %v6613_v0, 16  ;;  %v499_v13 = vpack.c.bf16 %v388_v1, %v387_v62  ;;  %v7724_v63 = vld [vmem:[%s10014_s3 + $0x88] sm:$0xff]   ;;  %v256_v1 = vld [vmem:[%s7877_s10 + $0xf0] sm:$0xff] }
  0x21   : > { %v7943_v16 = vor.u32 %v746_v6, %v743_v4  ;;  %v851_v17 = vrot.slane %v849_v7, 3  ;;  %v854_v18 = vrot.slane %v852_v8, 4  ;;  %v412_v41 = vmax.f32 %v364_v19, 0.0  ;;  %v257_v19 = vld [vmem:[%s7877_s10 + $0xf8] sm:$0xff] }
  0x22   : > { %668 = vst [vmem:[#allocation2 + $0x68] sm:$0xff] %v620_v9  ;;  %v833_v20 = vrot.slane %v831_v11, 3  ;;  %v836_v21 = vrot.slane %v834_v12, 4  ;;  %v840_v22 = vshrl.u32 %v620_v9, 16  ;;  %v843_v23 = vshll.u32 %v620_v9, 16 }
  0x23   : > { %7120 = vmatpush3.bf16.msra.mxu0 %v7718_v30  ;;  %7698 = vmatpush3.bf16.msra.mxu1 %v7718_v30  ;;  %v748_v25 = vsel %vm722_vm0, %v7870_v14, %v7943_v16  ;;  %v7952_v26 = vor.u32 %v854_v18, %v851_v17  ;;  %v7955_v27 = vcombine.low %v7798_v34, %v499_v13  ;;  %v565_v28 = vunpack.c.h.b16 %v499_v13  ;;  %v233_v30 = vld [vmem:[%s7877_s10 + $0x38] sm:$0xff]  ;;  %v7725_v17 = vld [vmem:[%s10014_s3 + $0x50] sm:$0xff]  }
  0x24   : > { %7121 = vmatprep.subr.bf16.mxu0 %v7719_v54  ;;  %7691 = vmatprep.subr.bf16.mxu1 %v7719_v54  ;;  %v7960_v32 = vor.u32 %v836_v21, %v833_v20  ;;  %v842_v33 = vrot.slane %v840_v22, 3  ;;  %v845_v36 = vrot.slane %v843_v23, 4  ;;  %v411_v14 = vmax.f32 %v7933_v3, 0.0 }
  0x25   : > { %658 = vst [vmem:[#allocation2 + $0x18] sm:$0xff] %v7955_v27  ;;  %v750_v38 = vshrl.u32 %v7955_v27, 16  ;;  %v753_v39 = vshll.u32 %v7955_v27, 16  ;;  %v7970_v40 = vpack.c.b16 %v7905_v35, %v565_v28  ;;  %v288_v43 = vmul.f32 %v7864_v10, %v232_v29 }
  0x26   : > { %v846_v42 = vor.u32 %v845_v36, %v842_v33  ;;  %v289_v44 = vmul.f32 %v7864_v10, %v233_v30  ;;  %v291_v45 = vmul.f32 %v7864_v10, %v235_v31  ;;  %v515_v55 = vpack.c.bf16 %v412_v41, %v411_v14  ;;  %v260_v14 = vld [vmem:[%s7877_s10 + $0x110] sm:$0xff] }
  0x27   : > { %7122 = vmatpush3.bf16.msra.mxu0 %v7719_v54  ;;  %7699 = vmatpush3.bf16.msra.mxu1 %v7719_v54  ;;  %v752_v46 = vrot.slane %v750_v38, 3  ;;  %v755_v47 = vrot.slane %v753_v39, 4  ;;  %659 = vst [vmem:[#allocation2 + $0x20] sm:$0xff] %v7970_v40  ;;  %v759_v48 = vshrl.u32 %v7970_v40, 16  ;;  %v762_v49 = vshll.u32 %v7970_v40, 16  ;;  %v7723_v54 = vld [vmem:[%s10014_s3 + $0x48] sm:$0xff]  }
  0x28   : > { %7123 = vmatprep.subr.bf16.mxu0 %v7720_v2  ;;  %7692 = vmatprep.subr.bf16.mxu1 %v7720_v2  ;;  %v847_v52 = vsel %vm722_vm0, %v7960_v32, %v846_v42  ;;  %v856_v53 = vsel %vm722_vm0, %v846_v42, %v7952_v26  ;;  %v7992_v56 = vrot.slane %v741_v59, 4  ;;  %v342_v0 = vadd.f32 %v7882_v15, %v288_v43 }
  0x29   : > { %7149 = vmatprep.mubr.bf16.mxu1 %v847_v52  ;;  %v756_v57 = vor.u32 %v755_v47, %v752_v46  ;;  %v761_v61 = vrot.slane %v759_v48, 3  ;;  %v764_v62 = vrot.slane %v762_v49, 4  ;;  %v6614_v59 = vcombine.low %v7798_v34, %v515_v55  ;;  %v7728_v46 = vld [vmem:[%s10014_s3 + $0x98] sm:$0xff]  }
  0x2a   : > { %v589_v3 = vunpack.c.h.b16 %v515_v55  ;;  %v292_v4 = vmul.f32 %v7864_v10, %v236_v51  ;;  %v390_v8 = vmax.f32 %v342_v0, 0.0  ;;  %v345_v9 = vadd.f32 %v7882_v15, %v291_v45  ;;  %v7727_v45 = vld [vmem:[%s10014_s3 + $0x58] sm:$0xff]  }
  0x2b   : > { %7124 = vmatpush3.bf16.msra.mxu0 %v7720_v2  ;;  %7700 = vmatpush3.bf16.msra.mxu1 %v7720_v2  ;;  %v343_v2 = vadd.f32 %v7882_v15, %v289_v44  ;;  %v757_v6 = vsel %vm722_vm0, %v7943_v16, %v756_v57  ;;  %v8008_v7 = vor.u32 %v764_v62, %v761_v61  ;;  %v858_v11 = vshrl.u32 %v6614_v59, 16  ;;  %v7726_v16 = vld [vmem:[%s10014_s3 + $0x90] sm:$0xff]  }
  0x2c   : > { %7173 = vmatprep.subr.bf16.mxu1 %v7721_v24  ;;  %7237 = vmatprep.subr.bf16.mxu0 %v7722_v37  ;;  %670 = vst [vmem:[#allocation2 + $0x78] sm:$0xff] %v6614_v59  ;;  %v861_v12 = vshll.u32 %v6614_v59, 16  ;;  %v623_v13 = vpack.c.b16 %v7905_v35, %v589_v3  ;;  %v346_v21 = vadd.f32 %v7882_v15, %v292_v4  ;;  %v393_v22 = vmax.f32 %v345_v9, 0.0  ;;  %v238_v59 = vld [vmem:[%s7877_s10 + $0x60] sm:$0xff] }
  0x2d   : > { %v391_v18 = vmax.f32 %v343_v2, 0.0  ;;  %v766_v20 = vsel %vm722_vm0, %v756_v57, %v8008_v7  ;;  %v312_v23 = vmul.f32 %v7864_v10, %v256_v1  ;;  %v313_v36 = vmul.f32 %v7864_v10, %v257_v19 }
  0x2e   : > { %7126 = vmatmul.mubr.bf16.vlgmr.msra.gmra.mrb[0].mxu0 %v748_v25  ;;  %7150 = vmatmul.mubr.bf16.vlgmr.msra.gmra.mrb[0].mxu1 %v856_v53  ;;  %v860_v25 = vrot.slane %v858_v11, 3  ;;  %v863_v28 = vrot.slane %v861_v12, 4  ;;  %671 = vst [vmem:[#allocation2 + $0x80] sm:$0xff] %v623_v13  ;;  %v867_v29 = vshrl.u32 %v623_v13, 16  ;;  %v870_v30 = vshll.u32 %v623_v13, 16  ;;  %v7729_v13 = vld [vmem:[%s10014_s3 + $0x60] sm:$0xff]  }
  0x2f   : > { %7174 = vmatpush3.bf16.msra.mxu1 %v7721_v24  ;;  %7238 = vmatpush3.bf16.msra.mxu0 %v7722_v37  ;;  %v259_v24 = vld [vmem:[%s7877_s10 + $0x108] sm:$0xff]  ;;  %v8024_v31 = vpack.c.bf16 %v391_v18, %v390_v8  ;;  %v394_v33 = vmax.f32 %v346_v21, 0.0  ;;  %v366_v37 = vadd.f32 %v7882_v15, %v312_v23  ;;  %v367_v53 = vadd.f32 %v7882_v15, %v313_v36 }
  0x30   : > { %7175 = vmatprep.subr.bf16.mxu1 %v7723_v54  ;;  %7129 = vmatprep.mubr.bf16.mxu0 %v757_v6  ;;  %v864_v41 = vor.u32 %v863_v28, %v860_v25  ;;  %v869_v42 = vrot.slane %v867_v29, 3  ;;  %v872_v43 = vrot.slane %v870_v30, 4  ;;  %v315_v44 = vmul.f32 %v7864_v10, %v259_v24  ;;  %v239_v6 = vld [vmem:[%s7877_s10 + $0x68] sm:$0xff]  ;;  %v262_v30 = vld [vmem:[%s7877_s10 + $0x120] sm:$0xff] }
  0x31   : > { %7239 = vmatprep.subr.bf16.mxu0 %v7724_v63  ;;  %660 = vst [vmem:[#allocation2 + $0x28] sm:$0xff] %v8024_v31  ;;  %v768_v47 = vshrl.u32 %v8024_v31, 16  ;;  %v771_v51 = vshll.u32 %v8024_v31, 16  ;;  %v503_v52 = vpack.c.bf16 %v394_v33, %v393_v22  ;;  %v414_v57 = vmax.f32 %v366_v37, 0.0  ;;  %v7731_v33 = vld [vmem:[%s10014_s3 + $0x68] sm:$0xff]  }
  0x32   : > { %v8042_v55 = vor.u32 %v872_v43, %v869_v42  ;;  %v316_v61 = vmul.f32 %v7864_v10, %v260_v14  ;;  %v415_v1 = vmax.f32 %v367_v53, 0.0  ;;  %v369_v3 = vadd.f32 %v7882_v15, %v315_v44  ;;  %v263_v42 = vld [vmem:[%s7877_s10 + $0x128] sm:$0xff] }
  0x33   : > { %7176 = vmatpush3.bf16.msra.mxu1 %v7723_v54  ;;  %7240 = vmatpush3.bf16.msra.mxu0 %v7724_v63  ;;  %v865_v54 = vsel %vm722_vm0, %v7952_v26, %v864_v41  ;;  %v770_v62 = vrot.slane %v768_v47, 3  ;;  %v773_v63 = vrot.slane %v771_v51, 4  ;;  %v8050_v0 = vcombine.low %v7798_v34, %v503_v52 }
  0x34   : > { %7177 = vmatprep.subr.bf16.mxu1 %v7725_v17  ;;  %7241 = vmatprep.subr.bf16.mxu0 %v7726_v16  ;;  %v874_v26 = vsel %vm722_vm0, %v864_v41, %v8042_v55  ;;  %v370_v2 = vadd.f32 %v7882_v15, %v316_v61  ;;  %v571_v4 = vunpack.c.h.b16 %v503_v52  ;;  %v517_v12 = vpack.c.bf16 %v415_v1, %v414_v57  ;;  %v7732_v52 = vld [vmem:[%s10014_s3 + $0xa8] sm:$0xff]  }
  0x35   : > { %7153 = vmatprep.mubr.bf16.mxu1 %v865_v54  ;;  %v774_v8 = vor.u32 %v773_v63, %v770_v62  ;;  %661 = vst [vmem:[#allocation2 + $0x30] sm:$0xff] %v8050_v0  ;;  %v777_v9 = vshrl.u32 %v8050_v0, 16  ;;  %v780_v11 = vshll.u32 %v8050_v0, 16  ;;  %v295_v14 = vmul.f32 %v7864_v10, %v239_v6 }
  0x36   : > { %7130 = vmatmul.mubr.bf16.gmra.mrb[4].mxu0 %v766_v20  ;;  %7154 = vmatmul.mubr.bf16.gmra.mrb[4].mxu1 %v874_v26  ;;  %v418_v18 = vmax.f32 %v370_v2, 0.0  ;;  %v8068_v19 = vpack.c.b16 %v7905_v35, %v571_v4  ;;  %v294_v20 = vmul.f32 %v7864_v10, %v238_v59  ;;  %672 = vst [vmem:[#allocation2 + $0x88] sm:$0xff] %v517_v12  ;;  %v876_v24 = vshrl.u32 %v517_v12, 16  ;;  %v241_v26 = vld [vmem:[%s7877_s10 + $0x78] sm:$0xff] }
  0x37   : > { %7178 = vmatpush3.bf16.msra.mxu1 %v7725_v17  ;;  %7242 = vmatpush3.bf16.msra.mxu0 %v7726_v16  ;;  %v7730_v17 = vld [vmem:[%s10014_s3 + $0xa0] sm:$0xff]   ;;  %v417_v16 = vmax.f32 %v369_v3, 0.0  ;;  %v775_v21 = vsel %vm722_vm0, %v8008_v7, %v774_v8  ;;  %v779_v22 = vrot.slane %v777_v9, 3  ;;  %v782_v23 = vrot.slane %v780_v11, 4 }
  0x38   : > { %7179 = vmatprep.subr.bf16.mxu1 %v7727_v45  ;;  %7243 = vmatprep.subr.bf16.mxu0 %v7728_v46  ;;  %v879_v25 = vshll.u32 %v517_v12, 16  ;;  %662 = vst [vmem:[#allocation2 + $0x38] sm:$0xff] %v8068_v19  ;;  %v786_v29 = vshrl.u32 %v8068_v19, 16  ;;  %v789_v7 = vshll.u32 %v8068_v19, 16  ;;  %v878_v37 = vrot.slane %v876_v24, 3  ;;  %v242_v3 = vld [vmem:[%s7877_s10 + $0x80] sm:$0xff] }
  0x39   : > { %7133 = vmatprep.mubr.bf16.mxu0 %v775_v21  ;;  %v519_v28 = vpack.c.bf16 %v418_v18, %v417_v16  ;;  %v783_v36 = vor.u32 %v782_v23, %v779_v22  ;;  %v348_v41 = vadd.f32 %v7882_v15, %v294_v20  ;;  %v349_v54 = vadd.f32 %v7882_v15, %v295_v14  ;;  %v7733_v12 = vld [vmem:[%s10014_s3 + $0x70] sm:$0xff]   ;;  %v265_v24 = vld [vmem:[%s7877_s10 + $0x138] sm:$0xff] }
  0x3a   : > { %v881_v43 = vrot.slane %v879_v25, 4  ;;  %v318_v6 = vmul.f32 %v7864_v10, %v262_v30  ;;  %v297_v30 = vmul.f32 %v7864_v10, %v241_v26  ;;  %v7735_v14 = vld [vmem:[%s10014_s3 + $0x78] sm:$0xff]  }
  0x3b   : > { %7180 = vmatpush3.bf16.msra.mxu1 %v7727_v45  ;;  %7244 = vmatpush3.bf16.msra.mxu0 %v7728_v46  ;;  %v8088_v44 = vcombine.low %v7798_v34, %v519_v28  ;;  %v788_v45 = vrot.slane %v786_v29, 3  ;;  %v791_v46 = vrot.slane %v789_v7, 4  ;;  %v784_v53 = vsel %vm722_vm0, %v774_v8, %v783_v36 }
  0x3c   : > { %7181 = vmatprep.subr.bf16.mxu1 %v7729_v13  ;;  %7245 = vmatprep.subr.bf16.mxu0 %v7730_v17  ;;  %v396_v57 = vmax.f32 %v348_v41, 0.0  ;;  %v595_v61 = vunpack.c.h.b16 %v519_v28  ;;  %v882_v62 = vor.u32 %v881_v43, %v878_v37  ;;  %v397_v2 = vmax.f32 %v349_v54, 0.0  ;;  %v266_v37 = vld [vmem:[%s7877_s10 + $0x140] sm:$0xff] }
  0x3d   : > { %673 = vst [vmem:[#allocation2 + $0x90] sm:$0xff] %v8088_v44  ;;  %v10024_v63 = vshrl.u32 %v8088_v44, 16  ;;  %v10023_v1 = vshll.u32 %v8088_v44, 16  ;;  %v8102_v59 = vor.u32 %v791_v46, %v788_v45  ;;  %v319_v8 = vmul.f32 %v7864_v10, %v263_v42 }
  0x3e   : > { %7134 = vmatmul.mubr.bf16.gmra.mrb[8].mxu0 %v784_v53  ;;  %v8107_v4 = vpack.c.b16 %v7905_v35, %v595_v61  ;;  %v8125_v21 = vpack.c.bf16 %v397_v2, %v396_v57  ;;  %v372_v23 = vadd.f32 %v7882_v15, %v318_v6  ;;  %v351_v54 = vadd.f32 %v7882_v15, %v297_v30  ;;  %v244_v57 = vld [vmem:[%s7877_s10 + $0x90] sm:$0xff]  ;;  %v7736_v61 = vld [vmem:[%s10014_s3 + $0xb8] sm:$0xff]  }
  0x3f   : > { %7182 = vmatpush3.bf16.msra.mxu1 %v7729_v13  ;;  %7246 = vmatpush3.bf16.msra.mxu0 %v7730_v17  ;;  %v883_v13 = vsel %vm722_vm0, %v8042_v55, %v882_v62  ;;  %v887_v16 = vrot.slane %v10024_v63, 3  ;;  %v890_v18 = vrot.slane %v10023_v1, 4  ;;  %v793_v20 = vsel %vm722_vm0, %v783_v36, %v8102_v59  ;;  %v7734_v17 = vld [vmem:[%s10014_s3 + $0xb0] sm:$0xff]  }
  0x40   : > { %7183 = vmatprep.subr.bf16.mxu1 %v7731_v33  ;;  %7247 = vmatprep.subr.bf16.mxu0 %v7732_v52  ;;  %674 = vst [vmem:[#allocation2 + $0x98] sm:$0xff] %v8107_v4  ;;  %v10022_v55 = vshrl.u32 %v8107_v4, 16  ;;  %v10019_v22 = vshll.u32 %v8107_v4, 16  ;;  %v373_v28 = vadd.f32 %v7882_v15, %v319_v8  ;;  %v298_v36 = vmul.f32 %v7864_v10, %v242_v3  ;;  %v268_v30 = vld [vmem:[%s7877_s10 + $0x150] sm:$0xff] }
  0x41   : > { %7157 = vmatprep.mubr.bf16.mxu1 %v883_v13  ;;  %7137 = vmatprep.mubr.bf16.mxu0 %v793_v20  ;;  %v891_v25 = vor.u32 %v890_v18, %v887_v16  ;;  %663 = vst [vmem:[#allocation2 + $0x40] sm:$0xff] %v8125_v21  ;;  %v795_v41 = vshrl.u32 %v8125_v21, 16  ;;  %v798_v42 = vshll.u32 %v8125_v21, 16  ;;  %v420_v46 = vmax.f32 %v372_v23, 0.0  ;;  %v245_v16 = vld [vmem:[%s7877_s10 + $0x98] sm:$0xff] }
  0x42   : > { %v896_v43 = vrot.slane %v10022_v55, 3  ;;  %v899_v45 = vrot.slane %v10019_v22, 4  ;;  %v421_v53 = vmax.f32 %v373_v28, 0.0  ;;  %v352_v3 = vadd.f32 %v7882_v15, %v298_v36  ;;  %v8170_v36 = vld [vmem:[%s10014_s3 + $0xc0] sm:$0xff]  }
  0x43   : > { %7184 = vmatpush3.bf16.msra.mxu1 %v7731_v33  ;;  %7248 = vmatpush3.bf16.msra.mxu0 %v7732_v52  ;;  %v892_v33 = vsel %vm722_vm0, %v882_v62, %v891_v25  ;;  %v797_v26 = vrot.slane %v795_v41, 3  ;;  %v800_v52 = vrot.slane %v798_v42, 4  ;;  %v399_v6 = vmax.f32 %v351_v54, 0.0 }
  0x44   : > { %7185 = vmatprep.subr.bf16.mxu1 %v7733_v12  ;;  %7249 = vmatprep.subr.bf16.mxu0 %v7734_v17  ;;  %v900_v62 = vor.u32 %v899_v45, %v896_v43  ;;  %v8157_v2 = vpack.c.bf16 %v421_v53, %v420_v46  ;;  %v321_v8 = vmul.f32 %v7864_v10, %v265_v24  ;;  %v400_v23 = vmax.f32 %v352_v3, 0.0  ;;  %v269_v43 = vld [vmem:[%s7877_s10 + $0x158] sm:$0xff] }
  0x45   : > { %7158 = vmatmul.mubr.bf16.gmra.mrb[8].mxu1 %v892_v33  ;;  %v322_v13 = vmul.f32 %v7864_v10, %v266_v37  ;;  %v8162_v18 = vor.u32 %v800_v52, %v797_v26  ;;  %v300_v28 = vmul.f32 %v7864_v10, %v244_v57  ;;  %v301_v46 = vmul.f32 %v7864_v10, %v245_v16 }
  0x46   : > { %v901_v20 = vsel %vm722_vm0, %v891_v25, %v900_v62  ;;  %675 = vst [vmem:[#allocation2 + $0xa0] sm:$0xff] %v8157_v2  ;;  %v10017_v24 = vshll.u32 %v8157_v2, 16  ;;  %v375_v25 = vadd.f32 %v7882_v15, %v321_v8  ;;  %v507_v33 = vpack.c.bf16 %v400_v23, %v399_v6 }
  0x47   : > { %7186 = vmatpush3.bf16.msra.mxu1 %v7733_v12  ;;  %7250 = vmatpush3.bf16.msra.mxu0 %v7734_v17  ;;  %v10018_v12 = vshrl.u32 %v8157_v2, 16  ;;  %v376_v37 = vadd.f32 %v7882_v15, %v322_v13  ;;  %v8181_v17 = vld [vmem:[%s10014_s3 + $0x100] sm:$0xff]   ;;  %v802_v45 = vsel %vm722_vm0, %v8102_v59, %v8162_v18  ;;  %v354_v53 = vadd.f32 %v7882_v15, %v300_v28 }
  0x48   : > { %7187 = vmatprep.subr.bf16.mxu1 %v7735_v14  ;;  %7161 = vmatprep.mubr.bf16.mxu1 %v901_v20  ;;  %v908_v57 = vrot.slane %v10017_v24, 4  ;;  %v423_v26 = vmax.f32 %v375_v25, 0.0  ;;  %v8193_v3 = vcombine.low %v7798_v34, %v507_v33  ;;  %v577_v8 = vunpack.c.h.b16 %v507_v33  ;;  %v272_v24 = vld [vmem:[%s7877_s10 + $0x170] sm:$0xff] }
  0x49   : > { %7251 = vmatprep.subr.bf16.mxu0 %v7736_v61  ;;  %7138 = vmatmul.mubr.bf16.gmra.mrb[12].mxu0 %v802_v45  ;;  %v905_v54 = vrot.slane %v10018_v12, 3  ;;  %v424_v52 = vmax.f32 %v376_v37, 0.0  ;;  %v355_v59 = vadd.f32 %v7882_v15, %v301_v46  ;;  %v402_v6 = vmax.f32 %v354_v53, 0.0 }
  0x4a   : > { %v324_v20 = vmul.f32 %v7864_v10, %v268_v30  ;;  %v325_v23 = vmul.f32 %v7864_v10, %v269_v43  ;;  %664 = vst [vmem:[#allocation2 + $0x48] sm:$0xff] %v8193_v3  ;;  %v10030_v28 = vshll.u32 %v8193_v3, 16  ;;  %v8204_v25 = vpack.c.b16 %v7905_v35, %v577_v8 }
  0x4b   : > { %7188 = vmatpush3.bf16.msra.mxu1 %v7735_v14  ;;  %7252 = vmatpush3.bf16.msra.mxu0 %v7736_v61  ;;  %v909_v13 = vor.u32 %v908_v57, %v905_v54  ;;  %v523_v16 = vpack.c.bf16 %v424_v52, %v423_v26  ;;  %v804_v14 = vshrl.u32 %v8193_v3, 16  ;;  %v403_v61 = vmax.f32 %v355_v59, 0.0 }
  0x4c   : > { %7301 = vmatprep.subr.bf16.mxu1 %v8170_v36  ;;  %7365 = vmatprep.subr.bf16.mxu0 %v8181_v17  ;;  %v378_v43 = vadd.f32 %v7882_v15, %v324_v20  ;;  %v809_v46 = vrot.slane %v10030_v28, 4  ;;  %665 = vst [vmem:[#allocation2 + $0x50] sm:$0xff] %v8204_v25  ;;  %v10028_v53 = vshrl.u32 %v8204_v25, 16  ;;  %v379_v20 = vadd.f32 %v7882_v15, %v325_v23 }
  0x4d   : > { %v910_v37 = vsel %vm722_vm0, %v900_v62, %v909_v13  ;;  %v8208_v45 = vcombine.low %v7798_v34, %v523_v16  ;;  %v601_v30 = vunpack.c.h.b16 %v523_v16  ;;  %v806_v33 = vrot.slane %v804_v14, 3 }
  0x4e   : > { %7162 = vmatmul.mubr.bf16.gmra.mrb[12].mxu1 %v910_v37  ;;  %v10025_v62 = vshll.u32 %v8204_v25, 16  ;;  %v8224_v52 = vpack.c.bf16 %v403_v61, %v402_v6  ;;  %v815_v59 = vrot.slane %v10028_v53, 3  ;;  %v271_v37 = vld [vmem:[%s7877_s10 + $0x168] sm:$0xff]  ;;  %v426_v63 = vmax.f32 %v378_v43, 0.0 }
  0x4f   : > { %676 = vst [vmem:[#allocation2 + $0xa8] sm:$0xff] %v8208_v45  ;;  %v10020_v54 = vshrl.u32 %v8208_v45, 16  ;;  %v10021_v57 = vshll.u32 %v8208_v45, 16  ;;  %v8222_v26 = vpack.c.b16 %v7905_v35, %v601_v30  ;;  %v810_v8 = vor.u32 %v809_v46, %v806_v33  ;;  %v1850_v33 = vld [vmem:[#allocation2] sm:$0xf0] }
  0x50   : > { %v818_v16 = vrot.slane %v10025_v62, 4  ;;  %666 = vst [vmem:[#allocation2 + $0x58] sm:$0xff] %v8224_v52  ;;  %v10029_v22 = vshrl.u32 %v8224_v52, 16  ;;  %v1897_v53 = vshll.u32 %v1850_v33, 16 }
  0x51   : > { %v914_v12 = vrot.slane %v10020_v54, 3  ;;  %v917_v30 = vrot.slane %v10021_v57, 4  ;;  %677 = vst [vmem:[#allocation2 + $0xb0] sm:$0xff] %v8222_v26  ;;  %v10026_v6 = vshrl.u32 %v8222_v26, 16  ;;  %v10027_v61 = vshll.u32 %v8222_v26, 16 }
  0x52   : > { %v811_v23 = vsel %vm722_vm0, %v8162_v18, %v810_v8  ;;  %v819_v46 = vor.u32 %v818_v16, %v815_v59  ;;  %v825_v54 = vshll.u32 %v8224_v52, 16  ;;  %v824_v18 = vrot.slane %v10029_v22, 3 }
  0x53   : > { %7141 = vmatprep.mubr.bf16.mxu0 %v811_v23  ;;  %v918_v57 = vor.u32 %v917_v30, %v914_v12  ;;  %v923_v55 = vrot.slane %v10026_v6, 3  ;;  %v926_v1 = vrot.slane %v10027_v61, 4  ;;  %v427_v16 = vmax.f32 %v379_v20, 0.0 }
  0x54   : > { %v820_v62 = vsel %vm722_vm0, %v810_v8, %v819_v46  ;;  %v827_v59 = vrot.slane %v825_v54, 4  ;;  %v327_v30 = vmul.f32 %v7864_v10, %v271_v37  ;;  %v328_v6 = vmul.f32 %v7864_v10, %v272_v24 }
  0x55   : > { %7142 = vmatmul.mubr.bf16.gmra.mrb[16].mxu0 %v820_v62  ;;  %v919_v23 = vsel %vm722_vm0, %v909_v13, %v918_v57  ;;  %v927_v12 = vor.u32 %v926_v1, %v923_v55  ;;  %v8257_v43 = vpack.c.bf16 %v427_v16, %v426_v63  ;;  %v1894_v8 = vshrl.u32 %v1850_v33, 16 }
  0x56   : > { %7165 = vmatprep.mubr.bf16.mxu1 %v919_v23  ;;  %v828_v61 = vor.u32 %v827_v59, %v824_v18  ;;  %v381_v28 = vadd.f32 %v7882_v15, %v327_v30  ;;  %v382_v20 = vadd.f32 %v7882_v15, %v328_v6  ;;  %v1908_v13 = vor.u32 %v7926_v58, %v7853_v5 }
  0x57   : > { %v928_v22 = vsel %vm722_vm0, %v918_v57, %v927_v12  ;;  %678 = vst [vmem:[#allocation2 + $0xb8] sm:$0xff] %v8257_v43  ;;  %v930_v10 = vshrl.u32 %v8257_v43, 16  ;;  %v933_v63 = vshll.u32 %v8257_v43, 16  ;;  %v1896_v62 = vrot.slane %v1894_v8, 4 }
  0x58   : > { %7166 = vmatmul.mubr.bf16.gmra.mrb[16].mxu1 %v928_v22  ;;  %v829_v1 = vsel %vm722_vm0, %v819_v46, %v828_v61  ;;  %v429_v55 = vmax.f32 %v381_v28, 0.0  ;;  %v430_v24 = vmax.f32 %v382_v20, 0.0  ;;  %v1899_v57 = vrot.slane %v1897_v53, 5 }
  0x59   : > { %7145 = vmatprep.mubr.bf16.mxu0 %v829_v1  ;;  %v838_v15 = vsel %vm722_vm0, %v828_v61, %v7960_v32  ;;  %v932_v5 = vrot.slane %v930_v10, 3  ;;  %v935_v58 = vrot.slane %v933_v63, 4  ;;  %v1916_v22 = vrot.slane %v744_v60, 5 }
  0x5a   : > { %v8276_v37 = vpack.c.bf16 %v430_v24, %v429_v55  ;;  %v1900_v6 = vor.u32 %v1899_v57, %v1896_v62  ;;  %v1922_v28 = vrot.slane %v750_v38, 4  ;;  %v1925_v32 = vrot.slane %v753_v39, 5  ;;  %v7785_v57 = vld [vmem:[#allocation2] sm:$0xff] }
  0x5b   : > { %v8280_v33 = vor.u32 %v935_v58, %v932_v5  ;;  %v1363_v46 = vrot.slane %v7916_v50, 4  ;;  %v1365_v60 = vrot.slane %v7955_v27, 4  ;;  %v1917_v38 = vor.u32 %v1916_v22, %v7992_v56  ;;  %v7740_v56 = vld [vmem:[%s10014_s3 + $0x108] sm:$0xff]  }
  0x5c   : > { %v6617_v53 = vcombine.low %v7798_v34, %v8276_v37  ;;  %v1909_v61 = vsel %vm1892_vm1, %v1900_v6, %v1908_v13  ;;  %v1926_v39 = vor.u32 %v1925_v32, %v1922_v28  ;;  %v1367_v59 = vrot.slane %v7970_v40, 4  ;;  %v7742_v28 = vld [vmem:[%s10014_s3 + $0x110] sm:$0xff]  }
  0x5d   : > { %7146 = vmatmul.mubr.bf16.gmra.mrb[20].mxu0 %v838_v15  ;;  %v937_v18 = vsel %vm722_vm0, %v927_v12, %v8280_v33  ;;  %v8295_v34 = vsel %vm1359_vm2, %v1363_v46, %v1365_v60  ;;  %v1369_v16 = vrot.slane %v8024_v31, 4  ;;  %v1931_v27 = vrot.slane %v759_v48, 4 }
  0x5e   : > { %7253 = vmatprep.mubr.bf16.mxu0 %v1909_v61  ;;  %7169 = vmatprep.mubr.bf16.mxu1 %v937_v18  ;;  %679 = vst [vmem:[#allocation2 + $0xc0] sm:$0xff] %v6617_v53  ;;  %v8302_v23 = vsel %vm1359_vm2, %v1365_v60, %v1367_v59  ;;  %v1371_v12 = vrot.slane %v8050_v0, 4  ;;  %v1918_v30 = vsel %vm1892_vm1, %v1908_v13, %v1917_v38  ;;  %v1934_v8 = vrot.slane %v762_v49, 5  ;;  %v1292_v13 = vld [vmem:[#allocation2] sm:$0xf0] }
  0x5f   : > { %v1940_v20 = vrot.slane %v768_v47, 4  ;;  %v8314_v1 = vsel %vm1359_vm2, %v1367_v59, %v1369_v16  ;;  %v1927_v48 = vsel %vm1892_vm1, %v1917_v38, %v1926_v39  ;;  %v1943_v55 = vrot.slane %v771_v51, 5 }
  0x60   : > { %v8320_v24 = vsel %vm1359_vm2, %v1369_v16, %v1371_v12  ;;  %v1373_v62 = vrot.slane %v8068_v19, 4  ;;  %v1375_v49 = vrot.slane %v8125_v21, 4  ;;  %v1361_v15 = vrot.slane %v7785_v57, 4  ;;  %v7739_v21 = vld [vmem:[%s10014_s3 + $0xc8] sm:$0xff]  }
  0x61   : > { %v1935_v31 = vor.u32 %v1934_v8, %v1931_v27  ;;  %v1377_v51 = vrot.slane %v8193_v3, 4  ;;  %v1944_v22 = vor.u32 %v1943_v55, %v1940_v20  ;;  %v1360_v32 = vrot.slane %v1292_v13, 4  ;;  %v7746_v8 = vld [vmem:[%s10014_s3 + $0x120] sm:$0xff]  }
  0x62   : > { %v8324_v40 = vsel %vm1359_vm2, %v1371_v12, %v1373_v62  ;;  %v8330_v6 = vsel %vm1359_vm2, %v1373_v62, %v1375_v49  ;;  %v1949_v53 = vrot.slane %v777_v9, 4  ;;  %v1952_v18 = vrot.slane %v780_v11, 5 }
  0x63   : > { %v1379_v38 = vrot.slane %v8204_v25, 4  ;;  %v1936_v59 = vsel %vm1892_vm1, %v1926_v39, %v1935_v31  ;;  %v1958_v16 = vrot.slane %v786_v29, 4  ;;  %v1381_v27 = vrot.slane %v8224_v52, 4  ;;  %v7744_v39 = vld [vmem:[%s10014_s3 + $0x118] sm:$0xff]  }
  0x64   : > { %v1945_v9 = vsel %vm1892_vm1, %v1935_v31, %v1944_v22  ;;  %v1362_v11 = vsel %vm1359_vm2, %v1360_v32, %v1361_v15  ;;  %v1953_v19 = vor.u32 %v1952_v18, %v1949_v53  ;;  %v1967_v20 = vrot.slane %v795_v41, 4 }
  0x65   : > { %7254 = vmatmul.mubr.bf16.vlgmr.msra.gmra.mrb[24].mxu0 %v1918_v30  ;;  %v705_v47 = vld [vmem:[#allocation2 + $0xc0] sm:$0xf]  ;;  %v1961_v30 = vrot.slane %v789_v7, 5  ;;  %v8351_v0 = vsel %vm1359_vm2, %v1377_v51, %v1379_v38  ;;  %v8360_v29 = vsel %vm1359_vm2, %v1379_v38, %v1381_v27  ;;  %v10071_v55 = vshll.u32 %v8193_v3, 16 }
  0x66   : > { %7366 = vmatpush3.bf16.msra.mxu0 %v8181_v17  ;;  %7257 = vmatprep.mubr.bf16.mxu0 %v1927_v48  ;;  %v939_v5 = vshrl.u32 %v705_v47, 16  ;;  %v942_v58 = vshll.u32 %v705_v47, 16  ;;  %v8338_v17 = vsel %vm1359_vm2, %v1375_v49, %v1377_v51  ;;  %v1970_v48 = vrot.slane %v798_v42, 5 }
  0x67   : > { %7367 = vmatprep.subr.bf16.mxu0 %v7740_v56  ;;  %v1962_v7 = vor.u32 %v1961_v30, %v1958_v16  ;;  %v1979_v62 = vrot.slane %v10071_v55, 5  ;;  %v1954_v13 = vsel %vm1892_vm1, %v1944_v22, %v1953_v19  ;;  %v1364_v49 = vsel %vm1359_vm2, %v1361_v15, %v1363_v46  ;;  %v7748_v46 = vld [vmem:[%s10014_s3 + $0x128] sm:$0xff]   ;;  %v7750_v16 = vld [vmem:[%s10014_s3 + $0x130] sm:$0xff]  }
  0x68   : > { %v941_v61 = vrot.slane %v939_v5, 3  ;;  %v944_v60 = vrot.slane %v942_v58, 4  ;;  %v1971_v41 = vor.u32 %v1970_v48, %v1967_v20  ;;  %v10072_v3 = vshrl.u32 %v8204_v25, 16  ;;  %v8398_v5 = vld [vmem:[#allocation2 + $0x60] sm:$0xff] }
  0x69   : > { %v1963_v47 = vsel %vm1892_vm1, %v1953_v19, %v1962_v7  ;;  %v10073_v57 = vshll.u32 %v8204_v25, 16  ;;  %v10074_v15 = vshrl.u32 %v8224_v52, 16  ;;  %v1997_v51 = vrot.slane %v825_v54, 5 }
  0x6a   : > { %7368 = vmatpush3.bf16.msra.mxu0 %v7740_v56  ;;  %v945_v12 = vor.u32 %v944_v60, %v941_v61  ;;  %v10075_v25 = vshrl.u32 %v8088_v44, 16  ;;  %v10076_v22 = vshll.u32 %v8088_v44, 16  ;;  %v1972_v32 = vsel %vm1892_vm1, %v1962_v7, %v1971_v41  ;;  %v8412_v60 = vld [vmem:[#allocation2 + $0x68] sm:$0xff] }
  0x6b   : > { %7369 = vmatprep.subr.bf16.mxu0 %v7742_v28  ;;  %v1988_v50 = vrot.slane %v10073_v57, 5  ;;  %v1994_v31 = vrot.slane %v10074_v15, 4  ;;  %v10077_v54 = vshrl.u32 %v8107_v4, 16  ;;  %v10078_v18 = vshll.u32 %v8107_v4, 16  ;;  %v7752_v57 = vld [vmem:[%s10014_s3 + $0x138] sm:$0xff]  }
  0x6c   : > { %v946_v56 = vsel %vm722_vm0, %v8280_v33, %v945_v12  ;;  %v1976_v33 = vrot.slane %v804_v14, 4  ;;  %v1985_v14 = vrot.slane %v10072_v3, 4  ;;  %v2057_v58 = vrot.slane %v10075_v25, 4 }
  0x6d   : > { %7258 = vmatmul.mubr.bf16.gmra.mrb[28].mxu0 %v1936_v59  ;;  %7170 = vmatmul.mubr.bf16.gmra.mrb[20].mxu1 %v946_v56  ;;  %v2066_v53 = vrot.slane %v10077_v54, 4  ;;  %v2069_v38 = vrot.slane %v10078_v18, 5  ;;  %v1397_v59 = vrot.slane %v8107_v4, 4  ;;  %v2001_v12 = vshrl.u32 %v8398_v5, 16  ;;  %v8496_v54 = vld [vmem:[%s10014_s3 + $0x180] sm:$0xff]  }
  0x6e   : > { %7261 = vmatprep.mubr.bf16.mxu0 %v1945_v9  ;;  %7189 = vmatprep.mubr.bf16.mxu1 %v1362_v11  ;;  %v8383_v42 = vor.u32 %v1979_v62, %v1976_v33  ;;  %v1989_v61 = vor.u32 %v1988_v50, %v1985_v14  ;;  %v2004_v9 = vshll.u32 %v8398_v5, 16  ;;  %v10079_v30 = vshrl.u32 %v8157_v2, 16  ;;  %v7743_v33 = vld [vmem:[%s10014_s3 + $0xd8] sm:$0xff]  }
  0x6f   : > { %7370 = vmatpush3.bf16.msra.mxu0 %v7742_v28  ;;  %v2060_v28 = vrot.slane %v10076_v22, 5  ;;  %v8428_v19 = vor.u32 %v1997_v51, %v1994_v31  ;;  %v2070_v7 = vor.u32 %v2069_v38, %v2066_v53  ;;  %v10081_v20 = vshrl.u32 %v8208_v45, 16  ;;  %v8471_v22 = vld [vmem:[#allocation2 + $0x70] sm:$0xff] }
  0x70   : > { %7371 = vmatprep.subr.bf16.mxu0 %v7744_v39  ;;  %v2075_v11 = vrot.slane %v10079_v30, 4  ;;  %v2010_v55 = vshrl.u32 %v8412_v60, 16  ;;  %v2013_v62 = vshll.u32 %v8412_v60, 16  ;;  %v10083_v3 = vshrl.u32 %v8222_v26, 16 }
  0x71   : > { %v8414_v44 = vor.u32 %v2060_v28, %v2057_v58  ;;  %v2084_v48 = vrot.slane %v10081_v20, 4  ;;  %v10084_v15 = vshll.u32 %v8222_v26, 16  ;;  %v1403_v51 = vrot.slane %v8222_v26, 4  ;;  %v7745_v26 = vld [vmem:[%s10014_s3 + $0xe0] sm:$0xff]  }
  0x72   : > { %v2093_v14 = vrot.slane %v10083_v3, 4  ;;  %v2102_v25 = vrot.slane %v930_v10, 4  ;;  %v10033_v58 = vrot.slane %v8257_v43, 4  ;;  %v1990_v10 = vsel %vm1892_vm1, %v8383_v42, %v1989_v61 }
  0x73   : > { %7372 = vmatpush3.bf16.msra.mxu0 %v7744_v39  ;;  %v10080_v39 = vshll.u32 %v8157_v2, 16  ;;  %v2096_v31 = vrot.slane %v10084_v15, 5  ;;  %v1999_v53 = vsel %vm1892_vm1, %v1989_v61, %v8428_v19  ;;  %v2012_v18 = vrot.slane %v2010_v55, 4  ;;  %v7751_v15 = vld [vmem:[%s10014_s3 + $0xf8] sm:$0xff]  }
  0x74   : > { %7373 = vmatprep.subr.bf16.mxu0 %v7746_v8  ;;  %v2019_v30 = vshrl.u32 %v8471_v22, 16  ;;  %v607_v52 = vunpack.c.h.b16 %v8276_v37  ;;  %v8613_v37 = vld [vmem:[#allocation2 + $0x28] sm:$0xff] }
  0x75   : > { %7262 = vmatmul.mubr.bf16.gmra.mrb[32].mxu0 %v1954_v13  ;;  %7190 = vmatmul.mubr.bf16.vlgmr.msra.gmra.mrb[24].mxu1 %v1364_v49  ;;  %v2078_v56 = vrot.slane %v10080_v39, 5  ;;  %v10082_v49 = vshll.u32 %v8208_v45, 16  ;;  %v2097_v28 = vor.u32 %v2096_v31, %v2093_v14  ;;  %v8511_v39 = vld [vmem:[#allocation2 + $0x78] sm:$0xff]  ;;  %v8532_v14 = vld [vmem:[#allocation2 + $0x88] sm:$0xff] }
  0x76   : > { %7265 = vmatprep.mubr.bf16.mxu0 %v1963_v47  ;;  %7302 = vmatpush3.bf16.msra.mxu1 %v8170_v36  ;;  %v7741_v36 = vld [vmem:[%s10014_s3 + $0xd0] sm:$0xff]   ;;  %v2031_v20 = vshll.u32 %v8511_v39, 16 }
  0x77   : > { %7193 = vmatprep.mubr.bf16.mxu1 %v8295_v34  ;;  %7303 = vmatprep.subr.bf16.mxu1 %v7739_v21  ;;  %v1981_v34 = vsel %vm1892_vm1, %v1971_v41, %v8383_v42  ;;  %v2079_v13 = vor.u32 %v2078_v56, %v2075_v11  ;;  %v2087_v47 = vrot.slane %v10082_v49, 5  ;;  %v1401_v41 = vrot.slane %v8208_v45, 4  ;;  %v7747_v56 = vld [vmem:[%s10014_s3 + $0xe8] sm:$0xff]   ;;  %v7749_v49 = vld [vmem:[%s10014_s3 + $0xf0] sm:$0xff]  }
  0x78   : > { %7374 = vmatpush3.bf16.msra.mxu0 %v7746_v8  ;;  %v1399_v8 = vrot.slane %v8157_v2, 4  ;;  %v8442_v2 = vsel %vm1892_vm1, %v8414_v44, %v2070_v7  ;;  %v2006_v42 = vrot.slane %v2004_v9, 5  ;;  %v2022_v11 = vshll.u32 %v8471_v22, 16 }
  0x79   : > { %7375 = vmatprep.subr.bf16.mxu0 %v7748_v46  ;;  %v8457_v50 = vsel %vm1892_vm1, %v2070_v7, %v2079_v13  ;;  %v2033_v3 = vrot.slane %v2031_v20, 5 }
  0x7a   : > { %7304 = vmatpush3.bf16.msra.mxu1 %v7739_v21  ;;  %v8447_v21 = vsel %vm1359_vm2, %v1397_v59, %v1399_v8  ;;  %v8464_v45 = vsel %vm1359_vm2, %v1399_v8, %v1401_v41  ;;  %v2028_v8 = vshrl.u32 %v8511_v39, 16 }
  0x7b   : > { %7305 = vmatprep.subr.bf16.mxu1 %v7741_v36 }
  0x7c   : > { %7376 = vmatpush3.bf16.msra.mxu0 %v7748_v46  ;;  %v2088_v46 = vor.u32 %v2087_v47, %v2084_v48  ;;  %v8528_v47 = vld [vmem:[#allocation2 + $0x80] sm:$0xff] }
  0x7d   : > { %7266 = vmatmul.mubr.bf16.gmra.mrb[36].mxu0 %v1972_v32  ;;  %7377 = vmatprep.subr.bf16.mxu0 %v7750_v16  ;;  %v8480_v32 = vsel %vm1359_vm2, %v1401_v41, %v1403_v51  ;;  %v2030_v41 = vrot.slane %v2028_v8, 4  ;;  %v2040_v31 = vshll.u32 %v8528_v47, 16 }
  0x7e   : > { %7194 = vmatmul.mubr.bf16.gmra.mrb[28].mxu1 %v8302_v23  ;;  %7269 = vmatprep.mubr.bf16.mxu0 %v1981_v34  ;;  %v2105_v23 = vrot.slane %v933_v63, 5  ;;  %v2003_v63 = vrot.slane %v2001_v12, 4  ;;  %v8491_v34 = vsel %vm1359_vm2, %v1403_v51, %v10033_v58  ;;  %v8505_v38 = vsel %vm1892_vm1, %v2088_v46, %v2097_v28 }
  0x7f   : > { %7197 = vmatprep.mubr.bf16.mxu1 %v8314_v1  ;;  %7306 = vmatpush3.bf16.msra.mxu1 %v7741_v36  ;;  %v8477_v1 = vsel %vm1892_vm1, %v2079_v13, %v2088_v46  ;;  %v2024_v13 = vrot.slane %v2022_v11, 5  ;;  %v2037_v46 = vshrl.u32 %v8528_v47, 16  ;;  %v2034_v51 = vor.u32 %v2033_v3, %v2030_v41 }
  0x80   : > { %7307 = vmatprep.subr.bf16.mxu1 %v7743_v33  ;;  %7378 = vmatpush3.bf16.msra.mxu0 %v7750_v16  ;;  %v8486_v36 = vor.u32 %v2105_v23, %v2102_v25  ;;  %v2015_v16 = vrot.slane %v2013_v62, 5  ;;  %v2007_v7 = vor.u32 %v2006_v42, %v2003_v63  ;;  %v2688_v25 = vrot.slane %v2001_v12, 7 }
  0x81   : > { %7379 = vmatprep.subr.bf16.mxu0 %v7752_v57  ;;  %v2712_v63 = vrot.slane %v2028_v8, 7 }
  0x82   : > { %v8515_v61 = vsel %vm1892_vm1, %v2097_v28, %v8486_v36  ;;  %v2016_v48 = vor.u32 %v2015_v16, %v2012_v18  ;;  %v2696_v28 = vrot.slane %v2010_v55, 7  ;;  %v8556_v12 = vor.u32 %v2688_v25, %v2004_v9 }
  0x83   : > { %7308 = vmatpush3.bf16.msra.mxu1 %v7743_v33  ;;  %v2021_v33 = vrot.slane %v2019_v30, 4  ;;  %v2720_v16 = vrot.slane %v2037_v46, 7 }
  0x84   : > { %7309 = vmatprep.subr.bf16.mxu1 %v7745_v26  ;;  %7380 = vmatpush3.bf16.msra.mxu0 %v7752_v57  ;;  %v2699_v18 = vor.u32 %v2696_v28, %v2013_v62 }
  0x85   : > { %7270 = vmatmul.mubr.bf16.gmra.mrb[40].mxu0 %v1990_v10  ;;  %7493 = vmatprep.subr.bf16.mxu0 %v8496_v54  ;;  %v2025_v57 = vor.u32 %v2024_v13, %v2021_v33  ;;  %v2039_v10 = vrot.slane %v2037_v46, 4  ;;  %v8561_v33 = vld [vmem:[#allocation2 + $0x90] sm:$0xff] }
  0x86   : > { %7198 = vmatmul.mubr.bf16.gmra.mrb[32].mxu1 %v8320_v24  ;;  %7273 = vmatprep.mubr.bf16.mxu0 %v1999_v53  ;;  %v2008_v24 = vsel %vm1892_vm1, %v8428_v19, %v2007_v7  ;;  %v2046_v19 = vshrl.u32 %v8532_v14, 16  ;;  %v2042_v53 = vrot.slane %v2040_v31, 5  ;;  %v8564_v9 = vsel %vm2600_vm3, %v2688_v25, %v2699_v18 }
  0x87   : > { %7201 = vmatprep.mubr.bf16.mxu1 %v8324_v40  ;;  %7310 = vmatpush3.bf16.msra.mxu1 %v7745_v26  ;;  %v2017_v40 = vsel %vm1892_vm1, %v2007_v7, %v2016_v48  ;;  %v2026_v23 = vsel %vm1892_vm1, %v2016_v48, %v2025_v57  ;;  %v2049_v26 = vshll.u32 %v8532_v14, 16  ;;  %v2035_v55 = vsel %vm1892_vm1, %v2025_v57, %v2034_v51 }
  0x88   : > { %7311 = vmatprep.subr.bf16.mxu1 %v7747_v56  ;;  %v2048_v42 = vrot.slane %v2046_v19, 4  ;;  %v2715_v7 = vor.u32 %v2712_v63, %v2031_v20  ;;  %v2728_v8 = vrot.slane %v2046_v19, 7  ;;  %v2043_v41 = vor.u32 %v2042_v53, %v2039_v10 }
  0x89   : > { %v2051_v48 = vrot.slane %v2049_v26, 5  ;;  %v1393_v53 = vrot.slane %v8532_v14, 4 }
  0x8a   : > { %v2044_v19 = vsel %vm1892_vm1, %v2034_v51, %v2043_v41 }
  0x8b   : > { %7312 = vmatpush3.bf16.msra.mxu1 %v7747_v56  ;;  %v2052_v57 = vor.u32 %v2051_v48, %v2048_v42  ;;  %v8611_v42 = vld [vmem:[#allocation2 + $0x20] sm:$0xff] }
  0x8c   : > { %7313 = vmatprep.subr.bf16.mxu1 %v7749_v49  ;;  %v8626_v48 = vshll.u32 %v8611_v42, 16 }
  0x8d   : > { %7274 = vmatmul.mubr.bf16.gmra.mrb[44].mxu0 %v2008_v24  ;;  %v2737_v24 = vshll.u32 %v8561_v33, 16  ;;  %v2062_v51 = vsel %vm1892_vm1, %v2052_v57, %v8414_v44  ;;  %v1874_v44 = vld [vmem:[#allocation2 + $0xc0] sm:$0x1f] }
  0x8e   : > { %7202 = vmatmul.mubr.bf16.gmra.mrb[36].mxu1 %v8330_v6  ;;  %7277 = vmatprep.mubr.bf16.mxu0 %v2017_v40  ;;  %v8552_v6 = vld [vmem:[%s10014_s3 + $0x140] sm:$0xff]   ;;  %v1383_v40 = vrot.slane %v8398_v5, 4 }
  0x8f   : > { %7205 = vmatprep.mubr.bf16.mxu1 %v8338_v17  ;;  %7314 = vmatpush3.bf16.msra.mxu1 %v7749_v49  ;;  %v2704_v17 = vrot.slane %v2019_v30, 7  ;;  %v2723_v30 = vor.u32 %v2720_v16, %v2040_v31  ;;  %v2731_v49 = vor.u32 %v2728_v8, %v2049_v26  ;;  %v1387_v26 = vrot.slane %v8471_v22, 4 }
  0x90   : > { %7315 = vmatprep.subr.bf16.mxu1 %v7751_v15  ;;  %v1384_v25 = vsel %vm1359_vm2, %v1381_v27, %v1383_v40 }
  0x91   : > { %v2707_v56 = vor.u32 %v2704_v17, %v2022_v11  ;;  %v8571_v62 = vsel %vm2600_vm3, %v2704_v17, %v2715_v7  ;;  %v2734_v11 = vshrl.u32 %v8561_v33, 16  ;;  %v8575_v20 = vsel %vm2600_vm3, %v2712_v63, %v2723_v30 }
  0x92   : > { %v8584_v46 = vsel %vm2600_vm3, %v2720_v16, %v2731_v49  ;;  %v8605_v17 = vpack.c.b16 %v7905_v35, %v607_v52  ;;  %v1391_v63 = vrot.slane %v8528_v47, 4  ;;  %v8617_v16 = vld [vmem:[#allocation2 + $0x10] sm:$0xff]  ;;  %v8623_v7 = vshrl.u32 %v8611_v42, 16 }
  0x93   : > { %7316 = vmatpush3.bf16.msra.mxu1 %v7751_v15  ;;  %v8568_v13 = vsel %vm2600_vm3, %v2696_v28, %v2707_v56  ;;  %v8579_v3 = vrot.slane %v2734_v11, 7  ;;  %v1385_v15 = vrot.slane %v8412_v60, 4  ;;  %v1389_v28 = vrot.slane %v8511_v39, 4  ;;  %v8620_v56 = vld [vmem:[#allocation2 + $0x18] sm:$0xff] }
  0x94   : > { %7429 = vmatprep.subr.bf16.mxu1 %v8552_v6  ;;  %10085 = vst [vmem:[#allocation4_spill] sm:$0xff] %v8605_v17  ;;  %680 = vst [vmem:[#allocation2 + $0xc8] sm:$0xff] %v8605_v17  ;;  %v1394_v35 = vsel %vm1359_vm2, %v1391_v63, %v1393_v53  ;;  %v2112_v30 = vshll.u32 %v1874_v44, 16  ;;  %v10031_v11 = vshll.u32 %v8620_v56, 16  ;;  %v8632_v49 = vshrl.u32 %v8613_v37, 16 }
  0x95   : > { %7278 = vmatmul.mubr.bf16.gmra.mrb[48].mxu0 %v2026_v23  ;;  %v2739_v31 = vor.u32 %v2737_v24, %v8579_v3  ;;  %v1386_v23 = vsel %vm1359_vm2, %v1383_v40, %v1385_v15  ;;  %v1388_v10 = vsel %vm1359_vm2, %v1385_v15, %v1387_v26  ;;  %v1390_v27 = vsel %vm1359_vm2, %v1387_v26, %v1389_v28 }
  0x96   : > { %7206 = vmatmul.mubr.bf16.gmra.mrb[40].mxu1 %v8351_v0  ;;  %7281 = vmatprep.mubr.bf16.mxu0 %v2035_v55  ;;  %v1392_v18 = vsel %vm1359_vm2, %v1389_v28, %v1391_v63  ;;  %v2109_v55 = vshrl.u32 %v1874_v44, 16  ;;  %v10035_v24 = vshrl.u32 %v8617_v16, 16  ;;  %v4429_v40 = vrot.slane %v8623_v7, 3  ;;  %v8658_v63 = vld [vmem:[#allocation2 + $0x38] sm:$0xff] }
  0x97   : > { %7209 = vmatprep.mubr.bf16.mxu1 %v8360_v29  ;;  %v8590_v0 = vsel %vm2600_vm3, %v2728_v8, %v2739_v31  ;;  %v2053_v29 = vsel %vm1892_vm1, %v2043_v41, %v2052_v57  ;;  %v10034_v8 = vshll.u32 %v8617_v16, 16  ;;  %v8637_v41 = vshll.u32 %v8613_v37, 16 }
  0x98   : > { %v10032_v57 = vshrl.u32 %v8620_v56, 16  ;;  %v3749_v31 = vrot.slane %v10031_v11, 1  ;;  %v3757_v26 = vrot.slane %v8626_v48, 1  ;;  %v2111_v28 = vrot.slane %v2109_v55, 4  ;;  %v8708_v11 = vld [vmem:[#allocation2 + $0x48] sm:$0xff] }
  0x99   : > { %v3744_v15 = vrot.slane %v10034_v8, 1  ;;  %v8682_v4 = vshrl.u32 %v8658_v63, 16 }
  0x9d   : > { %7282 = vmatmul.mubr.bf16.gmra.mrb[52].mxu0 %v2044_v19 }
  0x9e   : > { %7210 = vmatmul.mubr.bf16.gmra.mrb[44].mxu1 %v1384_v25  ;;  %7285 = vmatprep.mubr.bf16.mxu0 %v2053_v29  ;;  %v4441_v25 = vrot.slane %v8637_v41, 4  ;;  %v3745_v29 = vor.u32 %v3744_v15, %v10035_v24  ;;  %v3765_v15 = vrot.slane %v8637_v41, 1 }
  0x9f   : > { %7213 = vmatprep.mubr.bf16.mxu1 %v1386_v23  ;;  %v3753_v23 = vor.u32 %v3749_v31, %v10032_v57  ;;  %v8734_v57 = vld [vmem:[#allocation2 + $0x50] sm:$0xff] }
  0xa0   : > { %v8661_v44 = vsel %vm3738_vm4, %v3745_v29, %v3749_v31  ;;  %v4456_v31 = vrot.slane %v8682_v4, 3 }
  0xa1   : > { %10087 = vst [vmem:[#allocation6_spill] sm:$0xff] %v8661_v44  ;;  %v7756_v44 = vld [vmem:[%s10014_s3 + $0x188] sm:$0xff]  }
  0xa5   : > { %7286 = vmatmul.mubr.bf16.gmra.mrb[56].mxu0 %v2062_v51  ;;  %v2114_v51 = vrot.slane %v2112_v30, 5 }
  0xa6   : > { %7214 = vmatmul.mubr.bf16.gmra.mrb[48].mxu1 %v1388_v10  ;;  %7289 = vmatprep.mubr.bf16.mxu0 %v8442_v2  ;;  %v1395_v2 = vrot.slane %v8561_v33, 4  ;;  %v8655_v10 = vld [vmem:[#allocation2 + $0x30] sm:$0xff] }
  0xa7   : > { %7217 = vmatprep.mubr.bf16.mxu1 %v1390_v27  ;;  %v8678_v30 = vshll.u32 %v8655_v10, 16 }
  0xa8   : > { %v1396_v27 = vsel %vm1359_vm2, %v1393_v53, %v1395_v2  ;;  %v8675_v53 = vshrl.u32 %v8655_v10, 16 }
  0xad   : > { %7290 = vmatmul.mubr.bf16.gmra.mrb[60].mxu0 %v8457_v50  ;;  %v4432_v50 = vrot.slane %v8626_v48, 4 }
  0xae   : > { %7218 = vmatmul.mubr.bf16.gmra.mrb[52].mxu1 %v1392_v18  ;;  %7293 = vmatprep.mubr.bf16.mxu0 %v8477_v1  ;;  %v4438_v1 = vrot.slane %v8632_v49, 3  ;;  %v8664_v18 = vsel %vm3738_vm4, %v3753_v23, %v3757_v26  ;;  %v3769_v23 = vor.u32 %v3765_v15, %v8632_v49 }
  0xaf   : > { %7221 = vmatprep.mubr.bf16.mxu1 %v1394_v35  ;;  %v8647_v19 = vor.u32 %v4432_v50, %v4429_v40  ;;  %10088 = vst [vmem:[#allocation7_spill] sm:$0xff] %v8664_v18  ;;  %v1398_v35 = vsel %vm1359_vm2, %v1395_v2, %v1397_v59  ;;  %v2115_v40 = vor.u32 %v2114_v51, %v2111_v28  ;;  %v8685_v59 = vshll.u32 %v8658_v63, 16 }
  0xb0   : > { %v4442_v52 = vor.u32 %v4441_v25, %v4438_v1  ;;  %v4447_v2 = vrot.slane %v8675_v53, 3  ;;  %v3761_v50 = vor.u32 %v3757_v26, %v8623_v7  ;;  %v3773_v1 = vrot.slane %v8678_v30, 1 }
  0xb1   : > { %10086 = vst [vmem:[#allocation5_spill] sm:$0xff] %v8647_v19  ;;  %v2116_v28 = vsel %vm1892_vm1, %v8486_v36, %v2115_v40 }
  0xb2   : > { %v8671_v55 = vsel %vm722_vm0, %v8647_v19, %v4442_v52  ;;  %v8695_v29 = vsel %vm3738_vm4, %v3761_v50, %v3765_v15  ;;  %v2558_v15 = vld [vmem:[#allocation2 + $0x8] sm:$0x80] }
  0xb3   : > { %10089 = vst [vmem:[#allocation8_spill] sm:$0xff] %v8671_v55  ;;  %10090 = vst [vmem:[#allocation9_spill] sm:$0xff] %v8695_v29  ;;  %v10094_v29 = vshrl.u32 %v8617_v16, 16 }
  0xb5   : > { %7294 = vmatmul.mubr.bf16.gmra.mrb[64].mxu0 %v8505_v38  ;;  %v4450_v38 = vrot.slane %v8678_v30, 4  ;;  %v2608_v18 = vrot.slane %v10094_v29, 7 }
  0xb6   : > { %7222 = vmatmul.mubr.bf16.gmra.mrb[56].mxu1 %v1396_v27  ;;  %7297 = vmatprep.mubr.bf16.mxu0 %v8515_v61  ;;  %v4459_v61 = vrot.slane %v8685_v59, 4  ;;  %v8700_v27 = vld [vmem:[#allocation2 + $0x40] sm:$0xff] }
  0xb7   : > { %7225 = vmatprep.mubr.bf16.mxu1 %v1398_v35  ;;  %v4451_v25 = vor.u32 %v4450_v38, %v4447_v2  ;;  %v8706_v35 = vsel %vm3738_vm4, %v3769_v23, %v3773_v1  ;;  %v8716_v36 = vshrl.u32 %v8700_v27, 16  ;;  %v8719_v40 = vshll.u32 %v8700_v27, 16 }
  0xb8   : > { %v4460_v51 = vor.u32 %v4459_v61, %v4456_v31  ;;  %10092 = vst [vmem:[#allocation11_spill] sm:$0xff] %v8706_v35  ;;  %v8726_v38 = vshll.u32 %v8708_v11, 16  ;;  %v3781_v31 = vrot.slane %v8685_v59, 1  ;;  %v2602_v35 = vshrl.u32 %v2558_v15, 16 }
  0xb9   : > { %v8703_v26 = vsel %vm722_vm0, %v4442_v52, %v4451_v25  ;;  %v8723_v52 = vshrl.u32 %v8708_v11, 16  ;;  %v4465_v50 = vrot.slane %v8716_v36, 3  ;;  %v3789_v24 = vrot.slane %v8719_v40, 1 }
  0xba   : > { %10091 = vst [vmem:[#allocation10_spill] sm:$0xff] %v8703_v26  ;;  %v8711_v2 = vsel %vm722_vm0, %v4451_v25, %v4460_v51  ;;  %v4477_v25 = vrot.slane %v8726_v38, 4  ;;  %v3785_v8 = vor.u32 %v3781_v31, %v8682_v4 }
  0xbb   : > { %10093 = vst [vmem:[#allocation12_spill] sm:$0xff] %v8711_v2  ;;  %v4474_v61 = vrot.slane %v8723_v52, 3  ;;  %v8743_v2 = vld [vmem:[#allocation2 + $0x58] sm:$0xff] }
  0xbc   : > { %v8756_v15 = vsel %vm3738_vm4, %v3785_v8, %v3789_v24  ;;  %v7758_v8 = vld [vmem:[%s10014_s3 + $0x190] sm:$0xff]  }
  0xbd   : > { %7298 = vmatmul.mubr.bf16.gmra.mrb[68].mxu0 %v2116_v28  ;;  %v1316_v28 = vld [vmem:[#allocation2 + $0xc0] sm:$0xf]  ;;  %v4478_v58 = vor.u32 %v4477_v25, %v4474_v61  ;;  %10098 = vst [vmem:[#allocation16_spill] sm:$0xff] %v8756_v15  ;;  %v8761_v61 = vshrl.u32 %v8734_v57, 16  ;;  %v10099_v25 = vshll.u32 %v8617_v16, 16 }
  0xbe   : > { %7226 = vmatmul.mubr.bf16.gmra.mrb[60].mxu1 %v8447_v21  ;;  %7381 = vmatprep.mubr.bf16.mxu0 %v8617_v16  ;;  %v4468_v21 = vrot.slane %v8719_v40, 4  ;;  %v1407_v29 = vrot.slane %v1316_v28, 4  ;;  %v3793_v16 = vor.u32 %v3789_v24, %v8716_v36 }
  0xbf   : > { %7229 = vmatprep.mubr.bf16.mxu1 %v8464_v45  ;;  %v3777_v45 = vor.u32 %v3773_v1, %v8675_v53 }
  0xc0   : > { %v4469_v23 = vor.u32 %v4468_v21, %v4465_v50 }
  0xc1   : > { %v8749_v50 = vsel %vm3738_vm4, %v3777_v45, %v3781_v31  ;;  %v8772_v31 = vshrl.u32 %v8743_v2, 16  ;;  %v4483_v45 = vrot.slane %v8761_v61, 3 }
  0xc2   : > { %v8746_v1 = vsel %vm722_vm0, %v4460_v51, %v4469_v23  ;;  %10096 = vst [vmem:[#allocation14_spill] sm:$0xff] %v8749_v50  ;;  %v8753_v21 = vsel %vm722_vm0, %v4469_v23, %v4478_v58  ;;  %v8764_v51 = vshll.u32 %v8734_v57, 16  ;;  %v2611_v23 = vor.u32 %v10099_v25, %v2608_v18 }
  0xc3   : > { %10095 = vst [vmem:[#allocation13_spill] sm:$0xff] %v8746_v1  ;;  %10097 = vst [vmem:[#allocation15_spill] sm:$0xff] %v8753_v21  ;;  %v4492_v28 = vrot.slane %v8772_v31, 3  ;;  %v10100_v50 = vrot.slane %v8257_v43, 4  ;;  %v10101_v25 = vshrl.u32 %v8620_v56, 16  ;;  %v2624_v43 = vrot.slane %v8623_v7, 7 }
  0xc4   : > { %v3805_v17 = vrot.slane %v8764_v51, 1  ;;  %v10102_v7 = vshll.u32 %v8620_v56, 16 }
  0xc5   : > { %7382 = vmatmul.mubr.bf16.vlgmr.msra.gmra.mrb[72].mxu0 %v8620_v56  ;;  %v1408_v21 = vsel %vm1359_vm2, %v10100_v50, %v1407_v29  ;;  %v2616_v1 = vrot.slane %v10101_v25, 7 }
  0xc6   : > { %7230 = vmatmul.mubr.bf16.gmra.mrb[64].mxu1 %v8480_v32  ;;  %7494 = vmatpush3.bf16.msra.mxu0 %v8496_v54  ;;  %v8775_v32 = vshll.u32 %v8743_v2, 16  ;;  %v2604_v54 = vrot.slane %v2602_v35, 7 }
  0xc7   : > { %7233 = vmatprep.mubr.bf16.mxu1 %v8491_v34  ;;  %7385 = vmatprep.mubr.bf16.mxu0 %v8611_v42  ;;  %v4486_v34 = vrot.slane %v8764_v51, 4  ;;  %v3797_v42 = vrot.slane %v8726_v38, 1 }
  0xc8   : > { %7495 = vmatprep.subr.bf16.mxu0 %v7756_v44  ;;  %v4495_v15 = vrot.slane %v8775_v32, 4  ;;  %v2612_v19 = vsel %vm2600_vm3, %v2604_v54, %v2611_v23  ;;  %v2627_v54 = vor.u32 %v8626_v48, %v2624_v43  ;;  %v10053_v23 = vrot.slane %v8775_v32, 1  ;;  %v7755_v48 = vld [vmem:[%s10014_s3 + $0x148] sm:$0xff]  }
  0xc9   : > { %v4487_v35 = vor.u32 %v4486_v34, %v4483_v45  ;;  %v3801_v55 = vor.u32 %v3797_v42, %v8723_v52  ;;  %v8803_v50 = vsel %vm3738_vm4, %v3793_v16, %v3797_v42  ;;  %v7768_v45 = vld [vmem:[%s10014_s3 + $0x1b8] sm:$0xff]   ;;  %v7761_v34 = vld [vmem:[%s10014_s3 + $0x160] sm:$0xff]   ;;  %v2664_v42 = vrot.slane %v8723_v52, 7 }
  0xca   : > { %7496 = vmatpush3.bf16.msra.mxu0 %v7756_v44  ;;  %v8790_v26 = vor.u32 %v4495_v15, %v4492_v28  ;;  %v7760_v44 = vld [vmem:[%s10014_s3 + $0x198] sm:$0xff]   ;;  %v2628_v56 = vsel %vm2600_vm3, %v2616_v1, %v2627_v54  ;;  %v7763_v28 = vld [vmem:[%s10014_s3 + $0x168] sm:$0xff]  }
  0xcb   : > { %7497 = vmatprep.subr.bf16.mxu0 %v7758_v8  ;;  %v8800_v24 = vsel %vm722_vm0, %v4478_v58, %v4487_v35  ;;  %v8811_v29 = vsel %vm3738_vm4, %v3801_v55, %v3805_v17  ;;  %v2619_v58 = vor.u32 %v10102_v7, %v2616_v1  ;;  %v3809_v55 = vor.u32 %v3805_v17, %v8761_v61  ;;  %v7764_v17 = vld [vmem:[%s10014_s3 + $0x1a8] sm:$0xff]  }
  0xcc   : > { %v8808_v15 = vsel %vm722_vm0, %v4487_v35, %v8790_v26  ;;  %v2656_v1 = vrot.slane %v8716_v36, 7  ;;  %v2667_v52 = vor.u32 %v8726_v38, %v2664_v42 }
  0xcd   : > { %7386 = vmatmul.mubr.bf16.gmra.mrb[76].mxu0 %v8613_v37  ;;  %v7762_v37 = vld [vmem:[%s10014_s3 + $0x1a0] sm:$0xff]  }
  0xce   : > { %7234 = vmatmul.mubr.bf16.gmra.mrb[68].mxu1 %v1408_v21  ;;  %7389 = vmatprep.mubr.bf16.mxu0 %v8655_v10  ;;  %v2620_v21 = vsel %vm2600_vm3, %v2608_v18, %v2619_v58  ;;  %v2632_v10 = vrot.slane %v8632_v49, 7  ;;  %v2659_v36 = vor.u32 %v8719_v40, %v2656_v1  ;;  %v2672_v40 = vrot.slane %v8761_v61, 7  ;;  %v7765_v61 = vld [vmem:[%s10014_s3 + $0x170] sm:$0xff]  }
  0xcf   : > { %7317 = vmatprep.mubr.bf16.mxu1 %v2612_v19  ;;  %7498 = vmatpush3.bf16.msra.mxu0 %v7758_v8  ;;  %v2640_v19 = vrot.slane %v8675_v53, 7  ;;  %v8832_v8 = vsel %vm3738_vm4, %v3809_v55, %v10053_v23  ;;  %v7757_v53 = vld [vmem:[%s10014_s3 + $0x150] sm:$0xff]   ;;  %v2668_v16 = vsel %vm2600_vm3, %v2656_v1, %v2667_v52  ;;  %v4388_v23 = vld [vmem:[#allocation2 + $0x78] sm:$0xff] }
  0xd0   : > { %7499 = vmatprep.subr.bf16.mxu0 %v7760_v44  ;;  %v2635_v49 = vor.u32 %v8637_v41, %v2632_v10  ;;  %v2675_v35 = vor.u32 %v8764_v51, %v2672_v40  ;;  %v8897_v51 = vld [vmem:[%s10014_s3 + $0x1c0] sm:$0xff]  }
  0xd1   : > { %v2643_v18 = vor.u32 %v8678_v30, %v2640_v19  ;;  %v7759_v30 = vld [vmem:[%s10014_s3 + $0x158] sm:$0xff]  }
  0xd2   : > { %v2676_v25 = vsel %vm2600_vm3, %v2664_v42, %v2675_v35 }
  0xd3   : > { %7500 = vmatpush3.bf16.msra.mxu0 %v7760_v44  ;;  %v2644_v41 = vsel %vm2600_vm3, %v2632_v10, %v2643_v18  ;;  %v8949_v18 = vld [vmem:[#allocation2 + $0xa8] sm:$0xff] }
  0xd4   : > { %7501 = vmatprep.subr.bf16.mxu0 %v7762_v37 }
  0xd5   : > { %7390 = vmatmul.mubr.bf16.gmra.mrb[80].mxu0 %v8658_v63  ;;  %v7766_v63 = vld [vmem:[%s10014_s3 + $0x1b0] sm:$0xff]  }
  0xd6   : > { %7318 = vmatmul.mubr.bf16.vlgmr.msra.gmra.mrb[72].mxu1 %v2620_v21  ;;  %7393 = vmatprep.mubr.bf16.mxu0 %v8700_v27  ;;  %v2636_v27 = vsel %vm2600_vm3, %v2624_v43, %v2635_v49 }
  0xd7   : > { %7430 = vmatpush3.bf16.msra.mxu1 %v8552_v6  ;;  %7321 = vmatprep.mubr.bf16.mxu1 %v2628_v56  ;;  %v2648_v6 = vrot.slane %v8682_v4, 7 }
  0xd8   : > { %7431 = vmatprep.subr.bf16.mxu1 %v7755_v48  ;;  %7502 = vmatpush3.bf16.msra.mxu0 %v7762_v37 }
  0xd9   : > { %7503 = vmatprep.subr.bf16.mxu0 %v7764_v17  ;;  %v2651_v4 = vor.u32 %v8685_v59, %v2648_v6  ;;  %v2660_v59 = vsel %vm2600_vm3, %v2648_v6, %v2659_v36 }
  0xdb   : > { %7432 = vmatpush3.bf16.msra.mxu1 %v7755_v48 }
  0xdc   : > { %7433 = vmatprep.subr.bf16.mxu1 %v7757_v53  ;;  %7504 = vmatpush3.bf16.msra.mxu0 %v7764_v17 }
  0xdd   : > { %7394 = vmatmul.mubr.bf16.gmra.mrb[84].mxu0 %v8708_v11  ;;  %7505 = vmatprep.subr.bf16.mxu0 %v7766_v63  ;;  %v8868_v11 = vld [vmem:[%s10014_s3 + $0x200] sm:$0xff]  }
  0xde   : > { %7322 = vmatmul.mubr.bf16.gmra.mrb[76].mxu1 %v2636_v27  ;;  %7397 = vmatprep.mubr.bf16.mxu0 %v8734_v57  ;;  %v2652_v57 = vsel %vm2600_vm3, %v2640_v19, %v2651_v4  ;;  %v8952_v27 = vld [vmem:[#allocation2 + $0xb0] sm:$0xff] }
  0xdf   : > { %7325 = vmatprep.mubr.bf16.mxu1 %v2644_v41  ;;  %7434 = vmatpush3.bf16.msra.mxu1 %v7757_v53  ;;  %v10046_v41 = vshrl.u32 %v8949_v18, 16  ;;  %v10044_v4 = vshrl.u32 %v8952_v27, 16 }
  0xe0   : > { %7435 = vmatprep.subr.bf16.mxu1 %v7759_v30  ;;  %7506 = vmatpush3.bf16.msra.mxu0 %v7766_v63  ;;  %v4376_v63 = vld [vmem:[#allocation2 + $0x18] sm:$0xf8] }
  0xe1   : > { %7507 = vmatprep.subr.bf16.mxu0 %v7768_v45  ;;  %v4419_v1 = vshrl.u32 %v4376_v63, 16  ;;  %v2760_v42 = vrot.slane %v10046_v41, 7  ;;  %v2768_v35 = vrot.slane %v10044_v4, 7  ;;  %v9071_v4 = vld [vmem:[#allocation2 + $0x70] sm:$0xff] }
  0xe3   : > { %7436 = vmatpush3.bf16.msra.mxu1 %v7759_v30  ;;  %v4422_v30 = vshll.u32 %v4376_v63, 16 }
  0xe4   : > { %7437 = vmatprep.subr.bf16.mxu1 %v7761_v34  ;;  %7508 = vmatpush3.bf16.msra.mxu0 %v7768_v45 }
  0xe5   : > { %7398 = vmatmul.mubr.bf16.gmra.mrb[88].mxu0 %v8743_v2  ;;  %7621 = vmatprep.subr.bf16.mxu0 %v8868_v11  ;;  %v2680_v2 = vrot.slane %v8772_v31, 7 }
  0xe6   : > { %7326 = vmatmul.mubr.bf16.gmra.mrb[80].mxu1 %v2652_v57  ;;  %7401 = vmatprep.mubr.bf16.mxu0 %v8398_v5  ;;  %v7767_v5 = vld [vmem:[%s10014_s3 + $0x178] sm:$0xff]  }
  0xe7   : > { %7329 = vmatprep.mubr.bf16.mxu1 %v2660_v59  ;;  %7438 = vmatpush3.bf16.msra.mxu1 %v7761_v34  ;;  %v2683_v38 = vor.u32 %v8775_v32, %v2680_v2  ;;  %v2692_v44 = vsel %vm2600_vm3, %v2680_v2, %v8556_v12  ;;  %v8979_v2 = vld [vmem:[#allocation2 + $0xc0] sm:$0xff] }
  0xe8   : > { %7439 = vmatprep.subr.bf16.mxu1 %v7763_v28 }
  0xe9   : > { %v2684_v43 = vsel %vm2600_vm3, %v2672_v40, %v2683_v38  ;;  %v4421_v40 = vrot.slane %v4419_v1, 3 }
  0xeb   : > { %7440 = vmatpush3.bf16.msra.mxu1 %v7763_v28  ;;  %v4424_v28 = vrot.slane %v4422_v30, 4 }
  0xec   : > { %7441 = vmatprep.subr.bf16.mxu1 %v7765_v61 }
  0xed   : > { %7402 = vmatmul.mubr.bf16.gmra.mrb[92].mxu0 %v8412_v60  ;;  %v4425_v38 = vor.u32 %v4424_v28, %v4421_v40 }
  0xee   : > { %7330 = vmatmul.mubr.bf16.gmra.mrb[84].mxu1 %v2668_v16  ;;  %7405 = vmatprep.mubr.bf16.mxu0 %v8471_v22  ;;  %v8976_v16 = vld [vmem:[#allocation2 + $0xb8] sm:$0xff] }
  0xef   : > { %7333 = vmatprep.mubr.bf16.mxu1 %v2676_v25  ;;  %7442 = vmatpush3.bf16.msra.mxu1 %v7765_v61  ;;  %v10043_v61 = vshll.u32 %v8952_v27, 16  ;;  %v10042_v25 = vshrl.u32 %v8976_v16, 16  ;;  %v10041_v63 = vshll.u32 %v8976_v16, 16 }
  0xf0   : > { %7443 = vmatprep.subr.bf16.mxu1 %v7767_v5 }
  0xf3   : > { %7444 = vmatpush3.bf16.msra.mxu1 %v7767_v5 }
  0xf4   : > { %7557 = vmatprep.subr.bf16.mxu1 %v8897_v51 }
  0xf5   : > { %7406 = vmatmul.mubr.bf16.gmra.mrb[96].mxu0 %v8511_v39 }
  0xf6   : > { %7334 = vmatmul.mubr.bf16.gmra.mrb[88].mxu1 %v2684_v43  ;;  %7409 = vmatprep.mubr.bf16.mxu0 %v8528_v47  ;;  %v2771_v43 = vor.u32 %v10043_v61, %v2768_v35 }
  0xf7   : > { %7337 = vmatprep.mubr.bf16.mxu1 %v2692_v44 }
  0xf8   : > { %v2772_v30 = vsel %vm2600_vm3, %v2760_v42, %v2771_v43 }
  0xfd   : > { %7410 = vmatmul.mubr.bf16.gmra.mrb[100].mxu0 %v8532_v14  ;;  %v8921_v14 = vld [vmem:[#allocation2 + $0x98] sm:$0xff] }
  0xfe   : > { %7338 = vmatmul.mubr.bf16.gmra.mrb[92].mxu1 %v8564_v9  ;;  %7413 = vmatprep.mubr.bf16.mxu0 %v8561_v33  ;;  %v8924_v33 = vld [vmem:[#allocation2 + $0xa0] sm:$0xff]  ;;  %v10049_v19 = vshll.u32 %v8921_v14, 16 }
  0xff   : > { %7341 = vmatprep.mubr.bf16.mxu1 %v8568_v13  ;;  %v10050_v13 = vshrl.u32 %v8921_v14, 16  ;;  %v10048_v55 = vshrl.u32 %v8924_v33, 16  ;;  %v10047_v49 = vshll.u32 %v8924_v33, 16 }
 0x101   : > { %v7127_v60 = vpop.f32.mrb[0].mxu0  ;;  %v7151_v22 = vpop.f32.mrb[0].mxu1 }
 0x102   : > { %v8909_v7 = vpop.f32.mrb[1].mxu0  ;;  %v8911_v12 = vpop.f32.mrb[1].mxu1  ;;  %v10039_v60 = vshrl.u32 %v8979_v2, 16 }
 0x103   : > { %v8913_v58 = vpop.f32.mrb[2].mxu0  ;;  %v8915_v39 = vpop.f32.mrb[2].mxu1 }
 0x104   : > { %10103 = vst [vmem:[#allocation17_spill] sm:$0xff] %v8915_v39  ;;  %v8917_v47 = vpop.f32.mrb[3].mxu0  ;;  %v8919_v54 = vpop.f32.mrb[3].mxu1 }
 0x105   : > { %10104 = vst [vmem:[#allocation18_spill] sm:$0xff] %v8919_v54  ;;  %7414 = vmatmul.mubr.bf16.gmra.mrb[104].mxu0 %v8921_v14 }
 0x106   : > { %7342 = vmatmul.mubr.bf16.gmra.mrb[96].mxu1 %v8571_v62  ;;  %7417 = vmatprep.mubr.bf16.mxu0 %v8924_v33  ;;  %v2744_v62 = vrot.slane %v10050_v13, 7 }
 0x107   : > { %7345 = vmatprep.mubr.bf16.mxu1 %v8575_v20  ;;  %v2752_v20 = vrot.slane %v10048_v55, 7 }
 0x108   : > { %v2747_v6 = vor.u32 %v10049_v19, %v2744_v62  ;;  %v10055_v19 = vshrl.u32 %v9071_v4, 16 }
 0x109   : > { %v8928_v9 = vpop.f32.mrb[4].mxu0  ;;  %v8937_v10 = vpop.f32.mrb[4].mxu1  ;;  %v2755_v45 = vor.u32 %v10047_v49, %v2752_v20  ;;  %v10125_v49 = vld [vmem:[#allocation9_spill] sm:$0xff] }
 0x10a   : > { %v8932_v37 = vpop.f32.mrb[5].mxu0  ;;  %10105 = vst [vmem:[#allocation19_spill] sm:$0xff] %v8937_v10  ;;  %v8939_v48 = vpop.f32.mrb[5].mxu1 }
 0x10b   : > { %v8935_v21 = vpop.f32.mrb[6].mxu0  ;;  %10106 = vst [vmem:[#allocation20_spill] sm:$0xff] %v8939_v48  ;;  %v8944_v17 = vpop.f32.mrb[6].mxu1  ;;  %v2756_v52 = vsel %vm2600_vm3, %v2744_v62, %v2755_v45  ;;  %v2784_v45 = vrot.slane %v10039_v60, 7  ;;  %v10115_v60 = vld [vmem:[#allocation8_spill] sm:$0xff] }
 0x10c   : > { %v1072_v56 = vpop.f32.mrb[7].mxu0  ;;  %10107 = vst [vmem:[#allocation21_spill] sm:$0xff] %v8944_v17  ;;  %v1168_v53 = vpop.f32.mrb[7].mxu1 }
 0x10d   : > { %7418 = vmatmul.mubr.bf16.gmra.mrb[108].mxu0 %v8949_v18  ;;  %v2776_v53 = vrot.slane %v10042_v25, 7  ;;  %v7778_v25 = vld [vmem:[%s10014_s3 + $0x220] sm:$0xff]  }
 0x10e   : > { %7346 = vmatmul.mubr.bf16.gmra.mrb[100].mxu1 %v8584_v46  ;;  %7421 = vmatprep.mubr.bf16.mxu0 %v8952_v27  ;;  %v10045_v46 = vshll.u32 %v8949_v18, 16 }
 0x10f   : > { %7349 = vmatprep.mubr.bf16.mxu1 %v8590_v0  ;;  %v2748_v0 = vsel %vm2600_vm3, %v8579_v3, %v2747_v6  ;;  %v10110_v6 = vld [vmem:[#allocation5_spill] sm:$0xff]  ;;  %v2779_v28 = vor.u32 %v10041_v63, %v2776_v53 }
 0x110   : > { %v2763_v3 = vor.u32 %v10045_v46, %v2760_v42  ;;  %v4434_v1 = vsel %vm722_vm0, %v4425_v38, %v10110_v6  ;;  %v10124_v46 = vld [vmem:[#allocation7_spill] sm:$0xff] }
 0x111   : > { %v8963_v36 = vpop.f32.mrb[8].mxu0 }
 0x112   : > { %v1085_v34 = vpop.f32.mrb[9].mxu0  ;;  %v2764_v62 = vsel %vm2600_vm3, %v2752_v20, %v2763_v3 }
 0x113   : > { %v7136_v57 = vpop.f32.mrb[10].mxu0  ;;  %v10040_v34 = vshll.u32 %v8979_v2, 16 }
 0x114   : > { %v8970_v59 = vpop.f32.mrb[11].mxu0 }
 0x115   : > { %7422 = vmatmul.mubr.bf16.gmra.mrb[112].mxu0 %v8976_v16  ;;  %v2787_v3 = vor.u32 %v10040_v34, %v2784_v45  ;;  %v10121_v34 = vld [vmem:[#allocation13_spill] sm:$0xff] }
 0x116   : > { %7350 = vmatmul.mubr.bf16.gmra.mrb[104].mxu1 %v2748_v0  ;;  %7425 = vmatprep.mubr.bf16.mxu0 %v8979_v2  ;;  %v10111_v0 = vld [vmem:[#allocation4_spill] sm:$0xff] }
 0x117   : > { %7353 = vmatprep.mubr.bf16.mxu1 %v2756_v52  ;;  %v2790_v42 = vshrl.u32 %v10111_v0, 16 }
 0x118   : > { %v8985_v5 = vpop.f32.mrb[8].mxu1 }
 0x119   : > { %10108 = vst [vmem:[#allocation22_spill] sm:$0xff] %v8985_v5  ;;  %v1181_v44 = vpop.f32.mrb[9].mxu1 }
 0x11a   : > { %v7160_v22 = vpop.f32.mrb[10].mxu1  ;;  %v2780_v44 = vsel %vm2600_vm3, %v2768_v35, %v2779_v28  ;;  %v10116_v28 = vld [vmem:[#allocation10_spill] sm:$0xff] }
 0x11b   : > { %v8990_v56 = vpop.f32.mrb[11].mxu1  ;;  %v2792_v22 = vrot.slane %v2790_v42, 7 }
 0x11c   : > { %10109 = vst [vmem:[#allocation23_spill] sm:$0xff] %v8990_v56  ;;  %v7139_v57 = vpop.f32.mrb[12].mxu0 }
 0x11d   : > { %7426 = vmatmul.mubr.bf16.gmra.mrb[116].mxu0 %v10111_v0  ;;  %v9003_v40 = vpop.f32.mrb[13].mxu0  ;;  %v7772_v57 = vld [vmem:[%s10014_s3 + $0x208] sm:$0xff]  }
 0x11e   : > { %7354 = vmatmul.mubr.bf16.gmra.mrb[108].mxu1 %v2764_v62  ;;  %v9005_v20 = vpop.f32.mrb[14].mxu0  ;;  %7509 = vmatprep.mubr.bf16.mxu0 %v4434_v1  ;;  %v2793_v62 = vshll.u32 %v10111_v0, 16  ;;  %v2788_v1 = vsel %vm2600_vm3, %v2776_v53, %v2787_v3  ;;  %v7774_v0 = vld [vmem:[%s10014_s3 + $0x210] sm:$0xff]  }
 0x11f   : > { %7357 = vmatprep.mubr.bf16.mxu1 %v2772_v30  ;;  %v9010_v52 = vpop.f32.mrb[15].mxu0 }
 0x120   : > { %v2795_v35 = vor.u32 %v2793_v62, %v2792_v22  ;;  %v9043_v22 = vld [vmem:[#allocation2 + $0x60] sm:$0xff]  ;;  %v7776_v62 = vld [vmem:[%s10014_s3 + $0x218] sm:$0xff]  }
 0x121   : > { %v7163_v38 = vpop.f32.mrb[12].mxu1 }
 0x122   : > { %v9014_v43 = vpop.f32.mrb[13].mxu1 }
 0x123   : > { %10112 = vst [vmem:[#allocation5_spill] sm:$0xff] %v9014_v43  ;;  %v9018_v6 = vpop.f32.mrb[14].mxu1  ;;  %v4390_v43 = vld [vmem:[#allocation2 + $0x88] sm:$0xff] }
 0x124   : > { %10113 = vst [vmem:[#allocation4_spill] sm:$0xff] %v9018_v6  ;;  %v9021_v30 = vpop.f32.mrb[15].mxu1 }
 0x125   : > { %10114 = vst [vmem:[#allocation24_spill] sm:$0xff] %v9021_v30  ;;  %7510 = vmatmul.mubr.bf16.vlgmr.msra.gmra.mrb[120].mxu0 %v10115_v60  ;;  %v2796_v60 = vsel %vm2600_vm3, %v2784_v45, %v2795_v35  ;;  %v10122_v45 = vld [vmem:[#allocation6_spill] sm:$0xff]  ;;  %v10051_v35 = vshrl.u32 %v9043_v22, 16 }
 0x126   : > { %7358 = vmatmul.mubr.bf16.gmra.mrb[112].mxu1 %v2780_v44  ;;  %7622 = vmatpush3.bf16.msra.mxu0 %v8868_v11 }
 0x127   : > { %7361 = vmatprep.mubr.bf16.mxu1 %v2788_v1  ;;  %7513 = vmatprep.mubr.bf16.mxu0 %v10116_v28  ;;  %v10120_v28 = vld [vmem:[#allocation12_spill] sm:$0xff] }
 0x128   : > { %v9032_v53 = vpop.f32.mrb[16].mxu0  ;;  %7623 = vmatprep.subr.bf16.mxu0 %v7772_v57 }
 0x129   : > { %v9034_v42 = vpop.f32.mrb[17].mxu0 }
 0x12a   : > { %v9036_v3 = vpop.f32.mrb[18].mxu0  ;;  %7624 = vmatpush3.bf16.msra.mxu0 %v7772_v57 }
 0x12b   : > { %v9039_v38 = vpop.f32.mrb[16].mxu1  ;;  %v1120_v11 = vpop.f32.mrb[19].mxu0  ;;  %7625 = vmatprep.subr.bf16.mxu0 %v7774_v0 }
 0x12c   : > { %10117 = vst [vmem:[#allocation8_spill] sm:$0xff] %v9039_v38  ;;  %v9041_v44 = vpop.f32.mrb[17].mxu1  ;;  %v10052_v11 = vshll.u32 %v9043_v22, 16 }
 0x12d   : > { %10118 = vst [vmem:[#allocation10_spill] sm:$0xff] %v9041_v44  ;;  %v9048_v1 = vpop.f32.mrb[18].mxu1  ;;  %7514 = vmatmul.mubr.bf16.gmra.mrb[124].mxu0 %v10120_v28  ;;  %v10127_v44 = vld [vmem:[#allocation14_spill] sm:$0xff] }
 0x12e   : > { %10119 = vst [vmem:[#allocation25_spill] sm:$0xff] %v9048_v1  ;;  %7362 = vmatmul.mubr.bf16.gmra.mrb[116].mxu1 %v2796_v60  ;;  %v1216_v57 = vpop.f32.mrb[19].mxu1  ;;  %7517 = vmatprep.mubr.bf16.mxu0 %v10121_v34  ;;  %v4501_v34 = vrot.slane %v10051_v35, 3  ;;  %v4519_v35 = vrot.slane %v10055_v19, 3  ;;  %v4389_v1 = vld [vmem:[#allocation2 + $0x80] sm:$0xff] }
 0x12f   : > { %7445 = vmatprep.mubr.bf16.mxu1 %v10122_v45  ;;  %7626 = vmatpush3.bf16.msra.mxu0 %v7774_v0  ;;  %v4504_v0 = vrot.slane %v10052_v11, 4  ;;  %v9066_v57 = vld [vmem:[#allocation2 + $0x68] sm:$0xff] }
 0x130   : > { %v9055_v63 = vpop.f32.mrb[20].mxu0  ;;  %7627 = vmatprep.subr.bf16.mxu0 %v7776_v62  ;;  %v7771_v45 = vld [vmem:[%s10014_s3 + $0x1c8] sm:$0xff]   ;;  %v10054_v41 = vshrl.u32 %v9066_v57, 16 }
 0x131   : > { %v1133_v61 = vpop.f32.mrb[21].mxu0  ;;  %v4505_v55 = vor.u32 %v4504_v0, %v4501_v34 }
 0x132   : > { %v7148_v28 = vpop.f32.mrb[22].mxu0  ;;  %v10123_v61 = vld [vmem:[#allocation15_spill] sm:$0xff]  ;;  %v4510_v34 = vrot.slane %v10054_v41, 3 }
 0x133   : > { %v9060_v60 = vpop.f32.mrb[23].mxu0  ;;  %7628 = vmatpush3.bf16.msra.mxu0 %v7776_v62  ;;  %v7780_v28 = vld [vmem:[%s10014_s3 + $0x228] sm:$0xff]   ;;  %v10057_v62 = vshll.u32 %v9066_v57, 16  ;;  %v7775_v41 = vld [vmem:[%s10014_s3 + $0x1d8] sm:$0xff]  }
 0x134   : > { %7629 = vmatprep.subr.bf16.mxu0 %v7778_v25 }
 0x135   : > { %7518 = vmatmul.mubr.bf16.gmra.mrb[128].mxu0 %v10123_v61  ;;  %v10056_v61 = vshll.u32 %v9071_v4, 16 }
 0x136   : > { %7446 = vmatmul.mubr.bf16.vlgmr.msra.gmra.mrb[120].mxu1 %v10124_v46  ;;  %7521 = vmatprep.mubr.bf16.mxu0 %v8800_v24  ;;  %v7773_v46 = vld [vmem:[%s10014_s3 + $0x1d0] sm:$0xff]  }
 0x137   : > { %7558 = vmatpush3.bf16.msra.mxu1 %v8897_v51  ;;  %7449 = vmatprep.mubr.bf16.mxu1 %v10125_v49  ;;  %v7782_v51 = vld [vmem:[%s10014_s3 + $0x230] sm:$0xff]   ;;  %v4522_v11 = vrot.slane %v10056_v61, 4  ;;  %v9115_v61 = vshrl.u32 %v4388_v23, 16 }
 0x138   : > { %7559 = vmatprep.subr.bf16.mxu1 %v7771_v45  ;;  %v7255_v13 = vpop.f32.mrb[24].mxu0  ;;  %7630 = vmatpush3.bf16.msra.mxu0 %v7778_v25  ;;  %v4506_v25 = vsel %vm722_vm0, %v8790_v26, %v4505_v55  ;;  %v7784_v26 = vld [vmem:[%s10014_s3 + $0x238] sm:$0xff]  }
 0x139   : > { %v9088_v24 = vpop.f32.mrb[25].mxu0  ;;  %7631 = vmatprep.subr.bf16.mxu0 %v7780_v28  ;;  %v4513_v13 = vrot.slane %v10057_v62, 4  ;;  %v9117_v62 = vshll.u32 %v4388_v23, 16  ;;  %v4523_v38 = vor.u32 %v4522_v11, %v4519_v35 }
 0x13a   : > { %v9093_v49 = vpop.f32.mrb[26].mxu0 }
 0x13b   : > { %7560 = vmatpush3.bf16.msra.mxu1 %v7771_v45  ;;  %v9099_v0 = vpop.f32.mrb[27].mxu0  ;;  %v10126_v45 = vld [vmem:[#allocation11_spill] sm:$0xff]  ;;  %v4514_v19 = vor.u32 %v4513_v13, %v4510_v34  ;;  %v4531_v11 = vrot.slane %v9117_v62, 4 }
 0x13c   : > { %7561 = vmatprep.subr.bf16.mxu1 %v7773_v46  ;;  %7632 = vmatpush3.bf16.msra.mxu0 %v7780_v28  ;;  %v9120_v28 = vshrl.u32 %v4389_v1, 16 }
 0x13d   : > { %7522 = vmatmul.mubr.bf16.gmra.mrb[132].mxu0 %v8808_v15  ;;  %7633 = vmatprep.subr.bf16.mxu0 %v7782_v51  ;;  %v9122_v15 = vshll.u32 %v4389_v1, 16  ;;  %v4515_v35 = vsel %vm722_vm0, %v4505_v55, %v4514_v19  ;;  %v4528_v1 = vrot.slane %v9115_v61, 3  ;;  %v4524_v6 = vsel %vm722_vm0, %v4514_v19, %v4523_v38  ;;  %v7779_v55 = vld [vmem:[%s10014_s3 + $0x1e8] sm:$0xff]  }
 0x13e   : > { %7450 = vmatmul.mubr.bf16.gmra.mrb[124].mxu1 %v10126_v45  ;;  %7525 = vmatprep.mubr.bf16.mxu0 %v4506_v25  ;;  %v7777_v25 = vld [vmem:[%s10014_s3 + $0x1e0] sm:$0xff]   ;;  %v9147_v19 = vshrl.u32 %v4390_v43, 16 }
 0x13f   : > { %7453 = vmatprep.mubr.bf16.mxu1 %v10127_v44  ;;  %7562 = vmatpush3.bf16.msra.mxu1 %v7773_v46 }
 0x140   : > { %v9124_v30 = vpop.f32.mrb[28].mxu0  ;;  %7563 = vmatprep.subr.bf16.mxu1 %v7775_v41  ;;  %7634 = vmatpush3.bf16.msra.mxu0 %v7782_v51  ;;  %v9129_v34 = vpop.f32.mrb[20].mxu1  ;;  %v4537_v51 = vrot.slane %v9120_v28, 3 }
 0x141   : > { %10128 = vst [vmem:[#allocation12_spill] sm:$0xff] %v9129_v34  ;;  %v9131_v23 = vpop.f32.mrb[29].mxu0  ;;  %7635 = vmatprep.subr.bf16.mxu0 %v7784_v26  ;;  %v1229_v44 = vpop.f32.mrb[21].mxu1  ;;  %v4540_v34 = vrot.slane %v9122_v15, 4 }
 0x142   : > { %v9133_v46 = vpop.f32.mrb[30].mxu0  ;;  %v7172_v13 = vpop.f32.mrb[22].mxu1  ;;  %v4391_v44 = vld [vmem:[#allocation2 + $0x90] sm:$0xff] }
 0x143   : > { %v2242_v45 = vpop.f32.mrb[31].mxu0  ;;  %7564 = vmatpush3.bf16.msra.mxu1 %v7775_v41  ;;  %v9141_v56 = vpop.f32.mrb[23].mxu1  ;;  %v10130_v13 = vld [vmem:[#allocation16_spill] sm:$0xff]  ;;  %v4532_v41 = vor.u32 %v4531_v11, %v4528_v1  ;;  %v4541_v5 = vor.u32 %v4540_v34, %v4537_v51  ;;  %v9154_v17 = vshll.u32 %v4391_v44, 16 }
 0x144   : > { %10129 = vst [vmem:[#allocation13_spill] sm:$0xff] %v9141_v56  ;;  %7565 = vmatprep.subr.bf16.mxu1 %v7777_v25  ;;  %7636 = vmatpush3.bf16.msra.mxu0 %v7784_v26  ;;  %v9149_v45 = vshll.u32 %v4390_v43, 16  ;;  %v9152_v56 = vshrl.u32 %v4391_v44, 16 }
 0x145   : > { %7526 = vmatmul.mubr.bf16.gmra.mrb[136].mxu0 %v4515_v35  ;;  %v4533_v11 = vsel %vm722_vm0, %v4523_v38, %v4532_v41  ;;  %v7783_v38 = vld [vmem:[%s10014_s3 + $0x1f8] sm:$0xff]  }
 0x146   : > { %7454 = vmatmul.mubr.bf16.gmra.mrb[128].mxu1 %v10130_v13  ;;  %7529 = vmatprep.mubr.bf16.mxu0 %v4524_v6  ;;  %v7781_v6 = vld [vmem:[%s10014_s3 + $0x1f0] sm:$0xff]   ;;  %v4542_v13 = vsel %vm722_vm0, %v4532_v41, %v4541_v5  ;;  %v4555_v10 = vrot.slane %v9152_v56, 3  ;;  %v10132_v41 = vshll.u32 %v9043_v22, 16 }
 0x147   : > { %7457 = vmatprep.mubr.bf16.mxu1 %v8803_v50  ;;  %7566 = vmatpush3.bf16.msra.mxu1 %v7777_v25  ;;  %v4546_v50 = vrot.slane %v9147_v19, 3  ;;  %v4549_v25 = vrot.slane %v9149_v45, 4 }
 0x148   : > { %v9156_v48 = vpop.f32.mrb[32].mxu0  ;;  %7567 = vmatprep.subr.bf16.mxu1 %v7779_v55  ;;  %v7191_v26 = vpop.f32.mrb[24].mxu1  ;;  %v3821_v39 = vrot.slane %v10132_v41, 1  ;;  %v10138_v41 = vshll.u32 %v8924_v33, 16 }
 0x149   : > { %v2255_v35 = vpop.f32.mrb[33].mxu0  ;;  %v1515_v1 = vpop.f32.mrb[25].mxu1  ;;  %v4558_v26 = vrot.slane %v9154_v17, 4 }
 0x14a   : > { %v7264_v43 = vpop.f32.mrb[34].mxu0  ;;  %v1754_v34 = vadd.f32 %v1515_v1, %v8909_v7  ;;  %v7192_v51 = vpop.f32.mrb[26].mxu1  ;;  %v10131_v1 = vrot.slane %v8775_v32, 1  ;;  %v10133_v32 = vshrl.u32 %v9043_v22, 16  ;;  %v10135_v22 = vshrl.u32 %v8921_v14, 16 }
 0x14b   : > { %v9165_v44 = vpop.f32.mrb[35].mxu0  ;;  %7568 = vmatpush3.bf16.msra.mxu1 %v7779_v55  ;;  %v1757_v35 = vadd.f32 %v7192_v51, %v8913_v58  ;;  %v1518_v43 = vpop.f32.mrb[27].mxu1  ;;  %v4550_v58 = vor.u32 %v4549_v25, %v4546_v50 }
 0x14c   : > { %7569 = vmatprep.subr.bf16.mxu1 %v7781_v6  ;;  %v1755_v7 = vadd.f32 %v1518_v43, %v8917_v47  ;;  %v3817_v54 = vor.u32 %v10131_v1, %v8772_v31  ;;  %v9181_v55 = vadd.f32 %v9088_v24, %v1754_v34  ;;  %v4559_v47 = vor.u32 %v4558_v26, %v4555_v10 }
 0x14d   : > { %7530 = vmatmul.mubr.bf16.gmra.mrb[140].mxu0 %v4533_v11  ;;  %v9185_v51 = vadd.f32 %v9093_v49, %v1757_v35  ;;  %v3825_v11 = vor.u32 %v10133_v32, %v3821_v39  ;;  %v10134_v24 = vshll.u32 %v9066_v57, 16  ;;  %v4564_v25 = vrot.slane %v10135_v22, 3 }
 0x14e   : > { %7458 = vmatmul.mubr.bf16.gmra.mrb[132].mxu1 %v8811_v29  ;;  %7533 = vmatprep.mubr.bf16.mxu0 %v4542_v13  ;;  %v9189_v31 = vadd.f32 %v9099_v0, %v1755_v7  ;;  %v3822_v50 = vsel %vm3738_vm4, %v3817_v54, %v3821_v39  ;;  %v4551_v0 = vsel %vm722_vm0, %v4541_v5, %v4550_v58  ;;  %v10136_v13 = vshll.u32 %v8921_v14, 16 }
 0x14f   : > { %7461 = vmatprep.mubr.bf16.mxu1 %v8832_v8  ;;  %7570 = vmatpush3.bf16.msra.mxu1 %v7781_v6  ;;  %v3829_v34 = vrot.slane %v10134_v24, 1  ;;  %v4560_v39 = vsel %vm722_vm0, %v4550_v58, %v4559_v47  ;;  %v10137_v54 = vshrl.u32 %v8924_v33, 16  ;;  %v4576_v32 = vrot.slane %v10138_v41, 4 }
 0x150   : > { %v7267_v43 = vpop.f32.mrb[36].mxu0  ;;  %7571 = vmatprep.subr.bf16.mxu1 %v7783_v38  ;;  %v4567_v26 = vrot.slane %v10136_v13, 4  ;;  %v10139_v58 = vshll.u32 %v9071_v4, 16  ;;  %v10144_v41 = vshrl.u32 %v8952_v27, 16 }
 0x151   : > { %v7195_v29 = vpop.f32.mrb[28].mxu1  ;;  %v9196_v49 = vpop.f32.mrb[37].mxu0  ;;  %v3830_v14 = vsel %vm3738_vm4, %v3825_v11, %v3829_v34 }
 0x152   : > { %v1760_v8 = vadd.f32 %v7195_v29, %v8928_v9  ;;  %v1531_v10 = vpop.f32.mrb[29].mxu1  ;;  %v9199_v6 = vpop.f32.mrb[38].mxu0  ;;  %v4573_v9 = vrot.slane %v10137_v54, 3  ;;  %v3837_v29 = vrot.slane %v10139_v58, 1  ;;  %v4568_v33 = vor.u32 %v4567_v26, %v4564_v25 }
 0x153   : > { %v1758_v35 = vadd.f32 %v1531_v10, %v8932_v37  ;;  %v7196_v7 = vpop.f32.mrb[30].mxu1  ;;  %v9207_v1 = vpop.f32.mrb[39].mxu0  ;;  %7572 = vmatpush3.bf16.msra.mxu1 %v7783_v38 }
 0x154   : > { %v1761_v5 = vadd.f32 %v7196_v7, %v8935_v21  ;;  %v1534_v24 = vpop.f32.mrb[31].mxu1  ;;  %v9217_v43 = vadd.f32 %v9124_v30, %v1760_v8  ;;  %v10140_v21 = vshrl.u32 %v9066_v57, 16  ;;  %v4577_v10 = vor.u32 %v4576_v32, %v4573_v9 }
 0x155   : > { %7534 = vmatmul.mubr.bf16.gmra.mrb[144].mxu0 %v4551_v0  ;;  %v9220_v37 = vadd.f32 %v9131_v23, %v1758_v35  ;;  %v10141_v30 = vshrl.u32 %v9071_v4, 16  ;;  %v3845_v23 = vrot.slane %v9117_v62, 1  ;;  %v4569_v26 = vsel %vm722_vm0, %v4559_v47, %v4568_v33 }
 0x156   : > { %7462 = vmatmul.mubr.bf16.gmra.mrb[136].mxu1 %v3822_v50  ;;  %7537 = vmatprep.mubr.bf16.mxu0 %v4560_v39  ;;  %v9225_v38 = vadd.f32 %v9133_v46, %v1761_v5  ;;  %v3833_v11 = vor.u32 %v10140_v21, %v3829_v34  ;;  %v10142_v57 = vshrl.u32 %v8949_v18, 16  ;;  %v10143_v4 = vshll.u32 %v8949_v18, 16  ;;  %v9257_v21 = vld [vmem:[#allocation2 + $0x98] sm:$0xff] }
 0x157   : > { %7465 = vmatprep.mubr.bf16.mxu1 %v3830_v14  ;;  %v3841_v8 = vor.u32 %v10141_v30, %v3837_v29  ;;  %v4578_v9 = vsel %vm722_vm0, %v4568_v33, %v4577_v10  ;;  %v10145_v32 = vshll.u32 %v8952_v27, 16  ;;  %v3849_v58 = vor.u32 %v9115_v61, %v3845_v23 }
 0x158   : > { %v9232_v0 = vpop.f32.mrb[40].mxu0  ;;  %v4582_v34 = vrot.slane %v10142_v57, 3  ;;  %v4585_v35 = vrot.slane %v10143_v4, 4  ;;  %v3838_v39 = vsel %vm3738_vm4, %v3833_v11, %v3837_v29  ;;  %v3853_v29 = vrot.slane %v9122_v15, 1 }
 0x159   : > { %v7199_v50 = vpop.f32.mrb[32].mxu1  ;;  %v9234_v22 = vpop.f32.mrb[41].mxu0  ;;  %v4594_v5 = vrot.slane %v10145_v32, 4  ;;  %v3846_v47 = vsel %vm3738_vm4, %v3841_v8, %v3845_v23  ;;  %v3861_v30 = vrot.slane %v9149_v45, 1  ;;  %v10147_v4 = vshll.u32 %v8976_v16, 16 }
 0x15a   : > { %v1764_v25 = vadd.f32 %v7199_v50, %v8963_v36  ;;  %v1547_v13 = vpop.f32.mrb[33].mxu1  ;;  %v9237_v46 = vpop.f32.mrb[42].mxu0  ;;  %v4591_v36 = vrot.slane %v10144_v41, 3  ;;  %v4586_v33 = vor.u32 %v4585_v35, %v4582_v34  ;;  %v3854_v23 = vsel %vm3738_vm4, %v3849_v58, %v3853_v29 }
 0x15b   : > { %v7200_v7 = vpop.f32.mrb[34].mxu1  ;;  %v2290_v54 = vpop.f32.mrb[43].mxu0  ;;  %v10146_v34 = vshrl.u32 %v8976_v16, 16  ;;  %v4603_v35 = vrot.slane %v10147_v4, 4 }
 0x15c   : > { %v1550_v24 = vpop.f32.mrb[35].mxu1  ;;  %v9252_v14 = vadd.f32 %v9156_v48, %v1764_v25  ;;  %v4595_v27 = vor.u32 %v4594_v5, %v4591_v36  ;;  %v3857_v48 = vor.u32 %v9120_v28, %v3853_v29  ;;  %v4587_v57 = vsel %vm722_vm0, %v4577_v10, %v4586_v33  ;;  %v4398_v7 = vld [vmem:[#allocation2 + $0xc8] sm:$0xff] }
 0x15d   : > { %v1763_v18 = vadd.f32 %v1550_v24, %v8970_v59  ;;  %7538 = vmatmul.mubr.bf16.gmra.mrb[148].mxu0 %v4569_v26  ;;  %v10059_v26 = vshll.u32 %v9257_v21, 16  ;;  %v10148_v36 = vshrl.u32 %v8979_v2, 16  ;;  %v10149_v5 = vshll.u32 %v8979_v2, 16 }
 0x15e   : > { %7466 = vmatmul.mubr.bf16.gmra.mrb[140].mxu1 %v3838_v39  ;;  %7541 = vmatprep.mubr.bf16.mxu0 %v4578_v9  ;;  %v4596_v41 = vsel %vm722_vm0, %v4586_v33, %v4595_v27  ;;  %v3862_v16 = vsel %vm3738_vm4, %v3857_v48, %v3861_v30  ;;  %v9286_v29 = vshrl.u32 %v4398_v7, 16  ;;  %v9288_v33 = vshll.u32 %v4398_v7, 16  ;;  %v9296_v48 = vld [vmem:[#allocation2 + $0xa0] sm:$0xff] }
 0x15f   : > { %7469 = vmatprep.mubr.bf16.mxu1 %v3846_v47  ;;  %v9260_v11 = vadd.f32 %v9165_v44, %v1763_v18  ;;  %v4600_v44 = vrot.slane %v10146_v34, 3  ;;  %v4609_v32 = vrot.slane %v10148_v36, 3  ;;  %v4612_v10 = vrot.slane %v10149_v5, 4 }
 0x160   : > { %v9264_v59 = vpop.f32.mrb[44].mxu0  ;;  %v3865_v18 = vor.u32 %v9147_v19, %v3861_v30  ;;  %10150 = vst [vmem:[#allocation6_spill] sm:$0xff] %v9288_v33  ;;  %v4618_v7 = vrot.slane %v9286_v29, 3  ;;  %v10062_v36 = vshrl.u32 %v9257_v21, 16 }
 0x161   : > { %v7203_v8 = vpop.f32.mrb[36].mxu1  ;;  %v2303_v50 = vpop.f32.mrb[45].mxu0  ;;  %v4604_v30 = vor.u32 %v4603_v35, %v4600_v44  ;;  %v10061_v44 = vshll.u32 %v9296_v48, 16 }
 0x162   : > { %v1563_v25 = vpop.f32.mrb[37].mxu1  ;;  %v7276_v13 = vpop.f32.mrb[46].mxu0  ;;  %v4613_v50 = vor.u32 %v4612_v10, %v4609_v32  ;;  %v4400_v10 = vld [vmem:[#allocation2 + $0xd8] sm:$0xf] }
 0x163   : > { %v1766_v39 = vadd.f32 %v1563_v25, %v9003_v40  ;;  %v7204_v54 = vpop.f32.mrb[38].mxu1  ;;  %v9274_v9 = vpop.f32.mrb[47].mxu0  ;;  %v3869_v40 = vrot.slane %v9154_v17, 1  ;;  %v9301_v25 = vld [vmem:[#allocation2] sm:$0xff]  ;;  %v4605_v5 = vsel %vm722_vm0, %v4595_v27, %v4604_v30 }
 0x164   : > { %v1769_v24 = vadd.f32 %v7204_v54, %v9005_v20  ;;  %v1566_v47 = vpop.f32.mrb[39].mxu1  ;;  %v3877_v20 = vrot.slane %v10059_v26, 1  ;;  %10152 = vst [vmem:[#allocation7_spill] sm:$0xff] %v9301_v25  ;;  %v4634_v26 = vshrl.u32 %v4400_v10, 16 }
 0x165   : > { %v1767_v58 = vadd.f32 %v1566_v47, %v9010_v52  ;;  %7542 = vmatmul.mubr.bf16.gmra.mrb[152].mxu0 %v4587_v57  ;;  %v9291_v8 = vadd.f32 %v9196_v49, %v1766_v39  ;;  %v3873_v2 = vor.u32 %v9152_v56, %v3869_v40  ;;  %v10058_v49 = vshrl.u32 %v9301_v25, 16 }
 0x166   : > { %7470 = vmatmul.mubr.bf16.gmra.mrb[144].mxu1 %v3854_v23  ;;  %7545 = vmatprep.mubr.bf16.mxu0 %v4596_v41  ;;  %v9299_v52 = vadd.f32 %v9199_v6, %v1769_v24  ;;  %v10060_v23 = vshll.u32 %v9301_v25, 16  ;;  %v3870_v4 = vsel %vm3738_vm4, %v3865_v18, %v3869_v40  ;;  %v9312_v6 = vld [vmem:[#allocation2 + $0xa8] sm:$0xff]  ;;  %v4621_v39 = vrot.slane %v9288_v33, 4 }
 0x167   : > { %7473 = vmatprep.mubr.bf16.mxu1 %v3862_v16  ;;  %v9306_v13 = vadd.f32 %v9207_v1, %v1767_v58  ;;  %v3878_v1 = vsel %vm3738_vm4, %v3873_v2, %v3877_v20  ;;  %v4614_v18 = vsel %vm722_vm0, %v4604_v30, %v4613_v50  ;;  %v5640_v58 = vld [vmem:[#allocation2 + $0x18] sm:$0xf0]  ;;  %v3885_v30 = vrot.slane %v10061_v44, 1 }
 0x168   : > { %10151 = vst [vmem:[#allocation15_spill] sm:$0xff] %v9299_v52  ;;  %v7279_v57 = vpop.f32.mrb[48].mxu0  ;;  %v4630_v40 = vrot.slane %v10060_v23, 4  ;;  %v9370_v52 = vld [vmem:[#allocation2 + $0x28] sm:$0xff] }
 0x169   : > { %10153 = vst [vmem:[#allocation9_spill] sm:$0xff] %v9306_v13  ;;  %v7207_v34 = vpop.f32.mrb[40].mxu1  ;;  %v9310_v35 = vpop.f32.mrb[49].mxu0 }
 0x16a   : > { %v1772_v54 = vadd.f32 %v7207_v34, %v9032_v53  ;;  %v1579_v41 = vpop.f32.mrb[41].mxu1  ;;  %v9319_v32 = vpop.f32.mrb[50].mxu0  ;;  %v4627_v53 = vrot.slane %v10058_v49, 3  ;;  %v4622_v49 = vor.u32 %v4621_v39, %v4618_v7  ;;  %v5686_v34 = vshll.u32 %v5640_v58, 16 }
 0x16b   : > { %v1770_v24 = vadd.f32 %v1579_v41, %v9034_v42  ;;  %v7208_v47 = vpop.f32.mrb[42].mxu1  ;;  %v9323_v16 = vpop.f32.mrb[51].mxu0  ;;  %v9333_v42 = vld [vmem:[#allocation2 + $0x20] sm:$0xff] }
 0x16c   : > { %v1773_v2 = vadd.f32 %v7208_v47, %v9036_v3  ;;  %v1582_v57 = vpop.f32.mrb[43].mxu1  ;;  %v9336_v41 = vadd.f32 %v9232_v0, %v1772_v54  ;;  %v9343_v3 = vld [vmem:[#allocation2 + $0xb0] sm:$0xff]  ;;  %v4637_v47 = vshll.u32 %v4400_v10, 16  ;;  %v3881_v0 = vor.u32 %v10062_v36, %v3877_v20  ;;  %v9362_v20 = vld [vmem:[#allocation2 + $0xb8] sm:$0xff] }
 0x16d   : > { %7546 = vmatmul.mubr.bf16.gmra.mrb[156].mxu0 %v4605_v5  ;;  %v9341_v23 = vadd.f32 %v9234_v22, %v1770_v24  ;;  %v5683_v57 = vshrl.u32 %v5640_v58, 16  ;;  %v4631_v54 = vor.u32 %v4630_v40, %v4627_v53  ;;  %v5691_v7 = vshrl.u32 %v9333_v42, 16 }
 0x16e   : > { %10154 = vst [vmem:[#allocation11_spill] sm:$0xff] %v9336_v41  ;;  %7474 = vmatmul.mubr.bf16.gmra.mrb[148].mxu1 %v3870_v4  ;;  %7549 = vmatprep.mubr.bf16.mxu0 %v4614_v18  ;;  %v9346_v27 = vadd.f32 %v9237_v46, %v1773_v2  ;;  %v5694_v22 = vshll.u32 %v9333_v42, 16  ;;  %v10157_v4 = vshrl.u32 %v9296_v48, 16  ;;  %v10158_v5 = vshll.u32 %v9312_v6, 16 }
 0x16f   : > { %10155 = vst [vmem:[#allocation14_spill] sm:$0xff] %v9341_v23  ;;  %7477 = vmatprep.mubr.bf16.mxu1 %v3878_v1  ;;  %v4623_v53 = vsel %vm722_vm0, %v4613_v50, %v4622_v49  ;;  %v4636_v40 = vrot.slane %v4634_v26, 3  ;;  %v5685_v36 = vrot.slane %v5683_v57, 4  ;;  %v3886_v46 = vsel %vm3738_vm4, %v3881_v0, %v3885_v30  ;;  %v9385_v0 = vld [vmem:[#allocation2 + $0xc0] sm:$0xff] }
 0x170   : > { %10156 = vst [vmem:[#allocation16_spill] sm:$0xff] %v9346_v27  ;;  %v3889_v39 = vor.u32 %v10157_v4, %v3885_v30  ;;  %v3893_v10 = vrot.slane %v10158_v5, 1  ;;  %v9356_v24 = vpop.f32.mrb[52].mxu0  ;;  %v4639_v5 = vrot.slane %v4637_v47, 4  ;;  %v5688_v27 = vrot.slane %v5686_v34, 5  ;;  %v9375_v47 = vld [vmem:[#allocation2 + $0x30] sm:$0xff] }
 0x171   : > { %v7211_v18 = vpop.f32.mrb[44].mxu1  ;;  %v9360_v58 = vpop.f32.mrb[53].mxu0  ;;  %v4632_v1 = vsel %vm722_vm0, %v4622_v49, %v4631_v54  ;;  %v5693_v41 = vrot.slane %v5691_v7, 4  ;;  %v5696_v13 = vrot.slane %v5694_v22, 5  ;;  %v10160_v49 = vshrl.u32 %v9312_v6, 16  ;;  %10162 = vst [vmem:[#allocation27_spill] sm:$0xff] %v9385_v0 }
 0x172   : > { %v1776_v2 = vadd.f32 %v7211_v18, %v9055_v63  ;;  %v1595_v4 = vpop.f32.mrb[45].mxu1  ;;  %v9366_v44 = vpop.f32.mrb[54].mxu0  ;;  %v3894_v26 = vsel %vm3738_vm4, %v3889_v39, %v3893_v10  ;;  %v10066_v63 = vshrl.u32 %v9343_v3, 16  ;;  %v10065_v18 = vshll.u32 %v9362_v20, 16 }
 0x173   : > { %v7212_v25 = vpop.f32.mrb[46].mxu1  ;;  %v2338_v23 = vpop.f32.mrb[55].mxu0  ;;  %v3897_v34 = vor.u32 %v10160_v49, %v3893_v10  ;;  %v10161_v30 = vshll.u32 %v9343_v3, 16  ;;  %v4640_v7 = vor.u32 %v4639_v5, %v4636_v40  ;;  %v5689_v22 = vor.u32 %v5688_v27, %v5685_v36 }
 0x174   : > { %v1598_v50 = vpop.f32.mrb[47].mxu1  ;;  %v9378_v25 = vadd.f32 %v9264_v59, %v1776_v2  ;;  %v5700_v39 = vshrl.u32 %v9370_v52, 16  ;;  %v5703_v59 = vshll.u32 %v9370_v52, 16  ;;  %v5697_v2 = vor.u32 %v5696_v13, %v5693_v41 }
 0x175   : > { %v1775_v23 = vadd.f32 %v1598_v50, %v9060_v60  ;;  %v3901_v57 = vrot.slane %v10161_v30, 1  ;;  %7550 = vmatmul.mubr.bf16.gmra.mrb[160].mxu0 %v4623_v53  ;;  %v5709_v60 = vshrl.u32 %v9375_v47, 16  ;;  %v5712_v10 = vshll.u32 %v9375_v47, 16 }
 0x176   : > { %10159 = vst [vmem:[#allocation26_spill] sm:$0xff] %v9378_v25  ;;  %7478 = vmatmul.mubr.bf16.gmra.mrb[152].mxu1 %v3886_v46  ;;  %7553 = vmatprep.mubr.bf16.mxu0 %v4632_v1  ;;  %v3909_v1 = vrot.slane %v10065_v18, 1 }
 0x177   : > { %7481 = vmatprep.mubr.bf16.mxu1 %v3894_v26  ;;  %v9392_v4 = vadd.f32 %v9274_v9, %v1775_v23  ;;  %v3905_v46 = vor.u32 %v10066_v63, %v3901_v57  ;;  %v3902_v5 = vsel %vm3738_vm4, %v3897_v34, %v3901_v57  ;;  %v4641_v9 = vsel %vm722_vm0, %v4631_v54, %v4640_v7  ;;  %v9413_v57 = vld [vmem:[#allocation2 + $0x40] sm:$0xff]  ;;  %v10165_v7 = vld [vmem:[#allocation18_spill] sm:$0xff] }
 0x178   : > { %v9398_v36 = vpop.f32.mrb[56].mxu0  ;;  %v5702_v26 = vrot.slane %v5700_v39, 4  ;;  %v5705_v23 = vrot.slane %v5703_v59, 5  ;;  %v5711_v63 = vrot.slane %v5709_v60, 4  ;;  %v5714_v53 = vrot.slane %v5712_v10, 5 }
 0x179   : > { %10163 = vst [vmem:[#allocation28_spill] sm:$0xff] %v9392_v4  ;;  %v7215_v27 = vpop.f32.mrb[48].mxu1  ;;  %v2351_v41 = vpop.f32.mrb[57].mxu0  ;;  %v9408_v4 = vld [vmem:[#allocation2 + $0x38] sm:$0xff]  ;;  %v3910_v34 = vsel %vm3738_vm4, %v3905_v46, %v3909_v1  ;;  %v10067_v54 = vshrl.u32 %v9385_v0, 16  ;;  %v10166_v39 = vshrl.u32 %v9362_v20, 16 }
 0x17a   : > { %v1611_v40 = vpop.f32.mrb[49].mxu1  ;;  %v7288_v50 = vpop.f32.mrb[58].mxu0  ;;  %v5698_v27 = vsel %vm1892_vm1, %v5689_v22, %v5697_v2  ;;  %v10164_v41 = vld [vmem:[#allocation17_spill] sm:$0xff]  ;;  %v10167_v22 = vshll.u32 %v9385_v0, 16  ;;  %v5706_v46 = vor.u32 %v5705_v23, %v5702_v26  ;;  %v3925_v26 = vrot.slane %v9288_v33, 1  ;;  %v9451_v0 = vld [vmem:[#allocation2 + $0x50] sm:$0xff] }
 0x17b   : > { %v1778_v49 = vadd.f32 %v1611_v40, %v8911_v12  ;;  %v7216_v30 = vpop.f32.mrb[50].mxu1  ;;  %v9405_v18 = vpop.f32.mrb[59].mxu0  ;;  %v3913_v59 = vor.u32 %v10166_v39, %v3909_v1  ;;  %v3720_v40 = vld [vmem:[#allocation2 + $0xd0] sm:$0x1]  ;;  %v5718_v50 = vshrl.u32 %v9408_v4, 16  ;;  %v5715_v1 = vor.u32 %v5714_v53, %v5711_v63  ;;  %v10171_v63 = vld [vmem:[#allocation19_spill] sm:$0xff] }
 0x17c   : > { %v1781_v13 = vadd.f32 %v7216_v30, %v10164_v41  ;;  %v1614_v25 = vpop.f32.mrb[51].mxu1  ;;  %v3917_v60 = vrot.slane %v10167_v22, 1  ;;  %v5721_v30 = vshll.u32 %v9408_v4, 16  ;;  %v5727_v41 = vshrl.u32 %v9413_v57, 16  ;;  %v10172_v22 = vld [vmem:[#allocation20_spill] sm:$0xff] }
 0x17d   : > { %v1779_v12 = vadd.f32 %v1614_v25, %v10165_v7  ;;  %7554 = vmatmul.mubr.bf16.gmra.mrb[164].mxu0 %v4641_v9  ;;  %v9421_v10 = vadd.f32 %v9310_v35, %v1778_v49  ;;  %v5730_v9 = vshll.u32 %v9413_v57, 16 }
 0x17e   : > { %7482 = vmatmul.mubr.bf16.gmra.mrb[156].mxu1 %v3902_v5  ;;  %7637 = vmatprep.mubr.bf16.mxu0 %v5698_v27  ;;  %v9426_v25 = vadd.f32 %v9319_v32, %v1781_v13  ;;  %v3921_v5 = vor.u32 %v10067_v54, %v3917_v60  ;;  %v3918_v27 = vsel %vm3738_vm4, %v3913_v59, %v3917_v60  ;;  %v3931_v32 = vshll.u32 %v3720_v40, 16  ;;  %v9447_v40 = vld [vmem:[#allocation2 + $0x48] sm:$0xff] }
 0x17f   : > { %10168 = vst [vmem:[#allocation17_spill] sm:$0xff] %v9421_v10  ;;  %7485 = vmatprep.mubr.bf16.mxu1 %v3910_v34  ;;  %v9431_v35 = vadd.f32 %v9323_v16, %v1779_v12  ;;  %v5707_v16 = vsel %vm1892_vm1, %v5697_v2, %v5706_v46  ;;  %v5720_v12 = vrot.slane %v5718_v50, 4  ;;  %v5723_v39 = vrot.slane %v5721_v30, 5  ;;  %v10173_v10 = vld [vmem:[#allocation21_spill] sm:$0xff]  ;;  %v5083_v30 = vld [vmem:[#allocation2 + $0x18] sm:$0xf0] }
 0x180   : > { %10169 = vst [vmem:[#allocation18_spill] sm:$0xff] %v9426_v25  ;;  %v7291_v23 = vpop.f32.mrb[60].mxu0  ;;  %v5729_v59 = vrot.slane %v5727_v41, 4  ;;  %v5732_v60 = vrot.slane %v5730_v9, 5  ;;  %v3926_v33 = vsel %vm3738_vm4, %v3921_v5, %v3925_v26  ;;  %v3929_v50 = vor.u32 %v9286_v29, %v3925_v26 }
 0x181   : > { %10170 = vst [vmem:[#allocation29_spill] sm:$0xff] %v9431_v35  ;;  %v7219_v49 = vpop.f32.mrb[52].mxu1  ;;  %v9437_v13 = vpop.f32.mrb[61].mxu0  ;;  %v5716_v23 = vsel %vm1892_vm1, %v5706_v46, %v5715_v1  ;;  %v5724_v41 = vor.u32 %v5723_v39, %v5720_v12  ;;  %v5739_v9 = vshll.u32 %v9447_v40, 16  ;;  %v5745_v26 = vshrl.u32 %v9451_v0, 16  ;;  %v10176_v12 = vld [vmem:[#allocation22_spill] sm:$0xff] }
 0x182   : > { %v1784_v53 = vadd.f32 %v7219_v49, %v10171_v63  ;;  %v1627_v34 = vpop.f32.mrb[53].mxu1  ;;  %v9440_v7 = vpop.f32.mrb[62].mxu0  ;;  %v5733_v5 = vor.u32 %v5732_v60, %v5729_v59 }
 0x183   : > { %v1782_v54 = vadd.f32 %v1627_v34, %v10172_v22  ;;  %v7220_v35 = vpop.f32.mrb[54].mxu1  ;;  %v9444_v25 = vpop.f32.mrb[63].mxu0  ;;  %v5150_v34 = vrot.slane %v5083_v30, 4 }
 0x184   : > { %v1785_v49 = vadd.f32 %v7220_v35, %v10173_v10  ;;  %v1630_v63 = vpop.f32.mrb[55].mxu1  ;;  %v9454_v2 = vadd.f32 %v9356_v24, %v1784_v53  ;;  %v5736_v10 = vshrl.u32 %v9447_v40, 16  ;;  %v3933_v24 = vrot.slane %v3931_v32, 1 }
 0x185   : > { %7638 = vmatmul.mubr.bf16.vlgmr.msra.gmra.mrb[168].mxu0 %v5707_v16  ;;  %v9458_v46 = vadd.f32 %v9360_v58, %v1782_v54  ;;  %v5748_v53 = vshll.u32 %v9451_v0, 16  ;;  %v5151_v58 = vrot.slane %v9333_v42, 4  ;;  %v5734_v42 = vsel %vm1892_vm1, %v5724_v41, %v5733_v5 }
 0x186   : > { %7486 = vmatmul.mubr.bf16.gmra.mrb[160].mxu1 %v3918_v27  ;;  %7641 = vmatprep.mubr.bf16.mxu0 %v5716_v23  ;;  %v9463_v35 = vadd.f32 %v9366_v44, %v1785_v49  ;;  %v5738_v32 = vrot.slane %v5736_v10, 4  ;;  %v5741_v23 = vrot.slane %v5739_v9, 5  ;;  %v3934_v60 = vsel %vm3738_vm4, %v3929_v50, %v3933_v24 }
 0x187   : > { %10174 = vst [vmem:[#allocation19_spill] sm:$0xff] %v9458_v46  ;;  %7489 = vmatprep.mubr.bf16.mxu1 %v3926_v33  ;;  %v5725_v33 = vsel %vm1892_vm1, %v5715_v1, %v5724_v41  ;;  %v5747_v63 = vrot.slane %v5745_v26, 4  ;;  %v5750_v30 = vrot.slane %v5748_v53, 5  ;;  %v10178_v1 = vld [vmem:[#allocation23_spill] sm:$0xff]  ;;  %v5153_v50 = vrot.slane %v9370_v52, 4 }
 0x188   : > { %10175 = vst [vmem:[#allocation20_spill] sm:$0xff] %v9463_v35  ;;  %v9468_v54 = vpop.f32.mrb[64].mxu0  ;;  %v9478_v35 = vld [vmem:[#allocation2 + $0x58] sm:$0xff]  ;;  %v5742_v41 = vor.u32 %v5741_v23, %v5738_v32 }
 0x189   : > { %v7223_v27 = vpop.f32.mrb[56].mxu1  ;;  %v9470_v16 = vpop.f32.mrb[65].mxu0  ;;  %v5754_v9 = vshrl.u32 %v9478_v35, 16  ;;  %v5757_v24 = vshll.u32 %v9478_v35, 16  ;;  %v5751_v26 = vor.u32 %v5750_v30, %v5747_v63  ;;  %v5154_v23 = vsel %vm1359_vm2, %v5151_v58, %v5153_v50  ;;  %v10180_v63 = vld [vmem:[#allocation5_spill] sm:$0xff] }
 0x18a   : > { %v1788_v39 = vadd.f32 %v7223_v27, %v10176_v12  ;;  %v1643_v22 = vpop.f32.mrb[57].mxu1  ;;  %v9473_v44 = vpop.f32.mrb[66].mxu0  ;;  %v5152_v27 = vsel %vm1359_vm2, %v5150_v34, %v5151_v58  ;;  %v9481_v12 = vld [vmem:[#allocation2 + $0x60] sm:$0xff] }
 0x18b   : > { %v7224_v59 = vpop.f32.mrb[58].mxu1  ;;  %v2386_v49 = vpop.f32.mrb[67].mxu0  ;;  %v5763_v53 = vshrl.u32 %v9481_v12, 16  ;;  %v5766_v34 = vshll.u32 %v9481_v12, 16 }
 0x18c   : > { %v1646_v46 = vpop.f32.mrb[59].mxu1  ;;  %v9484_v22 = vadd.f32 %v9398_v36, %v1788_v39  ;;  %v5756_v49 = vrot.slane %v5754_v9, 4 }
 0x18d   : > { %v1787_v10 = vadd.f32 %v1646_v46, %v10178_v1  ;;  %7642 = vmatmul.mubr.bf16.gmra.mrb[172].mxu0 %v5725_v33  ;;  %v5155_v46 = vrot.slane %v9375_v47, 4  ;;  %v5765_v47 = vrot.slane %v5763_v53, 4 }
 0x18e   : > { %10177 = vst [vmem:[#allocation21_spill] sm:$0xff] %v9484_v22  ;;  %7490 = vmatmul.mubr.bf16.gmra.mrb[164].mxu1 %v3934_v60  ;;  %7645 = vmatprep.mubr.bf16.mxu0 %v5734_v42  ;;  %v5743_v60 = vsel %vm1892_vm1, %v5733_v5, %v5742_v41  ;;  %v5759_v42 = vrot.slane %v5757_v24, 5  ;;  %v10182_v5 = vld [vmem:[#allocation24_spill] sm:$0xff]  ;;  %v5157_v24 = vrot.slane %v9408_v4, 4 }
 0x18f   : > { %7573 = vmatprep.mubr.bf16.mxu1 %v5152_v27  ;;  %v9493_v36 = vadd.f32 %v9405_v18, %v1787_v10  ;;  %v5752_v18 = vsel %vm1892_vm1, %v5742_v41, %v5751_v26  ;;  %v5768_v10 = vrot.slane %v5766_v34, 5  ;;  %v5156_v58 = vsel %vm1359_vm2, %v5153_v50, %v5155_v46 }
 0x190   : > { %v9496_v39 = vpop.f32.mrb[68].mxu0  ;;  %v5760_v41 = vor.u32 %v5759_v42, %v5756_v49  ;;  %v5158_v42 = vsel %vm1359_vm2, %v5155_v46, %v5157_v24 }
 0x191   : > { %10179 = vst [vmem:[#allocation22_spill] sm:$0xff] %v9493_v36  ;;  %v7227_v52 = vpop.f32.mrb[60].mxu1  ;;  %v2399_v33 = vpop.f32.mrb[69].mxu0  ;;  %v9504_v36 = vld [vmem:[#allocation2 + $0x68] sm:$0xff]  ;;  %v5769_v50 = vor.u32 %v5768_v10, %v5765_v47 }
 0x192   : > { %v1659_v32 = vpop.f32.mrb[61].mxu1  ;;  %v7300_v59 = vpop.f32.mrb[70].mxu0  ;;  %v10181_v52 = vld [vmem:[#allocation4_spill] sm:$0xff]  ;;  %v5772_v53 = vshrl.u32 %v9504_v36, 16  ;;  %v5775_v34 = vshll.u32 %v9504_v36, 16  ;;  %v5761_v47 = vsel %vm1892_vm1, %v5751_v26, %v5760_v41 }
 0x193   : > { %v1790_v30 = vadd.f32 %v1659_v32, %v10180_v63  ;;  %v7228_v27 = vpop.f32.mrb[62].mxu1  ;;  %v9501_v1 = vpop.f32.mrb[71].mxu0  ;;  %v9508_v59 = vld [vmem:[#allocation2 + $0x70] sm:$0xff] }
 0x194   : > { %v1793_v33 = vadd.f32 %v7228_v27, %v10181_v52  ;;  %v1662_v22 = vpop.f32.mrb[63].mxu1  ;;  %v5784_v4 = vshll.u32 %v9508_v59, 16  ;;  %v10186_v27 = vld [vmem:[#allocation8_spill] sm:$0xff]  ;;  %v5774_v10 = vrot.slane %v5772_v53, 4 }
 0x195   : > { %v1791_v9 = vadd.f32 %v1662_v22, %v10182_v5  ;;  %7646 = vmatmul.mubr.bf16.gmra.mrb[176].mxu0 %v5743_v60  ;;  %v9513_v32 = vadd.f32 %v9437_v13, %v1790_v30  ;;  %v5781_v22 = vshrl.u32 %v9508_v59, 16  ;;  %v5159_v13 = vrot.slane %v9413_v57, 4 }
 0x196   : > { %7574 = vmatmul.mubr.bf16.vlgmr.msra.gmra.mrb[168].mxu1 %v5154_v23  ;;  %7649 = vmatprep.mubr.bf16.mxu0 %v5752_v18  ;;  %v9518_v63 = vadd.f32 %v9440_v7, %v1793_v33  ;;  %v5777_v33 = vrot.slane %v5775_v34, 5  ;;  %v5770_v57 = vsel %vm1892_vm1, %v5760_v41, %v5769_v50  ;;  %v5786_v46 = vrot.slane %v5784_v4, 5 }
 0x197   : > { %10183 = vst [vmem:[#allocation23_spill] sm:$0xff] %v9513_v32  ;;  %7577 = vmatprep.mubr.bf16.mxu1 %v5156_v58  ;;  %v9523_v60 = vadd.f32 %v9444_v25, %v1791_v9  ;;  %v10187_v58 = vld [vmem:[#allocation10_spill] sm:$0xff]  ;;  %v5161_v41 = vrot.slane %v9447_v40, 4 }
 0x198   : > { %10184 = vst [vmem:[#allocation5_spill] sm:$0xff] %v9518_v63  ;;  %v7383_v23 = vpop.f32.mrb[72].mxu0  ;;  %v5778_v53 = vor.u32 %v5777_v33, %v5774_v10  ;;  %v5801_v33 = vrot.slane %v9120_v28, 4 }
 0x199   : > { %10185 = vst [vmem:[#allocation4_spill] sm:$0xff] %v9523_v60  ;;  %v7231_v49 = vpop.f32.mrb[64].mxu1  ;;  %v9527_v30 = vpop.f32.mrb[73].mxu0  ;;  %v5783_v23 = vrot.slane %v5781_v22, 4  ;;  %v10188_v60 = vld [vmem:[#allocation25_spill] sm:$0xff] }
 0x19a   : > { %v1796_v7 = vadd.f32 %v7231_v49, %v10186_v27  ;;  %v1675_v18 = vpop.f32.mrb[65].mxu1  ;;  %v9530_v52 = vpop.f32.mrb[74].mxu0  ;;  %v5160_v49 = vsel %vm1359_vm2, %v5157_v24, %v5159_v13 }
 0x19b   : > { %v1794_v25 = vadd.f32 %v1675_v18, %v10187_v58  ;;  %v7232_v5 = vpop.f32.mrb[66].mxu1  ;;  %v9534_v9 = vpop.f32.mrb[75].mxu0  ;;  %v5787_v22 = vor.u32 %v5786_v46, %v5783_v23  ;;  %v5779_v18 = vsel %vm1892_vm1, %v5769_v50, %v5778_v53  ;;  %v5804_v58 = vrot.slane %v9122_v15, 5  ;;  %v10190_v50 = vld [vmem:[#allocation13_spill] sm:$0xff] }
 0x19c   : > { %v1797_v63 = vadd.f32 %v7232_v5, %v10188_v60  ;;  %v1678_v32 = vpop.f32.mrb[67].mxu1  ;;  %v9540_v27 = vadd.f32 %v9468_v54, %v1796_v7  ;;  %v10189_v60 = vld [vmem:[#allocation12_spill] sm:$0xff]  ;;  %v5167_v15 = vrot.slane %v9481_v12, 4 }
 0x19d   : > { %7650 = vmatmul.mubr.bf16.gmra.mrb[180].mxu0 %v5761_v47  ;;  %v9543_v26 = vadd.f32 %v9470_v16, %v1794_v25  ;;  %v5163_v32 = vrot.slane %v9451_v0, 4  ;;  %v5162_v47 = vsel %vm1359_vm2, %v5159_v13, %v5161_v41  ;;  %v5788_v10 = vsel %vm1892_vm1, %v5778_v53, %v5787_v22 }
 0x19e   : > { %7578 = vmatmul.mubr.bf16.gmra.mrb[172].mxu1 %v5158_v42  ;;  %7653 = vmatprep.mubr.bf16.mxu0 %v5770_v57  ;;  %v9546_v34 = vadd.f32 %v9473_v44, %v1797_v63  ;;  %v5792_v44 = vrot.slane %v9115_v61, 4  ;;  %v5795_v63 = vrot.slane %v9117_v62, 5  ;;  %v5165_v62 = vrot.slane %v9478_v35, 4 }
 0x19f   : > { %7581 = vmatprep.mubr.bf16.mxu1 %v5160_v49  ;;  %v5164_v5 = vsel %vm1359_vm2, %v5161_v41, %v5163_v32  ;;  %v5805_v23 = vor.u32 %v5804_v58, %v5801_v33  ;;  %v5810_v35 = vrot.slane %v9147_v19, 4 }
 0x1a0   : > { %v9550_v24 = vpop.f32.mrb[76].mxu0  ;;  %v5796_v13 = vor.u32 %v5795_v63, %v5792_v44  ;;  %v5166_v41 = vsel %vm1359_vm2, %v5163_v32, %v5165_v62  ;;  %v5819_v44 = vrot.slane %v9152_v56, 4  ;;  %v5822_v63 = vrot.slane %v9154_v17, 5 }
 0x1a1   : > { %v7235_v54 = vpop.f32.mrb[68].mxu1  ;;  %v9552_v4 = vpop.f32.mrb[77].mxu0 }
 0x1a2   : > { %v1800_v16 = vadd.f32 %v7235_v54, %v10189_v60  ;;  %v1691_v7 = vpop.f32.mrb[69].mxu1  ;;  %v9555_v42 = vpop.f32.mrb[78].mxu0  ;;  %v5797_v60 = vsel %vm1892_vm1, %v5787_v22, %v5796_v13  ;;  %v5806_v12 = vsel %vm1892_vm1, %v5796_v13, %v5805_v23  ;;  %v5168_v22 = vsel %vm1359_vm2, %v5165_v62, %v5167_v15 }
 0x1a3   : > { %v7236_v40 = vpop.f32.mrb[70].mxu1  ;;  %v3380_v0 = vpop.f32.mrb[79].mxu0  ;;  %v5823_v17 = vor.u32 %v5822_v63, %v5819_v44 }
 0x1a4   : > { %v1694_v25 = vpop.f32.mrb[71].mxu1  ;;  %v9566_v57 = vadd.f32 %v9496_v39, %v1800_v16  ;;  %v5813_v16 = vrot.slane %v9149_v45, 5  ;;  %v5169_v45 = vrot.slane %v9504_v36, 4  ;;  %v5171_v0 = vrot.slane %v9508_v59, 4 }
 0x1a5   : > { %v1799_v61 = vadd.f32 %v1694_v25, %v10190_v50  ;;  %7654 = vmatmul.mubr.bf16.gmra.mrb[184].mxu0 %v5779_v18 }
 0x1a6   : > { %7582 = vmatmul.mubr.bf16.gmra.mrb[176].mxu1 %v5162_v47  ;;  %7657 = vmatprep.mubr.bf16.mxu0 %v5788_v10  ;;  %v5814_v47 = vor.u32 %v5813_v16, %v5810_v35  ;;  %v5170_v36 = vsel %vm1359_vm2, %v5167_v15, %v5169_v45 }
 0x1a7   : > { %7585 = vmatprep.mubr.bf16.mxu1 %v5164_v5  ;;  %v9571_v28 = vadd.f32 %v9501_v1, %v1799_v61  ;;  %v10191_v5 = vshrl.u32 %v9257_v21, 16 }
 0x1a8   : > { %v9574_v46 = vpop.f32.mrb[80].mxu0  ;;  %v5824_v15 = vsel %vm1892_vm1, %v5814_v47, %v5823_v17 }
 0x1a9   : > { %v7319_v49 = vpop.f32.mrb[72].mxu1  ;;  %v3393_v39 = vpop.f32.mrb[81].mxu0  ;;  %v5828_v50 = vrot.slane %v10191_v5, 4 }
 0x1aa   : > { %v2903_v53 = vpop.f32.mrb[73].mxu1  ;;  %v7392_v54 = vpop.f32.mrb[82].mxu0  ;;  %v10194_v39 = vshll.u32 %v9296_v48, 16 }
 0x1ab   : > { %v3142_v7 = vadd.f32 %v2903_v53, %v9181_v55  ;;  %v7320_v1 = vpop.f32.mrb[74].mxu1  ;;  %v9581_v18 = vpop.f32.mrb[83].mxu0  ;;  %v5172_v54 = vsel %vm1359_vm2, %v5169_v45, %v5171_v0  ;;  %v10195_v45 = vshrl.u32 %v9312_v6, 16 }
 0x1ac   : > { %v3145_v32 = vadd.f32 %v7320_v1, %v9185_v51  ;;  %v2906_v40 = vpop.f32.mrb[75].mxu1  ;;  %v5840_v53 = vrot.slane %v10194_v39, 5  ;;  %v7787_v39 = vld [vmem:[#allocation2 + $0x90] sm:$0xff] }
 0x1ad   : > { %v3143_v19 = vadd.f32 %v2906_v40, %v9189_v31  ;;  %7658 = vmatmul.mubr.bf16.gmra.mrb[188].mxu0 %v5797_v60  ;;  %v9591_v55 = vadd.f32 %v9527_v30, %v3142_v7  ;;  %v5095_v60 = vld [vmem:[#allocation2 + $0x78] sm:$0xff] }
 0x1ae   : > { %7586 = vmatmul.mubr.bf16.gmra.mrb[180].mxu1 %v5166_v41  ;;  %7661 = vmatprep.mubr.bf16.mxu0 %v5806_v12  ;;  %v9594_v56 = vadd.f32 %v9530_v52, %v3145_v32  ;;  %v5815_v52 = vsel %vm1892_vm1, %v5805_v23, %v5814_v47  ;;  %v10196_v47 = vshll.u32 %v9312_v6, 16 }
 0x1af   : > { %7589 = vmatprep.mubr.bf16.mxu1 %v5168_v22  ;;  %v9597_v51 = vadd.f32 %v9534_v9, %v3143_v19  ;;  %v10192_v9 = vshll.u32 %v9257_v21, 16 }
 0x1b0   : > { %v7395_v31 = vpop.f32.mrb[84].mxu0 }
 0x1b1   : > { %v7323_v10 = vpop.f32.mrb[76].mxu1  ;;  %v9601_v33 = vpop.f32.mrb[85].mxu0  ;;  %v5831_v61 = vrot.slane %v10192_v9, 5  ;;  %v5849_v31 = vrot.slane %v10196_v47, 5 }
 0x1b2   : > { %v3148_v30 = vadd.f32 %v7323_v10, %v9217_v43  ;;  %v2919_v58 = vpop.f32.mrb[77].mxu1  ;;  %v9604_v25 = vpop.f32.mrb[86].mxu0  ;;  %v10193_v43 = vshrl.u32 %v9296_v48, 16 }
 0x1b3   : > { %v3146_v59 = vadd.f32 %v2919_v58, %v9220_v37  ;;  %v7324_v62 = vpop.f32.mrb[78].mxu1  ;;  %v9612_v13 = vpop.f32.mrb[87].mxu0  ;;  %v5096_v37 = vld [vmem:[#allocation2 + $0x80] sm:$0xff]  ;;  %v5832_v7 = vor.u32 %v5831_v61, %v5828_v50  ;;  %v10198_v50 = vshll.u32 %v9343_v3, 16 }
 0x1b4   : > { %v5837_v49 = vrot.slane %v10193_v43, 4  ;;  %v3149_v23 = vadd.f32 %v7324_v62, %v9225_v38  ;;  %v2922_v41 = vpop.f32.mrb[79].mxu1  ;;  %v9622_v35 = vadd.f32 %v9550_v24, %v3148_v30  ;;  %v5173_v38 = vrot.slane %v5095_v60, 4  ;;  %v5097_v30 = vld [vmem:[#allocation2 + $0x88] sm:$0xff] }
 0x1b5   : > { %7662 = vmatmul.mubr.bf16.gmra.mrb[192].mxu0 %v5815_v52  ;;  %v9625_v16 = vadd.f32 %v9552_v4, %v3146_v59  ;;  %v5175_v44 = vrot.slane %v5096_v37, 4  ;;  %v5833_v19 = vsel %vm1892_vm1, %v5823_v17, %v5832_v7  ;;  %v5858_v9 = vrot.slane %v10198_v50, 5 }
 0x1b6   : > { %7590 = vmatmul.mubr.bf16.gmra.mrb[184].mxu1 %v5170_v36  ;;  %7665 = vmatprep.mubr.bf16.mxu0 %v5824_v15  ;;  %v9628_v1 = vadd.f32 %v9555_v42, %v3149_v23  ;;  %v5841_v12 = vor.u32 %v5840_v53, %v5837_v49  ;;  %v5846_v42 = vrot.slane %v10195_v45, 4  ;;  %v5174_v36 = vsel %vm1359_vm2, %v5171_v0, %v5173_v38 }
 0x1b7   : > { %7593 = vmatprep.mubr.bf16.mxu1 %v5172_v54  ;;  %v5176_v61 = vsel %vm1359_vm2, %v5173_v38, %v5175_v44  ;;  %v5177_v0 = vrot.slane %v5097_v30, 4  ;;  %v5179_v53 = vrot.slane %v7787_v39, 4 }
 0x1b8   : > { %v9630_v63 = vpop.f32.mrb[88].mxu0  ;;  %v5842_v52 = vsel %vm1892_vm1, %v5832_v7, %v5841_v12  ;;  %v5850_v15 = vor.u32 %v5849_v31, %v5846_v42  ;;  %v10199_v7 = vshrl.u32 %v9362_v20, 16  ;;  %v10201_v42 = vld [vmem:[#allocation27_spill] sm:$0xff] }
 0x1b9   : > { %v7327_v32 = vpop.f32.mrb[80].mxu1  ;;  %v9632_v24 = vpop.f32.mrb[89].mxu0  ;;  %v5178_v60 = vsel %vm1359_vm2, %v5175_v44, %v5177_v0  ;;  %v10202_v47 = vshrl.u32 %v10201_v42, 16  ;;  %v10203_v44 = vshll.u32 %v10201_v42, 16 }
 0x1ba   : > { %v3152_v40 = vadd.f32 %v7327_v32, %v9252_v14  ;;  %v2935_v22 = vpop.f32.mrb[81].mxu1  ;;  %v9635_v4 = vpop.f32.mrb[90].mxu0  ;;  %v10197_v14 = vshrl.u32 %v9343_v3, 16  ;;  %v5851_v37 = vsel %vm1892_vm1, %v5841_v12, %v5850_v15  ;;  %v5864_v38 = vrot.slane %v10199_v7, 4  ;;  %v10204_v12 = vld [vmem:[#allocation15_spill] sm:$0xff] }
 0x1bb   : > { %v7328_v10 = vpop.f32.mrb[82].mxu1  ;;  %v3428_v58 = vpop.f32.mrb[91].mxu0  ;;  %v10200_v32 = vshll.u32 %v9362_v20, 16  ;;  %v5873_v31 = vrot.slane %v10202_v47, 4  ;;  %v5664_v47 = vld [vmem:[#allocation2 + $0xd8] sm:$0x1f] }
 0x1bc   : > { %v5855_v5 = vrot.slane %v10197_v14, 4  ;;  %v2938_v17 = vpop.f32.mrb[83].mxu1  ;;  %v9650_v59 = vadd.f32 %v9574_v46, %v3152_v40  ;;  %v5876_v10 = vrot.slane %v10203_v44, 5  ;;  %v5180_v58 = vsel %vm1359_vm2, %v5177_v0, %v5179_v53 }
 0x1bd   : > { %v3151_v62 = vadd.f32 %v2938_v17, %v9260_v11  ;;  %7666 = vmatmul.mubr.bf16.gmra.mrb[196].mxu0 %v5833_v19  ;;  %v5867_v40 = vrot.slane %v10200_v32, 5  ;;  %v10209_v32 = vld [vmem:[#allocation7_spill] sm:$0xff] }
 0x1be   : > { %7594 = vmatmul.mubr.bf16.gmra.mrb[188].mxu1 %v5174_v36  ;;  %7669 = vmatprep.mubr.bf16.mxu0 %v5842_v52  ;;  %v5859_v43 = vor.u32 %v5858_v9, %v5855_v5  ;;  %v10205_v52 = vld [vmem:[#allocation9_spill] sm:$0xff]  ;;  %v5877_v17 = vor.u32 %v5876_v10, %v5873_v31  ;;  %v10212_v31 = vld [vmem:[#allocation16_spill] sm:$0xff] }
 0x1bf   : > { %7597 = vmatprep.mubr.bf16.mxu1 %v5176_v61  ;;  %v9654_v49 = vadd.f32 %v9581_v18, %v3151_v62  ;;  %v5868_v50 = vor.u32 %v5867_v40, %v5864_v38  ;;  %v5183_v62 = vrot.slane %v9296_v48, 4  ;;  %v10210_v40 = vshrl.u32 %v10209_v32, 16 }
 0x1c0   : > { %v9656_v23 = vpop.f32.mrb[92].mxu0  ;;  %v5860_v45 = vsel %vm1892_vm1, %v5850_v15, %v5859_v43 }
 0x1c1   : > { %v7331_v41 = vpop.f32.mrb[84].mxu1  ;;  %v3441_v54 = vpop.f32.mrb[93].mxu0 }
 0x1c2   : > { %v2951_v46 = vpop.f32.mrb[85].mxu1  ;;  %v7404_v11 = vpop.f32.mrb[94].mxu0 }
 0x1c3   : > { %v3154_v18 = vadd.f32 %v2951_v46, %v9291_v8  ;;  %v7332_v22 = vpop.f32.mrb[86].mxu1  ;;  %v9665_v19 = vpop.f32.mrb[95].mxu0  ;;  %v5181_v8 = vrot.slane %v9257_v21, 4  ;;  %v10207_v11 = vld [vmem:[#allocation6_spill] sm:$0xff] }
 0x1c4   : > { %v3157_v36 = vadd.f32 %v7332_v22, %v10204_v12  ;;  %v2954_v30 = vpop.f32.mrb[87].mxu1  ;;  %v10211_v22 = vshll.u32 %v10209_v32, 16 }
 0x1c5   : > { %v3155_v14 = vadd.f32 %v2954_v30, %v10205_v52  ;;  %7670 = vmatmul.mubr.bf16.gmra.mrb[200].mxu0 %v5851_v37  ;;  %v9677_v5 = vadd.f32 %v9601_v33, %v3154_v18  ;;  %v5182_v21 = vsel %vm1359_vm2, %v5179_v53, %v5181_v8  ;;  %v10206_v33 = vld [vmem:[#allocation11_spill] sm:$0xff]  ;;  %v10208_v37 = vld [vmem:[#allocation14_spill] sm:$0xff]  ;;  %v5878_v53 = vsel %vm1892_vm1, %v5868_v50, %v5877_v17 }
 0x1c6   : > { %7598 = vmatmul.mubr.bf16.gmra.mrb[192].mxu1 %v5178_v60  ;;  %7673 = vmatprep.mubr.bf16.mxu0 %v5860_v45  ;;  %v9680_v9 = vadd.f32 %v9604_v25, %v3157_v36  ;;  %v5869_v25 = vsel %vm1892_vm1, %v5859_v43, %v5868_v50  ;;  %v5882_v60 = vrot.slane %v9286_v29, 4  ;;  %v5891_v18 = vrot.slane %v10210_v40, 4 }
 0x1c7   : > { %7601 = vmatprep.mubr.bf16.mxu1 %v5180_v58  ;;  %v9683_v61 = vadd.f32 %v9612_v13, %v3155_v14  ;;  %v5885_v13 = vrot.slane %v10207_v11, 5  ;;  %v5894_v45 = vrot.slane %v10211_v22, 5  ;;  %v5184_v29 = vsel %vm1359_vm2, %v5181_v8, %v5183_v62 }
 0x1c8   : > { %v7407_v0 = vpop.f32.mrb[96].mxu0  ;;  %v5898_v30 = vshrl.u32 %v5664_v47, 16  ;;  %v5901_v58 = vshll.u32 %v5664_v47, 16  ;;  %v5185_v14 = vrot.slane %v9312_v6, 4  ;;  %v5187_v8 = vrot.slane %v9343_v3, 4 }
 0x1c9   : > { %v7335_v15 = vpop.f32.mrb[88].mxu1  ;;  %v9687_v39 = vpop.f32.mrb[97].mxu0  ;;  %v5886_v36 = vor.u32 %v5885_v13, %v5882_v60  ;;  %v5895_v50 = vor.u32 %v5894_v45, %v5891_v18  ;;  %v5189_v40 = vrot.slane %v9362_v20, 4  ;;  %v5191_v18 = vrot.slane %v10201_v42, 4 }
 0x1ca   : > { %v3160_v41 = vadd.f32 %v7335_v15, %v10206_v33  ;;  %v2967_v54 = vpop.f32.mrb[89].mxu1  ;;  %v9690_v46 = vpop.f32.mrb[98].mxu0  ;;  %v10213_v33 = vld [vmem:[#allocation26_spill] sm:$0xff]  ;;  %v5903_v60 = vrot.slane %v5901_v58, 5  ;;  %v5188_v3 = vsel %vm1359_vm2, %v5185_v14, %v5187_v8 }
 0x1cb   : > { %v3158_v7 = vadd.f32 %v2967_v54, %v10208_v37  ;;  %v7336_v48 = vpop.f32.mrb[90].mxu1  ;;  %v9696_v38 = vpop.f32.mrb[99].mxu0  ;;  %v5887_v54 = vsel %vm1892_vm1, %v5877_v17, %v5886_v36  ;;  %v5896_v6 = vsel %vm1892_vm1, %v5886_v36, %v5895_v50 }
 0x1cc   : > { %v3161_v43 = vadd.f32 %v7336_v48, %v10212_v31  ;;  %v2970_v44 = vpop.f32.mrb[91].mxu1  ;;  %v9706_v10 = vadd.f32 %v9630_v63, %v3160_v41  ;;  %v10214_v48 = vld [vmem:[#allocation28_spill] sm:$0xff] }
 0x1cd   : > { %7674 = vmatmul.mubr.bf16.gmra.mrb[204].mxu0 %v5869_v25  ;;  %v9709_v12 = vadd.f32 %v9632_v24, %v3158_v7  ;;  %v5900_v25 = vrot.slane %v5898_v30, 4  ;;  %v10215_v44 = vld [vmem:[#allocation17_spill] sm:$0xff]  ;;  %v5190_v30 = vsel %vm1359_vm2, %v5187_v8, %v5189_v40 }
 0x1ce   : > { %7602 = vmatmul.mubr.bf16.gmra.mrb[196].mxu1 %v5182_v21  ;;  %7677 = vmatprep.mubr.bf16.mxu0 %v5878_v53  ;;  %v9712_v52 = vadd.f32 %v9635_v4, %v3161_v43  ;;  %v5186_v4 = vsel %vm1359_vm2, %v5183_v62, %v5185_v14  ;;  %v10216_v14 = vld [vmem:[#allocation18_spill] sm:$0xff] }
 0x1cf   : > { %7605 = vmatprep.mubr.bf16.mxu1 %v5184_v29  ;;  %v5904_v17 = vor.u32 %v5903_v60, %v5900_v25  ;;  %v5195_v25 = vrot.slane %v10209_v32, 4 }
 0x1d0   : > { %v7411_v63 = vpop.f32.mrb[100].mxu0 }
 0x1d1   : > { %v7339_v0 = vpop.f32.mrb[92].mxu1  ;;  %v3473_v15 = vpop.f32.mrb[101].mxu0  ;;  %v5905_v43 = vsel %vm1892_vm1, %v5895_v50, %v5904_v17  ;;  %v10219_v17 = vld [vmem:[#allocation20_spill] sm:$0xff] }
 0x1d2   : > { %v3164_v24 = vadd.f32 %v7339_v0, %v10213_v33  ;;  %v2983_v41 = vpop.f32.mrb[93].mxu1  ;;  %v7412_v21 = vpop.f32.mrb[102].mxu0  ;;  %v10217_v33 = vld [vmem:[#allocation29_spill] sm:$0xff] }
 0x1d3   : > { %v7340_v11 = vpop.f32.mrb[94].mxu1  ;;  %v3476_v13 = vpop.f32.mrb[103].mxu0  ;;  %v7788_v41 = vld [vmem:[#allocation2 + $0xc8] sm:$0xff] }
 0x1d4   : > { %v2986_v37 = vpop.f32.mrb[95].mxu1  ;;  %v9722_v7 = vadd.f32 %v9656_v23, %v3164_v24 }
 0x1d5   : > { %v3163_v53 = vadd.f32 %v2986_v37, %v10214_v48  ;;  %7678 = vmatmul.mubr.bf16.gmra.mrb[208].mxu0 %v5887_v54  ;;  %v5193_v54 = vrot.slane %v7788_v41, 4  ;;  %v10218_v37 = vld [vmem:[#allocation19_spill] sm:$0xff] }
 0x1d6   : > { %7606 = vmatmul.mubr.bf16.gmra.mrb[200].mxu1 %v5186_v4  ;;  %7681 = vmatprep.mubr.bf16.mxu0 %v5896_v6 }
 0x1d7   : > { %7609 = vmatprep.mubr.bf16.mxu1 %v5188_v3  ;;  %v9727_v62 = vadd.f32 %v9665_v19, %v3163_v53  ;;  %v5192_v19 = vsel %vm1359_vm2, %v5189_v40, %v5191_v18 }
 0x1d8   : > { %v7415_v22 = vpop.f32.mrb[104].mxu0 }
 0x1d9   : > { %v7343_v45 = vpop.f32.mrb[96].mxu1  ;;  %v3489_v47 = vpop.f32.mrb[105].mxu0 }
 0x1da   : > { %v2999_v31 = vpop.f32.mrb[97].mxu1  ;;  %v7416_v23 = vpop.f32.mrb[106].mxu0  ;;  %v5107_v47 = vld [vmem:[#allocation2 + $0xd8] sm:$0xf] }
 0x1db   : > { %v3166_v29 = vadd.f32 %v2999_v31, %v10215_v44  ;;  %v7344_v36 = vpop.f32.mrb[98].mxu1  ;;  %v3492_v58 = vpop.f32.mrb[107].mxu0  ;;  %v5197_v23 = vrot.slane %v5107_v47, 4 }
 0x1dc   : > { %v3169_v20 = vadd.f32 %v7344_v36, %v10216_v14  ;;  %v3002_v0 = vpop.f32.mrb[99].mxu1 }
 0x1dd   : > { %v3167_v42 = vadd.f32 %v3002_v0, %v10217_v33  ;;  %7682 = vmatmul.mubr.bf16.gmra.mrb[212].mxu0 %v5905_v43  ;;  %v9737_v24 = vadd.f32 %v9687_v39, %v3166_v29  ;;  %v5198_v0 = vsel %vm1359_vm2, %v5195_v25, %v5197_v23 }
 0x1de   : > { %7610 = vmatmul.mubr.bf16.gmra.mrb[204].mxu1 %v5190_v30  ;;  %v9740_v50 = vadd.f32 %v9690_v46, %v3169_v20  ;;  %v5194_v46 = vsel %vm1359_vm2, %v5191_v18, %v5193_v54  ;;  %v10220_v18 = vld [vmem:[#allocation21_spill] sm:$0xff] }
 0x1df   : > { %7613 = vmatprep.mubr.bf16.mxu1 %v5192_v19  ;;  %v9743_v8 = vadd.f32 %v9696_v38, %v3167_v42  ;;  %v5196_v38 = vsel %vm1359_vm2, %v5193_v54, %v5195_v25 }
 0x1e0   : > { %v7419_v60 = vpop.f32.mrb[108].mxu0 }
 0x1e1   : > { %v7347_v11 = vpop.f32.mrb[100].mxu1  ;;  %v3505_v4 = vpop.f32.mrb[109].mxu0 }
 0x1e2   : > { %v3172_v13 = vadd.f32 %v7347_v11, %v9454_v2  ;;  %v3015_v6 = vpop.f32.mrb[101].mxu1  ;;  %v7420_v39 = vpop.f32.mrb[110].mxu0 }
 0x1e3   : > { %v3170_v3 = vadd.f32 %v3015_v6, %v10218_v37  ;;  %v7348_v48 = vpop.f32.mrb[102].mxu1  ;;  %v3508_v53 = vpop.f32.mrb[111].mxu0  ;;  %v10222_v6 = vld [vmem:[#allocation23_spill] sm:$0xff] }
 0x1e4   : > { %v3173_v40 = vadd.f32 %v7348_v48, %v10219_v17  ;;  %v3018_v45 = vpop.f32.mrb[103].mxu1  ;;  %v9751_v32 = vadd.f32 %v7411_v63, %v3172_v13 }
 0x1e5   : > { %v9753_v31 = vadd.f32 %v3473_v15, %v3170_v3  ;;  %v10221_v15 = vld [vmem:[#allocation22_spill] sm:$0xff] }
 0x1e6   : > { %7614 = vmatmul.mubr.bf16.gmra.mrb[208].mxu1 %v5194_v46  ;;  %v9755_v2 = vadd.f32 %v7412_v21, %v3173_v40  ;;  %v10223_v46 = vld [vmem:[#allocation5_spill] sm:$0xff]  ;;  %v10224_v40 = vld [vmem:[#allocation4_spill] sm:$0xff] }
 0x1e7   : > { %7617 = vmatprep.mubr.bf16.mxu1 %v5196_v38 }
 0x1e8   : > { %v7423_v43 = vpop.f32.mrb[112].mxu0 }
 0x1e9   : > { %v7351_v44 = vpop.f32.mrb[104].mxu1  ;;  %v3521_v29 = vpop.f32.mrb[113].mxu0 }
 0x1ea   : > { %v3176_v36 = vadd.f32 %v7351_v44, %v10220_v18  ;;  %v3031_v30 = vpop.f32.mrb[105].mxu1  ;;  %v7424_v14 = vpop.f32.mrb[114].mxu0 }
 0x1eb   : > { %v7352_v20 = vpop.f32.mrb[106].mxu1  ;;  %v3524_v19 = vpop.f32.mrb[115].mxu0 }
 0x1ec   : > { %v3034_v63 = vpop.f32.mrb[107].mxu1  ;;  %v9759_v33 = vadd.f32 %v7415_v22, %v3176_v36 }
 0x1ed   : > { %v3175_v42 = vadd.f32 %v3034_v63, %v10221_v15 }
 0x1ee   : > { %7618 = vmatmul.mubr.bf16.gmra.mrb[212].mxu1 %v5198_v0 }
 0x1ef   : > { %v9762_v21 = vadd.f32 %v3492_v58, %v3175_v42 }
 0x1f0   : > { %v7427_v41 = vpop.f32.mrb[116].mxu0 }
 0x1f1   : > { %v7355_v54 = vpop.f32.mrb[108].mxu1  ;;  %v3537_v60 = vpop.f32.mrb[117].mxu0 }
 0x1f2   : > { %v3047_v11 = vpop.f32.mrb[109].mxu1  ;;  %v7428_v13 = vpop.f32.mrb[118].mxu0 }
 0x1f3   : > { %v3178_v37 = vadd.f32 %v3047_v11, %v10222_v6  ;;  %v7356_v3 = vpop.f32.mrb[110].mxu1  ;;  %v3540_v48 = vpop.f32.mrb[119].mxu0 }
 0x1f4   : > { %v3181_v25 = vadd.f32 %v7356_v3, %v10223_v46  ;;  %v3050_v17 = vpop.f32.mrb[111].mxu1 }
 0x1f5   : > { %v3179_v22 = vadd.f32 %v3050_v17, %v10224_v40  ;;  %v9767_v45 = vadd.f32 %v3505_v4, %v3178_v37 }
 0x1f6   : > { %v9769_v38 = vadd.f32 %v7420_v39, %v3181_v25 }
 0x1f7   : > { %v9771_v58 = vadd.f32 %v3508_v53, %v3179_v22 }
 0x1f8   : > { %v7511_v47 = vpop.f32.mrb[120].mxu0 }
 0x1f9   : > { %v7359_v23 = vpop.f32.mrb[112].mxu1  ;;  %v4748_v44 = vpop.f32.mrb[121].mxu0 }
 0x1fa   : > { %v3184_v18 = vadd.f32 %v7359_v23, %v9540_v27  ;;  %v3063_v36 = vpop.f32.mrb[113].mxu1  ;;  %v7512_v30 = vpop.f32.mrb[122].mxu0 }
 0x1fb   : > { %v3182_v20 = vadd.f32 %v3063_v36, %v9543_v26  ;;  %v7360_v0 = vpop.f32.mrb[114].mxu1  ;;  %v4751_v19 = vpop.f32.mrb[123].mxu0 }
 0x1fc   : > { %v3185_v63 = vadd.f32 %v7360_v0, %v9546_v34  ;;  %v3066_v15 = vpop.f32.mrb[115].mxu1  ;;  %v9776_v4 = vadd.f32 %v7423_v43, %v3184_v18 }
 0x1fd   : > { %v9778_v39 = vadd.f32 %v3521_v29, %v3182_v20 }
 0x1fe   : > { %v9780_v53 = vadd.f32 %v7424_v14, %v3185_v63 }
 0x200   : > { %v7515_v42 = vpop.f32.mrb[124].mxu0 }
 0x201   : > { %v7363_v54 = vpop.f32.mrb[116].mxu1  ;;  %v4764_v60 = vpop.f32.mrb[125].mxu0 }
 0x202   : > { %v3188_v27 = vadd.f32 %v7363_v54, %v9566_v57  ;;  %v3079_v11 = vpop.f32.mrb[117].mxu1  ;;  %v7516_v13 = vpop.f32.mrb[126].mxu0 }
 0x203   : > { %v7364_v6 = vpop.f32.mrb[118].mxu1  ;;  %v4767_v26 = vpop.f32.mrb[127].mxu0 }
 0x204   : > { %v3082_v37 = vpop.f32.mrb[119].mxu1  ;;  %v9783_v3 = vadd.f32 %v7427_v41, %v3188_v27 }
 0x205   : > { %v3187_v34 = vadd.f32 %v3082_v37, %v9571_v28 }
 0x207   : > { %v9786_v43 = vadd.f32 %v3540_v48, %v3187_v34 }
 0x208   : > { %v7519_v29 = vpop.f32.mrb[128].mxu0 }
 0x209   : > { %v7447_v46 = vpop.f32.mrb[120].mxu1  ;;  %v4780_v14 = vpop.f32.mrb[129].mxu0 }
 0x20a   : > { %v4041_v25 = vpop.f32.mrb[121].mxu1  ;;  %v7520_v17 = vpop.f32.mrb[130].mxu0 }
 0x20b   : > { %v4280_v40 = vadd.f32 %v4041_v25, %v9591_v55  ;;  %v7448_v22 = vpop.f32.mrb[122].mxu1  ;;  %v4783_v57 = vpop.f32.mrb[131].mxu0 }
 0x20c   : > { %v4283_v47 = vadd.f32 %v7448_v22, %v9594_v56  ;;  %v4044_v23 = vpop.f32.mrb[123].mxu1 }
 0x20d   : > { %v4281_v18 = vadd.f32 %v4044_v23, %v9597_v51  ;;  %v9791_v41 = vadd.f32 %v4748_v44, %v4280_v40 }
 0x20e   : > { %v9793_v36 = vadd.f32 %v7512_v30, %v4283_v47 }
 0x20f   : > { %v9795_v28 = vadd.f32 %v4751_v19, %v4281_v18 }
 0x210   : > { %v7523_v48 = vpop.f32.mrb[132].mxu0 }
 0x211   : > { %v7451_v20 = vpop.f32.mrb[124].mxu1  ;;  %v4796_v0 = vpop.f32.mrb[133].mxu0 }
 0x212   : > { %v4286_v63 = vadd.f32 %v7451_v20, %v9622_v35  ;;  %v4057_v15 = vpop.f32.mrb[125].mxu1  ;;  %v7524_v55 = vpop.f32.mrb[134].mxu0 }
 0x213   : > { %v4284_v54 = vadd.f32 %v4057_v15, %v9625_v16  ;;  %v7452_v27 = vpop.f32.mrb[126].mxu1  ;;  %v4799_v56 = vpop.f32.mrb[135].mxu0 }
 0x214   : > { %v4287_v11 = vadd.f32 %v7452_v27, %v9628_v1  ;;  %v4060_v51 = vpop.f32.mrb[127].mxu1  ;;  %v9800_v44 = vadd.f32 %v7515_v42, %v4286_v63 }
 0x215   : > { %v9802_v30 = vadd.f32 %v4764_v60, %v4284_v54 }
 0x216   : > { %v9804_v19 = vadd.f32 %v7516_v13, %v4287_v11 }
 0x218   : > { %v7527_v6 = vpop.f32.mrb[136].mxu0 }
 0x219   : > { %v7455_v26 = vpop.f32.mrb[128].mxu1  ;;  %v4812_v37 = vpop.f32.mrb[137].mxu0 }
 0x21a   : > { %v4290_v35 = vadd.f32 %v7455_v26, %v9650_v59  ;;  %v4073_v34 = vpop.f32.mrb[129].mxu1  ;;  %v7528_v46 = vpop.f32.mrb[138].mxu0 }
 0x21b   : > { %v7456_v14 = vpop.f32.mrb[130].mxu1  ;;  %v4815_v16 = vpop.f32.mrb[139].mxu0 }
 0x21c   : > { %v4076_v25 = vpop.f32.mrb[131].mxu1  ;;  %v9807_v17 = vadd.f32 %v7519_v29, %v4290_v35 }
 0x21d   : > { %v4289_v1 = vadd.f32 %v4076_v25, %v9654_v49 }
 0x21f   : > { %v9810_v42 = vadd.f32 %v4783_v57, %v4289_v1 }
 0x220   : > { %v7531_v60 = vpop.f32.mrb[140].mxu0 }
 0x221   : > { %v7459_v40 = vpop.f32.mrb[132].mxu1  ;;  %v4828_v13 = vpop.f32.mrb[141].mxu0 }
 0x222   : > { %v4089_v22 = vpop.f32.mrb[133].mxu1  ;;  %v7532_v47 = vpop.f32.mrb[142].mxu0 }
 0x223   : > { %v4292_v23 = vadd.f32 %v4089_v22, %v9677_v5  ;;  %v7460_v18 = vpop.f32.mrb[134].mxu1  ;;  %v4831_v59 = vpop.f32.mrb[143].mxu0 }
 0x224   : > { %v4295_v48 = vadd.f32 %v7460_v18, %v9680_v9  ;;  %v4092_v20 = vpop.f32.mrb[135].mxu1 }
 0x225   : > { %v4293_v63 = vadd.f32 %v4092_v20, %v9683_v61  ;;  %v9815_v29 = vadd.f32 %v4796_v0, %v4292_v23 }
 0x226   : > { %v9817_v15 = vadd.f32 %v7524_v55, %v4295_v48 }
 0x227   : > { %v9819_v49 = vadd.f32 %v4799_v56, %v4293_v63 }
 0x228   : > { %v7535_v57 = vpop.f32.mrb[144].mxu0 }
 0x229   : > { %v7463_v54 = vpop.f32.mrb[136].mxu1  ;;  %v4844_v27 = vpop.f32.mrb[145].mxu0 }
 0x22a   : > { %v4298_v11 = vadd.f32 %v7463_v54, %v9706_v10  ;;  %v4105_v51 = vpop.f32.mrb[137].mxu1  ;;  %v7536_v5 = vpop.f32.mrb[146].mxu0 }
 0x22b   : > { %v4296_v26 = vadd.f32 %v4105_v51, %v9709_v12  ;;  %v7464_v35 = vpop.f32.mrb[138].mxu1  ;;  %v4847_v9 = vpop.f32.mrb[147].mxu0 }
 0x22c   : > { %v4299_v34 = vadd.f32 %v7464_v35, %v9712_v52  ;;  %v4108_v61 = vpop.f32.mrb[139].mxu1  ;;  %v9824_v0 = vadd.f32 %v7527_v6, %v4298_v11 }
 0x22d   : > { %v9826_v55 = vadd.f32 %v4812_v37, %v4296_v26 }
 0x22e   : > { %v9828_v56 = vadd.f32 %v7528_v46, %v4299_v34 }
 0x230   : > { %v7539_v14 = vpop.f32.mrb[148].mxu0 }
 0x231   : > { %v7467_v16 = vpop.f32.mrb[140].mxu1  ;;  %v4860_v25 = vpop.f32.mrb[149].mxu0 }
 0x232   : > { %v4302_v10 = vadd.f32 %v7467_v16, %v9722_v7  ;;  %v4121_v1 = vpop.f32.mrb[141].mxu1  ;;  %v7540_v40 = vpop.f32.mrb[150].mxu0 }
 0x233   : > { %v7468_v13 = vpop.f32.mrb[142].mxu1  ;;  %v4863_v12 = vpop.f32.mrb[151].mxu0 }
 0x234   : > { %v4124_v22 = vpop.f32.mrb[143].mxu1  ;;  %v9831_v47 = vadd.f32 %v7531_v60, %v4302_v10 }
 0x235   : > { %v4301_v52 = vadd.f32 %v4124_v22, %v9727_v62 }
 0x237   : > { %v9834_v6 = vadd.f32 %v4831_v59, %v4301_v52 }
 0x238   : > { %v7543_v37 = vpop.f32.mrb[152].mxu0 }
 0x239   : > { %v7471_v23 = vpop.f32.mrb[144].mxu1  ;;  %v4876_v46 = vpop.f32.mrb[153].mxu0 }
 0x23a   : > { %v4137_v18 = vpop.f32.mrb[145].mxu1  ;;  %v7544_v48 = vpop.f32.mrb[154].mxu0 }
 0x23b   : > { %v4304_v20 = vadd.f32 %v4137_v18, %v9737_v24  ;;  %v7472_v63 = vpop.f32.mrb[146].mxu1  ;;  %v4879_v7 = vpop.f32.mrb[155].mxu0 }
 0x23c   : > { %v4307_v57 = vadd.f32 %v7472_v63, %v9740_v50  ;;  %v4140_v54 = vpop.f32.mrb[147].mxu1 }
 0x23d   : > { %v4305_v11 = vadd.f32 %v4140_v54, %v9743_v8  ;;  %v9839_v60 = vadd.f32 %v4844_v27, %v4304_v20 }
 0x23e   : > { %v9841_v51 = vadd.f32 %v7536_v5, %v4307_v57 }
 0x23f   : > { %v9843_v62 = vadd.f32 %v4847_v9, %v4305_v11 }
 0x240   : > { %v7547_v59 = vpop.f32.mrb[156].mxu0 }
 0x241   : > { %v7475_v26 = vpop.f32.mrb[148].mxu1  ;;  %v4892_v35 = vpop.f32.mrb[157].mxu0 }
 0x242   : > { %v4310_v34 = vadd.f32 %v7475_v26, %v9751_v32  ;;  %v4153_v24 = vpop.f32.mrb[149].mxu1  ;;  %v7548_v61 = vpop.f32.mrb[158].mxu0 }
 0x243   : > { %v4308_v16 = vadd.f32 %v4153_v24, %v9753_v31  ;;  %v7476_v50 = vpop.f32.mrb[150].mxu1  ;;  %v4895_v10 = vpop.f32.mrb[159].mxu0 }
 0x244   : > { %v4311_v8 = vadd.f32 %v7476_v50, %v9755_v2  ;;  %v4156_v27 = vpop.f32.mrb[151].mxu1  ;;  %v9848_v1 = vadd.f32 %v7539_v14, %v4310_v34 }
 0x245   : > { %v9850_v5 = vadd.f32 %v4860_v25, %v4308_v16 }
 0x246   : > { %v9852_v9 = vadd.f32 %v7540_v40, %v4311_v8  ;;  %v7799_v40 = vmov 0.0  }
 0x247   : > { %6500 = vst [vmem:[%s9859_s20 + $0x10] sm:$0xff] %v7799_v40  ;;  %6503 = vst [vmem:[%s9859_s20 + $0x28] sm:$0xff] %v7799_v40 }
 0x248   : > { %v7551_v13 = vpop.f32.mrb[160].mxu0  ;;  %6506 = vst [vmem:[%s9859_s20 + $0x40] sm:$0xff] %v7799_v40  ;;  %6509 = vst [vmem:[%s9859_s20 + $0x58] sm:$0xff] %v7799_v40 }
 0x249   : > { %v7479_v12 = vpop.f32.mrb[152].mxu1  ;;  %v4908_v22 = vpop.f32.mrb[161].mxu0  ;;  %6512 = vst [vmem:[%s9859_s20 + $0x70] sm:$0xff] %v7799_v40  ;;  %6515 = vst [vmem:[%s9859_s20 + $0x88] sm:$0xff] %v7799_v40 }
 0x24a   : > { %v4314_v32 = vadd.f32 %v7479_v12, %v9759_v33  ;;  %v4169_v31 = vpop.f32.mrb[153].mxu1  ;;  %v7552_v2 = vpop.f32.mrb[162].mxu0  ;;  %6518 = vst [vmem:[%s9859_s20 + $0xa0] sm:$0xff] %v7799_v40  ;;  %6521 = vst [vmem:[%s9859_s20 + $0xb8] sm:$0xff] %v7799_v40 }
 0x24b   : > { %v7480_v14 = vpop.f32.mrb[154].mxu1  ;;  %v4911_v25 = vpop.f32.mrb[163].mxu0  ;;  %6524 = vst [vmem:[%s9859_s20 + $0xd0] sm:$0xff] %v7799_v40  ;;  %6527 = vst [vmem:[%s9859_s20 + $0xe8] sm:$0xff] %v7799_v40 }
 0x24c   : > { %6530 = vst [vmem:[%s9859_s20 + $0x100] sm:$0xff] %v7799_v40  ;;  %6533 = vst [vmem:[%s9859_s20 + $0x118] sm:$0xff] %v7799_v40  ;;  %v4172_v33 = vpop.f32.mrb[155].mxu1  ;;  %v9878_v52 = vadd.f32 %v7543_v37, %v4314_v32 }
 0x24d   : > { %6536 = vst [vmem:[%s9859_s20 + $0x130] sm:$0xff] %v7799_v40  ;;  %6539 = vst [vmem:[%s9859_s20 + $0x148] sm:$0xff] %v7799_v40  ;;  %v4313_v23 = vadd.f32 %v4172_v33, %v9762_v21 }
 0x24e   : > { %6542 = vst [vmem:[%s9859_s20 + $0x160] sm:$0xff] %v7799_v40  ;;  %6545 = vst [vmem:[%s9859_s20 + $0x178] sm:$0xff] %v7799_v40 }
 0x24f   : > { %v9881_v46 = vadd.f32 %v4879_v7, %v4313_v23 }
 0x250   : > { %v7555_v18 = vpop.f32.mrb[164].mxu0 }
 0x251   : > { %v7483_v48 = vpop.f32.mrb[156].mxu1  ;;  %v4924_v20 = vpop.f32.mrb[165].mxu0 }
 0x252   : > { %v4185_v63 = vpop.f32.mrb[157].mxu1  ;;  %v7556_v57 = vpop.f32.mrb[166].mxu0 }
 0x253   : > { %v4316_v54 = vadd.f32 %v4185_v63, %v9767_v45  ;;  %v7484_v11 = vpop.f32.mrb[158].mxu1  ;;  %v4927_v59 = vpop.f32.mrb[167].mxu0 }
 0x254   : > { %v4319_v26 = vadd.f32 %v7484_v11, %v9769_v38  ;;  %v4188_v34 = vpop.f32.mrb[159].mxu1 }
 0x255   : > { %v4317_v24 = vadd.f32 %v4188_v34, %v9771_v58  ;;  %v9886_v37 = vadd.f32 %v4892_v35, %v4316_v54 }
 0x256   : > { %v9888_v16 = vadd.f32 %v7548_v61, %v4319_v26 }
 0x257   : > { %v9890_v21 = vadd.f32 %v4895_v10, %v4317_v24 }
 0x258   : > { %v7639_v7 = vpop.f32.mrb[168].mxu0 }
 0x259   : > { %v7487_v50 = vpop.f32.mrb[160].mxu1  ;;  %v6012_v8 = vpop.f32.mrb[169].mxu0 }
 0x25a   : > { %v4322_v27 = vadd.f32 %v7487_v50, %v9776_v4  ;;  %v4201_v12 = vpop.f32.mrb[161].mxu1  ;;  %v7640_v45 = vpop.f32.mrb[170].mxu0 }
 0x25b   : > { %v4320_v32 = vadd.f32 %v4201_v12, %v9778_v39  ;;  %v7488_v31 = vpop.f32.mrb[162].mxu1  ;;  %v6015_v38 = vpop.f32.mrb[171].mxu0 }
 0x25c   : > { %v4323_v14 = vadd.f32 %v7488_v31, %v9780_v53  ;;  %v4204_v58 = vpop.f32.mrb[163].mxu1  ;;  %v9895_v35 = vadd.f32 %v7551_v13, %v4322_v27 }
 0x25d   : > { %v9897_v61 = vadd.f32 %v4908_v22, %v4320_v32 }
 0x25e   : > { %v9899_v10 = vadd.f32 %v7552_v2, %v4323_v14 }
 0x260   : > { %v7643_v25 = vpop.f32.mrb[172].mxu0 }
 0x261   : > { %v7491_v40 = vpop.f32.mrb[164].mxu1  ;;  %v6028_v33 = vpop.f32.mrb[173].mxu0 }
 0x262   : > { %v4326_v4 = vadd.f32 %v7491_v40, %v9783_v3  ;;  %v4217_v23 = vpop.f32.mrb[165].mxu1  ;;  %v7644_v48 = vpop.f32.mrb[174].mxu0 }
 0x263   : > { %v7492_v20 = vpop.f32.mrb[166].mxu1  ;;  %v6031_v39 = vpop.f32.mrb[175].mxu0 }
 0x264   : > { %v4220_v63 = vpop.f32.mrb[167].mxu1  ;;  %v9902_v57 = vadd.f32 %v7555_v18, %v4326_v4  ;;  %v9911_v18 = vld [vmem:[%s10015_s4] ss:$0 sm:$0xff] }
 0x265   : > { %v4325_v53 = vadd.f32 %v4220_v63, %v9786_v43 }
 0x267   : > { %v9905_v13 = vadd.f32 %v4927_v59, %v4325_v53 }
 0x268   : > { %v7647_v22 = vpop.f32.mrb[176].mxu0 }
 0x269   : > { %v7575_v54 = vpop.f32.mrb[168].mxu1  ;;  %v6044_v2 = vpop.f32.mrb[177].mxu0 }
 0x26a   : > { %v5305_v11 = vpop.f32.mrb[169].mxu1  ;;  %v7648_v26 = vpop.f32.mrb[178].mxu0 }
 0x26b   : > { %v5544_v34 = vadd.f32 %v5305_v11, %v9791_v41  ;;  %v7576_v3 = vpop.f32.mrb[170].mxu1  ;;  %v6047_v24 = vpop.f32.mrb[179].mxu0 }
 0x26c   : > { %v5547_v43 = vadd.f32 %v7576_v3, %v9793_v36  ;;  %v5308_v59 = vpop.f32.mrb[171].mxu1 }
 0x26d   : > { %v6251_v7 = vadd.f32 %v6012_v8, %v5544_v34  ;;  %v5545_v50 = vadd.f32 %v5308_v59, %v9795_v28 }
 0x26e   : > { %v6254_v27 = vadd.f32 %v7640_v45, %v5547_v43 }
 0x26f   : > { %v6402_v12 = vadd.f32 %v9911_v18, %v6251_v7  ;;  %v6252_v32 = vadd.f32 %v6015_v38, %v5545_v50 }
 0x270   : > { %v6405_v41 = vadd.f32 %v9911_v18, %v6254_v27  ;;  %v7651_v31 = vpop.f32.mrb[180].mxu0 }
 0x271   : > { %6498 = vst [vmem:[%s9859_s20] sm:$0xff] %v6402_v12  ;;  %v6403_v14 = vadd.f32 %v9911_v18, %v6252_v32  ;;  %v7579_v58 = vpop.f32.mrb[172].mxu1  ;;  %v6060_v40 = vpop.f32.mrb[181].mxu0 }
 0x272   : > { %6501 = vst [vmem:[%s9859_s20 + $0x18] sm:$0xff] %v6405_v41  ;;  %v5550_v36 = vadd.f32 %v7579_v58, %v9800_v44  ;;  %v5321_v4 = vpop.f32.mrb[173].mxu1  ;;  %v7652_v8 = vpop.f32.mrb[182].mxu0 }
 0x273   : > { %6499 = vst [vmem:[%s9859_s20 + $0x8] sm:$0xff] %v6403_v14  ;;  %v5548_v28 = vadd.f32 %v5321_v4, %v9802_v30  ;;  %v7580_v45 = vpop.f32.mrb[174].mxu1  ;;  %v6063_v38 = vpop.f32.mrb[183].mxu0 }
 0x274   : > { %v6257_v23 = vadd.f32 %v7643_v25, %v5550_v36  ;;  %v5551_v20 = vadd.f32 %v7580_v45, %v9804_v19  ;;  %v5324_v39 = vpop.f32.mrb[175].mxu1 }
 0x275   : > { %v6255_v63 = vadd.f32 %v6028_v33, %v5548_v28 }
 0x276   : > { %v6408_v53 = vadd.f32 %v9911_v18, %v6257_v23  ;;  %v6258_v54 = vadd.f32 %v7644_v48, %v5551_v20 }
 0x277   : > { %v6406_v2 = vadd.f32 %v9911_v18, %v6255_v63 }
 0x278   : > { %6504 = vst [vmem:[%s9859_s20 + $0x30] sm:$0xff] %v6408_v53  ;;  %v6409_v44 = vadd.f32 %v9911_v18, %v6258_v54  ;;  %v7655_v11 = vpop.f32.mrb[184].mxu0 }
 0x279   : > { %6502 = vst [vmem:[%s9859_s20 + $0x20] sm:$0xff] %v6406_v2  ;;  %v7583_v30 = vpop.f32.mrb[176].mxu1  ;;  %v6076_v26 = vpop.f32.mrb[185].mxu0 }
 0x27a   : > { %6505 = vst [vmem:[%s9859_s20 + $0x38] sm:$0xff] %v6409_v44  ;;  %v5554_v25 = vadd.f32 %v7583_v30, %v9807_v17  ;;  %v5337_v34 = vpop.f32.mrb[177].mxu1  ;;  %v7656_v19 = vpop.f32.mrb[186].mxu0 }
 0x27b   : > { %v7584_v33 = vpop.f32.mrb[178].mxu1  ;;  %v6079_v3 = vpop.f32.mrb[187].mxu0 }
 0x27c   : > { %v6261_v43 = vadd.f32 %v7647_v22, %v5554_v25  ;;  %v5340_v48 = vpop.f32.mrb[179].mxu1 }
 0x27d   : > { %v5553_v59 = vadd.f32 %v5340_v48, %v9810_v42 }
 0x27e   : > { %v6412_v7 = vadd.f32 %v9911_v18, %v6261_v43 }
 0x27f   : > { %v6260_v50 = vadd.f32 %v6047_v24, %v5553_v59 }
 0x280   : > { %6508 = vst [vmem:[%s9859_s20 + $0x50] sm:$0xff] %v6412_v7  ;;  %v7659_v27 = vpop.f32.mrb[188].mxu0 }
 0x281   : > { %v6411_v12 = vadd.f32 %v9911_v18, %v6260_v50  ;;  %v7587_v32 = vpop.f32.mrb[180].mxu1  ;;  %v6092_v41 = vpop.f32.mrb[189].mxu0 }
 0x282   : > { %v5353_v17 = vpop.f32.mrb[181].mxu1  ;;  %v7660_v31 = vpop.f32.mrb[190].mxu0 }
 0x283   : > { %6507 = vst [vmem:[%s9859_s20 + $0x48] sm:$0xff] %v6411_v12  ;;  %v5556_v14 = vadd.f32 %v5353_v17, %v9815_v29  ;;  %v7588_v22 = vpop.f32.mrb[182].mxu1  ;;  %v6095_v58 = vpop.f32.mrb[191].mxu0 }
 0x284   : > { %v5559_v42 = vadd.f32 %v7588_v22, %v9817_v15  ;;  %v5356_v36 = vpop.f32.mrb[183].mxu1 }
 0x285   : > { %v6263_v24 = vadd.f32 %v6060_v40, %v5556_v14  ;;  %v5557_v4 = vadd.f32 %v5356_v36, %v9819_v49 }
 0x286   : > { %v6266_v28 = vadd.f32 %v7652_v8, %v5559_v42 }
 0x287   : > { %v6414_v45 = vadd.f32 %v9911_v18, %v6263_v24  ;;  %v6264_v23 = vadd.f32 %v6063_v38, %v5557_v4 }
 0x288   : > { %v6417_v20 = vadd.f32 %v9911_v18, %v6266_v28  ;;  %v7663_v39 = vpop.f32.mrb[192].mxu0 }
 0x289   : > { %6510 = vst [vmem:[%s9859_s20 + $0x60] sm:$0xff] %v6414_v45  ;;  %v6415_v29 = vadd.f32 %v9911_v18, %v6264_v23  ;;  %v7591_v63 = vpop.f32.mrb[184].mxu1  ;;  %v6108_v53 = vpop.f32.mrb[193].mxu0 }
 0x28a   : > { %6513 = vst [vmem:[%s9859_s20 + $0x78] sm:$0xff] %v6417_v20  ;;  %v5562_v15 = vadd.f32 %v7591_v63, %v9824_v0  ;;  %v5369_v54 = vpop.f32.mrb[185].mxu1  ;;  %v7664_v40 = vpop.f32.mrb[194].mxu0 }
 0x28b   : > { %6511 = vst [vmem:[%s9859_s20 + $0x68] sm:$0xff] %v6415_v29  ;;  %v5560_v49 = vadd.f32 %v5369_v54, %v9826_v55  ;;  %v7592_v8 = vpop.f32.mrb[186].mxu1  ;;  %v6111_v38 = vpop.f32.mrb[195].mxu0 }
 0x28c   : > { %v6269_v2 = vadd.f32 %v7655_v11, %v5562_v15  ;;  %v5563_v44 = vadd.f32 %v7592_v8, %v9828_v56  ;;  %v5372_v30 = vpop.f32.mrb[187].mxu1 }
 0x28d   : > { %v6267_v25 = vadd.f32 %v6076_v26, %v5560_v49 }
 0x28e   : > { %v6420_v34 = vadd.f32 %v9911_v18, %v6269_v2  ;;  %v6270_v33 = vadd.f32 %v7656_v19, %v5563_v44 }
 0x28f   : > { %v6418_v3 = vadd.f32 %v9911_v18, %v6267_v25 }
 0x290   : > { %6516 = vst [vmem:[%s9859_s20 + $0x90] sm:$0xff] %v6420_v34  ;;  %v6421_v0 = vadd.f32 %v9911_v18, %v6270_v33  ;;  %v7667_v43 = vpop.f32.mrb[196].mxu0 }
 0x291   : > { %6514 = vst [vmem:[%s9859_s20 + $0x80] sm:$0xff] %v6418_v3  ;;  %v7595_v55 = vpop.f32.mrb[188].mxu1  ;;  %v6124_v48 = vpop.f32.mrb[197].mxu0 }
 0x292   : > { %6517 = vst [vmem:[%s9859_s20 + $0x98] sm:$0xff] %v6421_v0  ;;  %v5566_v11 = vadd.f32 %v7595_v55, %v9831_v47  ;;  %v5385_v59 = vpop.f32.mrb[189].mxu1  ;;  %v7668_v56 = vpop.f32.mrb[198].mxu0 }
 0x293   : > { %v7596_v26 = vpop.f32.mrb[190].mxu1  ;;  %v6127_v7 = vpop.f32.mrb[199].mxu0 }
 0x294   : > { %v6273_v50 = vadd.f32 %v7659_v27, %v5566_v11  ;;  %v5388_v19 = vpop.f32.mrb[191].mxu1 }
 0x295   : > { %v5565_v12 = vadd.f32 %v5388_v19, %v9834_v6 }
 0x296   : > { %v6424_v32 = vadd.f32 %v9911_v18, %v6273_v50 }
 0x297   : > { %v6272_v41 = vadd.f32 %v6095_v58, %v5565_v12 }
 0x298   : > { %6520 = vst [vmem:[%s9859_s20 + $0xb0] sm:$0xff] %v6424_v32  ;;  %v7671_v17 = vpop.f32.mrb[200].mxu0 }
 0x299   : > { %v6423_v31 = vadd.f32 %v9911_v18, %v6272_v41  ;;  %v7599_v14 = vpop.f32.mrb[192].mxu1  ;;  %v6140_v22 = vpop.f32.mrb[201].mxu0 }
 0x29a   : > { %v5401_v47 = vpop.f32.mrb[193].mxu1  ;;  %v7672_v42 = vpop.f32.mrb[202].mxu0 }
 0x29b   : > { %6519 = vst [vmem:[%s9859_s20 + $0xa8] sm:$0xff] %v6423_v31  ;;  %v5568_v36 = vadd.f32 %v5401_v47, %v9839_v60  ;;  %v7600_v27 = vpop.f32.mrb[194].mxu1  ;;  %v6143_v24 = vpop.f32.mrb[203].mxu0 }
 0x29c   : > { %v5571_v6 = vadd.f32 %v7600_v27, %v9841_v51  ;;  %v5404_v4 = vpop.f32.mrb[195].mxu1 }
 0x29d   : > { %v6275_v58 = vadd.f32 %v6108_v53, %v5568_v36  ;;  %v5569_v28 = vadd.f32 %v5404_v4, %v9843_v62 }
 0x29e   : > { %v6278_v45 = vadd.f32 %v7664_v40, %v5571_v6 }
 0x29f   : > { %v6426_v23 = vadd.f32 %v9911_v18, %v6275_v58  ;;  %v6276_v20 = vadd.f32 %v6111_v38, %v5569_v28 }
 0x2a0   : > { %v6429_v39 = vadd.f32 %v9911_v18, %v6278_v45  ;;  %v7675_v29 = vpop.f32.mrb[204].mxu0 }
 0x2a1   : > { %6522 = vst [vmem:[%s9859_s20 + $0xc0] sm:$0xff] %v6426_v23  ;;  %v6427_v60 = vadd.f32 %v9911_v18, %v6276_v20  ;;  %v7603_v63 = vpop.f32.mrb[196].mxu1  ;;  %v6156_v15 = vpop.f32.mrb[205].mxu0 }
 0x2a2   : > { %6525 = vst [vmem:[%s9859_s20 + $0xd8] sm:$0xff] %v6429_v39  ;;  %v5574_v51 = vadd.f32 %v7603_v63, %v9848_v1  ;;  %v5417_v54 = vpop.f32.mrb[197].mxu1  ;;  %v7676_v53 = vpop.f32.mrb[206].mxu0 }
 0x2a3   : > { %6523 = vst [vmem:[%s9859_s20 + $0xc8] sm:$0xff] %v6427_v60  ;;  %v5572_v62 = vadd.f32 %v5417_v54, %v9850_v5  ;;  %v7604_v40 = vpop.f32.mrb[198].mxu1  ;;  %v6159_v49 = vpop.f32.mrb[207].mxu0 }
 0x2a4   : > { %v6281_v8 = vadd.f32 %v7667_v43, %v5574_v51  ;;  %v5575_v38 = vadd.f32 %v7604_v40, %v9852_v9  ;;  %v5420_v2 = vpop.f32.mrb[199].mxu1 }
 0x2a5   : > { %v6279_v44 = vadd.f32 %v6124_v48, %v5572_v62 }
 0x2a6   : > { %v6432_v30 = vadd.f32 %v9911_v18, %v6281_v8  ;;  %v6282_v25 = vadd.f32 %v7668_v56, %v5575_v38 }
 0x2a7   : > { %v6430_v34 = vadd.f32 %v9911_v18, %v6279_v44 }
 0x2a8   : > { %6528 = vst [vmem:[%s9859_s20 + $0xf0] sm:$0xff] %v6432_v30  ;;  %v6433_v1 = vadd.f32 %v9911_v18, %v6282_v25  ;;  %v7679_v33 = vpop.f32.mrb[208].mxu0 }
 0x2a9   : > { %6526 = vst [vmem:[%s9859_s20 + $0xe0] sm:$0xff] %v6430_v34  ;;  %v7607_v5 = vpop.f32.mrb[200].mxu1  ;;  %v6172_v3 = vpop.f32.mrb[209].mxu0 }
 0x2aa   : > { %6529 = vst [vmem:[%s9859_s20 + $0xf8] sm:$0xff] %v6433_v1  ;;  %v5578_v0 = vadd.f32 %v7607_v5, %v9878_v52  ;;  %v5433_v43 = vpop.f32.mrb[201].mxu1  ;;  %v7680_v9 = vpop.f32.mrb[210].mxu0 }
 0x2ab   : > { %v7608_v55 = vpop.f32.mrb[202].mxu1  ;;  %v6175_v48 = vpop.f32.mrb[211].mxu0 }
 0x2ac   : > { %v6285_v11 = vadd.f32 %v7671_v17, %v5578_v0  ;;  %v5436_v59 = vpop.f32.mrb[203].mxu1 }
 0x2ad   : > { %v5577_v56 = vadd.f32 %v5436_v59, %v9881_v46 }
 0x2ae   : > { %v6436_v26 = vadd.f32 %v9911_v18, %v6285_v11 }
 0x2af   : > { %v6284_v7 = vadd.f32 %v6143_v24, %v5577_v56 }
 0x2b0   : > { %6532 = vst [vmem:[%s9859_s20 + $0x110] sm:$0xff] %v6436_v26  ;;  %v7683_v50 = vpop.f32.mrb[212].mxu0 }
 0x2b1   : > { %v6435_v19 = vadd.f32 %v9911_v18, %v6284_v7  ;;  %v7611_v12 = vpop.f32.mrb[204].mxu1  ;;  %v6188_v32 = vpop.f32.mrb[213].mxu0 }
 0x2b2   : > { %v5449_v52 = vpop.f32.mrb[205].mxu1  ;;  %v7684_v41 = vpop.f32.mrb[214].mxu0 }
 0x2b3   : > { %6531 = vst [vmem:[%s9859_s20 + $0x108] sm:$0xff] %v6435_v19  ;;  %v5580_v31 = vadd.f32 %v5449_v52, %v9886_v37  ;;  %v7612_v17 = vpop.f32.mrb[206].mxu1  ;;  %v6191_v14 = vpop.f32.mrb[215].mxu0 }
 0x2b4   : > { %v5583_v46 = vadd.f32 %v7612_v17, %v9888_v16  ;;  %v5452_v22 = vpop.f32.mrb[207].mxu1 }
 0x2b5   : > { %v6287_v47 = vadd.f32 %v6156_v15, %v5580_v31  ;;  %v5581_v42 = vadd.f32 %v5452_v22, %v9890_v21 }
 0x2b6   : > { %v6290_v36 = vadd.f32 %v7676_v53, %v5583_v46 }
 0x2b7   : > { %v6438_v27 = vadd.f32 %v9911_v18, %v6287_v47  ;;  %v6288_v24 = vadd.f32 %v6159_v49, %v5581_v42 }
 0x2b8   : > { %v6441_v6 = vadd.f32 %v9911_v18, %v6290_v36 }
 0x2b9   : > { %6534 = vst [vmem:[%s9859_s20 + $0x120] sm:$0xff] %v6438_v27  ;;  %v6439_v4 = vadd.f32 %v9911_v18, %v6288_v24  ;;  %v7615_v37 = vpop.f32.mrb[208].mxu1 }
 0x2ba   : > { %6537 = vst [vmem:[%s9859_s20 + $0x138] sm:$0xff] %v6441_v6  ;;  %v5586_v58 = vadd.f32 %v7615_v37, %v9895_v35  ;;  %v5465_v16 = vpop.f32.mrb[209].mxu1 }
 0x2bb   : > { %6535 = vst [vmem:[%s9859_s20 + $0x128] sm:$0xff] %v6439_v4  ;;  %v5584_v21 = vadd.f32 %v5465_v16, %v9897_v61  ;;  %v7616_v28 = vpop.f32.mrb[210].mxu1 }
 0x2bc   : > { %v6293_v45 = vadd.f32 %v7679_v33, %v5586_v58  ;;  %v5587_v23 = vadd.f32 %v7616_v28, %v9899_v10  ;;  %v5468_v20 = vpop.f32.mrb[211].mxu1 }
 0x2bd   : > { %v6291_v39 = vadd.f32 %v6172_v3, %v5584_v21 }
 0x2be   : > { %v6444_v29 = vadd.f32 %v9911_v18, %v6293_v45  ;;  %v6294_v60 = vadd.f32 %v7680_v9, %v5587_v23 }
 0x2bf   : > { %v6442_v63 = vadd.f32 %v9911_v18, %v6291_v39 }
 0x2c0   : > { %6540 = vst [vmem:[%s9859_s20 + $0x150] sm:$0xff] %v6444_v29  ;;  %v6445_v35 = vadd.f32 %v9911_v18, %v6294_v60 }
 0x2c1   : > { %6538 = vst [vmem:[%s9859_s20 + $0x140] sm:$0xff] %v6442_v63  ;;  %v7619_v15 = vpop.f32.mrb[212].mxu1 }
 0x2c2   : > { %6541 = vst [vmem:[%s9859_s20 + $0x158] sm:$0xff] %v6445_v35  ;;  %v5590_v61 = vadd.f32 %v7619_v15, %v9902_v57  ;;  %v5481_v51 = vpop.f32.mrb[213].mxu1 }
 0x2c3   : > { %v7620_v54 = vpop.f32.mrb[214].mxu1 }
 0x2c4   : > { %v6297_v10 = vadd.f32 %v7683_v50, %v5590_v61  ;;  %v5484_v53 = vpop.f32.mrb[215].mxu1 }
 0x2c5   : > { %v5589_v62 = vadd.f32 %v5484_v53, %v9905_v13 }
 0x2c6   : > { %v6448_v40 = vadd.f32 %v9911_v18, %v6297_v10 }
 0x2c7   : > { %v6296_v49 = vadd.f32 %v6191_v14, %v5589_v62 }
 0x2c8   : > { %6544 = vst [vmem:[%s9859_s20 + $0x170] sm:$0xff] %v6448_v40 }
 0x2c9   : > { %v6447_v8 = vadd.f32 %v9911_v18, %v6296_v49 }
 0x2cb   : > { %6543 = vst [vmem:[%s9859_s20 + $0x168] sm:$0xff] %v6447_v8 }
 0x2cc PF: > { %s15_s18 = sadd.s32 1, %s7795_s18  }
 0x2cd   : > { %p12_p4 = scmp.ge.s32.totalorder %s15_s18, 4  }
 0x2cf   :  { %14 = sbr.rel (!%p12_p4) target bundleno = 1 (0x1), region = 78 }

// kernel: gblock_pallas.7
= control target key start
LH: loop header
LB: loop body
LE: loop exit
PB: predicated region body
PF: predicated region fallthrough
CT: control target
= control target key end

     0   :  { %s8769_s27 = smov 0   ;;  %s10962_s0 = inlined_call_operand.vmem [shape: f32[2,16,24,128], index: 0, kind: input, shape index: {}]   ;;  %s10963_s1 = inlined_call_operand.vmem [shape: f32[2,16,24,128], index: 1, kind: input, shape index: {}]   ;;  %s10964_s2 = inlined_call_operand.vmem [shape: f32[1,128], index: 2, kind: input, shape index: {}]   ;;  %s10965_s3 = inlined_call_operand.vmem [shape: f32[1,128], index: 3, kind: input, shape index: {}]   ;;  %s10966_s4 = inlined_call_operand.vmem [shape: bf16[3,3,128,128], index: 4, kind: input, shape index: {}]   ;;  %s10967_s5 = inlined_call_operand.vmem [shape: f32[1,128], index: 5, kind: input, shape index: {}]   ;;  %s10968_s6 = inlined_call_operand.vmem [shape: bf16[128,128], index: 6, kind: input, shape index: {}]   ;;  %s10969_s7 = inlined_call_operand.vmem [shape: f32[1,128], index: 7, kind: input, shape index: {}]   ;;  %s10970_s8 = inlined_call_operand.vmem [shape: f32[2,16,24,128], index: 8, kind: output, shape index: {}]  }
   0x1 LB: > { %s7410_s28 = sadd.s32 4294967295, %s8719_s27   ;;  %p7414_p0 = scmp.ge.s32.totalorder %s8719_s27, 1  ;;  %s8719_s27 = sphi %s8769_s27, %s18_s27  }
   0x2   : > { %p272_p1 = scmp.lt.s32.totalorder %s8719_s27, 3 }
   0x4   : > { %p273_p2 = pnand %p7414_p0, %p272_p1 }
   0x6   : > { %276 = sbr.rel (%p273_p2) target bundleno = 743 (0x2e7), region = 52 }
   0xd   : > { %v8628_v0 = vld [vmem:[%s10968_s6] sm:$0xff]   ;;  %v8630_v2 = vld [vmem:[%s10968_s6 + $0x8] sm:$0xff]   ;;  %v8721_v3 = vmov 0   ;;  %p311_p3 = scmp.lt.s32.totalorder %s7410_s28, 1  ;;  %v8632_v5 = vld [vmem:[%s10968_s6 + $0x10] sm:$0xff]   ;;  %v8722_v57 = vmov 0.0|0.0  }
   0xe   : > { %v8629_v1 = vld [vmem:[%s10966_s4] sm:$0xff]   ;;  %7976 = vmatprep.subr.bf16.mxu0 %v8628_v0  ;;  %594 = vst [vmem:[#allocation2] sm:$0xff] %v8721_v3  ;;  %595 = vst [vmem:[#allocation2 + $0x8] sm:$0xff] %v8721_v3  ;;  %v8631_v4 = vld [vmem:[%s10966_s4 + $0x8] sm:$0xff]   ;;  %v1380_v11 = vrot.slane %v8721_v3, 3  ;;  %v8821_v12 = vrot.slane %v8721_v3, 4  ;;  %v8896_v58 = vunpack.c.l.b16 %v8722_v57 }
   0xf   : > { %596 = vst [vmem:[#allocation2 + $0xd0] sm:$0xff] %v8721_v3  ;;  %597 = vst [vmem:[#allocation2 + $0xd8] sm:$0xff] %v8721_v3  ;;  %8040 = vmatprep.subr.bf16.mxu1 %v8629_v1  ;;  %7977 = vmatpush3.bf16.msra.mxu0 %v8628_v0  ;;  %v8633_v6 = vld [vmem:[%s10966_s4 + $0x10] sm:$0xff]   ;;  %s11184_s28 = smov (!%p311_p3, %s7410_s28), 1  ;;  %v8634_v7 = vld [vmem:[%s10968_s6 + $0x18] sm:$0xff]   ;;  %vm2101_vm1 = vcmask 1043456  }
  0x10   : > { %8041 = vmatpush3.bf16.msra.mxu1 %v8629_v1  ;;  %7978 = vmatprep.subr.bf16.mxu0 %v8630_v2  ;;  %v8635_v8 = vld [vmem:[%s10966_s4 + $0x18] sm:$0xff]   ;;  %s8805_s23 = smul.u32 384, %s11184_s28  ;;  %v8636_v9 = vld [vmem:[%s10968_s6 + $0x20] sm:$0xff]   ;;  %v8638_v13 = vld [vmem:[%s10968_s6 + $0x28] sm:$0xff]   ;;  %vm1368_vm0 = vsmask.f32 4352  ;;  %v8842_v23 = vor.u32 %v8821_v12, %v1380_v11 }
  0x11   : > { %8042 = vmatprep.subr.bf16.mxu1 %v8631_v4  ;;  %v8637_v10 = vld [vmem:[%s10966_s4 + $0x20] sm:$0xff]   ;;  %v8639_v17 = vld [vmem:[%s10966_s4 + $0x28] sm:$0xff]   ;;  %v8640_v22 = vld [vmem:[%s10968_s6 + $0x30] sm:$0xff]   ;;  %vm2634_vm2 = vsmask.f32 3328 }
  0x12   : > { %s8817_s10 = scalar_lea.vmem %s10963_s1, %s8805_s23  ;;  %s8830_s14 = scalar_lea.vmem %s10962_s0, %s8805_s23  ;;  %v8849_v26 = vld [vmem:[%s10964_s2] ss:$0 sm:$0xff]  ;;  %v8641_v33 = vld [vmem:[%s10966_s4 + $0x30] sm:$0xff]   ;;  %v8642_v42 = vld [vmem:[%s10968_s6 + $0x38] sm:$0xff]   ;;  %vm3342_vm3 = vsmask.f32 256 }
  0x13   : > { %7979 = vmatpush3.bf16.msra.mxu0 %v8630_v2  ;;  %v782_v14 = vld [vmem:[%s8817_s10] sm:$0xff]  ;;  %v783_v15 = vld [vmem:[%s8817_s10 + $0x8] sm:$0xff]  ;;  %v8859_v32 = vld [vmem:[%s8817_s10 + $0x18] sm:$0xff]  ;;  %vm4480_vm4 = vsmask.f32 7424  ;;  %s10777_s30 = scalar_lea.vmem %s10970_s8, %s8805_s23 }
  0x14   : > { %8043 = vmatpush3.bf16.msra.mxu1 %v8631_v4  ;;  %7980 = vmatprep.subr.bf16.mxu0 %v8632_v5  ;;  %v830_v18 = vpack.c.bf16 %v783_v15, %v782_v14  ;;  %v786_v21 = vld [vmem:[%s8817_s10 + $0x20] sm:$0xff]  ;;  %v328_v25 = vld [vmem:[%s8830_s14 + $0x8] sm:$0xff]  ;;  %v330_v40 = vld [vmem:[%s8830_s14 + $0x18] sm:$0xff] }
  0x15   : > { %8044 = vmatprep.subr.bf16.mxu1 %v8633_v6  ;;  %v1327_v16 = vld [vmem:[#allocation2] sm:$0xf8]  ;;  %v8854_v29 = vld [vmem:[%s10965_s3] ss:$0 sm:$0xff]  ;;  %v384_v31 = vmul.f32 %v8849_v26, %v328_v25  ;;  %v832_v35 = vpack.c.bf16 %v786_v21, %v8859_v32  ;;  %v787_v38 = vld [vmem:[%s8817_s10 + $0x28] sm:$0xff]  ;;  %v386_v47 = vmul.f32 %v8849_v26, %v330_v40 }
  0x16   : > { %v1370_v19 = vshrl.u32 %v1327_v16, 16  ;;  %v1373_v20 = vshll.u32 %v1327_v16, 16  ;;  %v327_v24 = vld [vmem:[%s8830_s14] sm:$0xff]  ;;  %7992 = vmatprep.mubr.bf16.mxu0 %v830_v18  ;;  %v833_v39 = vpack.c.bf16 %v787_v38, %v787_v38  ;;  %v8876_v44 = vld [vmem:[%s8817_s10 + $0x10] sm:$0xff]  ;;  %v8643_v49 = vld [vmem:[%s10966_s4 + $0x38] sm:$0xff]  }
  0x17   : > { %7981 = vmatpush3.bf16.msra.mxu0 %v8632_v5  ;;  %v383_v30 = vmul.f32 %v8849_v26, %v327_v24  ;;  %v438_v37 = vadd.f32 %v8854_v29, %v384_v31  ;;  %v331_v41 = vld [vmem:[%s8830_s14 + $0x20] sm:$0xff]  ;;  %v8883_v51 = vunpack.c.h.b16 %v832_v35  ;;  %v440_v53 = vadd.f32 %v8854_v29, %v386_v47  ;;  %v8889_v54 = vld [vmem:[%s8817_s10 + $0x30] sm:$0xff]  ;;  %v8892_v55 = vld [vmem:[%s8817_s10 + $0x38] sm:$0xff] }
  0x18   : > { %8045 = vmatpush3.bf16.msra.mxu1 %v8633_v6  ;;  %7982 = vmatprep.subr.bf16.mxu0 %v8634_v7  ;;  %v1372_v27 = vrot.slane %v1370_v19, 3  ;;  %v1375_v28 = vrot.slane %v1373_v20, 4  ;;  %v387_v48 = vmul.f32 %v8849_v26, %v331_v41  ;;  %v8885_v52 = vunpack.c.l.b16 %v833_v39  ;;  %v333_v59 = vld [vmem:[%s8830_s14 + $0x30] sm:$0xff]  ;;  %v334_v60 = vld [vmem:[%s8830_s14 + $0x38] sm:$0xff]  ;;  %v8903_v1 = vld [vmem:[%s8817_s10 + $0x48] sm:$0xff] }
  0x19   : > { %8046 = vmatprep.subr.bf16.mxu1 %v8635_v8  ;;  %v437_v36 = vadd.f32 %v8854_v29, %v383_v30  ;;  %v486_v46 = vmax.f32 %v438_v37, 0.0  ;;  %v7648_v61 = vpack.c.bf16 %v8859_v32, %v8876_v44  ;;  %v488_v0 = vmax.f32 %v440_v53, 0.0  ;;  %v792_v2 = vld [vmem:[%s8817_s10 + $0x50] sm:$0xff]  ;;  %v336_v4 = vld [vmem:[%s8830_s14 + $0x48] sm:$0xff]  ;;  %v8644_v5 = vld [vmem:[%s10966_s4 + $0x40] sm:$0xff]  }
  0x1a   : > { %v1376_v34 = vor.u32 %v1375_v28, %v1372_v27  ;;  %v441_v56 = vadd.f32 %v8854_v29, %v387_v48  ;;  %v337_v11 = vld [vmem:[%s8830_s14 + $0x50] sm:$0xff]  ;;  %v8645_v15 = vld [vmem:[%s10966_s4 + $0x80] sm:$0xff]   ;;  %v960_v16 = vpack.c.b16 %v8885_v52, %v8883_v51  ;;  %v836_v20 = vpack.c.bf16 %v792_v2, %v8903_v1  ;;  %v8647_v37 = vld [vmem:[%s10966_s4 + $0x88] sm:$0xff]  }
  0x1b   : > { %7983 = vmatpush3.bf16.msra.mxu0 %v8634_v7  ;;  %v485_v45 = vmax.f32 %v437_v36, 0.0  ;;  %v834_v7 = vpack.c.bf16 %v8892_v55, %v8889_v54  ;;  %v8923_v19 = vld [vmem:[%s8817_s10 + $0x40] sm:$0xff]  ;;  %v393_v27 = vmul.f32 %v8849_v26, %v337_v11  ;;  %v8646_v36 = vld [vmem:[%s10966_s4 + $0x48] sm:$0xff]   ;;  %v8648_v53 = vld [vmem:[%s10966_s4 + $0x50] sm:$0xff]  }
  0x1c   : > { %8047 = vmatpush3.bf16.msra.mxu1 %v8635_v8  ;;  %7984 = vmatprep.subr.bf16.mxu0 %v8636_v9  ;;  %v1385_v43 = vsel %vm1368_vm0, %v1376_v34, %v8842_v23  ;;  %v489_v6 = vmax.f32 %v441_v56, 0.0  ;;  %v389_v8 = vmul.f32 %v8849_v26, %v333_v59  ;;  %v339_v34 = vld [vmem:[%s8830_s14 + $0x60] sm:$0xff]  ;;  %v7649_v38 = vpack.c.bf16 %v8903_v1, %v8923_v19  ;;  %v340_v41 = vld [vmem:[%s8830_s14 + $0x68] sm:$0xff] }
  0x1d   : > { %8048 = vmatprep.subr.bf16.mxu1 %v8637_v10  ;;  %8056 = vmatprep.mubr.bf16.mxu1 %v1385_v43  ;;  %v598_v50 = vpack.c.bf16 %v486_v46, %v485_v45  ;;  %v447_v39 = vadd.f32 %v8854_v29, %v393_v27  ;;  %v8945_v45 = vunpack.c.h.b16 %v836_v20  ;;  %v395_v48 = vmul.f32 %v8849_v26, %v339_v34  ;;  %v8975_v27 = vld [vmem:[%s8817_s10 + $0x60] sm:$0xff] }
  0x1e   : > { %v600_v18 = vpack.c.bf16 %v489_v6, %v488_v0  ;;  %v443_v21 = vadd.f32 %v8854_v29, %v389_v8 }
  0x1f   : > { %7985 = vmatpush3.bf16.msra.mxu0 %v8636_v9  ;;  %758 = vst [vmem:[#allocation2 + $0x10] sm:$0xff] %v598_v50  ;;  %v1387_v62 = vshrl.u32 %v598_v50, 16  ;;  %v1390_v63 = vshll.u32 %v598_v50, 16  ;;  %v390_v9 = vmul.f32 %v8849_v26, %v334_v60  ;;  %v495_v47 = vmax.f32 %v447_v39, 0.0 }
  0x20   : > { %8049 = vmatpush3.bf16.msra.mxu1 %v8637_v10  ;;  %7986 = vmatprep.subr.bf16.mxu0 %v8638_v13  ;;  %v793_v10 = vld [vmem:[%s8817_s10 + $0x58] sm:$0xff]  ;;  %v7420_v30 = vcombine.low %v8722_v57, %v600_v18  ;;  %v666_v31 = vunpack.c.h.b16 %v600_v18  ;;  %v491_v32 = vmax.f32 %v443_v21, 0.0 }
  0x21   : > { %8050 = vmatprep.subr.bf16.mxu1 %v8639_v17  ;;  %v1392_v14 = vrot.slane %v1390_v63, 4  ;;  %v837_v25 = vpack.c.bf16 %v793_v10, %v793_v10 }
  0x22   : > { %759 = vst [vmem:[#allocation2 + $0x18] sm:$0xff] %v7420_v30  ;;  %v712_v43 = vpack.c.b16 %v8896_v58, %v666_v31  ;;  %v8651_v31 = vld [vmem:[%s10966_s4 + $0x98] sm:$0xff]  }
  0x23   : > { %7987 = vmatpush3.bf16.msra.mxu0 %v8638_v13  ;;  %v1389_v13 = vrot.slane %v1387_v62, 3  ;;  %v8947_v46 = vunpack.c.l.b16 %v837_v25  ;;  %v8649_v62 = vld [vmem:[%s10966_s4 + $0x90] sm:$0xff]  }
  0x24   : > { %8051 = vmatpush3.bf16.msra.mxu1 %v8639_v17  ;;  %7988 = vmatprep.subr.bf16.mxu0 %v8640_v22  ;;  %v392_v17 = vmul.f32 %v8849_v26, %v336_v4  ;;  %760 = vst [vmem:[#allocation2 + $0x20] sm:$0xff] %v712_v43  ;;  %v1405_v51 = vshrl.u32 %v712_v43, 16  ;;  %v1408_v52 = vshll.u32 %v712_v43, 16  ;;  %v449_v4 = vadd.f32 %v8854_v29, %v395_v48  ;;  %v346_v43 = vld [vmem:[%s8830_s14 + $0x98] sm:$0xff] }
  0x25   : > { %8052 = vmatprep.subr.bf16.mxu1 %v8641_v33  ;;  %v1393_v24 = vor.u32 %v1392_v14, %v1389_v13  ;;  %v8961_v13 = vld [vmem:[%s8817_s10 + $0x80] sm:$0xff]  ;;  %v963_v34 = vpack.c.b16 %v8947_v46, %v8945_v45 }
  0x26   : > { %v446_v28 = vadd.f32 %v8854_v29, %v392_v17  ;;  %v1407_v0 = vrot.slane %v1405_v51, 3  ;;  %v1410_v2 = vrot.slane %v1408_v52, 4 }
  0x27   : > { %7989 = vmatpush3.bf16.msra.mxu0 %v8640_v22  ;;  %v444_v22 = vadd.f32 %v8854_v29, %v390_v9  ;;  %v1394_v35 = vsel %vm1368_vm0, %v8842_v23, %v1393_v24  ;;  %v1399_v23 = vshll.u32 %v7420_v30, 16 }
  0x28   : > { %8053 = vmatpush3.bf16.msra.mxu1 %v8641_v33  ;;  %7990 = vmatprep.subr.bf16.mxu0 %v8642_v42  ;;  %v494_v40 = vmax.f32 %v446_v28, 0.0  ;;  %v1411_v11 = vor.u32 %v1410_v2, %v1407_v0  ;;  %v8978_v28 = vld [vmem:[%s8817_s10 + $0x68] sm:$0xff] }
  0x29   : > { %8054 = vmatprep.subr.bf16.mxu1 %v8643_v49  ;;  %v492_v33 = vmax.f32 %v444_v22, 0.0  ;;  %v1401_v50 = vrot.slane %v1399_v23, 4  ;;  %v343_v22 = vld [vmem:[%s8830_s14 + $0x80] sm:$0xff]  ;;  %v9002_v23 = vld [vmem:[%s8817_s10 + $0x90] sm:$0xff] }
  0x2a   : > { %v604_v60 = vpack.c.bf16 %v495_v47, %v494_v40 }
  0x2b   : > { %7991 = vmatpush3.bf16.msra.mxu0 %v8642_v42  ;;  %v1396_v42 = vshrl.u32 %v7420_v30, 16  ;;  %v602_v44 = vpack.c.bf16 %v492_v33, %v491_v32  ;;  %v799_v33 = vld [vmem:[%s8817_s10 + $0x88] sm:$0xff] }
  0x2c   : > { %8055 = vmatpush3.bf16.msra.mxu1 %v8643_v49  ;;  %8104 = vmatprep.subr.bf16.mxu0 %v8644_v5  ;;  %v7421_v8 = vcombine.low %v8722_v57, %v604_v60  ;;  %v672_v9 = vunpack.c.h.b16 %v604_v60  ;;  %v841_v48 = vpack.c.bf16 %v799_v33, %v799_v33  ;;  %v8656_v33 = vld [vmem:[%s10966_s4 + $0x70] sm:$0xff]  }
  0x2d   : > { %8168 = vmatprep.subr.bf16.mxu1 %v8645_v15  ;;  %v1398_v49 = vrot.slane %v1396_v42, 3  ;;  %761 = vst [vmem:[#allocation2 + $0x28] sm:$0xff] %v602_v44  ;;  %v1414_v56 = vshrl.u32 %v602_v44, 16  ;;  %v1417_v59 = vshll.u32 %v602_v44, 16  ;;  %v399_v42 = vmul.f32 %v8849_v26, %v343_v22  ;;  %v8652_v44 = vld [vmem:[%s10966_s4 + $0x60] sm:$0xff]   ;;  %v9043_v22 = vld [vmem:[%s8817_s10 + $0xb8] sm:$0xff] }
  0x2e   : > { %7993 = vmatmul.mubr.bf16.vlgmr.msra.gmra.mrb[0].mxu0 %v7648_v61  ;;  %v396_v61 = vmul.f32 %v8849_v26, %v340_v41  ;;  %762 = vst [vmem:[#allocation2 + $0x30] sm:$0xff] %v7421_v8  ;;  %v1423_v18 = vshrl.u32 %v7421_v8, 16  ;;  %v1426_v20 = vshll.u32 %v7421_v8, 16  ;;  %v715_v21 = vpack.c.b16 %v8896_v58, %v672_v9  ;;  %v8654_v8 = vld [vmem:[%s10966_s4 + $0x68] sm:$0xff]  }
  0x2f   : > { %8057 = vmatmul.mubr.bf16.vlgmr.msra.gmra.mrb[0].mxu1 %v1394_v35  ;;  %8105 = vmatpush3.bf16.msra.mxu0 %v8644_v5  ;;  %v1402_v63 = vor.u32 %v1401_v50, %v1398_v49  ;;  %v1416_v5 = vrot.slane %v1414_v56, 3  ;;  %v1419_v6 = vrot.slane %v1417_v59, 4  ;;  %v8653_v49 = vld [vmem:[%s10966_s4 + $0xa0] sm:$0xff]   ;;  %v838_v50 = vpack.c.bf16 %v8978_v28, %v8975_v27  ;;  %v9018_v56 = vld [vmem:[%s8817_s10 + $0x98] sm:$0xff] }
  0x30   : > { %8169 = vmatpush3.bf16.msra.mxu1 %v8645_v15  ;;  %7996 = vmatprep.mubr.bf16.mxu0 %v960_v16  ;;  %v450_v14 = vadd.f32 %v8854_v29, %v396_v61  ;;  %v497_v15 = vmax.f32 %v449_v4, 0.0  ;;  %v342_v16 = vld [vmem:[%s8830_s14 + $0x78] sm:$0xff]  ;;  %v1425_v55 = vrot.slane %v1423_v18, 3  ;;  %763 = vst [vmem:[#allocation2 + $0x38] sm:$0xff] %v715_v21  ;;  %v1432_v32 = vshrl.u32 %v715_v21, 16 }
  0x31   : > { %8106 = vmatprep.subr.bf16.mxu0 %v8646_v36  ;;  %8170 = vmatprep.subr.bf16.mxu1 %v8647_v37  ;;  %v1403_v10 = vsel %vm1368_vm0, %v1393_v24, %v1402_v63  ;;  %v1420_v17 = vor.u32 %v1419_v6, %v1416_v5  ;;  %v8650_v24 = vld [vmem:[%s10966_s4 + $0x58] sm:$0xff]   ;;  %v1412_v25 = vsel %vm1368_vm0, %v1402_v63, %v1411_v11  ;;  %v1435_v35 = vshll.u32 %v715_v21, 16  ;;  %v348_v5 = vld [vmem:[%s8830_s14 + $0xa8] sm:$0xff]  ;;  %v349_v6 = vld [vmem:[%s8830_s14 + $0xb0] sm:$0xff] }
  0x32   : > { %8060 = vmatprep.mubr.bf16.mxu1 %v1403_v10  ;;  %v498_v30 = vmax.f32 %v450_v14, 0.0  ;;  %v398_v19 = vmul.f32 %v8849_v26, %v342_v16  ;;  %v1434_v40 = vrot.slane %v1432_v32, 3  ;;  %v402_v4 = vmul.f32 %v8849_v26, %v346_v43  ;;  %v8655_v14 = vld [vmem:[%s10966_s4 + $0xa8] sm:$0xff]  }
  0x33   : > { %8107 = vmatpush3.bf16.msra.mxu0 %v8646_v36  ;;  %v1421_v54 = vsel %vm1368_vm0, %v1411_v11, %v1420_v17  ;;  %v8991_v36 = vld [vmem:[%s8817_s10 + $0x70] sm:$0xff]  ;;  %v1437_v45 = vrot.slane %v1435_v35, 4  ;;  %v911_v11 = vunpack.c.l.b16 %v841_v48  ;;  %v9035_v16 = vld [vmem:[%s8817_s10 + $0xa8] sm:$0xff] }
  0x34   : > { %8171 = vmatpush3.bf16.msra.mxu1 %v8647_v37  ;;  %8108 = vmatprep.subr.bf16.mxu0 %v8648_v53  ;;  %v8994_v37 = vld [vmem:[%s8817_s10 + $0x78] sm:$0xff]  ;;  %v606_v1 = vpack.c.bf16 %v498_v30, %v497_v15  ;;  %v452_v52 = vadd.f32 %v8854_v29, %v398_v19 }
  0x35   : > { %8172 = vmatprep.subr.bf16.mxu1 %v8649_v62  ;;  %v840_v41 = vpack.c.bf16 %v8961_v13, %v8994_v37  ;;  %v7650_v51 = vpack.c.bf16 %v8994_v37, %v8991_v36  ;;  %v1438_v60 = vor.u32 %v1437_v45, %v1434_v40  ;;  %v842_v13 = vpack.c.bf16 %v9018_v56, %v9002_v23 }
  0x36   : > { %7997 = vmatmul.mubr.bf16.gmra.mrb[4].mxu0 %v834_v7  ;;  %v1428_v7 = vrot.slane %v1426_v20, 4  ;;  %764 = vst [vmem:[#allocation2 + $0x40] sm:$0xff] %v606_v1  ;;  %v1441_v46 = vshrl.u32 %v606_v1, 16  ;;  %v1444_v47 = vshll.u32 %v606_v1, 16  ;;  %v500_v63 = vmax.f32 %v452_v52, 0.0 }
  0x37   : > { %8061 = vmatmul.mubr.bf16.gmra.mrb[4].mxu1 %v1412_v25  ;;  %8000 = vmatprep.mubr.bf16.mxu0 %v7649_v38  ;;  %v345_v38 = vld [vmem:[%s8830_s14 + $0x90] sm:$0xff]  ;;  %v910_v10 = vunpack.c.h.b16 %v840_v41  ;;  %v456_v20 = vadd.f32 %v8854_v29, %v402_v4  ;;  %v405_v25 = vmul.f32 %v8849_v26, %v349_v6  ;;  %v845_v41 = vpack.c.bf16 %v9043_v22, %v9043_v22 }
  0x38   : > { %8064 = vmatprep.mubr.bf16.mxu1 %v1421_v54  ;;  %8109 = vmatpush3.bf16.msra.mxu0 %v8648_v53  ;;  %v1429_v39 = vor.u32 %v1428_v7, %v1425_v55  ;;  %v453_v53 = vadd.f32 %v8854_v29, %v399_v42  ;;  %v1443_v61 = vrot.slane %v1441_v46, 3  ;;  %v401_v2 = vmul.f32 %v8849_v26, %v345_v38  ;;  %v351_v38 = vld [vmem:[%s8830_s14 + $0xc0] sm:$0xff] }
  0x39   : > { %8173 = vmatpush3.bf16.msra.mxu1 %v8649_v62  ;;  %8110 = vmatprep.subr.bf16.mxu0 %v8650_v24  ;;  %v1446_v62 = vrot.slane %v1444_v47, 4  ;;  %v966_v54 = vpack.c.b16 %v911_v11, %v910_v10  ;;  %v459_v32 = vadd.f32 %v8854_v29, %v405_v25 }
  0x3a   : > { %8174 = vmatprep.subr.bf16.mxu1 %v8651_v31  ;;  %v1430_v59 = vsel %vm1368_vm0, %v1420_v17, %v1429_v39  ;;  %v501_v0 = vmax.f32 %v453_v53, 0.0  ;;  %v1439_v9 = vsel %vm1368_vm0, %v1429_v39, %v1438_v60  ;;  %v9038_v17 = vld [vmem:[%s8817_s10 + $0xb0] sm:$0xff]  ;;  %v455_v18 = vadd.f32 %v8854_v29, %v401_v2 }
  0x3b   : > { %v1447_v21 = vor.u32 %v1446_v62, %v1443_v61  ;;  %v844_v55 = vpack.c.bf16 %v9038_v17, %v9035_v16  ;;  %v8657_v39 = vld [vmem:[%s10966_s4 + $0xb0] sm:$0xff]   ;;  %v507_v43 = vmax.f32 %v459_v32, 0.0  ;;  %v407_v53 = vmul.f32 %v8849_v26, %v351_v38  ;;  %v802_v62 = vld [vmem:[%s8817_s10 + $0xa0] sm:$0xff] }
  0x3c   : > { %8111 = vmatpush3.bf16.msra.mxu0 %v8650_v24  ;;  %v608_v15 = vpack.c.bf16 %v501_v0, %v500_v63  ;;  %v404_v24 = vmul.f32 %v8849_v26, %v348_v5  ;;  %v503_v30 = vmax.f32 %v455_v18, 0.0  ;;  %v810_v17 = vld [vmem:[%s8817_s10 + $0xe0] sm:$0xff]  ;;  %v811_v18 = vld [vmem:[%s8817_s10 + $0xe8] sm:$0xff] }
  0x3d   : > { %8175 = vmatpush3.bf16.msra.mxu1 %v8651_v31  ;;  %8112 = vmatprep.subr.bf16.mxu0 %v8652_v44  ;;  %v504_v31 = vmax.f32 %v456_v20, 0.0  ;;  %v1448_v40 = vsel %vm1368_vm0, %v1438_v60, %v1447_v21  ;;  %v8659_v60 = vld [vmem:[%s10966_s4 + $0xb8] sm:$0xff]   ;;  %v7651_v20 = vpack.c.bf16 %v9035_v16, %v802_v62  ;;  %v806_v38 = vld [vmem:[%s8817_s10 + $0xc0] sm:$0xff]  ;;  %v361_v62 = vld [vmem:[%s8830_s14 + $0x110] sm:$0xff] }
  0x3e   : > { %8001 = vmatmul.mubr.bf16.gmra.mrb[8].mxu0 %v963_v34  ;;  %8176 = vmatprep.subr.bf16.mxu1 %v8653_v49  ;;  %v7422_v27 = vcombine.low %v8722_v57, %v608_v15  ;;  %v678_v28 = vunpack.c.h.b16 %v608_v15  ;;  %v458_v7 = vadd.f32 %v8854_v29, %v404_v24 }
  0x3f   : > { %8065 = vmatmul.mubr.bf16.gmra.mrb[8].mxu1 %v1430_v59  ;;  %8004 = vmatprep.mubr.bf16.mxu0 %v838_v50  ;;  %v9056_v19 = vpack.c.bf16 %v504_v31, %v503_v30  ;;  %v8658_v59 = vld [vmem:[%s10966_s4 + $0x78] sm:$0xff]   ;;  %v9109_v30 = vld [vmem:[%s10966_s4 + $0xc0] sm:$0xff]  }
  0x40   : > { %8068 = vmatprep.mubr.bf16.mxu1 %v1439_v9  ;;  %8113 = vmatpush3.bf16.msra.mxu0 %v8652_v44  ;;  %765 = vst [vmem:[#allocation2 + $0x48] sm:$0xff] %v7422_v27  ;;  %v1450_v34 = vshrl.u32 %v7422_v27, 16  ;;  %v1453_v35 = vshll.u32 %v7422_v27, 16  ;;  %v718_v1 = vpack.c.b16 %v8896_v58, %v678_v28  ;;  %v506_v42 = vmax.f32 %v458_v7, 0.0  ;;  %v352_v44 = vld [vmem:[%s8830_s14 + $0xc8] sm:$0xff]  ;;  %v354_v27 = vld [vmem:[%s8830_s14 + $0xd8] sm:$0xff] }
  0x41   : > { %8177 = vmatpush3.bf16.msra.mxu1 %v8653_v49  ;;  %8114 = vmatprep.subr.bf16.mxu0 %v8654_v8  ;;  %767 = vst [vmem:[#allocation2 + $0x58] sm:$0xff] %v9056_v19  ;;  %v1468_v49 = vshrl.u32 %v9056_v19, 16  ;;  %v1471_v50 = vshll.u32 %v9056_v19, 16  ;;  %v408_v61 = vmul.f32 %v8849_v26, %v352_v44  ;;  %v355_v28 = vld [vmem:[%s8830_s14 + $0xe0] sm:$0xff]  ;;  %v357_v44 = vld [vmem:[%s8830_s14 + $0xf0] sm:$0xff] }
  0x42   : > { %8178 = vmatprep.subr.bf16.mxu1 %v8655_v14  ;;  %v1452_v45 = vrot.slane %v1450_v34, 3  ;;  %v1455_v46 = vrot.slane %v1453_v35, 4  ;;  %766 = vst [vmem:[#allocation2 + $0x50] sm:$0xff] %v718_v1  ;;  %v1459_v47 = vshrl.u32 %v718_v1, 16  ;;  %v1462_v48 = vshll.u32 %v718_v1, 16  ;;  %v9121_v7 = vld [vmem:[%s10966_s4 + $0x100] sm:$0xff]  }
  0x43   : > { %v612_v52 = vpack.c.bf16 %v507_v43, %v506_v42  ;;  %v1470_v63 = vrot.slane %v1468_v49, 3  ;;  %v1473_v0 = vrot.slane %v1471_v50, 4  ;;  %v462_v9 = vadd.f32 %v8854_v29, %v408_v61  ;;  %v9130_v35 = vld [vmem:[%s8817_s10 + $0xd8] sm:$0xff] }
  0x44   : > { %8115 = vmatpush3.bf16.msra.mxu0 %v8654_v8  ;;  %v1456_v36 = vor.u32 %v1455_v46, %v1452_v45  ;;  %v1461_v37 = vrot.slane %v1459_v47, 3  ;;  %v461_v8 = vadd.f32 %v8854_v29, %v407_v53  ;;  %v411_v42 = vmul.f32 %v8849_v26, %v355_v28 }
  0x45   : > { %8179 = vmatpush3.bf16.msra.mxu1 %v8655_v14  ;;  %8116 = vmatprep.subr.bf16.mxu0 %v8656_v33  ;;  %v9086_v2 = vcombine.low %v8722_v57, %v612_v52  ;;  %v684_v4 = vunpack.c.h.b16 %v612_v52  ;;  %v9091_v10 = vor.u32 %v1473_v0, %v1470_v63  ;;  %v510_v25 = vmax.f32 %v462_v9, 0.0 }
  0x46   : > { %8005 = vmatmul.mubr.bf16.gmra.mrb[12].mxu0 %v7650_v51  ;;  %8180 = vmatprep.subr.bf16.mxu1 %v8657_v39  ;;  %v1464_v51 = vrot.slane %v1462_v48, 4  ;;  %v1457_v5 = vsel %vm1368_vm0, %v1447_v21, %v1456_v36  ;;  %v9102_v21 = vunpack.c.h.b16 %v844_v55  ;;  %v509_v24 = vmax.f32 %v461_v8, 0.0  ;;  %v358_v48 = vld [vmem:[%s8830_s14 + $0xf8] sm:$0xff]  ;;  %v808_v8 = vld [vmem:[%s8817_s10 + $0xd0] sm:$0xff] }
  0x47   : > { %8069 = vmatmul.mubr.bf16.gmra.mrb[12].mxu1 %v1448_v40  ;;  %8008 = vmatprep.mubr.bf16.mxu0 %v966_v54  ;;  %768 = vst [vmem:[#allocation2 + $0x60] sm:$0xff] %v9086_v2  ;;  %v1477_v11 = vshrl.u32 %v9086_v2, 16  ;;  %v1480_v14 = vshll.u32 %v9086_v2, 16  ;;  %v9097_v15 = vpack.c.b16 %v8896_v58, %v684_v4  ;;  %v848_v40 = vpack.c.bf16 %v810_v17, %v9130_v35 }
  0x48   : > { %8117 = vmatpush3.bf16.msra.mxu0 %v8656_v33  ;;  %v1465_v6 = vor.u32 %v1464_v51, %v1461_v37  ;;  %8072 = vmatprep.mubr.bf16.mxu1 %v1457_v5  ;;  %v917_v33 = vunpack.c.l.b16 %v845_v41  ;;  %v9132_v1 = vpack.c.bf16 %v510_v25, %v509_v24  ;;  %v410_v41 = vmul.f32 %v8849_v26, %v354_v27 }
  0x49   : > { %8181 = vmatpush3.bf16.msra.mxu1 %v8657_v39  ;;  %8118 = vmatprep.subr.bf16.mxu0 %v8658_v59  ;;  %v1479_v16 = vrot.slane %v1477_v11, 3  ;;  %v1482_v54 = vrot.slane %v1480_v14, 4  ;;  %769 = vst [vmem:[#allocation2 + $0x68] sm:$0xff] %v9097_v15  ;;  %v1486_v55 = vshrl.u32 %v9097_v15, 16  ;;  %v1489_v34 = vshll.u32 %v9097_v15, 16  ;;  %v807_v39 = vld [vmem:[%s8817_s10 + $0xc8] sm:$0xff] }
  0x4a   : > { %8182 = vmatprep.subr.bf16.mxu1 %v8659_v60  ;;  %v1466_v31 = vsel %vm1368_vm0, %v1456_v36, %v1465_v6  ;;  %v1475_v32 = vsel %vm1368_vm0, %v1465_v6, %v9091_v10  ;;  %770 = vst [vmem:[#allocation2 + $0x70] sm:$0xff] %v9132_v1  ;;  %v1495_v56 = vshrl.u32 %v9132_v1, 16  ;;  %v849_v43 = vpack.c.bf16 %v811_v18, %v811_v18 }
  0x4b   : > { %v1488_v22 = vrot.slane %v1486_v55, 3  ;;  %v1491_v23 = vrot.slane %v1489_v34, 4  ;;  %v1483_v45 = vor.u32 %v1482_v54, %v1479_v16  ;;  %v464_v46 = vadd.f32 %v8854_v29, %v410_v41 }
  0x4c   : > { %8119 = vmatpush3.bf16.msra.mxu0 %v8658_v59  ;;  %v465_v47 = vadd.f32 %v8854_v29, %v411_v42  ;;  %v1497_v53 = vrot.slane %v1495_v56, 3  ;;  %v969_v36 = vpack.c.b16 %v917_v33, %v9102_v21  ;;  %v413_v61 = vmul.f32 %v8849_v26, %v357_v44  ;;  %v9193_v42 = vld [vmem:[%s8817_s10 + $0x108] sm:$0xff] }
  0x4d   : > { %8183 = vmatpush3.bf16.msra.mxu1 %v8659_v60  ;;  %8232 = vmatprep.subr.bf16.mxu0 %v9109_v30  ;;  %v1492_v52 = vor.u32 %v1491_v23, %v1488_v22  ;;  %v360_v60 = vld [vmem:[%s8830_s14 + $0x108] sm:$0xff]  ;;  %v512_v37 = vmax.f32 %v464_v46, 0.0  ;;  %v846_v63 = vpack.c.bf16 %v807_v39, %v806_v38  ;;  %v9163_v0 = vunpack.c.h.b16 %v848_v40  ;;  %v363_v40 = vld [vmem:[%s8830_s14 + $0x120] sm:$0xff]  ;;  %v816_v23 = vld [vmem:[%s8817_s10 + $0x110] sm:$0xff] }
  0x4e   : > { %8009 = vmatmul.mubr.bf16.gmra.mrb[16].mxu0 %v842_v13  ;;  %8296 = vmatprep.subr.bf16.mxu1 %v9121_v7  ;;  %v1498_v13 = vshll.u32 %v9132_v1, 16  ;;  %v513_v51 = vmax.f32 %v465_v47, 0.0  ;;  %v9165_v4 = vunpack.c.l.b16 %v849_v43  ;;  %v414_v5 = vmul.f32 %v8849_v26, %v358_v48 }
  0x4f   : > { %8073 = vmatmul.mubr.bf16.gmra.mrb[16].mxu1 %v1466_v31  ;;  %8012 = vmatprep.mubr.bf16.mxu0 %v7651_v20  ;;  %v1484_v6 = vsel %vm1368_vm0, %v9091_v10, %v1483_v45  ;;  %v467_v17 = vadd.f32 %v8854_v29, %v413_v61  ;;  %v416_v18 = vmul.f32 %v8849_v26, %v360_v60  ;;  %v813_v61 = vld [vmem:[%s8817_s10 + $0xf8] sm:$0xff]  ;;  %v2748_v19 = vrot.slane %v1480_v14, 5 }
  0x50   : > { %8076 = vmatprep.mubr.bf16.mxu1 %v1475_v32  ;;  %v1500_v59 = vrot.slane %v1498_v13, 4  ;;  %v616_v9 = vpack.c.bf16 %v513_v51, %v512_v37  ;;  %v1493_v20 = vsel %vm1368_vm0, %v1483_v45, %v1492_v52  ;;  %v468_v24 = vadd.f32 %v8854_v29, %v414_v5  ;;  %v364_v45 = vld [vmem:[%s8830_s14 + $0x128] sm:$0xff]  ;;  %v812_v51 = vld [vmem:[%s8817_s10 + $0xf0] sm:$0xff] }
  0x51   : > { %v417_v25 = vmul.f32 %v8849_v26, %v361_v62  ;;  %v515_v10 = vmax.f32 %v467_v17, 0.0  ;;  %v470_v31 = vadd.f32 %v8854_v29, %v416_v18  ;;  %v7652_v16 = vpack.c.bf16 %v9130_v35, %v808_v8  ;;  %v814_v18 = vld [vmem:[%s8817_s10 + $0x100] sm:$0xff] }
  0x52   : > { %v1501_v21 = vor.u32 %v1500_v59, %v1497_v53  ;;  %v9177_v27 = vcombine.low %v8722_v57, %v616_v9  ;;  %v690_v28 = vunpack.c.h.b16 %v616_v9  ;;  %v516_v54 = vmax.f32 %v468_v24, 0.0 }
  0x53   : > { %v471_v32 = vadd.f32 %v8854_v29, %v417_v25  ;;  %v518_v22 = vmax.f32 %v470_v31, 0.0  ;;  %v972_v35 = vpack.c.b16 %v9165_v4, %v9163_v0  ;;  %v817_v0 = vld [vmem:[%s8817_s10 + $0x118] sm:$0xff]  ;;  %v420_v4 = vmul.f32 %v8849_v26, %v364_v45 }
  0x54   : > { %771 = vst [vmem:[#allocation2 + $0x78] sm:$0xff] %v9177_v27  ;;  %v1504_v33 = vshrl.u32 %v9177_v27, 16  ;;  %v10995_v38 = vshll.u32 %v9177_v27, 16  ;;  %v9186_v39 = vpack.c.b16 %v8896_v58, %v690_v28  ;;  %v1502_v41 = vsel %vm1368_vm0, %v1492_v52, %v1501_v21 }
  0x55   : > { %v9196_v43 = vpack.c.bf16 %v516_v54, %v515_v10  ;;  %v519_v44 = vmax.f32 %v471_v32, 0.0  ;;  %v474_v25 = vadd.f32 %v8854_v29, %v420_v4  ;;  %v853_v28 = vpack.c.bf16 %v817_v0, %v817_v0  ;;  %v367_v54 = vld [vmem:[%s8830_s14 + $0x140] sm:$0xff] }
  0x56   : > { %8013 = vmatmul.mubr.bf16.gmra.mrb[20].mxu0 %v969_v36  ;;  %v1506_v46 = vrot.slane %v1504_v33, 3  ;;  %v1509_v47 = vrot.slane %v10995_v38, 4  ;;  %772 = vst [vmem:[#allocation2 + $0x80] sm:$0xff] %v9186_v39  ;;  %v10994_v48 = vshrl.u32 %v9186_v39, 16  ;;  %v10987_v52 = vshll.u32 %v9186_v39, 16 }
  0x57   : > { %8077 = vmatmul.mubr.bf16.gmra.mrb[20].mxu1 %v1484_v6  ;;  %8016 = vmatprep.mubr.bf16.mxu0 %v846_v63  ;;  %773 = vst [vmem:[#allocation2 + $0x88] sm:$0xff] %v9196_v43  ;;  %v10986_v53 = vshrl.u32 %v9196_v43, 16  ;;  %v10976_v59 = vshll.u32 %v9196_v43, 16  ;;  %v620_v60 = vpack.c.bf16 %v519_v44, %v518_v22  ;;  %v419_v36 = vmul.f32 %v8849_v26, %v363_v40 }
  0x58   : > { %8080 = vmatprep.mubr.bf16.mxu1 %v1493_v20  ;;  %v1510_v37 = vor.u32 %v1509_v47, %v1506_v46  ;;  %v1515_v62 = vrot.slane %v10994_v48, 3  ;;  %v1518_v63 = vrot.slane %v10987_v52, 4  ;;  %v852_v20 = vpack.c.bf16 %v816_v23, %v9193_v42 }
  0x59   : > { %v1524_v5 = vrot.slane %v10986_v53, 3  ;;  %v1527_v6 = vrot.slane %v10976_v59, 4  ;;  %v9223_v8 = vcombine.low %v8722_v57, %v620_v60  ;;  %v696_v9 = vunpack.c.h.b16 %v620_v60 }
  0x5a   : > { %v1511_v17 = vsel %vm1368_vm0, %v1501_v21, %v1510_v37  ;;  %v473_v24 = vadd.f32 %v8854_v29, %v419_v36  ;;  %v366_v21 = vld [vmem:[%s8830_s14 + $0x138] sm:$0xff]  ;;  %v1519_v32 = vor.u32 %v1518_v63, %v1515_v62  ;;  %v522_v29 = vmax.f32 %v474_v25, 0.0 }
  0x5b   : > { %774 = vst [vmem:[#allocation2 + $0x90] sm:$0xff] %v9223_v8  ;;  %v10975_v10 = vshrl.u32 %v9223_v8, 16  ;;  %v10974_v31 = vshll.u32 %v9223_v8, 16  ;;  %v850_v40 = vpack.c.bf16 %v813_v61, %v812_v51  ;;  %v7653_v44 = vpack.c.bf16 %v9193_v42, %v814_v18  ;;  %v9249_v51 = vld [vmem:[%s8817_s10 + $0x120] sm:$0xff]  ;;  %v9252_v61 = vld [vmem:[%s8817_s10 + $0x128] sm:$0xff]  ;;  %v369_v42 = vld [vmem:[%s8830_s14 + $0x150] sm:$0xff] }
  0x5c   : > { %v521_v22 = vmax.f32 %v473_v24, 0.0  ;;  %v928_v60 = vunpack.c.h.b16 %v852_v20  ;;  %v929_v36 = vunpack.c.l.b16 %v853_v28  ;;  %v422_v62 = vmul.f32 %v8849_v26, %v366_v21  ;;  %v9272_v28 = vld [vmem:[%s8817_s10 + $0x138] sm:$0xff] }
  0x5d   : > { %v1536_v45 = vrot.slane %v10974_v31, 4  ;;  %v423_v63 = vmul.f32 %v8849_v26, %v367_v54  ;;  %v1520_v0 = vsel %vm1368_vm0, %v1510_v37, %v1519_v32  ;;  %v823_v26 = vld [vmem:[%s8817_s10 + $0x148] sm:$0xff]  ;;  %v8708_v37 = vld [vmem:[%s10965_s3] ss:$0 sm:$0xff] }
  0x5e   : > { %8017 = vmatmul.mubr.bf16.gmra.mrb[24].mxu0 %v7652_v16  ;;  %v9234_v16 = vpack.c.b16 %v8896_v58, %v696_v9  ;;  %v9246_v47 = vpack.c.bf16 %v522_v29, %v521_v22  ;;  %v476_v20 = vadd.f32 %v8708_v37, %v422_v62  ;;  %v372_v54 = vld [vmem:[%s8830_s14 + $0x168] sm:$0xff]  ;;  %v857_v31 = vpack.c.bf16 %v823_v26, %v823_v26 }
  0x5f   : > { %8081 = vmatmul.mubr.bf16.gmra.mrb[24].mxu1 %v1502_v41  ;;  %8020 = vmatprep.mubr.bf16.mxu0 %v972_v35  ;;  %v1528_v41 = vor.u32 %v1527_v6, %v1524_v5  ;;  %v1533_v35 = vrot.slane %v10975_v10, 3  ;;  %v822_v6 = vld [vmem:[%s8817_s10 + $0x140] sm:$0xff]  ;;  %v477_v24 = vadd.f32 %v8708_v37, %v423_v63  ;;  %v373_v63 = vld [vmem:[%s8830_s14 + $0x170] sm:$0xff] }
  0x60   : > { %8084 = vmatprep.mubr.bf16.mxu1 %v1511_v17  ;;  %775 = vst [vmem:[#allocation2 + $0x98] sm:$0xff] %v9234_v16  ;;  %v10972_v23 = vshrl.u32 %v9234_v16, 16  ;;  %v10971_v46 = vshll.u32 %v9234_v16, 16  ;;  %776 = vst [vmem:[#allocation2 + $0xa0] sm:$0xff] %v9246_v47  ;;  %v10973_v9 = vshrl.u32 %v9246_v47, 16  ;;  %v370_v17 = vld [vmem:[%s8830_s14 + $0x158] sm:$0xff]  ;;  %v935_v26 = vunpack.c.l.b16 %v857_v31 }
  0x61   : > { %v1529_v18 = vsel %vm1368_vm0, %v1519_v32, %v1528_v41  ;;  %v1537_v25 = vor.u32 %v1536_v45, %v1533_v35  ;;  %v10983_v21 = vshll.u32 %v9246_v47, 16  ;;  %v524_v22 = vmax.f32 %v476_v20, 0.0  ;;  %v828_v31 = vld [vmem:[%s8817_s10 + $0x170] sm:$0xff] }
  0x62   : > { %v1542_v4 = vrot.slane %v10972_v23, 3  ;;  %v1545_v5 = vrot.slane %v10971_v46, 4  ;;  %v1551_v32 = vrot.slane %v10973_v9, 3  ;;  %v525_v29 = vmax.f32 %v477_v24, 0.0  ;;  %v8709_v46 = vld [vmem:[%s10964_s2] ss:$0 sm:$0xff] }
  0x63   : > { %v425_v62 = vmul.f32 %v8709_v46, %v369_v42  ;;  %v854_v35 = vpack.c.bf16 %v9252_v61, %v9249_v51  ;;  %v426_v23 = vmul.f32 %v8709_v46, %v370_v17  ;;  %v428_v20 = vmul.f32 %v8709_v46, %v372_v54  ;;  %v820_v17 = vld [vmem:[%s8817_s10 + $0x130] sm:$0xff] }
  0x64   : > { %v1546_v45 = vor.u32 %v1545_v5, %v1542_v4  ;;  %v1538_v24 = vsel %vm1368_vm0, %v1528_v41, %v1537_v25  ;;  %v429_v59 = vmul.f32 %v8709_v46, %v373_v63  ;;  %v1554_v4 = vrot.slane %v10983_v21, 4 }
  0x65   : > { %v479_v9 = vadd.f32 %v8708_v37, %v425_v62  ;;  %v480_v10 = vadd.f32 %v8708_v37, %v426_v23  ;;  %v482_v51 = vadd.f32 %v8708_v37, %v428_v20  ;;  %v829_v62 = vld [vmem:[%s8817_s10 + $0x178] sm:$0xff] }
  0x66   : > { %8021 = vmatmul.mubr.bf16.gmra.mrb[28].mxu0 %v850_v40  ;;  %v975_v40 = vpack.c.b16 %v929_v36, %v928_v60  ;;  %v1547_v61 = vsel %vm1368_vm0, %v1537_v25, %v1546_v45  ;;  %v9300_v25 = vld [vmem:[%s8817_s10 + $0x168] sm:$0xff]  ;;  %v1555_v63 = vor.u32 %v1554_v4, %v1551_v32  ;;  %v9323_v4 = vld [vmem:[#allocation2 + $0x10] sm:$0xff] }
  0x67   : > { %8085 = vmatmul.mubr.bf16.gmra.mrb[28].mxu1 %v1520_v0  ;;  %8024 = vmatprep.mubr.bf16.mxu0 %v7653_v44  ;;  %v856_v44 = vpack.c.bf16 %v822_v6, %v9272_v28  ;;  %v624_v0 = vpack.c.bf16 %v525_v29, %v524_v22  ;;  %v527_v36 = vmax.f32 %v479_v9, 0.0  ;;  %v528_v5 = vmax.f32 %v480_v10, 0.0  ;;  %11044 = vst [vmem:[#allocation4_spill] sm:$0xff] %v9323_v4 }
  0x68   : > { %8088 = vmatprep.mubr.bf16.mxu1 %v1529_v18  ;;  %v483_v6 = vadd.f32 %v8708_v37, %v429_v59  ;;  %v530_v9 = vmax.f32 %v482_v51, 0.0  ;;  %v861_v51 = vpack.c.bf16 %v829_v62, %v829_v62 }
  0x69   : > { %v9287_v42 = vcombine.low %v8722_v57, %v624_v0  ;;  %v702_v60 = vunpack.c.h.b16 %v624_v0  ;;  %v934_v18 = vunpack.c.h.b16 %v856_v44  ;;  %v9302_v10 = vpack.c.bf16 %v528_v5, %v527_v36 }
  0x6a   : > { %v531_v59 = vmax.f32 %v483_v6, 0.0  ;;  %v860_v36 = vpack.c.bf16 %v828_v31, %v9300_v25  ;;  %v825_v6 = vld [vmem:[%s8817_s10 + $0x158] sm:$0xff]  ;;  %v9340_v62 = vunpack.c.l.b16 %v861_v51 }
  0x6b   : > { %777 = vst [vmem:[#allocation2 + $0xa8] sm:$0xff] %v9287_v42  ;;  %v10982_v41 = vshrl.u32 %v9287_v42, 16  ;;  %v10981_v23 = vshll.u32 %v9287_v42, 16  ;;  %v9297_v46 = vpack.c.b16 %v8896_v58, %v702_v60  ;;  %779 = vst [vmem:[#allocation2 + $0xb8] sm:$0xff] %v9302_v10  ;;  %v10980_v0 = vshrl.u32 %v9302_v10, 16 }
  0x6c   : > { %v10979_v20 = vshll.u32 %v9302_v10, 16  ;;  %v7654_v60 = vpack.c.bf16 %v9272_v28, %v820_v17  ;;  %v978_v5 = vpack.c.b16 %v935_v26, %v934_v18  ;;  %v1556_v28 = vsel %vm1368_vm0, %v1546_v45, %v1555_v63  ;;  %v9345_v45 = vld [vmem:[#allocation2 + $0x18] sm:$0xff] }
  0x6d   : > { %v1560_v37 = vrot.slane %v10982_v41, 3  ;;  %v1563_v54 = vrot.slane %v10981_v23, 4  ;;  %778 = vst [vmem:[#allocation2 + $0xb0] sm:$0xff] %v9297_v46  ;;  %v10978_v22 = vshrl.u32 %v9297_v46, 16  ;;  %v10977_v29 = vshll.u32 %v9297_v46, 16  ;;  %11045 = vst [vmem:[#allocation5_spill] sm:$0xff] %v9345_v45 }
  0x6e   : > { %8025 = vmatmul.mubr.bf16.gmra.mrb[32].mxu0 %v975_v40  ;;  %v9314_v40 = vpack.c.bf16 %v531_v59, %v530_v9  ;;  %v1578_v31 = vrot.slane %v10980_v0, 3  ;;  %v1581_v18 = vrot.slane %v10979_v20, 4  ;;  %v9338_v26 = vunpack.c.h.b16 %v860_v36  ;;  %v9349_v20 = vld [vmem:[#allocation2 + $0x20] sm:$0xff]  ;;  %v9371_v23 = vld [vmem:[#allocation2 + $0x30] sm:$0xff] }
  0x6f   : > { %8089 = vmatmul.mubr.bf16.gmra.mrb[32].mxu1 %v1538_v24  ;;  %8028 = vmatprep.mubr.bf16.mxu0 %v854_v35  ;;  %v2649_v35 = vrot.slane %v8721_v3, 5  ;;  %v1564_v44 = vor.u32 %v1563_v54, %v1560_v37  ;;  %v2592_v24 = vld [vmem:[#allocation2] sm:$0xf0]  ;;  %v824_v3 = vld [vmem:[%s8817_s10 + $0x150] sm:$0xff]  ;;  %v1569_v9 = vrot.slane %v10978_v22, 3  ;;  %v1572_v59 = vrot.slane %v10977_v29, 4 }
  0x70   : > { %8092 = vmatprep.mubr.bf16.mxu1 %v1547_v61  ;;  %v7427_v32 = vcombine.low %v8722_v57, %v9314_v40  ;;  %v2034_v61 = vld [vmem:[#allocation2] sm:$0xf0]  ;;  %v2636_v17 = vshrl.u32 %v2592_v24, 16  ;;  %v2639_v54 = vshll.u32 %v2592_v24, 16  ;;  %v10984_v24 = vshrl.u32 %v9323_v4, 16  ;;  %11046 = vst [vmem:[#allocation6_spill] sm:$0xff] %v9349_v20 }
  0x71   : > { %v826_v37 = vld [vmem:[%s8817_s10 + $0x160] sm:$0xff]  ;;  %v1565_v57 = vsel %vm1368_vm0, %v1555_v63, %v1564_v44  ;;  %v2102_v29 = vrot.slane %v2034_v61, 4  ;;  %v9343_v22 = vor.u32 %v2649_v35, %v8821_v12  ;;  %v1573_v63 = vor.u32 %v1572_v59, %v1569_v9  ;;  %v9355_v9 = vld [vmem:[#allocation2 + $0x28] sm:$0xff] }
  0x72   : > { %780 = vst [vmem:[#allocation2 + $0xc0] sm:$0xff] %v7427_v32  ;;  %v10985_v32 = vshll.u32 %v9323_v4, 16  ;;  %v7655_v36 = vpack.c.bf16 %v9300_v25, %v826_v37  ;;  %v2638_v51 = vrot.slane %v2636_v17, 4  ;;  %v2105_v35 = vrot.slane %v9323_v4, 4  ;;  %11047 = vst [vmem:[#allocation7_spill] sm:$0xff] %v9355_v9 }
  0x73   : > { %v1582_v61 = vor.u32 %v1581_v18, %v1578_v31  ;;  %v2641_v0 = vrot.slane %v2639_v54, 5  ;;  %v981_v59 = vpack.c.b16 %v9340_v62, %v9338_v26  ;;  %v10990_v25 = vshll.u32 %v9349_v20, 16 }
  0x74   : > { %v2655_v17 = vrot.slane %v10984_v24, 4  ;;  %v2658_v54 = vrot.slane %v10985_v32, 5  ;;  %v2107_v31 = vrot.slane %v9345_v45, 4  ;;  %v10991_v62 = vshrl.u32 %v9355_v9, 16 }
  0x75   : > { %v1583_v41 = vsel %vm1368_vm0, %v1573_v63, %v1582_v61  ;;  %v2676_v52 = vrot.slane %v10990_v25, 5  ;;  %v10998_v25 = vshll.u32 %v9371_v23, 16 }
  0x76   : > { %8029 = vmatmul.mubr.bf16.gmra.mrb[36].mxu0 %v7654_v60  ;;  %v858_v60 = vpack.c.bf16 %v825_v6, %v824_v3  ;;  %v10989_v3 = vshrl.u32 %v9349_v20, 16  ;;  %v1574_v6 = vsel %vm1368_vm0, %v1564_v44, %v1573_v63  ;;  %v2642_v44 = vor.u32 %v2641_v0, %v2638_v51 }
  0x77   : > { %8093 = vmatmul.mubr.bf16.gmra.mrb[36].mxu1 %v1556_v28  ;;  %8032 = vmatprep.mubr.bf16.mxu0 %v978_v5  ;;  %v10993_v28 = vshrl.u32 %v9345_v45, 16  ;;  %v10988_v5 = vshll.u32 %v9345_v45, 16  ;;  %v9384_v0 = vsel %vm2101_vm1, %v8821_v12, %v2105_v35  ;;  %v2659_v63 = vor.u32 %v2658_v54, %v2655_v17 }
  0x78   : > { %8096 = vmatprep.mubr.bf16.mxu1 %v1565_v57  ;;  %v2104_v57 = vsel %vm2101_vm1, %v2102_v29, %v8821_v12  ;;  %v10992_v29 = vshll.u32 %v9355_v9, 16  ;;  %v2109_v51 = vrot.slane %v9349_v20, 4  ;;  %v2113_v17 = vrot.slane %v9371_v23, 4 }
  0x79   : > { %v1351_v37 = vld [vmem:[#allocation2 + $0xc0] sm:$0xf]  ;;  %v2664_v21 = vrot.slane %v10993_v28, 4  ;;  %v2667_v24 = vrot.slane %v10988_v5, 5  ;;  %v2111_v5 = vrot.slane %v9355_v9, 4  ;;  %v11006_v54 = vshrl.u32 %v9371_v23, 16 }
  0x7a   : > { %v1585_v18 = vshrl.u32 %v1351_v37, 16  ;;  %v1588_v26 = vshll.u32 %v1351_v37, 16  ;;  %v2673_v37 = vrot.slane %v10989_v3, 4  ;;  %v9393_v3 = vsel %vm2101_vm1, %v2105_v35, %v2107_v31 }
  0x7b   : > { %v2685_v12 = vrot.slane %v10992_v29, 5  ;;  %v9409_v29 = vsel %vm2101_vm1, %v2107_v31, %v2109_v51  ;;  %v9415_v48 = vsel %vm2101_vm1, %v2109_v51, %v2111_v5  ;;  %v2691_v31 = vrot.slane %v11006_v54, 4 }
  0x7c   : > { %v1587_v32 = vrot.slane %v1585_v18, 3  ;;  %v1590_v53 = vrot.slane %v1588_v26, 4  ;;  %v9390_v18 = vld [vmem:[#allocation2 + $0x40] sm:$0xff]  ;;  %v2694_v38 = vrot.slane %v10998_v25, 5 }
  0x7e   : > { %8033 = vmatmul.mubr.bf16.gmra.mrb[40].mxu0 %v858_v60  ;;  %v9388_v60 = vld [vmem:[#allocation2 + $0x38] sm:$0xff]  ;;  %v1591_v26 = vor.u32 %v1590_v53, %v1587_v32  ;;  %v2677_v53 = vor.u32 %v2676_v52, %v2673_v37  ;;  %v9460_v25 = vor.u32 %v2694_v38, %v2691_v31 }
  0x7f   : > { %8097 = vmatmul.mubr.bf16.gmra.mrb[40].mxu1 %v1574_v6  ;;  %8036 = vmatprep.mubr.bf16.mxu0 %v7655_v36  ;;  %v2682_v36 = vrot.slane %v10991_v62, 4  ;;  %v2668_v6 = vor.u32 %v2667_v24, %v2664_v21  ;;  %v11002_v32 = vshrl.u32 %v9388_v60, 16  ;;  %v10996_v35 = vshll.u32 %v9388_v60, 16 }
  0x80   : > { %8100 = vmatprep.mubr.bf16.mxu1 %v1583_v41  ;;  %v2651_v41 = vsel %vm2634_vm2, %v2642_v44, %v9343_v22  ;;  %v2660_v62 = vsel %vm2634_vm2, %v9343_v22, %v2659_v63  ;;  %v10999_v21 = vshrl.u32 %v9390_v18, 16  ;;  %v10997_v24 = vshll.u32 %v9390_v18, 16 }
  0x81   : > { %v1592_v28 = vsel %vm1368_vm0, %v1582_v61, %v1591_v26  ;;  %v9417_v52 = vor.u32 %v2685_v12, %v2682_v36  ;;  %v2115_v44 = vrot.slane %v9388_v60, 4  ;;  %v2669_v37 = vsel %vm2634_vm2, %v2659_v63, %v2668_v6  ;;  %v9444_v36 = vld [vmem:[#allocation2 + $0x48] sm:$0xff] }
  0x82   : > { %v9422_v22 = vsel %vm2101_vm1, %v2111_v5, %v2113_v17  ;;  %v9429_v61 = vsel %vm2634_vm2, %v2668_v6, %v2677_v53  ;;  %v2700_v51 = vrot.slane %v11002_v32, 4  ;;  %v2703_v26 = vrot.slane %v10996_v35, 5 }
  0x83   : > { %v11001_v63 = vrot.slane %v9390_v18, 4  ;;  %v9438_v5 = vrot.slane %v10999_v21, 4  ;;  %v2736_v12 = vrot.slane %v1468_v49, 4  ;;  %v2739_v6 = vrot.slane %v1471_v50, 5 }
  0x84   : > { %v11000_v35 = vrot.slane %v9086_v2, 4  ;;  %v2127_v49 = vrot.slane %v9097_v15, 4  ;;  %v9467_v50 = vor.u32 %v2703_v26, %v2700_v51  ;;  %v11005_v38 = vshrl.u32 %v9444_v36, 16 }
  0x85   : > { %v9462_v21 = vor.u32 %v2739_v6, %v2736_v12  ;;  %v2763_v26 = vrot.slane %v1495_v56, 4  ;;  %v2766_v15 = vrot.slane %v1498_v13, 5  ;;  %v2772_v12 = vrot.slane %v1504_v33, 4 }
  0x86   : > { %8037 = vmatmul.mubr.bf16.gmra.mrb[44].mxu0 %v981_v59  ;;  %v9442_v59 = vrot.slane %v10997_v24, 5  ;;  %v2745_v24 = vrot.slane %v1477_v11, 4  ;;  %v2757_v11 = vrot.slane %v1489_v34, 5  ;;  %v9483_v31 = vsel %vm2101_vm1, %v11000_v35, %v2127_v49 }
  0x87   : > { %8101 = vmatmul.mubr.bf16.gmra.mrb[44].mxu1 %v1592_v28  ;;  %8120 = vmatprep.mubr.bf16.mxu0 %v2104_v57  ;;  %v9452_v28 = vsel %vm2634_vm2, %v2677_v53, %v9417_v52  ;;  %v9455_v57 = vsel %vm2101_vm1, %v2113_v17, %v2115_v44  ;;  %v9472_v17 = vsel %vm2101_vm1, %v2115_v44, %v11001_v63  ;;  %v11004_v53 = vshll.u32 %v9444_v36, 16 }
  0x88   : > { %8184 = vmatprep.mubr.bf16.mxu1 %v2651_v41  ;;  %v2754_v41 = vrot.slane %v1486_v55, 4  ;;  %v2749_v14 = vor.u32 %v2748_v19, %v2745_v24  ;;  %v2129_v44 = vrot.slane %v9132_v1, 4  ;;  %v8662_v55 = vld [vmem:[%s10966_s4 + $0xc8] sm:$0xff]   ;;  %v2131_v24 = vrot.slane %v9177_v27, 4 }
  0x89   : > { %v11048_v6 = vshll.u32 %v9177_v27, 16  ;;  %v8663_v1 = vld [vmem:[%s10966_s4 + $0x108] sm:$0xff]   ;;  %v11050_v35 = vshll.u32 %v9186_v39, 16  ;;  %v2139_v63 = vrot.slane %v9234_v16, 4 }
  0x8a   : > { %v2758_v51 = vor.u32 %v2757_v11, %v2754_v41  ;;  %v9495_v34 = vsel %vm2634_vm2, %v9462_v21, %v2749_v14  ;;  %v9510_v13 = vsel %vm2101_vm1, %v2127_v49, %v2129_v44  ;;  %v2767_v41 = vor.u32 %v2766_v15, %v2763_v26 }
  0x8b   : > { %v2775_v19 = vrot.slane %v11048_v6, 5  ;;  %v2133_v11 = vrot.slane %v9186_v39, 4  ;;  %v9515_v27 = vsel %vm2101_vm1, %v2129_v44, %v2131_v24  ;;  %v2135_v44 = vrot.slane %v9196_v43, 4 }
  0x8c   : > { %v9507_v56 = vsel %vm2634_vm2, %v2749_v14, %v2758_v51  ;;  %v2784_v14 = vrot.slane %v11050_v35, 5  ;;  %v11051_v26 = vshrl.u32 %v9196_v43, 16 }
  0x8d   : > { %v2776_v33 = vor.u32 %v2775_v19, %v2772_v12  ;;  %v9530_v49 = vsel %vm2101_vm1, %v2131_v24, %v2133_v11  ;;  %v2137_v24 = vrot.slane %v9223_v8, 4  ;;  %v9545_v12 = vsel %vm2101_vm1, %v2133_v11, %v2135_v44 }
  0x8e   : > { %8121 = vmatmul.mubr.bf16.vlgmr.msra.gmra.mrb[48].mxu0 %v9384_v0  ;;  %v11049_v0 = vshrl.u32 %v9186_v39, 16  ;;  %v2790_v39 = vrot.slane %v11051_v26, 4 }
  0x8f   : > { %8185 = vmatmul.mubr.bf16.vlgmr.msra.gmra.mrb[48].mxu1 %v2660_v62  ;;  %8233 = vmatpush3.bf16.msra.mxu0 %v9109_v30  ;;  %v8664_v62 = vld [vmem:[%s10966_s4 + $0xd0] sm:$0xff]   ;;  %v9527_v30 = vsel %vm2634_vm2, %v2758_v51, %v2767_v41  ;;  %v11052_v51 = vshll.u32 %v9196_v43, 16 }
  0x90   : > { %v2781_v6 = vrot.slane %v11049_v0, 4  ;;  %8297 = vmatpush3.bf16.msra.mxu1 %v9121_v7  ;;  %8124 = vmatprep.mubr.bf16.mxu0 %v9393_v3  ;;  %v8665_v7 = vld [vmem:[%s10966_s4 + $0x110] sm:$0xff]   ;;  %v9539_v3 = vsel %vm2634_vm2, %v2767_v41, %v2776_v33  ;;  %v11054_v0 = vshll.u32 %v9223_v8, 16 }
  0x91   : > { %8188 = vmatprep.mubr.bf16.mxu1 %v2669_v37  ;;  %8234 = vmatprep.subr.bf16.mxu0 %v8662_v55  ;;  %v2793_v15 = vrot.slane %v11052_v51, 5  ;;  %v11053_v37 = vshrl.u32 %v9223_v8, 16  ;;  %v11056_v8 = vshll.u32 %v9234_v16, 16 }
  0x92   : > { %v2785_v35 = vor.u32 %v2784_v14, %v2781_v6  ;;  %8298 = vmatprep.subr.bf16.mxu1 %v8663_v1  ;;  %v2802_v26 = vrot.slane %v11054_v0, 5  ;;  %v9556_v6 = vsel %vm2101_vm1, %v2135_v44, %v2137_v24  ;;  %v11055_v14 = vshrl.u32 %v9234_v16, 16  ;;  %v8667_v16 = vld [vmem:[%s10966_s4 + $0x118] sm:$0xff]  }
  0x93   : > { %v2799_v19 = vrot.slane %v11053_v37, 4  ;;  %8235 = vmatpush3.bf16.msra.mxu0 %v8662_v55  ;;  %v2794_v43 = vor.u32 %v2793_v15, %v2790_v39  ;;  %v9561_v37 = vsel %vm2101_vm1, %v2137_v24, %v2139_v63  ;;  %v2811_v0 = vrot.slane %v11056_v8, 5 }
  0x94   : > { %v9553_v41 = vsel %vm2634_vm2, %v2776_v33, %v2785_v35  ;;  %v2808_v11 = vrot.slane %v11055_v14, 4  ;;  %8299 = vmatpush3.bf16.msra.mxu1 %v8663_v1  ;;  %8236 = vmatprep.subr.bf16.mxu0 %v8664_v62  ;;  %v2141_v55 = vrot.slane %v9246_v47, 4  ;;  %v8666_v33 = vld [vmem:[%s10966_s4 + $0xd8] sm:$0xff]   ;;  %v11057_v1 = vshrl.u32 %v9246_v47, 16 }
  0x95   : > { %v2803_v51 = vor.u32 %v2802_v26, %v2799_v19  ;;  %8300 = vmatprep.subr.bf16.mxu1 %v8665_v7  ;;  %v9570_v44 = vsel %vm2634_vm2, %v2785_v35, %v2794_v43  ;;  %v11058_v15 = vshll.u32 %v9246_v47, 16  ;;  %v2143_v19 = vrot.slane %v9287_v42, 4 }
  0x96   : > { %v2817_v39 = vrot.slane %v11057_v1, 4  ;;  %8125 = vmatmul.mubr.bf16.gmra.mrb[52].mxu0 %v9409_v29  ;;  %v2812_v14 = vor.u32 %v2811_v0, %v2808_v11  ;;  %v9585_v35 = vsel %vm2101_vm1, %v2139_v63, %v2141_v55  ;;  %v11059_v8 = vshrl.u32 %v9287_v42, 16 }
  0x97   : > { %v2820_v24 = vrot.slane %v11058_v15, 5  ;;  %v9582_v26 = vsel %vm2634_vm2, %v2794_v43, %v2803_v51  ;;  %8189 = vmatmul.mubr.bf16.gmra.mrb[52].mxu1 %v9429_v61  ;;  %8128 = vmatprep.mubr.bf16.mxu0 %v9415_v48  ;;  %v9592_v29 = vsel %vm2101_vm1, %v2141_v55, %v2143_v19  ;;  %v11060_v15 = vshll.u32 %v9287_v42, 16  ;;  %v8668_v42 = vld [vmem:[%s10966_s4 + $0xe0] sm:$0xff]  }
  0x98   : > { %v2826_v1 = vrot.slane %v11059_v8, 4  ;;  %v2145_v43 = vrot.slane %v9297_v46, 4  ;;  %8192 = vmatprep.mubr.bf16.mxu1 %v9452_v28  ;;  %8237 = vmatpush3.bf16.msra.mxu0 %v8664_v62  ;;  %v9599_v63 = vsel %vm2634_vm2, %v2803_v51, %v2812_v14  ;;  %v11061_v11 = vshrl.u32 %v9297_v46, 16 }
  0x99   : > { %v2821_v47 = vor.u32 %v2820_v24, %v2817_v39  ;;  %v2829_v32 = vrot.slane %v11060_v15, 5  ;;  %v11062_v48 = vshll.u32 %v9297_v46, 16  ;;  %v11003_v55 = vrot.slane %v9302_v10, 4  ;;  %8301 = vmatpush3.bf16.msra.mxu1 %v8665_v7  ;;  %v9606_v39 = vld [vmem:[#allocation2 + $0x50] sm:$0xff]  ;;  %8238 = vmatprep.subr.bf16.mxu0 %v8666_v33  ;;  %v8669_v7 = vld [vmem:[%s10966_s4 + $0x120] sm:$0xff]  }
  0x9a   : > { %v2835_v61 = vrot.slane %v11061_v11, 4  ;;  %11063 = vst [vmem:[#allocation8_spill] sm:$0xff] %v9606_v39  ;;  %v9615_v51 = vsel %vm2101_vm1, %v2143_v19, %v2145_v43  ;;  %v11064_v46 = vshrl.u32 %v9302_v10, 16  ;;  %8302 = vmatprep.subr.bf16.mxu1 %v8667_v16  ;;  %v2718_v11 = vrot.slane %v11005_v38, 4 }
  0x9b   : > { %v2838_v0 = vrot.slane %v11062_v48, 5  ;;  %v9612_v28 = vsel %vm2634_vm2, %v2812_v14, %v2821_v47  ;;  %v2830_v62 = vor.u32 %v2829_v32, %v2826_v1  ;;  %v9626_v14 = vsel %vm2101_vm1, %v2145_v43, %v11003_v55 }
  0x9c   : > { %v2844_v24 = vrot.slane %v11064_v46, 4  ;;  %v11065_v32 = vshll.u32 %v9302_v10, 16  ;;  %v2696_v1 = vsel %vm2634_vm2, %v9417_v52, %v9460_v25  ;;  %v2721_v48 = vrot.slane %v11004_v53, 5  ;;  %8239 = vmatpush3.bf16.msra.mxu0 %v8666_v33 }
  0x9d   : > { %v2839_v15 = vor.u32 %v2838_v0, %v2835_v61  ;;  %v9638_v61 = vsel %vm2634_vm2, %v2821_v47, %v2830_v62  ;;  %v2705_v43 = vsel %vm2634_vm2, %v9460_v25, %v9467_v50  ;;  %v2725_v0 = vshrl.u32 %v9606_v39, 16  ;;  %8303 = vmatpush3.bf16.msra.mxu1 %v8667_v16  ;;  %8240 = vmatprep.subr.bf16.mxu0 %v8668_v42  ;;  %v8670_v47 = vld [vmem:[%s10966_s4 + $0xe8] sm:$0xff]  }
  0x9e   : > { %v2847_v19 = vrot.slane %v11065_v32, 5  ;;  %v2713_v32 = vor.u32 %v9442_v59, %v9438_v5  ;;  %v2728_v55 = vshll.u32 %v9606_v39, 16  ;;  %v11067_v25 = vshrl.u32 %v9323_v4, 16  ;;  %8129 = vmatmul.mubr.bf16.gmra.mrb[56].mxu0 %v9422_v22  ;;  %8304 = vmatprep.subr.bf16.mxu1 %v8669_v7  ;;  %v8671_v5 = vld [vmem:[%s10966_s4 + $0x128] sm:$0xff]  }
  0x9f   : > { %v9645_v46 = vsel %vm2634_vm2, %v2830_v62, %v2839_v15  ;;  %v11068_v33 = vshrl.u32 %v9345_v45, 16  ;;  %v11069_v16 = vshrl.u32 %v9349_v20, 16  ;;  %8193 = vmatmul.mubr.bf16.gmra.mrb[56].mxu1 %v2696_v1  ;;  %8132 = vmatprep.mubr.bf16.mxu0 %v9455_v57  ;;  %v2722_v22 = vor.u32 %v2721_v48, %v2718_v11 }
  0xa0   : > { %v9647_v52 = vor.u32 %v2847_v19, %v2844_v24  ;;  %v3350_v53 = vrot.slane %v11067_v25, 7  ;;  %v11070_v19 = vshrl.u32 %v9355_v9, 16  ;;  %v11073_v8 = vshll.u32 %v9345_v45, 16  ;;  %8196 = vmatprep.mubr.bf16.mxu1 %v2705_v43  ;;  %8241 = vmatpush3.bf16.msra.mxu0 %v8668_v42  ;;  %v8672_v42 = vld [vmem:[%s10966_s4 + $0xf0] sm:$0xff]  }
  0xa1   : > { %v3358_v62 = vrot.slane %v11068_v33, 7  ;;  %v3366_v24 = vrot.slane %v11069_v16, 7  ;;  %v11071_v33 = vshll.u32 %v9323_v4, 16  ;;  %v11075_v16 = vshll.u32 %v9349_v20, 16  ;;  %8305 = vmatpush3.bf16.msra.mxu1 %v8669_v7  ;;  %8242 = vmatprep.subr.bf16.mxu0 %v8670_v47 }
  0xa2   : > { %11066 = vst [vmem:[#allocation9_spill] sm:$0xff] %v9647_v52  ;;  %v9665_v59 = vsel %vm2634_vm2, %v2839_v15, %v9647_v52  ;;  %v3374_v25 = vrot.slane %v11070_v19, 7  ;;  %v11074_v15 = vshrl.u32 %v9371_v23, 16  ;;  %v11076_v1 = vshll.u32 %v9355_v9, 16  ;;  %8306 = vmatprep.subr.bf16.mxu1 %v8671_v5 }
  0xa3   : > { %v9674_v38 = vor.u32 %v3350_v53, %v11071_v33  ;;  %v3361_v54 = vor.u32 %v3358_v62, %v11073_v8  ;;  %v3369_v52 = vor.u32 %v3366_v24, %v11075_v16  ;;  %v11077_v57 = vshrl.u32 %v9388_v60, 16 }
  0xa4   : > { %v3382_v39 = vrot.slane %v11074_v15, 7  ;;  %v3377_v19 = vor.u32 %v3374_v25, %v11076_v1  ;;  %v11078_v48 = vshrl.u32 %v9390_v18, 16  ;;  %v11079_v45 = vrot.slane %v9444_v36, 4  ;;  %8243 = vmatpush3.bf16.msra.mxu0 %v8670_v47 }
  0xa5   : > { %11072 = vst [vmem:[#allocation10_spill] sm:$0xff] %v9674_v38  ;;  %v3390_v11 = vrot.slane %v11077_v57, 7  ;;  %v11080_v8 = vrot.slane %v9390_v18, 4  ;;  %v2727_v43 = vrot.slane %v2725_v0, 4  ;;  %v9697_v16 = vsel %vm3342_vm3, %v3350_v53, %v3361_v54  ;;  %8307 = vmatpush3.bf16.msra.mxu1 %v8671_v5  ;;  %8244 = vmatprep.subr.bf16.mxu0 %v8672_v42 }
  0xa6   : > { %v3398_v33 = vrot.slane %v11078_v48, 7  ;;  %11081 = vst [vmem:[#allocation11_spill] sm:$0xff] %v9697_v16  ;;  %v11082_v1 = vshrl.u32 %v9444_v36, 16  ;;  %v8673_v48 = vld [vmem:[%s10966_s4 + $0x130] sm:$0xff]   ;;  %v9708_v7 = vsel %vm3342_vm3, %v3366_v24, %v3377_v19  ;;  %v11084_v54 = vshll.u32 %v9388_v60, 16  ;;  %8133 = vmatmul.mubr.bf16.gmra.mrb[60].mxu0 %v9472_v17  ;;  %v9749_v17 = vld [vmem:[%s10966_s4 + $0x140] sm:$0xff]  }
  0xa7   : > { %v2120_v15 = vsel %vm2101_vm1, %v11080_v8, %v11079_v45  ;;  %v9705_v45 = vsel %vm3342_vm3, %v3358_v62, %v3369_v52  ;;  %v11083_v8 = vshll.u32 %v9371_v23, 16  ;;  %v11085_v20 = vshll.u32 %v9390_v18, 16  ;;  %8308 = vmatprep.subr.bf16.mxu1 %v8673_v48 }
  0xa8   : > { %v3406_v57 = vrot.slane %v11082_v1, 7  ;;  %v3393_v53 = vor.u32 %v3390_v11, %v11084_v54  ;;  %v2714_v1 = vsel %vm2634_vm2, %v9467_v50, %v2713_v32  ;;  %v11086_v4 = vshll.u32 %v9444_v36, 16  ;;  %8136 = vmatprep.mubr.bf16.mxu0 %v2120_v15  ;;  %8245 = vmatpush3.bf16.msra.mxu0 %v8672_v42  ;;  %v9838_v54 = vld [vmem:[#allocation2 + $0x58] sm:$0xff] }
  0xa9   : > { %v3385_v9 = vor.u32 %v3382_v39, %v11083_v8  ;;  %v3401_v16 = vor.u32 %v3398_v33, %v11085_v20  ;;  %v9720_v52 = vrot.slane %v2725_v0, 7  ;;  %v2723_v62 = vsel %vm2634_vm2, %v2713_v32, %v2722_v22  ;;  %v8674_v20 = vld [vmem:[%s10966_s4 + $0xf8] sm:$0xff]   ;;  %8197 = vmatmul.mubr.bf16.gmra.mrb[60].mxu1 %v2714_v1  ;;  %v8687_v1 = vld [vmem:[%s10966_s4 + $0x1a8] sm:$0xff]  }
  0xaa   : > { %v3409_v38 = vor.u32 %v3406_v57, %v11086_v4  ;;  %v2730_v24 = vrot.slane %v2728_v55, 5  ;;  %v9727_v8 = vsel %vm3342_vm3, %v3382_v39, %v3393_v53  ;;  %v8710_v39 = vld [vmem:[#allocation2 + $0x50] sm:$0xff]  ;;  %8200 = vmatprep.mubr.bf16.mxu1 %v2723_v62  ;;  %8309 = vmatpush3.bf16.msra.mxu1 %v8673_v48  ;;  %v11096_v48 = vld [vmem:[#allocation7_spill] sm:$0xff]  ;;  %v9840_v53 = vld [vmem:[#allocation2 + $0x60] sm:$0xff]  ;;  %v9852_v62 = vshrl.u32 %v9838_v54, 16 }
  0xab   : > { %v9724_v19 = vsel %vm3342_vm3, %v3374_v25, %v3385_v9  ;;  %v9733_v4 = vsel %vm3342_vm3, %v3390_v11, %v3401_v16  ;;  %v3417_v0 = vor.u32 %v9720_v52, %v2728_v55  ;;  %v8675_v9 = vld [vmem:[%s10966_s4 + $0x138] sm:$0xff]   ;;  %v2121_v32 = vrot.slane %v8710_v39, 4  ;;  %8246 = vmatprep.subr.bf16.mxu0 %v8674_v20  ;;  %v9754_v55 = vld [vmem:[%s10966_s4 + $0x180] sm:$0xff]  }
  0xac   : > { %v9736_v50 = vsel %vm3342_vm3, %v3398_v33, %v3409_v38  ;;  %v2731_v5 = vor.u32 %v2730_v24, %v2727_v43  ;;  %v8711_v38 = vld [vmem:[#allocation2 + $0x58] sm:$0xff]  ;;  %8310 = vmatprep.subr.bf16.mxu1 %v8675_v9  ;;  %v11087_v11 = vrot.slane %v9444_v36, 4  ;;  %8247 = vmatpush3.bf16.msra.mxu0 %v8674_v20  ;;  %v11088_v16 = vrot.slane %v9086_v2, 4 }
  0xad   : > { %v9744_v47 = vsel %vm3342_vm3, %v3406_v57, %v3417_v0  ;;  %v2123_v25 = vrot.slane %v8711_v38, 4  ;;  %8360 = vmatprep.subr.bf16.mxu0 %v9749_v17  ;;  %v9856_v24 = vshrl.u32 %v9840_v53, 16  ;;  %v9866_v39 = vshll.u32 %v9838_v54, 16 }
  0xae   : > { %v2122_v33 = vsel %vm2101_vm1, %v11087_v11, %v2121_v32  ;;  %v2732_v15 = vsel %vm2634_vm2, %v2722_v22, %v2731_v5  ;;  %v2741_v42 = vsel %vm2634_vm2, %v2731_v5, %v9462_v21  ;;  %8311 = vmatpush3.bf16.msra.mxu1 %v8675_v9  ;;  %v708_v21 = vunpack.c.h.b16 %v9314_v40 }
  0xaf   : > { %v2124_v43 = vsel %vm2101_vm1, %v2121_v32, %v2123_v25  ;;  %8137 = vmatmul.mubr.bf16.gmra.mrb[64].mxu0 %v2122_v33  ;;  %8424 = vmatprep.subr.bf16.mxu1 %v9754_v55  ;;  %v2126_v57 = vsel %vm2101_vm1, %v2123_v25, %v11088_v16  ;;  %v3422_v9 = vrot.slane %v9852_v62, 7  ;;  %v3430_v25 = vrot.slane %v9856_v24, 7  ;;  %v8691_v16 = vld [vmem:[%s10966_s4 + $0x1b8] sm:$0xff]  }
  0xb0   : > { %8140 = vmatprep.mubr.bf16.mxu0 %v2124_v43  ;;  %v9774_v22 = vpack.c.b16 %v8896_v58, %v708_v21  ;;  %v2616_v58 = vld [vmem:[#allocation2 + $0xc0] sm:$0x1f]  ;;  %v8690_v43 = vld [vmem:[%s10966_s4 + $0x178] sm:$0xff]  }
  0xb1   : > { %8201 = vmatmul.mubr.bf16.gmra.mrb[64].mxu1 %v2732_v15  ;;  %v2851_v2 = vshrl.u32 %v2616_v58, 16  ;;  %v2854_v40 = vshll.u32 %v2616_v58, 16  ;;  %v9878_v15 = vld [vmem:[#allocation2 + $0x70] sm:$0xff]  ;;  %v11097_v58 = vld [vmem:[#allocation8_spill] sm:$0xff] }
  0xb2   : > { %8204 = vmatprep.mubr.bf16.mxu1 %v2741_v42  ;;  %781 = vst [vmem:[#allocation2 + $0xc8] sm:$0xff] %v9774_v22 }
  0xb7   : > { %8141 = vmatmul.mubr.bf16.gmra.mrb[68].mxu0 %v2126_v57  ;;  %v3425_v57 = vor.u32 %v9866_v39, %v3422_v9 }
  0xb8   : > { %8144 = vmatprep.mubr.bf16.mxu0 %v9483_v31  ;;  %v3300_v31 = vld [vmem:[#allocation2 + $0x8] sm:$0x80] }
  0xb9   : > { %8205 = vmatmul.mubr.bf16.gmra.mrb[68].mxu1 %v9495_v34  ;;  %v2058_v34 = vld [vmem:[#allocation2 + $0xc0] sm:$0xf] }
  0xba   : > { %8208 = vmatprep.mubr.bf16.mxu1 %v9507_v56  ;;  %v2853_v56 = vrot.slane %v2851_v2, 4  ;;  %v9900_v2 = vshrl.u32 %v9878_v15, 16 }
  0xbf   : > { %8145 = vmatmul.mubr.bf16.gmra.mrb[72].mxu0 %v9510_v13  ;;  %v2856_v13 = vrot.slane %v2854_v40, 5 }
  0xc0   : > { %8148 = vmatprep.mubr.bf16.mxu0 %v9515_v27  ;;  %v3344_v27 = vshrl.u32 %v3300_v31, 16 }
  0xc1   : > { %8209 = vmatmul.mubr.bf16.gmra.mrb[72].mxu1 %v9527_v30  ;;  %v2149_v30 = vrot.slane %v2058_v34, 4  ;;  %v9910_v34 = vld [vmem:[%s10966_s4 + $0x200] sm:$0xff]  }
  0xc2   : > { %8212 = vmatprep.mubr.bf16.mxu1 %v9539_v3  ;;  %v3346_v3 = vrot.slane %v3344_v27, 7 }
  0xc7   : > { %8149 = vmatmul.mubr.bf16.gmra.mrb[76].mxu0 %v9530_v49  ;;  %v2857_v49 = vor.u32 %v2856_v13, %v2853_v56 }
  0xc8   : > { %8152 = vmatprep.mubr.bf16.mxu0 %v9545_v12  ;;  %v11089_v12 = vrot.slane %v9302_v10, 4  ;;  %v8679_v10 = vld [vmem:[%s10966_s4 + $0x188] sm:$0xff]  }
  0xc9   : > { %8213 = vmatmul.mubr.bf16.gmra.mrb[76].mxu1 %v9553_v41 }
  0xca   : > { %8216 = vmatprep.mubr.bf16.mxu1 %v9570_v44  ;;  %v2150_v41 = vsel %vm2101_vm1, %v11089_v12, %v2149_v30  ;;  %v11091_v44 = vld [vmem:[#allocation10_spill] sm:$0xff]  ;;  %v3426_v30 = vsel %vm3342_vm3, %v9720_v52, %v3425_v57 }
  0xcf   : > { %8153 = vmatmul.mubr.bf16.gmra.mrb[80].mxu0 %v9556_v6  ;;  %v11090_v6 = vld [vmem:[#allocation9_spill] sm:$0xff] }
  0xd0   : > { %8156 = vmatprep.mubr.bf16.mxu0 %v9561_v37  ;;  %v2858_v37 = vsel %vm2634_vm2, %v11090_v6, %v2857_v49 }
  0xd1   : > { %8217 = vmatmul.mubr.bf16.gmra.mrb[80].mxu1 %v9582_v26  ;;  %v3354_v26 = vsel %vm3342_vm3, %v3346_v3, %v11091_v44  ;;  %v3446_v44 = vrot.slane %v9900_v2, 7 }
  0xd2   : > { %8220 = vmatprep.mubr.bf16.mxu1 %v9599_v63  ;;  %v11093_v63 = vld [vmem:[#allocation11_spill] sm:$0xff] }
  0xd7   : > { %8157 = vmatmul.mubr.bf16.gmra.mrb[84].mxu0 %v9585_v35  ;;  %v11092_v35 = vld [vmem:[#allocation4_spill] sm:$0xff] }
  0xd8   : > { %8160 = vmatprep.mubr.bf16.mxu0 %v9592_v29  ;;  %v8678_v29 = vld [vmem:[%s10966_s4 + $0x148] sm:$0xff]  }
  0xd9   : > { %8221 = vmatmul.mubr.bf16.gmra.mrb[84].mxu1 %v9612_v28  ;;  %v11094_v28 = vld [vmem:[#allocation5_spill] sm:$0xff] }
  0xda   : > { %8224 = vmatprep.mubr.bf16.mxu1 %v9638_v61  ;;  %v8681_v61 = vld [vmem:[%s10966_s4 + $0x190] sm:$0xff]  }
  0xdf   : > { %8161 = vmatmul.mubr.bf16.gmra.mrb[88].mxu0 %v9615_v51  ;;  %v8680_v51 = vld [vmem:[%s10966_s4 + $0x150] sm:$0xff]  }
  0xe0   : > { %8164 = vmatprep.mubr.bf16.mxu0 %v9626_v14  ;;  %v11095_v14 = vld [vmem:[#allocation6_spill] sm:$0xff] }
  0xe1   : > { %8225 = vmatmul.mubr.bf16.gmra.mrb[88].mxu1 %v9645_v46  ;;  %v8682_v46 = vld [vmem:[%s10966_s4 + $0x158] sm:$0xff]  }
  0xe2   : > { %8228 = vmatprep.mubr.bf16.mxu1 %v9665_v59  ;;  %v8683_v59 = vld [vmem:[%s10966_s4 + $0x198] sm:$0xff]  }
  0xe7   : > { %8165 = vmatmul.mubr.bf16.gmra.mrb[92].mxu0 %v2150_v41 }
  0xe8   : > { %8248 = vmatprep.mubr.bf16.mxu0 %v3354_v26  ;;  %v9925_v26 = vshll.u32 %v9878_v15, 16 }
  0xe9   : > { %8229 = vmatmul.mubr.bf16.gmra.mrb[92].mxu1 %v2858_v37 }
  0xea   : > { %8312 = vmatprep.mubr.bf16.mxu1 %v11092_v35  ;;  %v3314_v35 = vld [vmem:[#allocation2 + $0x78] sm:$0xff] }
  0xef   : > { %8249 = vmatmul.mubr.bf16.vlgmr.msra.gmra.mrb[96].mxu0 %v11093_v63  ;;  %v3315_v63 = vld [vmem:[#allocation2 + $0x80] sm:$0xff] }
  0xf0   : > { %8361 = vmatpush3.bf16.msra.mxu0 %v9749_v17  ;;  %8252 = vmatprep.mubr.bf16.mxu0 %v9705_v45  ;;  %v8684_v45 = vld [vmem:[%s10966_s4 + $0x160] sm:$0xff]   ;;  %v9872_v17 = vshll.u32 %v9840_v53, 16 }
  0xf1   : > { %8313 = vmatmul.mubr.bf16.vlgmr.msra.gmra.mrb[96].mxu1 %v11094_v28  ;;  %8362 = vmatprep.subr.bf16.mxu0 %v8678_v29  ;;  %v9933_v28 = vshrl.u32 %v3314_v35, 16 }
  0xf2   : > { %8425 = vmatpush3.bf16.msra.mxu1 %v9754_v55  ;;  %8316 = vmatprep.mubr.bf16.mxu1 %v11095_v14  ;;  %v9874_v55 = vld [vmem:[#allocation2 + $0x68] sm:$0xff]  ;;  %v9937_v14 = vshrl.u32 %v3315_v63, 16 }
  0xf3   : > { %8426 = vmatprep.subr.bf16.mxu1 %v8679_v10  ;;  %v9893_v21 = vshrl.u32 %v9874_v55, 16  ;;  %v9918_v3 = vshll.u32 %v9874_v55, 16 }
  0xf4   : > { %8363 = vmatpush3.bf16.msra.mxu0 %v8678_v29 }
  0xf5   : > { %8364 = vmatprep.subr.bf16.mxu0 %v8680_v51  ;;  %v3438_v49 = vrot.slane %v9893_v21, 7 }
  0xf6   : > { %8427 = vmatpush3.bf16.msra.mxu1 %v8679_v10 }
  0xf7   : > { %8428 = vmatprep.subr.bf16.mxu1 %v8681_v61  ;;  %8253 = vmatmul.mubr.bf16.gmra.mrb[100].mxu0 %v9708_v7  ;;  %v8685_v7 = vld [vmem:[%s10966_s4 + $0x1a0] sm:$0xff]   ;;  %v3441_v10 = vor.u32 %v9918_v3, %v3438_v49 }
  0xf8   : > { %8256 = vmatprep.mubr.bf16.mxu0 %v9724_v19  ;;  %8365 = vmatpush3.bf16.msra.mxu0 %v8680_v51  ;;  %v3449_v51 = vor.u32 %v9925_v26, %v3446_v44 }
  0xf9   : > { %8317 = vmatmul.mubr.bf16.gmra.mrb[100].mxu1 %v11096_v48  ;;  %8366 = vmatprep.subr.bf16.mxu0 %v8682_v46 }
  0xfa   : > { %8320 = vmatprep.mubr.bf16.mxu1 %v9371_v23  ;;  %8429 = vmatpush3.bf16.msra.mxu1 %v8681_v61  ;;  %v8686_v23 = vld [vmem:[%s10966_s4 + $0x168] sm:$0xff]  }
  0xfb   : > { %8430 = vmatprep.subr.bf16.mxu1 %v8683_v59 }
  0xfc   : > { %8367 = vmatpush3.bf16.msra.mxu0 %v8682_v46 }
  0xfd   : > { %8368 = vmatprep.subr.bf16.mxu0 %v8684_v45 }
  0xfe   : > { %8431 = vmatpush3.bf16.msra.mxu1 %v8683_v59 }
  0xff   : > { %8257 = vmatmul.mubr.bf16.gmra.mrb[104].mxu0 %v9727_v8  ;;  %8432 = vmatprep.subr.bf16.mxu1 %v8685_v7  ;;  %v8688_v8 = vld [vmem:[%s10966_s4 + $0x170] sm:$0xff]  }
 0x100   : > { %8260 = vmatprep.mubr.bf16.mxu0 %v9733_v4  ;;  %8369 = vmatpush3.bf16.msra.mxu0 %v8684_v45  ;;  %v8689_v4 = vld [vmem:[%s10966_s4 + $0x1b0] sm:$0xff]  }
 0x101   : > { %8321 = vmatmul.mubr.bf16.gmra.mrb[104].mxu1 %v9388_v60  ;;  %v7994_v19 = vpop.f32.mrb[0].mxu0  ;;  %8370 = vmatprep.subr.bf16.mxu0 %v8686_v23 }
 0x102   : > { %8324 = vmatprep.mubr.bf16.mxu1 %v9390_v18  ;;  %8433 = vmatpush3.bf16.msra.mxu1 %v8685_v7  ;;  %v8058_v20 = vpop.f32.mrb[0].mxu1  ;;  %v1088_v60 = vpop.f32.mrb[1].mxu0 }
 0x103   : > { %8434 = vmatprep.subr.bf16.mxu1 %v8687_v1  ;;  %v1699_v0 = vpop.f32.mrb[1].mxu1  ;;  %v7995_v18 = vpop.f32.mrb[2].mxu0  ;;  %v3462_v20 = vrot.slane %v9937_v14, 7 }
 0x104   : > { %v9868_v32 = vadd.f32 %v1699_v0, %v1088_v60  ;;  %v8059_v5 = vpop.f32.mrb[2].mxu1  ;;  %v1091_v38 = vpop.f32.mrb[3].mxu0  ;;  %8371 = vmatpush3.bf16.msra.mxu0 %v8686_v23  ;;  %v3454_v23 = vrot.slane %v9933_v28, 7  ;;  %v9949_v60 = vshll.u32 %v3315_v63, 16 }
 0x105   : > { %v9876_v11 = vadd.f32 %v8059_v5, %v7995_v18  ;;  %v1702_v33 = vpop.f32.mrb[3].mxu1  ;;  %8372 = vmatprep.subr.bf16.mxu0 %v8688_v8  ;;  %v9953_v18 = vld [vmem:[#allocation2 + $0x90] sm:$0xff] }
 0x106   : > { %8435 = vmatpush3.bf16.msra.mxu1 %v8687_v1  ;;  %v9883_v42 = vadd.f32 %v1702_v33, %v1091_v38  ;;  %v9945_v1 = vshll.u32 %v3314_v35, 16  ;;  %v11016_v33 = vshrl.u32 %v9953_v18, 16 }
 0x107   : > { %8261 = vmatmul.mubr.bf16.gmra.mrb[108].mxu0 %v9736_v50  ;;  %8436 = vmatprep.subr.bf16.mxu1 %v8689_v4  ;;  %v3433_v50 = vor.u32 %v9872_v17, %v3430_v25 }
 0x108   : > { %8264 = vmatprep.mubr.bf16.mxu0 %v9744_v47  ;;  %8373 = vmatpush3.bf16.msra.mxu0 %v8688_v8  ;;  %v3450_v8 = vsel %vm3342_vm3, %v3438_v49, %v3449_v51  ;;  %v3457_v5 = vor.u32 %v9945_v1, %v3454_v23  ;;  %v11015_v49 = vshll.u32 %v9953_v18, 16 }
 0x109   : > { %8325 = vmatmul.mubr.bf16.gmra.mrb[108].mxu1 %v9444_v36  ;;  %v7998_v40 = vpop.f32.mrb[4].mxu0  ;;  %8374 = vmatprep.subr.bf16.mxu0 %v8690_v43  ;;  %v9905_v36 = vld [vmem:[%s10966_s4 + $0x1c0] sm:$0xff]   ;;  %v3434_v37 = vsel %vm3342_vm3, %v3422_v9, %v3433_v50 }
 0x10a   : > { %8328 = vmatprep.mubr.bf16.mxu1 %v11097_v58  ;;  %8437 = vmatpush3.bf16.msra.mxu1 %v8689_v4  ;;  %v8062_v47 = vpop.f32.mrb[4].mxu1  ;;  %v1104_v31 = vpop.f32.mrb[5].mxu0  ;;  %v9951_v4 = vld [vmem:[#allocation2 + $0x88] sm:$0xff] }
 0x10b   : > { %8438 = vmatprep.subr.bf16.mxu1 %v8691_v16  ;;  %v9912_v56 = vadd.f32 %v8062_v47, %v7998_v40  ;;  %v1715_v13 = vpop.f32.mrb[5].mxu1  ;;  %v7999_v27 = vpop.f32.mrb[6].mxu0  ;;  %v11018_v38 = vshrl.u32 %v9951_v4, 16  ;;  %v3458_v40 = vsel %vm3342_vm3, %v3446_v44, %v3457_v5  ;;  %v11017_v47 = vshll.u32 %v9951_v4, 16  ;;  %v3319_v44 = vld [vmem:[#allocation2 + $0xa0] sm:$0xff] }
 0x10c   : > { %v9920_v12 = vadd.f32 %v1715_v13, %v1104_v31  ;;  %v8063_v41 = vpop.f32.mrb[6].mxu1  ;;  %v1107_v6 = vpop.f32.mrb[7].mxu0  ;;  %8375 = vmatpush3.bf16.msra.mxu0 %v8690_v43 }
 0x10d   : > { %v9927_v29 = vadd.f32 %v8063_v41, %v7999_v27  ;;  %v1718_v52 = vpop.f32.mrb[7].mxu1  ;;  %8488 = vmatprep.subr.bf16.mxu0 %v9905_v36  ;;  %v9973_v41 = vld [vmem:[#allocation2 + $0x98] sm:$0xff] }
 0x10e   : > { %8439 = vmatpush3.bf16.msra.mxu1 %v8691_v16  ;;  %v11014_v51 = vshrl.u32 %v9973_v41, 16 }
 0x10f   : > { %8265 = vmatmul.mubr.bf16.gmra.mrb[112].mxu0 %v3426_v30  ;;  %8552 = vmatprep.subr.bf16.mxu1 %v9910_v34  ;;  %v3478_v30 = vrot.slane %v11016_v33, 7 }
 0x110   : > { %8268 = vmatprep.mubr.bf16.mxu0 %v3434_v37 }
 0x111   : > { %8329 = vmatmul.mubr.bf16.gmra.mrb[112].mxu1 %v9838_v54  ;;  %v8002_v61 = vpop.f32.mrb[8].mxu0  ;;  %v3442_v54 = vsel %vm3342_vm3, %v3430_v25, %v3441_v10  ;;  %v3465_v25 = vor.u32 %v9949_v60, %v3462_v20 }
 0x112   : > { %8332 = vmatprep.mubr.bf16.mxu1 %v9840_v53  ;;  %v8066_v46 = vpop.f32.mrb[8].mxu1  ;;  %v1120_v59 = vpop.f32.mrb[9].mxu0 }
 0x113   : > { %v9939_v48 = vadd.f32 %v8066_v46, %v8002_v61  ;;  %v1731_v45 = vpop.f32.mrb[9].mxu1  ;;  %v8003_v7 = vpop.f32.mrb[10].mxu0  ;;  %v3466_v27 = vsel %vm3342_vm3, %v3454_v23, %v3465_v25  ;;  %v3481_v61 = vor.u32 %v11015_v49, %v3478_v30  ;;  %v3492_v46 = vshrl.u32 %v3319_v44, 16 }
 0x114   : > { %v8067_v53 = vpop.f32.mrb[10].mxu1  ;;  %v1123_v19 = vpop.f32.mrb[11].mxu0 }
 0x115   : > { %v1734_v0 = vpop.f32.mrb[11].mxu1 }
 0x116   : > { %v9955_v9 = vadd.f32 %v1734_v0, %v1123_v19  ;;  %v3486_v19 = vrot.slane %v11014_v51, 7 }
 0x117   : > { %8269 = vmatmul.mubr.bf16.gmra.mrb[116].mxu0 %v3442_v54 }
 0x118   : > { %8272 = vmatprep.mubr.bf16.mxu0 %v3450_v8  ;;  %v11013_v8 = vshll.u32 %v9973_v41, 16 }
 0x119   : > { %8333 = vmatmul.mubr.bf16.gmra.mrb[116].mxu1 %v9874_v55  ;;  %v8006_v43 = vpop.f32.mrb[12].mxu0  ;;  %v3470_v55 = vrot.slane %v11018_v38, 7  ;;  %v3535_v38 = vshll.u32 %v9774_v22, 16 }
 0x11a   : > { %8336 = vmatprep.mubr.bf16.mxu1 %v9878_v15  ;;  %v8070_v16 = vpop.f32.mrb[12].mxu1  ;;  %v1136_v57 = vpop.f32.mrb[13].mxu0  ;;  %v3494_v43 = vrot.slane %v3492_v46, 7 }
 0x11b   : > { %v1747_v58 = vpop.f32.mrb[13].mxu1  ;;  %v8007_v50 = vpop.f32.mrb[14].mxu0  ;;  %v3473_v10 = vor.u32 %v11017_v47, %v3470_v55  ;;  %v3482_v25 = vsel %vm3342_vm3, %v3470_v55, %v3481_v61  ;;  %v3495_v16 = vshll.u32 %v3319_v44, 16 }
 0x11c   : > { %v9967_v31 = vadd.f32 %v1747_v58, %v1136_v57  ;;  %v8071_v13 = vpop.f32.mrb[14].mxu1  ;;  %v1139_v15 = vpop.f32.mrb[15].mxu0  ;;  %v3320_v57 = vld [vmem:[#allocation2 + $0xa8] sm:$0xff] }
 0x11d   : > { %v9975_v6 = vadd.f32 %v8071_v13, %v8007_v50  ;;  %v1750_v37 = vpop.f32.mrb[15].mxu1  ;;  %v3500_v13 = vshrl.u32 %v3320_v57, 16 }
 0x11e   : > { %v9977_v52 = vadd.f32 %v1750_v37, %v1139_v15  ;;  %v3497_v15 = vor.u32 %v3495_v16, %v3494_v43 }
 0x11f   : > { %8273 = vmatmul.mubr.bf16.gmra.mrb[120].mxu0 %v3458_v40  ;;  %v3321_v40 = vld [vmem:[#allocation2 + $0xb0] sm:$0xff] }
 0x120   : > { %8276 = vmatprep.mubr.bf16.mxu0 %v3466_v27  ;;  %v3508_v27 = vshrl.u32 %v3321_v40, 16  ;;  %v3511_v16 = vshll.u32 %v3321_v40, 16 }
 0x121   : > { %8337 = vmatmul.mubr.bf16.gmra.mrb[120].mxu1 %v3314_v35  ;;  %v8010_v59 = vpop.f32.mrb[16].mxu0  ;;  %v3474_v35 = vsel %vm3342_vm3, %v3462_v20, %v3473_v10  ;;  %v3489_v20 = vor.u32 %v11013_v8, %v3486_v19 }
 0x122   : > { %8340 = vmatprep.mubr.bf16.mxu1 %v3315_v63  ;;  %v8074_v45 = vpop.f32.mrb[16].mxu1  ;;  %v1152_v7 = vpop.f32.mrb[17].mxu0 }
 0x123   : > { %v9984_v54 = vadd.f32 %v8074_v45, %v8010_v59  ;;  %v1763_v23 = vpop.f32.mrb[17].mxu1  ;;  %v8011_v53 = vpop.f32.mrb[18].mxu0  ;;  %v3490_v45 = vsel %vm3342_vm3, %v3478_v30, %v3489_v20 }
 0x124   : > { %v9990_v0 = vadd.f32 %v1763_v23, %v1152_v7  ;;  %v8075_v63 = vpop.f32.mrb[18].mxu1  ;;  %v1155_v5 = vpop.f32.mrb[19].mxu0  ;;  %v3502_v7 = vrot.slane %v3500_v13, 7  ;;  %v3503_v23 = vshll.u32 %v3320_v57, 16 }
 0x125   : > { %v9993_v58 = vadd.f32 %v8075_v63, %v8011_v53  ;;  %v1766_v50 = vpop.f32.mrb[19].mxu1  ;;  %v10002_v53 = vld [vmem:[#allocation2 + $0xb8] sm:$0xff]  ;;  %v3498_v5 = vsel %vm3342_vm3, %v3486_v19, %v3497_v15 }
 0x126   : > { %v10005_v50 = vld [vmem:[#allocation2 + $0xc0] sm:$0xff]  ;;  %v3505_v30 = vor.u32 %v3503_v23, %v3502_v7 }
 0x127   : > { %11098 = vst [vmem:[#allocation9_spill] sm:$0xff] %v9993_v58  ;;  %8277 = vmatmul.mubr.bf16.gmra.mrb[124].mxu0 %v3474_v35  ;;  %v3524_v20 = vshrl.u32 %v10005_v50, 16 }
 0x128   : > { %8280 = vmatprep.mubr.bf16.mxu0 %v3482_v25  ;;  %v3510_v25 = vrot.slane %v3508_v27, 7 }
 0x129   : > { %8341 = vmatmul.mubr.bf16.gmra.mrb[124].mxu1 %v9951_v4  ;;  %v8014_v55 = vpop.f32.mrb[20].mxu0 }
 0x12a   : > { %8344 = vmatprep.mubr.bf16.mxu1 %v9953_v18  ;;  %v8078_v37 = vpop.f32.mrb[20].mxu1  ;;  %v1168_v10 = vpop.f32.mrb[21].mxu0  ;;  %v3513_v13 = vor.u32 %v3511_v16, %v3510_v25 }
 0x12b   : > { %v9999_v61 = vadd.f32 %v8078_v37, %v8014_v55  ;;  %v1779_v46 = vpop.f32.mrb[21].mxu1  ;;  %v8015_v59 = vpop.f32.mrb[22].mxu0  ;;  %v3516_v55 = vshrl.u32 %v10002_v53, 16 }
 0x12c   : > { %v8079_v35 = vpop.f32.mrb[22].mxu1  ;;  %v1171_v63 = vpop.f32.mrb[23].mxu0  ;;  %v3519_v46 = vshll.u32 %v10002_v53, 16 }
 0x12d   : > { %11099 = vst [vmem:[#allocation10_spill] sm:$0xff] %v9999_v61  ;;  %v1782_v8 = vpop.f32.mrb[23].mxu1  ;;  %v3518_v27 = vrot.slane %v3516_v55, 7  ;;  %v10014_v35 = vrot.slane %v3524_v20, 7  ;;  %v4438_v55 = vld [vmem:[#allocation2 + $0x10] sm:$0xff] }
 0x12e   : > { %v10007_v10 = vadd.f32 %v1782_v8, %v1171_v63  ;;  %v3527_v63 = vshll.u32 %v10005_v50, 16 }
 0x12f   : > { %8281 = vmatmul.mubr.bf16.gmra.mrb[128].mxu0 %v3490_v45  ;;  %v3506_v45 = vsel %vm3342_vm3, %v3494_v43, %v3505_v30  ;;  %v3521_v33 = vor.u32 %v3519_v46, %v3518_v27  ;;  %v3532_v43 = vshrl.u32 %v9774_v22, 16  ;;  %v10025_v30 = vld [vmem:[#allocation2 + $0x20] sm:$0xff] }
 0x130   : > { %11100 = vst [vmem:[#allocation4_spill] sm:$0xff] %v10007_v10  ;;  %8284 = vmatprep.mubr.bf16.mxu0 %v3498_v5  ;;  %v3529_v20 = vor.u32 %v3527_v63, %v10014_v35 }
 0x131   : > { %8345 = vmatmul.mubr.bf16.gmra.mrb[128].mxu1 %v9973_v41  ;;  %v8018_v37 = vpop.f32.mrb[24].mxu0  ;;  %v3534_v47 = vrot.slane %v3532_v43, 7  ;;  %v11104_v43 = vshrl.u32 %v10025_v30, 16 }
 0x132   : > { %8348 = vmatprep.mubr.bf16.mxu1 %v3319_v44  ;;  %v8082_v19 = vpop.f32.mrb[24].mxu1  ;;  %v1184_v15 = vpop.f32.mrb[25].mxu0  ;;  %v3514_v44 = vsel %vm3342_vm3, %v3502_v7, %v3513_v13  ;;  %v4484_v7 = vshll.u32 %v4438_v55, 16 }
 0x133   : > { %v1795_v59 = vpop.f32.mrb[25].mxu1  ;;  %v8019_v8 = vpop.f32.mrb[26].mxu0  ;;  %v5118_v19 = vld [vmem:[#allocation2 + $0x18] sm:$0xf8] }
 0x134   : > { %v10017_v5 = vadd.f32 %v1795_v59, %v1184_v15  ;;  %v8083_v23 = vpop.f32.mrb[26].mxu1  ;;  %v1187_v51 = vpop.f32.mrb[27].mxu0  ;;  %v10028_v15 = vld [vmem:[#allocation2 + $0x18] sm:$0xff]  ;;  %v5161_v13 = vshrl.u32 %v5118_v19, 16  ;;  %v4486_v10 = vrot.slane %v4484_v7, 1 }
 0x135   : > { %v10020_v16 = vadd.f32 %v8083_v23, %v8019_v8  ;;  %v1798_v37 = vpop.f32.mrb[27].mxu1  ;;  %v5164_v8 = vshll.u32 %v5118_v19, 16 }
 0x136   : > { %11101 = vst [vmem:[#allocation11_spill] sm:$0xff] %v10017_v5  ;;  %v10022_v49 = vadd.f32 %v1798_v37, %v1187_v51  ;;  %v3522_v37 = vsel %vm3342_vm3, %v3510_v25, %v3521_v33  ;;  %v4482_v5 = vshrl.u32 %v4438_v55, 16  ;;  %v5163_v61 = vrot.slane %v5161_v13, 3 }
 0x137   : > { %11102 = vst [vmem:[#allocation5_spill] sm:$0xff] %v10020_v16  ;;  %8285 = vmatmul.mubr.bf16.gmra.mrb[132].mxu0 %v3506_v45  ;;  %v5172_v45 = vshll.u32 %v10025_v30, 16  ;;  %v5166_v25 = vrot.slane %v5164_v8, 4 }
 0x138   : > { %11103 = vst [vmem:[#allocation6_spill] sm:$0xff] %v10022_v49  ;;  %8288 = vmatprep.mubr.bf16.mxu0 %v3514_v44  ;;  %v4489_v49 = vshll.u32 %v10028_v15, 16 }
 0x139   : > { %8349 = vmatmul.mubr.bf16.gmra.mrb[132].mxu1 %v3320_v57  ;;  %v8022_v59 = vpop.f32.mrb[28].mxu0 }
 0x13a   : > { %8352 = vmatprep.mubr.bf16.mxu1 %v3321_v40  ;;  %v8086_v46 = vpop.f32.mrb[28].mxu1  ;;  %v1200_v23 = vpop.f32.mrb[29].mxu0  ;;  %v3530_v40 = vsel %vm3342_vm3, %v3518_v27, %v3529_v20  ;;  %v10044_v27 = vld [vmem:[#allocation2 + $0x28] sm:$0xff]  ;;  %v3537_v20 = vor.u32 %v3535_v38, %v3534_v47  ;;  %v4491_v55 = vrot.slane %v4489_v49, 1 }
 0x13b   : > { %v10033_v57 = vadd.f32 %v8086_v46, %v8022_v59  ;;  %v1811_v44 = vpop.f32.mrb[29].mxu1  ;;  %v8023_v63 = vpop.f32.mrb[30].mxu0  ;;  %v5171_v59 = vrot.slane %v11104_v43, 3  ;;  %v5174_v46 = vrot.slane %v5172_v45, 4  ;;  %v11020_v7 = vshrl.u32 %v10044_v27, 16 }
 0x13c   : > { %v10038_v19 = vadd.f32 %v1811_v44, %v1200_v23  ;;  %v8087_v51 = vpop.f32.mrb[30].mxu1  ;;  %v1203_v16 = vpop.f32.mrb[31].mxu0  ;;  %v10047_v23 = vld [vmem:[#allocation2 + $0x30] sm:$0xff]  ;;  %v5181_v13 = vshll.u32 %v10044_v27, 16  ;;  %v3538_v49 = vsel %vm3342_vm3, %v10014_v35, %v3537_v20  ;;  %v10069_v20 = vld [vmem:[#allocation2 + $0x40] sm:$0xff] }
 0x13d   : > { %v10040_v58 = vadd.f32 %v8087_v51, %v8023_v63  ;;  %v1814_v33 = vpop.f32.mrb[31].mxu1  ;;  %v4487_v16 = vor.u32 %v4486_v10, %v4482_v5  ;;  %v5167_v51 = vor.u32 %v5166_v25, %v5163_v61  ;;  %v5175_v44 = vor.u32 %v5174_v46, %v5171_v59 }
 0x13e   : > { %v5190_v38 = vshll.u32 %v10047_v23, 16  ;;  %v4493_v10 = vshrl.u32 %v10028_v15, 16  ;;  %v5180_v25 = vrot.slane %v11020_v7, 3  ;;  %v5183_v43 = vrot.slane %v5181_v13, 4 }
 0x13f   : > { %8289 = vmatmul.mubr.bf16.gmra.mrb[136].mxu0 %v3522_v37  ;;  %v4492_v61 = vsel %vm4480_vm4, %v4487_v16, %v4491_v55  ;;  %v5176_v46 = vsel %vm1368_vm0, %v5167_v51, %v5175_v44 }
 0x140   : > { %8292 = vmatprep.mubr.bf16.mxu0 %v3530_v40  ;;  %v5192_v15 = vrot.slane %v5190_v38, 4  ;;  %v4495_v16 = vor.u32 %v4493_v10, %v4491_v55 }
 0x141   : > { %8353 = vmatmul.mubr.bf16.gmra.mrb[136].mxu1 %v10002_v53  ;;  %v8026_v8 = vpop.f32.mrb[32].mxu0  ;;  %v11019_v53 = vshrl.u32 %v10047_v23, 16 }
 0x142   : > { %8356 = vmatprep.mubr.bf16.mxu1 %v10005_v50  ;;  %v8090_v63 = vpop.f32.mrb[32].mxu1  ;;  %v1216_v37 = vpop.f32.mrb[33].mxu0 }
 0x143   : > { %v10054_v47 = vadd.f32 %v8090_v63, %v8026_v8  ;;  %v1827_v40 = vpop.f32.mrb[33].mxu1  ;;  %v8027_v50 = vpop.f32.mrb[34].mxu0  ;;  %v10063_v8 = vld [vmem:[#allocation2 + $0x38] sm:$0xff]  ;;  %v5189_v35 = vrot.slane %v11019_v53, 3  ;;  %v4499_v37 = vrot.slane %v5172_v45, 1  ;;  %v11021_v53 = vshrl.u32 %v10069_v20, 16 }
 0x144   : > { %v8091_v5 = vpop.f32.mrb[34].mxu1  ;;  %v1219_v33 = vpop.f32.mrb[35].mxu0  ;;  %v5184_v40 = vor.u32 %v5183_v43, %v5180_v25  ;;  %v11022_v51 = vshrl.u32 %v10063_v8, 16  ;;  %v5199_v50 = vshll.u32 %v10063_v8, 16 }
 0x145   : > { %v1830_v59 = vpop.f32.mrb[35].mxu1  ;;  %v5193_v55 = vor.u32 %v5192_v15, %v5189_v35  ;;  %v8694_v15 = vld [vmem:[%s10966_s4 + $0x1c8] sm:$0xff]  }
 0x146   : > { %v10065_v63 = vadd.f32 %v1830_v59, %v1219_v33  ;;  %v4507_v59 = vrot.slane %v5181_v13, 1  ;;  %v5201_v13 = vrot.slane %v5199_v50, 4 }
 0x147   : > { %8293 = vmatmul.mubr.bf16.gmra.mrb[140].mxu0 %v3538_v49  ;;  %v11106_v49 = vshrl.u32 %v10025_v30, 16  ;;  %v5198_v30 = vrot.slane %v11022_v51, 3 }
 0x148   : > { %11105 = vst [vmem:[#allocation7_spill] sm:$0xff] %v10065_v63  ;;  %8376 = vmatprep.mubr.bf16.mxu0 %v4492_v61  ;;  %v4500_v61 = vsel %vm4480_vm4, %v4495_v16, %v4499_v37  ;;  %v5207_v16 = vrot.slane %v11021_v53, 3  ;;  %v11110_v53 = vshrl.u32 %v10044_v27, 16 }
 0x149   : > { %8357 = vmatmul.mubr.bf16.gmra.mrb[140].mxu1 %v9774_v22  ;;  %v8030_v5 = vpop.f32.mrb[36].mxu0  ;;  %v4503_v33 = vor.u32 %v11106_v49, %v4499_v37  ;;  %v10084_v49 = vld [vmem:[#allocation2 + $0x48] sm:$0xff] }
 0x14a   : > { %8440 = vmatprep.mubr.bf16.mxu1 %v5176_v46  ;;  %v8094_v63 = vpop.f32.mrb[36].mxu1  ;;  %v1232_v22 = vpop.f32.mrb[37].mxu0  ;;  %v5185_v5 = vsel %vm1368_vm0, %v5175_v44, %v5184_v40  ;;  %v11108_v44 = vshll.u32 %v10069_v20, 16  ;;  %v4511_v51 = vor.u32 %v11110_v53, %v4507_v59 }
 0x14b   : > { %v1843_v10 = vpop.f32.mrb[37].mxu1  ;;  %v8031_v45 = vpop.f32.mrb[38].mxu0  ;;  %v4508_v35 = vsel %vm4480_vm4, %v4503_v33, %v4507_v59  ;;  %v8695_v33 = vld [vmem:[%s10966_s4 + $0x208] sm:$0xff]  }
 0x14c   : > { %v10079_v25 = vadd.f32 %v1843_v10, %v1232_v22  ;;  %v8095_v43 = vpop.f32.mrb[38].mxu1  ;;  %v1235_v46 = vpop.f32.mrb[39].mxu0  ;;  %v5210_v37 = vrot.slane %v11108_v44, 4  ;;  %v5194_v10 = vsel %vm1368_vm0, %v5184_v40, %v5193_v55  ;;  %v11023_v44 = vshrl.u32 %v10084_v49, 16 }
 0x14d   : > { %v10086_v7 = vadd.f32 %v8095_v43, %v8031_v45  ;;  %v1846_v63 = vpop.f32.mrb[39].mxu1  ;;  %v4515_v45 = vrot.slane %v5190_v38, 1  ;;  %v10102_v43 = vld [vmem:[#allocation2 + $0x50] sm:$0xff]  ;;  %v5202_v38 = vor.u32 %v5201_v13, %v5198_v30  ;;  %v11111_v40 = vshrl.u32 %v10047_v23, 16 }
 0x14e   : > { %v10096_v22 = vadd.f32 %v1846_v63, %v1235_v46  ;;  %v5217_v46 = vshll.u32 %v10084_v49, 16  ;;  %v4523_v63 = vrot.slane %v5199_v50, 1  ;;  %v5211_v27 = vor.u32 %v5210_v37, %v5207_v16 }
 0x14f   : > { %11107 = vst [vmem:[#allocation8_spill] sm:$0xff] %v10086_v7  ;;  %8377 = vmatmul.mubr.bf16.vlgmr.msra.gmra.mrb[144].mxu0 %v4500_v61  ;;  %v4519_v61 = vor.u32 %v11111_v40, %v4515_v45  ;;  %v4516_v40 = vsel %vm4480_vm4, %v4511_v51, %v4515_v45  ;;  %v5216_v16 = vrot.slane %v11023_v44, 3  ;;  %v11113_v44 = vshll.u32 %v10102_v43, 16 }
 0x150   : > { %11109 = vst [vmem:[#allocation12_spill] sm:$0xff] %v10096_v22  ;;  %8489 = vmatpush3.bf16.msra.mxu0 %v9905_v36  ;;  %8380 = vmatprep.mubr.bf16.mxu0 %v4508_v35  ;;  %v5219_v37 = vrot.slane %v5217_v46, 4  ;;  %v5203_v22 = vsel %vm1368_vm0, %v5193_v55, %v5202_v38  ;;  %v5212_v51 = vsel %vm1368_vm0, %v5202_v38, %v5211_v27  ;;  %v8698_v55 = vld [vmem:[%s10966_s4 + $0x1d8] sm:$0xff]   ;;  %v11115_v38 = vshrl.u32 %v10063_v8, 16  ;;  %v8701_v8 = vld [vmem:[%s10966_s4 + $0x220] sm:$0xff]  }
 0x151   : > { %8441 = vmatmul.mubr.bf16.vlgmr.msra.gmra.mrb[144].mxu1 %v5185_v5  ;;  %v8696_v5 = vld [vmem:[%s10966_s4 + $0x1d0] sm:$0xff]   ;;  %v8034_v36 = vpop.f32.mrb[40].mxu0  ;;  %8490 = vmatprep.subr.bf16.mxu0 %v8694_v15  ;;  %v4524_v7 = vsel %vm4480_vm4, %v4519_v61, %v4523_v63 }
 0x152   : > { %8553 = vmatpush3.bf16.msra.mxu1 %v9910_v34  ;;  %8444 = vmatprep.mubr.bf16.mxu1 %v5194_v10  ;;  %v8697_v34 = vld [vmem:[%s10966_s4 + $0x210] sm:$0xff]   ;;  %v8098_v30 = vpop.f32.mrb[40].mxu1  ;;  %v1248_v23 = vpop.f32.mrb[41].mxu0 }
 0x153   : > { %8554 = vmatprep.subr.bf16.mxu1 %v8695_v33  ;;  %v10120_v50 = vadd.f32 %v8098_v30, %v8034_v36  ;;  %v1859_v13 = vpop.f32.mrb[41].mxu1  ;;  %v8035_v35 = vpop.f32.mrb[42].mxu0 }
 0x154   : > { %8491 = vmatpush3.bf16.msra.mxu0 %v8694_v15  ;;  %v10125_v10 = vadd.f32 %v1859_v13, %v1248_v23  ;;  %v8099_v59 = vpop.f32.mrb[42].mxu1  ;;  %v1251_v53 = vpop.f32.mrb[43].mxu0  ;;  %v11112_v15 = vshrl.u32 %v10102_v43, 16  ;;  %v5228_v23 = vrot.slane %v11113_v44, 4  ;;  %v5220_v13 = vor.u32 %v5219_v37, %v5216_v16 }
 0x155   : > { %8492 = vmatprep.subr.bf16.mxu0 %v8696_v5  ;;  %v10129_v36 = vadd.f32 %v8099_v59, %v8035_v35  ;;  %v1862_v30 = vpop.f32.mrb[43].mxu1  ;;  %v8699_v53 = vld [vmem:[%s10966_s4 + $0x218] sm:$0xff]   ;;  %v4527_v59 = vor.u32 %v11115_v38, %v4523_v63  ;;  %v11116_v44 = vshrl.u32 %v10069_v20, 16  ;;  %v5234_v16 = vrot.slane %v9852_v62, 3 }
 0x156   : > { %8555 = vmatpush3.bf16.msra.mxu1 %v8695_v33  ;;  %v5225_v45 = vrot.slane %v11112_v15, 3  ;;  %v11114_v33 = vshll.u32 %v10069_v20, 16  ;;  %v4539_v30 = vrot.slane %v5217_v46, 1  ;;  %v5243_v38 = vrot.slane %v9856_v24, 3 }
 0x157   : > { %8556 = vmatprep.subr.bf16.mxu1 %v8697_v34  ;;  %8381 = vmatmul.mubr.bf16.gmra.mrb[148].mxu0 %v4516_v40 }
 0x158   : > { %v4531_v61 = vrot.slane %v11114_v33, 1  ;;  %8384 = vmatprep.mubr.bf16.mxu0 %v4524_v7  ;;  %8493 = vmatpush3.bf16.msra.mxu0 %v8696_v5  ;;  %v5229_v15 = vor.u32 %v5228_v23, %v5225_v45  ;;  %v8700_v33 = vld [vmem:[%s10966_s4 + $0x1e0] sm:$0xff]   ;;  %v5237_v23 = vrot.slane %v9866_v39, 4 }
 0x159   : > { %8445 = vmatmul.mubr.bf16.gmra.mrb[148].mxu1 %v5203_v22  ;;  %v8038_v40 = vpop.f32.mrb[44].mxu0  ;;  %8494 = vmatprep.subr.bf16.mxu0 %v8698_v55 }
 0x15a   : > { %8448 = vmatprep.mubr.bf16.mxu1 %v5212_v51  ;;  %v4535_v35 = vor.u32 %v11116_v44, %v4531_v61  ;;  %8557 = vmatpush3.bf16.msra.mxu1 %v8697_v34  ;;  %v8102_v22 = vpop.f32.mrb[44].mxu1  ;;  %v1264_v7 = vpop.f32.mrb[45].mxu0  ;;  %v4532_v5 = vsel %vm4480_vm4, %v4527_v59, %v4531_v61  ;;  %v5221_v34 = vsel %vm1368_vm0, %v5211_v27, %v5220_v13  ;;  %v5246_v44 = vrot.slane %v9872_v17, 4  ;;  %v8702_v27 = vld [vmem:[%s10966_s4 + $0x1e8] sm:$0xff]  }
 0x15b   : > { %8558 = vmatprep.subr.bf16.mxu1 %v8699_v53  ;;  %v10154_v63 = vadd.f32 %v8102_v22, %v8038_v40  ;;  %v1875_v20 = vpop.f32.mrb[45].mxu1  ;;  %v8039_v46 = vpop.f32.mrb[46].mxu0  ;;  %v5230_v22 = vsel %vm1368_vm0, %v5220_v13, %v5229_v15  ;;  %v11117_v59 = vshll.u32 %v10102_v43, 16  ;;  %v5238_v7 = vor.u32 %v5237_v23, %v5234_v16 }
 0x15c   : > { %v8103_v37 = vpop.f32.mrb[46].mxu1  ;;  %v1267_v51 = vpop.f32.mrb[47].mxu0  ;;  %v4540_v45 = vsel %vm4480_vm4, %v4535_v35, %v4539_v30  ;;  %8495 = vmatpush3.bf16.msra.mxu0 %v8698_v55  ;;  %v8703_v55 = vld [vmem:[%s10966_s4 + $0x228] sm:$0xff]   ;;  %v11119_v20 = vshrl.u32 %v10102_v43, 16  ;;  %v5255_v16 = vrot.slane %v9918_v3, 4 }
 0x15d   : > { %v1878_v40 = vpop.f32.mrb[47].mxu1  ;;  %8496 = vmatprep.subr.bf16.mxu0 %v8700_v33  ;;  %v4547_v35 = vrot.slane %v11117_v59, 1  ;;  %v5247_v37 = vor.u32 %v5246_v44, %v5243_v38 }
 0x15e   : > { %8559 = vmatpush3.bf16.msra.mxu1 %v8699_v53  ;;  %v10167_v61 = vadd.f32 %v1878_v40, %v1267_v51  ;;  %v11118_v53 = vshrl.u32 %v10084_v49, 16  ;;  %v8705_v49 = vld [vmem:[%s10966_s4 + $0x230] sm:$0xff]  }
 0x15f   : > { %8385 = vmatmul.mubr.bf16.gmra.mrb[152].mxu0 %v4532_v5  ;;  %8560 = vmatprep.subr.bf16.mxu1 %v8701_v8  ;;  %v4551_v46 = vor.u32 %v11119_v20, %v4547_v35  ;;  %v4555_v5 = vrot.slane %v9866_v39, 1 }
 0x160   : > { %8388 = vmatprep.mubr.bf16.mxu0 %v4540_v45  ;;  %v4543_v13 = vor.u32 %v11118_v53, %v4539_v30  ;;  %8497 = vmatpush3.bf16.msra.mxu0 %v8700_v33  ;;  %v5248_v53 = vsel %vm1368_vm0, %v5238_v7, %v5247_v37 }
 0x161   : > { %8449 = vmatmul.mubr.bf16.gmra.mrb[152].mxu1 %v5221_v34  ;;  %v8122_v51 = vpop.f32.mrb[48].mxu0  ;;  %8498 = vmatprep.subr.bf16.mxu0 %v8702_v27  ;;  %v8704_v34 = vld [vmem:[%s10966_s4 + $0x1f0] sm:$0xff]   ;;  %v4556_v59 = vsel %vm4480_vm4, %v4551_v46, %v4555_v5 }
 0x162   : > { %8452 = vmatprep.mubr.bf16.mxu1 %v5230_v22  ;;  %8561 = vmatpush3.bf16.msra.mxu1 %v8701_v8  ;;  %v8186_v45 = vpop.f32.mrb[48].mxu1  ;;  %v2257_v40 = vpop.f32.mrb[49].mxu0  ;;  %v4548_v33 = vsel %vm4480_vm4, %v4543_v13, %v4547_v35  ;;  %v5252_v8 = vrot.slane %v9893_v21, 3  ;;  %v5239_v22 = vsel %vm1368_vm0, %v5229_v15, %v5238_v7  ;;  %v5261_v13 = vrot.slane %v9900_v2, 3 }
 0x163   : > { %8562 = vmatprep.subr.bf16.mxu1 %v8703_v55  ;;  %v2496_v43 = vadd.f32 %v2257_v40, %v9868_v32  ;;  %v2965_v30 = vpop.f32.mrb[49].mxu1  ;;  %v8123_v39 = vpop.f32.mrb[50].mxu0  ;;  %v5264_v51 = vrot.slane %v9925_v26, 4  ;;  %v4563_v7 = vrot.slane %v9872_v17, 1  ;;  %v4571_v40 = vrot.slane %v9918_v3, 1 }
 0x164   : > { %v2499_v23 = vadd.f32 %v8123_v39, %v9876_v11  ;;  %v8187_v38 = vpop.f32.mrb[50].mxu1  ;;  %v2260_v44 = vpop.f32.mrb[51].mxu0  ;;  %8499 = vmatpush3.bf16.msra.mxu0 %v8702_v27  ;;  %v8706_v11 = vld [vmem:[%s10966_s4 + $0x1f8] sm:$0xff]   ;;  %v4559_v27 = vor.u32 %v4555_v5, %v9852_v62  ;;  %v5270_v3 = vrot.slane %v9933_v28, 3 }
 0x165   : > { %v10193_v32 = vadd.f32 %v2965_v30, %v2496_v43  ;;  %v2497_v20 = vadd.f32 %v2260_v44, %v9883_v42  ;;  %v2968_v35 = vpop.f32.mrb[51].mxu1  ;;  %8500 = vmatprep.subr.bf16.mxu0 %v8704_v34  ;;  %v8707_v42 = vld [vmem:[%s10966_s4 + $0x238] sm:$0xff]   ;;  %v4567_v45 = vor.u32 %v4563_v7, %v9856_v24  ;;  %v5265_v62 = vor.u32 %v5264_v51, %v5261_v13 }
 0x166   : > { %8563 = vmatpush3.bf16.msra.mxu1 %v8703_v55  ;;  %v10201_v15 = vadd.f32 %v8187_v38, %v2499_v23  ;;  %v5256_v55 = vor.u32 %v5255_v16, %v5252_v8  ;;  %v4564_v39 = vsel %vm4480_vm4, %v4559_v27, %v4563_v7  ;;  %v10233_v27 = vld [vmem:[#allocation2 + $0x88] sm:$0xff] }
 0x167   : > { %8389 = vmatmul.mubr.bf16.gmra.mrb[156].mxu0 %v4548_v33  ;;  %8564 = vmatprep.subr.bf16.mxu1 %v8705_v49  ;;  %v10208_v46 = vadd.f32 %v2968_v35, %v2497_v20  ;;  %v4572_v44 = vsel %vm4480_vm4, %v4567_v45, %v4571_v40  ;;  %v4575_v35 = vor.u32 %v4571_v40, %v9893_v21 }
 0x168   : > { %8392 = vmatprep.mubr.bf16.mxu0 %v4556_v59  ;;  %8501 = vmatpush3.bf16.msra.mxu0 %v8704_v34  ;;  %v5257_v24 = vsel %vm1368_vm0, %v5247_v37, %v5256_v55  ;;  %v5273_v34 = vrot.slane %v9945_v1, 4  ;;  %v5266_v59 = vsel %vm1368_vm0, %v5256_v55, %v5265_v62  ;;  %v5279_v37 = vrot.slane %v9937_v14, 3 }
 0x169   : > { %8453 = vmatmul.mubr.bf16.gmra.mrb[156].mxu1 %v5239_v22  ;;  %v8126_v43 = vpop.f32.mrb[52].mxu0  ;;  %8502 = vmatprep.subr.bf16.mxu0 %v8706_v11 }
 0x16a   : > { %8456 = vmatprep.mubr.bf16.mxu1 %v5248_v53  ;;  %8565 = vmatpush3.bf16.msra.mxu1 %v8705_v49  ;;  %v2502_v17 = vadd.f32 %v8126_v43, %v9912_v56  ;;  %v8190_v5 = vpop.f32.mrb[52].mxu1  ;;  %v2273_v30 = vpop.f32.mrb[53].mxu0  ;;  %v5282_v53 = vrot.slane %v9949_v60, 4  ;;  %v5274_v13 = vor.u32 %v5273_v34, %v5270_v3 }
 0x16b   : > { %8566 = vmatprep.subr.bf16.mxu1 %v8707_v42  ;;  %v2500_v33 = vadd.f32 %v2273_v30, %v9920_v12  ;;  %v2981_v8 = vpop.f32.mrb[53].mxu1  ;;  %v8127_v16 = vpop.f32.mrb[54].mxu0 }
 0x16c   : > { %v10218_v23 = vadd.f32 %v8190_v5, %v2502_v17  ;;  %v2503_v49 = vadd.f32 %v8127_v16, %v9927_v29  ;;  %v8191_v56 = vpop.f32.mrb[54].mxu1  ;;  %v2276_v38 = vpop.f32.mrb[55].mxu0  ;;  %8503 = vmatpush3.bf16.msra.mxu0 %v8706_v11  ;;  %v4579_v29 = vrot.slane %v9925_v26, 1  ;;  %v4587_v11 = vrot.slane %v9945_v1, 1 }
 0x16d   : > { %v10222_v22 = vadd.f32 %v2981_v8, %v2500_v33  ;;  %v2984_v12 = vpop.f32.mrb[55].mxu1  ;;  %v5283_v55 = vor.u32 %v5282_v53, %v5279_v37  ;;  %v11120_v26 = vshrl.u32 %v9951_v4, 16  ;;  %v11121_v5 = vshll.u32 %v9951_v4, 16  ;;  %v10261_v53 = vld [vmem:[#allocation2 + $0x90] sm:$0xff] }
 0x16e   : > { %8567 = vmatpush3.bf16.msra.mxu1 %v8707_v42  ;;  %v10227_v20 = vadd.f32 %v8191_v56, %v2503_v49  ;;  %v4583_v51 = vor.u32 %v4579_v29, %v9900_v2  ;;  %v4580_v2 = vsel %vm4480_vm4, %v4575_v35, %v4579_v29  ;;  %v5275_v1 = vsel %vm1368_vm0, %v5265_v62, %v5274_v13  ;;  %v10263_v35 = vld [vmem:[#allocation2 + $0x98] sm:$0xff] }
 0x16f   : > { %8393 = vmatmul.mubr.bf16.gmra.mrb[160].mxu0 %v4564_v39  ;;  %v5288_v17 = vrot.slane %v11120_v26, 3  ;;  %v5291_v21 = vrot.slane %v11121_v5, 4  ;;  %v11028_v39 = vshll.u32 %v10233_v27, 16  ;;  %v11123_v4 = vshll.u32 %v9953_v18, 16 }
 0x170   : > { %8396 = vmatprep.mubr.bf16.mxu0 %v4572_v44  ;;  %v4588_v16 = vsel %vm4480_vm4, %v4583_v51, %v4587_v11  ;;  %v5284_v38 = vsel %vm1368_vm0, %v5274_v13, %v5283_v55  ;;  %v4595_v62 = vrot.slane %v9949_v60, 1  ;;  %v4591_v44 = vor.u32 %v4587_v11, %v9933_v28 }
 0x171   : > { %8457 = vmatmul.mubr.bf16.gmra.mrb[160].mxu1 %v5257_v24  ;;  %v8130_v7 = vpop.f32.mrb[56].mxu0  ;;  %v11122_v24 = vshrl.u32 %v9953_v18, 16  ;;  %v5300_v34 = vrot.slane %v11123_v4, 4  ;;  %v5292_v12 = vor.u32 %v5291_v21, %v5288_v17  ;;  %v11124_v21 = vshrl.u32 %v9973_v41, 16 }
 0x172   : > { %8460 = vmatprep.mubr.bf16.mxu1 %v5266_v59  ;;  %v2506_v42 = vadd.f32 %v8130_v7, %v9939_v48  ;;  %v8194_v45 = vpop.f32.mrb[56].mxu1  ;;  %v2289_v43 = vpop.f32.mrb[57].mxu0  ;;  %v10254_v59 = vld [vmem:[#allocation2 + $0xa0] sm:$0xff]  ;;  %v4599_v18 = vor.u32 %v4595_v62, %v9937_v14  ;;  %v4596_v14 = vsel %vm4480_vm4, %v4591_v44, %v4595_v62  ;;  %v10298_v62 = vld [vmem:[#allocation2 + $0xb0] sm:$0xff] }
 0x173   : > { %v2997_v40 = vpop.f32.mrb[57].mxu1  ;;  %v8131_v30 = vpop.f32.mrb[58].mxu0  ;;  %v5297_v3 = vrot.slane %v11122_v24, 3  ;;  %v10266_v28 = vshrl.u32 %v10254_v59, 16  ;;  %v10269_v13 = vshll.u32 %v10254_v59, 16  ;;  %v5293_v7 = vsel %vm1368_vm0, %v5283_v55, %v5292_v12  ;;  %v10285_v24 = vld [vmem:[#allocation2 + $0xa8] sm:$0xff] }
 0x174   : > { %v10243_v33 = vadd.f32 %v8194_v45, %v2506_v42  ;;  %v8195_v8 = vpop.f32.mrb[58].mxu1  ;;  %v2292_v48 = vpop.f32.mrb[59].mxu0  ;;  %v11029_v42 = vshrl.u32 %v10233_v27, 16  ;;  %v11026_v45 = vshll.u32 %v10261_v53, 16  ;;  %v5306_v40 = vrot.slane %v11124_v21, 3  ;;  %11126 = vst [vmem:[#allocation13_spill] sm:$0xff] %v10285_v24 }
 0x175   : > { %v2505_v49 = vadd.f32 %v2292_v48, %v9955_v9  ;;  %v3000_v56 = vpop.f32.mrb[59].mxu1  ;;  %v4603_v9 = vrot.slane %v11028_v39, 1  ;;  %v5301_v29 = vor.u32 %v5300_v34, %v5297_v3  ;;  %v11125_v30 = vshll.u32 %v9973_v41, 16  ;;  %11127 = vst [vmem:[#allocation14_spill] sm:$0xff] %v10298_v62  ;;  %v10362_v39 = vld [vmem:[#allocation2 + $0xc8] sm:$0xff] }
 0x176   : > { %v5315_v41 = vrot.slane %v10266_v28, 3 }
 0x177   : > { %8397 = vmatmul.mubr.bf16.gmra.mrb[164].mxu0 %v4580_v2  ;;  %v10256_v37 = vadd.f32 %v3000_v56, %v2505_v49  ;;  %v4604_v5 = vsel %vm4480_vm4, %v4599_v18, %v4603_v9  ;;  %v5309_v2 = vrot.slane %v11125_v30, 4  ;;  %v5302_v48 = vsel %vm1368_vm0, %v5292_v12, %v5301_v29 }
 0x178   : > { %8400 = vmatprep.mubr.bf16.mxu0 %v4588_v16  ;;  %v11027_v16 = vshrl.u32 %v10261_v53, 16  ;;  %v5318_v49 = vrot.slane %v10269_v13, 4  ;;  %v4607_v56 = vor.u32 %v11029_v42, %v4603_v9  ;;  %v10306_v12 = vshll.u32 %v10285_v24, 16 }
 0x179   : > { %8461 = vmatmul.mubr.bf16.gmra.mrb[164].mxu1 %v5275_v1  ;;  %v8134_v60 = vpop.f32.mrb[60].mxu0  ;;  %v5310_v18 = vor.u32 %v5309_v2, %v5306_v40  ;;  %v11025_v2 = vshrl.u32 %v10263_v35, 16 }
 0x17a   : > { %8464 = vmatprep.mubr.bf16.mxu1 %v5284_v38  ;;  %v2305_v11 = vpop.f32.mrb[61].mxu0  ;;  %v4611_v38 = vrot.slane %v11026_v45, 1  ;;  %11128 = vst [vmem:[#allocation15_spill] sm:$0xff] %v10306_v12 }
 0x17b   : > { %v2508_v43 = vadd.f32 %v2305_v11, %v9967_v31  ;;  %v8135_v17 = vpop.f32.mrb[62].mxu0  ;;  %v11024_v31 = vshll.u32 %v10263_v35, 16  ;;  %v5319_v11 = vor.u32 %v5318_v49, %v5315_v41  ;;  %v5311_v41 = vsel %vm1368_vm0, %v5301_v29, %v5310_v18 }
 0x17c   : > { %v8198_v51 = vpop.f32.mrb[60].mxu1  ;;  %v2511_v1 = vadd.f32 %v8135_v17, %v9975_v6  ;;  %v2308_v55 = vpop.f32.mrb[63].mxu0  ;;  %v4615_v9 = vor.u32 %v11027_v16, %v4611_v38  ;;  %v4627_v29 = vrot.slane %v10269_v13, 1 }
 0x17d   : > { %v3013_v26 = vpop.f32.mrb[61].mxu1  ;;  %v2509_v4 = vadd.f32 %v2308_v55, %v9977_v52  ;;  %v10303_v52 = vshrl.u32 %v10285_v24, 16  ;;  %v4619_v60 = vrot.slane %v11024_v31, 1 }
 0x17e   : > { %v8199_v8 = vpop.f32.mrb[62].mxu1  ;;  %v10287_v3 = vadd.f32 %v3013_v26, %v2508_v43 }
 0x17f   : > { %v3016_v34 = vpop.f32.mrb[63].mxu1  ;;  %v10292_v6 = vadd.f32 %v8199_v8, %v2511_v1  ;;  %8401 = vmatmul.mubr.bf16.gmra.mrb[168].mxu0 %v4596_v14  ;;  %v10313_v14 = vshrl.u32 %v10298_v62, 16  ;;  %v5324_v1 = vrot.slane %v10303_v52, 3  ;;  %v5327_v8 = vrot.slane %v10306_v12, 4 }
 0x180   : > { %v10300_v44 = vadd.f32 %v3016_v34, %v2509_v4  ;;  %8404 = vmatprep.mubr.bf16.mxu0 %v4604_v5  ;;  %v4612_v5 = vsel %vm4480_vm4, %v4607_v56, %v4611_v38  ;;  %v4620_v49 = vsel %vm4480_vm4, %v4615_v9, %v4619_v60  ;;  %v10329_v56 = vld [vmem:[#allocation2 + $0xb8] sm:$0xff]  ;;  %v4623_v9 = vor.u32 %v11025_v2, %v4619_v60 }
 0x181   : > { %8465 = vmatmul.mubr.bf16.gmra.mrb[168].mxu1 %v5293_v7  ;;  %11129 = vst [vmem:[#allocation16_spill] sm:$0xff] %v10313_v14  ;;  %v10316_v7 = vshll.u32 %v10298_v62, 16 }
 0x182   : > { %8468 = vmatprep.mubr.bf16.mxu1 %v5302_v48  ;;  %v8138_v51 = vpop.f32.mrb[64].mxu0  ;;  %v11131_v48 = vld [vmem:[#allocation9_spill] sm:$0xff] }
 0x183   : > { %11130 = vst [vmem:[#allocation17_spill] sm:$0xff] %v10316_v7  ;;  %v2514_v43 = vadd.f32 %v8138_v51, %v9984_v54  ;;  %v2321_v17 = vpop.f32.mrb[65].mxu0  ;;  %11132 = vst [vmem:[#allocation9_spill] sm:$0xff] %v10329_v56  ;;  %v5320_v51 = vsel %vm1368_vm0, %v5310_v18, %v5319_v11  ;;  %v10347_v18 = vshll.u32 %v10329_v56, 16 }
 0x184   : > { %v8202_v26 = vpop.f32.mrb[64].mxu1  ;;  %v2512_v21 = vadd.f32 %v2321_v17, %v9990_v0  ;;  %v8139_v30 = vpop.f32.mrb[66].mxu0  ;;  %v5333_v17 = vrot.slane %v10313_v14, 3 }
 0x185   : > { %v3029_v40 = vpop.f32.mrb[65].mxu1  ;;  %v10324_v55 = vadd.f32 %v8202_v26, %v2514_v43  ;;  %v2515_v4 = vadd.f32 %v8139_v30, %v11131_v48  ;;  %v2324_v54 = vpop.f32.mrb[67].mxu0  ;;  %v5336_v43 = vrot.slane %v10316_v7, 4  ;;  %v10336_v26 = vld [vmem:[#allocation2 + $0xc0] sm:$0xff]  ;;  %11135 = vst [vmem:[#allocation20_spill] sm:$0xff] %v10347_v18  ;;  %v4631_v48 = vor.u32 %v10266_v28, %v4627_v29 }
 0x186   : > { %v8203_v34 = vpop.f32.mrb[66].mxu1  ;;  %v10331_v0 = vadd.f32 %v3029_v40, %v2512_v21  ;;  %11133 = vst [vmem:[#allocation18_spill] sm:$0xff] %v10336_v26  ;;  %v5328_v21 = vor.u32 %v5327_v8, %v5324_v1  ;;  %v10344_v40 = vshrl.u32 %v10329_v56, 16  ;;  %v11138_v1 = vld [vmem:[#allocation10_spill] sm:$0xff]  ;;  %v5345_v16 = vrot.slane %v10347_v18, 4  ;;  %v10383_v56 = vld [vmem:[#allocation2] sm:$0xff] }
 0x187   : > { %v3032_v38 = vpop.f32.mrb[67].mxu1  ;;  %v10338_v30 = vadd.f32 %v8203_v34, %v2515_v4  ;;  %8405 = vmatmul.mubr.bf16.gmra.mrb[172].mxu0 %v4612_v5  ;;  %v4635_v4 = vrot.slane %v10306_v12, 1  ;;  %v10352_v5 = vshrl.u32 %v10336_v26, 16  ;;  %v10355_v34 = vshll.u32 %v10336_v26, 16  ;;  %11139 = vst [vmem:[#allocation10_spill] sm:$0xff] %v10362_v39  ;;  %11144 = vst [vmem:[#allocation25_spill] sm:$0xff] %v10383_v56 }
 0x188   : > { %8408 = vmatprep.mubr.bf16.mxu0 %v4620_v49  ;;  %v5337_v60 = vor.u32 %v5336_v43, %v5333_v17  ;;  %v5329_v2 = vsel %vm1368_vm0, %v5319_v11, %v5328_v21  ;;  %v5342_v45 = vrot.slane %v10344_v40, 3 }
 0x189   : > { %11134 = vst [vmem:[#allocation19_spill] sm:$0xff] %v10338_v30  ;;  %8469 = vmatmul.mubr.bf16.gmra.mrb[172].mxu1 %v5311_v41  ;;  %11136 = vst [vmem:[#allocation21_spill] sm:$0xff] %v10352_v5  ;;  %v4636_v43 = vsel %vm4480_vm4, %v4631_v48, %v4635_v4  ;;  %v4639_v48 = vor.u32 %v10303_v52, %v4635_v4  ;;  %v4659_v24 = vrot.slane %v10355_v34, 1 }
 0x18a   : > { %8472 = vmatprep.mubr.bf16.mxu1 %v5320_v51  ;;  %11137 = vst [vmem:[#allocation22_spill] sm:$0xff] %v10355_v34  ;;  %v8142_v54 = vpop.f32.mrb[68].mxu0  ;;  %v4628_v51 = vsel %vm4480_vm4, %v4623_v9, %v4627_v29  ;;  %v5338_v11 = vsel %vm1368_vm0, %v5328_v21, %v5337_v60  ;;  %v4651_v21 = vrot.slane %v10347_v18, 1 }
 0x18b   : > { %v2518_v8 = vadd.f32 %v8142_v54, %v11138_v1  ;;  %v2337_v49 = vpop.f32.mrb[69].mxu0  ;;  %v5351_v54 = vrot.slane %v10352_v5, 3  ;;  %v11141_v1 = vld [vmem:[#allocation4_spill] sm:$0xff] }
 0x18c   : > { %v8206_v41 = vpop.f32.mrb[68].mxu1  ;;  %v8143_v31 = vpop.f32.mrb[70].mxu0  ;;  %v4643_v49 = vrot.slane %v10316_v7, 1 }
 0x18d   : > { %v3045_v38 = vpop.f32.mrb[69].mxu1  ;;  %v10364_v42 = vadd.f32 %v8206_v41, %v2518_v8  ;;  %v2340_v17 = vpop.f32.mrb[71].mxu0  ;;  %v5354_v31 = vrot.slane %v10355_v34, 4  ;;  %v5346_v41 = vor.u32 %v5345_v16, %v5342_v45  ;;  %v11145_v45 = vld [vmem:[#allocation11_spill] sm:$0xff]  ;;  %v10406_v34 = vld [vmem:[#allocation2 + $0x20] sm:$0xff] }
 0x18e   : > { %v8207_v26 = vpop.f32.mrb[70].mxu1  ;;  %v2517_v29 = vadd.f32 %v2340_v17, %v11141_v1  ;;  %v10373_v38 = vshrl.u32 %v10362_v39, 16  ;;  %v4647_v17 = vor.u32 %v10313_v14, %v4643_v49 }
 0x18f   : > { %11140 = vst [vmem:[#allocation23_spill] sm:$0xff] %v10364_v42  ;;  %v3048_v9 = vpop.f32.mrb[71].mxu1  ;;  %8409 = vmatmul.mubr.bf16.gmra.mrb[176].mxu0 %v4628_v51  ;;  %v10376_v26 = vshll.u32 %v10362_v39, 16  ;;  %v5355_v51 = vor.u32 %v5354_v31, %v5351_v54  ;;  %v5347_v54 = vsel %vm1368_vm0, %v5337_v60, %v5346_v41  ;;  %v5142_v31 = vld [vmem:[#allocation2 + $0xd8] sm:$0xf]  ;;  %v11150_v60 = vshll.u32 %v10383_v56, 16 }
 0x190   : > { %v10378_v8 = vadd.f32 %v3048_v9, %v2517_v29  ;;  %8412 = vmatprep.mubr.bf16.mxu0 %v4636_v43  ;;  %v5376_v12 = vshrl.u32 %v5142_v31, 16 }
 0x191   : > { %11142 = vst [vmem:[#allocation4_spill] sm:$0xff] %v10376_v26  ;;  %8473 = vmatmul.mubr.bf16.gmra.mrb[176].mxu1 %v5329_v2  ;;  %v5360_v2 = vrot.slane %v10373_v38, 3  ;;  %v5363_v4 = vrot.slane %v10376_v26, 4  ;;  %v5356_v39 = vsel %vm1368_vm0, %v5346_v41, %v5355_v51  ;;  %v5372_v30 = vrot.slane %v11150_v60, 4 }
 0x192   : > { %11143 = vst [vmem:[#allocation24_spill] sm:$0xff] %v10378_v8  ;;  %8476 = vmatprep.mubr.bf16.mxu1 %v5338_v11  ;;  %v8146_v1 = vpop.f32.mrb[72].mxu0  ;;  %v4644_v8 = vsel %vm4480_vm4, %v4639_v48, %v4643_v49  ;;  %v11149_v49 = vshrl.u32 %v10383_v56, 16 }
 0x193   : > { %v2353_v9 = vpop.f32.mrb[73].mxu0  ;;  %v11146_v1 = vld [vmem:[#allocation5_spill] sm:$0xff]  ;;  %v5364_v41 = vor.u32 %v5363_v4, %v5360_v2  ;;  %v6436_v2 = vshll.u32 %v10406_v34, 16 }
 0x194   : > { %v8210_v29 = vpop.f32.mrb[72].mxu1  ;;  %v2520_v16 = vadd.f32 %v2353_v9, %v11145_v45  ;;  %v8147_v11 = vpop.f32.mrb[74].mxu0  ;;  %v11148_v9 = vld [vmem:[#allocation6_spill] sm:$0xff]  ;;  %v5369_v48 = vrot.slane %v11149_v49, 3  ;;  %v5379_v49 = vshll.u32 %v5142_v31, 16 }
 0x195   : > { %v3061_v43 = vpop.f32.mrb[73].mxu1  ;;  %v2523_v18 = vadd.f32 %v8147_v11, %v11146_v1  ;;  %v2356_v62 = vpop.f32.mrb[75].mxu0  ;;  %v4652_v29 = vsel %vm4480_vm4, %v4647_v17, %v4651_v21  ;;  %v6382_v11 = vld [vmem:[#allocation2 + $0x18] sm:$0xf0]  ;;  %v4655_v17 = vor.u32 %v10344_v40, %v4651_v21  ;;  %v6433_v21 = vshrl.u32 %v10406_v34, 16 }
 0x196   : > { %v8211_v42 = vpop.f32.mrb[74].mxu1  ;;  %v10396_v7 = vadd.f32 %v3061_v43, %v2520_v16  ;;  %v2521_v45 = vadd.f32 %v2356_v62, %v11148_v9  ;;  %v4663_v62 = vor.u32 %v10352_v5, %v4659_v24  ;;  %v4667_v43 = vrot.slane %v10376_v26, 1  ;;  %v4462_v9 = vld [vmem:[#allocation2 + $0xd0] sm:$0x1] }
 0x197   : > { %v3064_v14 = vpop.f32.mrb[75].mxu1  ;;  %v10403_v1 = vadd.f32 %v8211_v42, %v2523_v18  ;;  %8413 = vmatmul.mubr.bf16.gmra.mrb[180].mxu0 %v4644_v8  ;;  %v6425_v42 = vshrl.u32 %v6382_v11, 16  ;;  %v6428_v18 = vshll.u32 %v6382_v11, 16  ;;  %v5373_v60 = vor.u32 %v5372_v30, %v5369_v48 }
 0x198   : > { %11147 = vst [vmem:[#allocation11_spill] sm:$0xff] %v10396_v7  ;;  %v10408_v16 = vadd.f32 %v3064_v14, %v2521_v45  ;;  %8416 = vmatprep.mubr.bf16.mxu0 %v4652_v29  ;;  %v4660_v29 = vsel %vm4480_vm4, %v4655_v17, %v4659_v24  ;;  %v5365_v45 = vsel %vm1368_vm0, %v5355_v51, %v5364_v41  ;;  %v4673_v56 = vshll.u32 %v4462_v9, 16  ;;  %v10422_v24 = vld [vmem:[#allocation2 + $0x28] sm:$0xff]  ;;  %v5825_v9 = vld [vmem:[#allocation2 + $0x18] sm:$0xf0] }
 0x199   : > { %11151 = vst [vmem:[#allocation5_spill] sm:$0xff] %v10403_v1  ;;  %8477 = vmatmul.mubr.bf16.gmra.mrb[180].mxu1 %v5347_v54  ;;  %v4668_v11 = vsel %vm4480_vm4, %v4663_v62, %v4667_v43  ;;  %v5378_v30 = vrot.slane %v5376_v12, 3  ;;  %v5381_v48 = vrot.slane %v5379_v49, 4  ;;  %v6427_v7 = vrot.slane %v6425_v42, 4  ;;  %v10427_v12 = vld [vmem:[#allocation2 + $0x30] sm:$0xff] }
 0x19a   : > { %11152 = vst [vmem:[#allocation6_spill] sm:$0xff] %v10408_v16  ;;  %8480 = vmatprep.mubr.bf16.mxu1 %v5356_v39  ;;  %v8150_v8 = vpop.f32.mrb[76].mxu0  ;;  %v6430_v5 = vrot.slane %v6428_v18, 5  ;;  %v6438_v62 = vrot.slane %v6436_v2, 5  ;;  %v6442_v18 = vshrl.u32 %v10422_v24, 16  ;;  %v6451_v2 = vshrl.u32 %v10427_v12, 16 }
 0x19b   : > { %v2526_v14 = vadd.f32 %v8150_v8, %v10033_v57  ;;  %v2369_v54 = vpop.f32.mrb[77].mxu0  ;;  %v5382_v42 = vor.u32 %v5381_v48, %v5378_v30 }
 0x19c   : > { %v8214_v4 = vpop.f32.mrb[76].mxu1  ;;  %v2524_v31 = vadd.f32 %v2369_v54, %v10038_v19  ;;  %v8151_v16 = vpop.f32.mrb[78].mxu0  ;;  %v5374_v19 = vsel %vm1368_vm0, %v5364_v41, %v5373_v60  ;;  %v6435_v54 = vrot.slane %v6433_v21, 4  ;;  %v5892_v41 = vrot.slane %v5825_v9, 4 }
 0x19d   : > { %v3077_v39 = vpop.f32.mrb[77].mxu1  ;;  %v10419_v1 = vadd.f32 %v8214_v4, %v2526_v14  ;;  %v2527_v26 = vadd.f32 %v8151_v16, %v10040_v58  ;;  %v2372_v8 = vpop.f32.mrb[79].mxu0  ;;  %v4671_v58 = vor.u32 %v10373_v38, %v4667_v43  ;;  %v4675_v16 = vrot.slane %v4673_v56, 1 }
 0x19e   : > { %v8215_v57 = vpop.f32.mrb[78].mxu1  ;;  %v10424_v51 = vadd.f32 %v3077_v39, %v2524_v31  ;;  %v6445_v14 = vshll.u32 %v10422_v24, 16  ;;  %v5893_v21 = vrot.slane %v10406_v34, 4  ;;  %v6439_v31 = vor.u32 %v6438_v62, %v6435_v54  ;;  %v10443_v54 = vld [vmem:[#allocation2 + $0x38] sm:$0xff] }
 0x19f   : > { %v3080_v17 = vpop.f32.mrb[79].mxu1  ;;  %v10429_v49 = vadd.f32 %v8215_v57, %v2527_v26  ;;  %8417 = vmatmul.mubr.bf16.gmra.mrb[184].mxu0 %v4660_v29  ;;  %v6454_v26 = vshll.u32 %v10427_v12, 16  ;;  %v6431_v29 = vor.u32 %v6430_v5, %v6427_v7  ;;  %v4676_v30 = vsel %vm4480_vm4, %v4671_v58, %v4675_v16  ;;  %v10447_v58 = vld [vmem:[#allocation2 + $0x40] sm:$0xff] }
 0x1a0   : > { %8420 = vmatprep.mubr.bf16.mxu0 %v4668_v11  ;;  %v5383_v48 = vsel %vm1368_vm0, %v5373_v60, %v5382_v42  ;;  %v6444_v57 = vrot.slane %v6442_v18, 4  ;;  %v6447_v8 = vrot.slane %v6445_v14, 5  ;;  %v5894_v9 = vsel %vm2101_vm1, %v5892_v41, %v5893_v21 }
 0x1a1   : > { %8481 = vmatmul.mubr.bf16.gmra.mrb[184].mxu1 %v5365_v45  ;;  %v6453_v7 = vrot.slane %v6451_v2, 4  ;;  %v6456_v5 = vrot.slane %v6454_v26, 5  ;;  %v5895_v16 = vrot.slane %v10422_v24, 4  ;;  %v6460_v18 = vshrl.u32 %v10443_v54, 16 }
 0x1a2   : > { %8484 = vmatprep.mubr.bf16.mxu1 %v5374_v19  ;;  %v8154_v4 = vpop.f32.mrb[80].mxu0  ;;  %v6448_v42 = vor.u32 %v6447_v8, %v6444_v57  ;;  %v5897_v14 = vrot.slane %v10427_v12, 4  ;;  %v6463_v2 = vshll.u32 %v10443_v54, 16  ;;  %v11154_v12 = vld [vmem:[#allocation8_spill] sm:$0xff] }
 0x1a3   : > { %v2530_v43 = vadd.f32 %v8154_v4, %v10054_v47  ;;  %v2385_v56 = vpop.f32.mrb[81].mxu0  ;;  %v11153_v47 = vld [vmem:[#allocation7_spill] sm:$0xff]  ;;  %v6457_v41 = vor.u32 %v6456_v5, %v6453_v7  ;;  %v6462_v8 = vrot.slane %v6460_v18, 4  ;;  %v10470_v18 = vld [vmem:[#allocation2 + $0x50] sm:$0xff] }
 0x1a4   : > { %v8218_v45 = vpop.f32.mrb[80].mxu1  ;;  %v8155_v11 = vpop.f32.mrb[82].mxu0  ;;  %v6440_v56 = vsel %vm2634_vm2, %v6431_v29, %v6439_v31  ;;  %v6469_v29 = vshrl.u32 %v10447_v58, 16  ;;  %v6449_v57 = vsel %vm2634_vm2, %v6439_v31, %v6448_v42  ;;  %v5898_v7 = vsel %vm2101_vm1, %v5895_v16, %v5897_v14 }
 0x1a5   : > { %v3093_v39 = vpop.f32.mrb[81].mxu1  ;;  %v10440_v34 = vadd.f32 %v8218_v45, %v2530_v43  ;;  %v2388_v19 = vpop.f32.mrb[83].mxu0  ;;  %v6472_v43 = vshll.u32 %v10447_v58, 16  ;;  %v6458_v5 = vsel %vm2634_vm2, %v6448_v42, %v6457_v41 }
 0x1a6   : > { %v8219_v17 = vpop.f32.mrb[82].mxu1  ;;  %v2529_v62 = vadd.f32 %v2388_v19, %v11153_v47  ;;  %v6465_v47 = vrot.slane %v6463_v2, 5 }
 0x1a7   : > { %v3096_v4 = vpop.f32.mrb[83].mxu1  ;;  %8421 = vmatmul.mubr.bf16.gmra.mrb[188].mxu0 %v4676_v30 }
 0x1a8   : > { %v10449_v60 = vadd.f32 %v3096_v4, %v2529_v62  ;;  %8504 = vmatprep.mubr.bf16.mxu0 %v5894_v9  ;;  %v10463_v62 = vld [vmem:[#allocation2 + $0x48] sm:$0xff] }
 0x1a9   : > { %8485 = vmatmul.mubr.bf16.gmra.mrb[188].mxu1 %v5383_v48  ;;  %v5896_v48 = vsel %vm2101_vm1, %v5893_v21, %v5895_v16  ;;  %v6471_v21 = vrot.slane %v6469_v29, 4  ;;  %v5899_v16 = vrot.slane %v10443_v54, 4  ;;  %v6478_v42 = vshrl.u32 %v10463_v62, 16 }
 0x1aa   : > { %8568 = vmatprep.mubr.bf16.mxu1 %v6440_v56  ;;  %v8158_v26 = vpop.f32.mrb[84].mxu0  ;;  %v6481_v2 = vshll.u32 %v10463_v62, 16  ;;  %v5901_v29 = vrot.slane %v10447_v58, 4 }
 0x1ab   : > { %v2401_v39 = vpop.f32.mrb[85].mxu0 }
 0x1ac   : > { %v8222_v45 = vpop.f32.mrb[84].mxu1  ;;  %v2532_v11 = vadd.f32 %v2401_v39, %v10079_v25  ;;  %v8159_v24 = vpop.f32.mrb[86].mxu0  ;;  %v11155_v25 = vld [vmem:[#allocation12_spill] sm:$0xff] }
 0x1ad   : > { %v3109_v30 = vpop.f32.mrb[85].mxu1  ;;  %v2535_v17 = vadd.f32 %v8159_v24, %v11154_v12  ;;  %v2404_v9 = vpop.f32.mrb[87].mxu0  ;;  %v6474_v45 = vrot.slane %v6472_v43, 5  ;;  %v6487_v24 = vshrl.u32 %v10470_v18, 16 }
 0x1ae   : > { %v8223_v19 = vpop.f32.mrb[86].mxu1  ;;  %v10465_v4 = vadd.f32 %v3109_v30, %v2532_v11  ;;  %v2533_v56 = vadd.f32 %v2404_v9, %v11155_v25  ;;  %v6466_v11 = vor.u32 %v6465_v47, %v6462_v8  ;;  %v6483_v8 = vrot.slane %v6481_v2, 5  ;;  %v10493_v2 = vld [vmem:[#allocation2 + $0x60] sm:$0xff] }
 0x1af   : > { %v3112_v26 = vpop.f32.mrb[87].mxu1  ;;  %v10468_v31 = vadd.f32 %v8223_v19, %v2535_v17  ;;  %8505 = vmatmul.mubr.bf16.vlgmr.msra.gmra.mrb[192].mxu0 %v5896_v48  ;;  %v6475_v30 = vor.u32 %v6474_v45, %v6471_v21  ;;  %v6490_v48 = vshll.u32 %v10470_v18, 16  ;;  %v10488_v21 = vld [vmem:[#allocation2 + $0x58] sm:$0xff] }
 0x1b0   : > { %v10472_v39 = vadd.f32 %v3112_v26, %v2533_v56  ;;  %8508 = vmatprep.mubr.bf16.mxu0 %v5898_v7  ;;  %v5900_v7 = vsel %vm2101_vm1, %v5897_v14, %v5899_v16  ;;  %v6467_v26 = vsel %vm2634_vm2, %v6457_v41, %v6466_v11  ;;  %v6489_v14 = vrot.slane %v6487_v24, 4 }
 0x1b1   : > { %8569 = vmatmul.mubr.bf16.vlgmr.msra.gmra.mrb[192].mxu1 %v6449_v57  ;;  %v6508_v24 = vshll.u32 %v10493_v2, 16 }
 0x1b2   : > { %8572 = vmatprep.mubr.bf16.mxu1 %v6458_v5  ;;  %v8162_v43 = vpop.f32.mrb[88].mxu0  ;;  %v6480_v5 = vrot.slane %v6478_v42, 4  ;;  %v6492_v42 = vrot.slane %v6490_v48, 5 }
 0x1b3   : > { %v2538_v12 = vadd.f32 %v8162_v43, %v10120_v50  ;;  %v2417_v17 = vpop.f32.mrb[89].mxu0  ;;  %v5902_v50 = vsel %vm2101_vm1, %v5899_v16, %v5901_v29  ;;  %v6476_v43 = vsel %vm2634_vm2, %v6466_v11, %v6475_v30  ;;  %v6496_v16 = vshrl.u32 %v10488_v21, 16 }
 0x1b4   : > { %v8226_v57 = vpop.f32.mrb[88].mxu1  ;;  %v2536_v54 = vadd.f32 %v2417_v17, %v10125_v10  ;;  %v8163_v9 = vpop.f32.mrb[90].mxu0  ;;  %v6484_v41 = vor.u32 %v6483_v8, %v6480_v5  ;;  %v5905_v17 = vrot.slane %v10470_v18, 4  ;;  %v6505_v11 = vshrl.u32 %v10493_v2, 16 }
 0x1b5   : > { %v3125_v19 = vpop.f32.mrb[89].mxu1  ;;  %v10483_v47 = vadd.f32 %v8226_v57, %v2538_v12  ;;  %v2539_v58 = vadd.f32 %v8163_v9, %v10129_v36  ;;  %v2420_v56 = vpop.f32.mrb[91].mxu0  ;;  %v5903_v36 = vrot.slane %v10463_v62, 4  ;;  %v6499_v57 = vshll.u32 %v10488_v21, 16 }
 0x1b6   : > { %v8227_v25 = vpop.f32.mrb[90].mxu1  ;;  %v10490_v45 = vadd.f32 %v3125_v19, %v2536_v54  ;;  %v6493_v54 = vor.u32 %v6492_v42, %v6489_v14  ;;  %v6485_v8 = vsel %vm2634_vm2, %v6475_v30, %v6484_v41  ;;  %v6510_v14 = vrot.slane %v6508_v24, 5  ;;  %v10509_v42 = vld [vmem:[#allocation2 + $0x68] sm:$0xff] }
 0x1b7   : > { %v3128_v10 = vpop.f32.mrb[91].mxu1  ;;  %v10495_v12 = vadd.f32 %v8227_v25, %v2539_v58  ;;  %8509 = vmatmul.mubr.bf16.gmra.mrb[196].mxu0 %v5900_v7  ;;  %v5904_v5 = vsel %vm2101_vm1, %v5901_v29, %v5903_v36  ;;  %v6498_v25 = vrot.slane %v6496_v16, 4  ;;  %v6501_v56 = vrot.slane %v6499_v57, 5  ;;  %v10513_v29 = vld [vmem:[#allocation2 + $0x70] sm:$0xff] }
 0x1b8   : > { %8512 = vmatprep.mubr.bf16.mxu0 %v5902_v50  ;;  %v5906_v10 = vsel %vm2101_vm1, %v5903_v36, %v5905_v17  ;;  %v5907_v16 = vrot.slane %v10488_v21, 4  ;;  %v6514_v36 = vshrl.u32 %v10509_v42, 16 }
 0x1b9   : > { %8573 = vmatmul.mubr.bf16.gmra.mrb[196].mxu1 %v6467_v26  ;;  %v6502_v57 = vor.u32 %v6501_v56, %v6498_v25 }
 0x1ba   : > { %8576 = vmatprep.mubr.bf16.mxu1 %v6476_v43  ;;  %v8166_v48 = vpop.f32.mrb[92].mxu0  ;;  %v6507_v43 = vrot.slane %v6505_v11, 4  ;;  %v5909_v11 = vrot.slane %v10493_v2, 4  ;;  %v5908_v25 = vsel %vm2101_vm1, %v5905_v17, %v5907_v16 }
 0x1bb   : > { %v2542_v19 = vadd.f32 %v8166_v48, %v10154_v63  ;;  %v2433_v7 = vpop.f32.mrb[93].mxu0  ;;  %v6503_v56 = vsel %vm2634_vm2, %v6493_v54, %v6502_v57 }
 0x1bc   : > { %v8230_v9 = vpop.f32.mrb[92].mxu1  ;;  %v8167_v62 = vpop.f32.mrb[94].mxu0  ;;  %v6494_v7 = vsel %vm2634_vm2, %v6484_v41, %v6493_v54  ;;  %v6511_v24 = vor.u32 %v6510_v14, %v6507_v43  ;;  %v6523_v41 = vshrl.u32 %v10513_v29, 16  ;;  %v5910_v43 = vsel %vm2101_vm1, %v5907_v16, %v5909_v11 }
 0x1bd   : > { %v3141_v58 = vpop.f32.mrb[93].mxu1  ;;  %v10506_v26 = vadd.f32 %v8230_v9, %v2542_v19  ;;  %v2436_v50 = vpop.f32.mrb[95].mxu0  ;;  %v6526_v9 = vshll.u32 %v10513_v29, 16  ;;  %v5911_v16 = vrot.slane %v10509_v42, 4 }
 0x1be   : > { %v8231_v18 = vpop.f32.mrb[94].mxu1  ;;  %v2541_v63 = vadd.f32 %v2436_v50, %v10167_v61  ;;  %v6517_v61 = vshll.u32 %v10509_v42, 16  ;;  %v6512_v14 = vsel %vm2634_vm2, %v6502_v57, %v6511_v24  ;;  %v6525_v17 = vrot.slane %v6523_v41, 4 }
 0x1bf   : > { %v3144_v48 = vpop.f32.mrb[95].mxu1  ;;  %8513 = vmatmul.mubr.bf16.gmra.mrb[200].mxu0 %v5904_v5  ;;  %v6516_v18 = vrot.slane %v6514_v36, 4  ;;  %v5913_v41 = vrot.slane %v10513_v29, 4 }
 0x1c0   : > { %v10515_v30 = vadd.f32 %v3144_v48, %v2541_v63  ;;  %8516 = vmatprep.mubr.bf16.mxu0 %v5906_v10  ;;  %v6519_v63 = vrot.slane %v6517_v61, 5  ;;  %v10529_v48 = vld [vmem:[#allocation2 + $0x78] sm:$0xff] }
 0x1c1   : > { %8577 = vmatmul.mubr.bf16.gmra.mrb[200].mxu1 %v6485_v8  ;;  %v6532_v57 = vshrl.u32 %v10529_v48, 16  ;;  %v6535_v61 = vshll.u32 %v10529_v48, 16 }
 0x1c2   : > { %8580 = vmatprep.mubr.bf16.mxu1 %v6494_v7  ;;  %v8250_v19 = vpop.f32.mrb[96].mxu0 }
 0x1c3   : > { %v3645_v62 = vpop.f32.mrb[97].mxu0 }
 0x1c4   : > { %v8314_v58 = vpop.f32.mrb[96].mxu1  ;;  %v3884_v5 = vadd.f32 %v3645_v62, %v10193_v32  ;;  %v8251_v21 = vpop.f32.mrb[98].mxu0 }
 0x1c5   : > { %v4103_v8 = vpop.f32.mrb[97].mxu1  ;;  %v3887_v2 = vadd.f32 %v8251_v21, %v10201_v15  ;;  %v3648_v10 = vpop.f32.mrb[99].mxu0  ;;  %v6528_v58 = vrot.slane %v6526_v9, 5  ;;  %v10536_v15 = vld [vmem:[#allocation2 + $0x80] sm:$0xff] }
 0x1c6   : > { %v8315_v50 = vpop.f32.mrb[98].mxu1  ;;  %v10531_v7 = vadd.f32 %v4103_v8, %v3884_v5  ;;  %v3885_v32 = vadd.f32 %v3648_v10, %v10208_v46  ;;  %v6520_v46 = vor.u32 %v6519_v63, %v6516_v18  ;;  %v6541_v5 = vshrl.u32 %v10536_v15, 16 }
 0x1c7   : > { %v4106_v19 = vpop.f32.mrb[99].mxu1  ;;  %v10534_v54 = vadd.f32 %v8315_v50, %v3887_v2  ;;  %8517 = vmatmul.mubr.bf16.gmra.mrb[204].mxu0 %v5908_v25  ;;  %v6529_v62 = vor.u32 %v6528_v58, %v6525_v17  ;;  %v6544_v8 = vshll.u32 %v10536_v15, 16  ;;  %v5912_v10 = vsel %vm2101_vm1, %v5909_v11, %v5911_v16 }
 0x1c8   : > { %v10538_v36 = vadd.f32 %v4106_v19, %v3885_v32  ;;  %8520 = vmatprep.mubr.bf16.mxu0 %v5910_v43  ;;  %v6534_v43 = vrot.slane %v6532_v57, 4  ;;  %v6537_v18 = vrot.slane %v6535_v61, 5  ;;  %v6521_v19 = vsel %vm2634_vm2, %v6511_v24, %v6520_v46 }
 0x1c9   : > { %8581 = vmatmul.mubr.bf16.gmra.mrb[204].mxu1 %v6503_v56  ;;  %v5917_v24 = vrot.slane %v10536_v15, 4 }
 0x1ca   : > { %8584 = vmatprep.mubr.bf16.mxu1 %v6512_v14  ;;  %v8254_v9 = vpop.f32.mrb[100].mxu0  ;;  %v6538_v57 = vor.u32 %v6537_v18, %v6534_v43 }
 0x1cb   : > { %v3890_v21 = vadd.f32 %v8254_v9, %v10218_v23  ;;  %v3661_v56 = vpop.f32.mrb[101].mxu0  ;;  %v5914_v23 = vsel %vm2101_vm1, %v5911_v16, %v5913_v41  ;;  %v6543_v9 = vrot.slane %v6541_v5, 4 }
 0x1cc   : > { %v8318_v25 = vpop.f32.mrb[100].mxu1  ;;  %v3888_v42 = vadd.f32 %v3661_v56, %v10222_v22  ;;  %v8255_v50 = vpop.f32.mrb[102].mxu0  ;;  %v6530_v22 = vsel %vm2634_vm2, %v6520_v46, %v6529_v62  ;;  %v6546_v56 = vrot.slane %v6544_v8, 5 }
 0x1cd   : > { %v4119_v2 = vpop.f32.mrb[101].mxu1  ;;  %v10549_v14 = vadd.f32 %v8318_v25, %v3890_v21  ;;  %v3891_v29 = vadd.f32 %v8255_v50, %v10227_v20  ;;  %v3664_v32 = vpop.f32.mrb[103].mxu0  ;;  %v5915_v20 = vrot.slane %v10529_v48, 4  ;;  %v11156_v50 = vshrl.u32 %v10233_v27, 16 }
 0x1ce   : > { %v8319_v63 = vpop.f32.mrb[102].mxu1  ;;  %v10554_v17 = vadd.f32 %v4119_v2, %v3888_v42  ;;  %v6547_v16 = vor.u32 %v6546_v56, %v6543_v9  ;;  %v6539_v2 = vsel %vm2634_vm2, %v6529_v62, %v6538_v57  ;;  %v11157_v48 = vshll.u32 %v10233_v27, 16 }
 0x1cf   : > { %v4122_v58 = vpop.f32.mrb[103].mxu1  ;;  %v10557_v11 = vadd.f32 %v8319_v63, %v3891_v29  ;;  %8521 = vmatmul.mubr.bf16.gmra.mrb[208].mxu0 %v5912_v10  ;;  %v5916_v8 = vsel %vm2101_vm1, %v5913_v41, %v5915_v20  ;;  %v6552_v10 = vrot.slane %v11156_v50, 4  ;;  %v11158_v63 = vshrl.u32 %v10261_v53, 16 }
 0x1d0   : > { %8524 = vmatprep.mubr.bf16.mxu0 %v5914_v23  ;;  %v6555_v43 = vrot.slane %v11157_v48, 5  ;;  %v6548_v58 = vsel %vm2634_vm2, %v6538_v57, %v6547_v16  ;;  %v5919_v9 = vrot.slane %v10233_v27, 4 }
 0x1d1   : > { %8585 = vmatmul.mubr.bf16.gmra.mrb[208].mxu1 %v6521_v19  ;;  %v6561_v32 = vrot.slane %v11158_v63, 4  ;;  %v11159_v19 = vshll.u32 %v10261_v53, 16  ;;  %v6582_v63 = vrot.slane %v10269_v13, 5 }
 0x1d2   : > { %8588 = vmatprep.mubr.bf16.mxu1 %v6530_v22  ;;  %v8258_v61 = vpop.f32.mrb[104].mxu0  ;;  %v6556_v56 = vor.u32 %v6555_v43, %v6552_v10  ;;  %v5920_v57 = vsel %vm2101_vm1, %v5917_v24, %v5919_v9 }
 0x1d3   : > { %v3894_v21 = vadd.f32 %v8258_v61, %v10243_v33  ;;  %v3677_v42 = vpop.f32.mrb[105].mxu0  ;;  %v5918_v33 = vsel %vm2101_vm1, %v5915_v20, %v5917_v24  ;;  %v6564_v41 = vrot.slane %v11159_v19, 5  ;;  %v5921_v20 = vrot.slane %v10261_v53, 4 }
 0x1d4   : > { %v8322_v25 = vpop.f32.mrb[104].mxu1  ;;  %v8259_v5 = vpop.f32.mrb[106].mxu0  ;;  %v5923_v19 = vrot.slane %v10263_v35, 4 }
 0x1d5   : > { %v4135_v46 = vpop.f32.mrb[105].mxu1  ;;  %v10568_v18 = vadd.f32 %v8322_v25, %v3894_v21  ;;  %v3680_v29 = vpop.f32.mrb[107].mxu0  ;;  %v6565_v61 = vor.u32 %v6564_v41, %v6561_v32  ;;  %v5922_v53 = vsel %vm2101_vm1, %v5919_v9, %v5921_v20 }
 0x1d6   : > { %v8323_v15 = vpop.f32.mrb[106].mxu1  ;;  %v3893_v62 = vadd.f32 %v3680_v29, %v10256_v37 }
 0x1d7   : > { %v4138_v23 = vpop.f32.mrb[107].mxu1  ;;  %8525 = vmatmul.mubr.bf16.gmra.mrb[212].mxu0 %v5916_v8  ;;  %v6557_v8 = vsel %vm2634_vm2, %v6547_v16, %v6556_v56  ;;  %v6566_v43 = vsel %vm2634_vm2, %v6556_v56, %v6565_v61  ;;  %v11161_v15 = vshll.u32 %v10263_v35, 16  ;;  %v6579_v16 = vrot.slane %v10266_v28, 4 }
 0x1d8   : > { %v10577_v22 = vadd.f32 %v4138_v23, %v3893_v62  ;;  %8528 = vmatprep.mubr.bf16.mxu0 %v5918_v33  ;;  %v5925_v62 = vrot.slane %v10254_v59, 4 }
 0x1d9   : > { %8589 = vmatmul.mubr.bf16.gmra.mrb[212].mxu1 %v6539_v2  ;;  %v11160_v2 = vshrl.u32 %v10263_v35, 16 }
 0x1da   : > { %8592 = vmatprep.mubr.bf16.mxu1 %v6548_v58  ;;  %v8262_v21 = vpop.f32.mrb[108].mxu0 }
 0x1db   : > { %v3693_v42 = vpop.f32.mrb[109].mxu0  ;;  %v6570_v50 = vrot.slane %v11160_v2, 4  ;;  %v5926_v2 = vsel %vm2101_vm1, %v5923_v19, %v5925_v62 }
 0x1dc   : > { %v8326_v25 = vpop.f32.mrb[108].mxu1  ;;  %v3896_v37 = vadd.f32 %v3693_v42, %v10287_v3  ;;  %v8263_v5 = vpop.f32.mrb[110].mxu0  ;;  %v6573_v3 = vrot.slane %v11161_v15, 5  ;;  %v6588_v42 = vrot.slane %v10303_v52, 4  ;;  %v11165_v52 = vld [vmem:[#allocation17_spill] sm:$0xff] }
 0x1dd   : > { %v4151_v46 = vpop.f32.mrb[109].mxu1  ;;  %v3899_v27 = vadd.f32 %v8263_v5, %v10292_v6  ;;  %v3696_v48 = vpop.f32.mrb[111].mxu0  ;;  %v5924_v25 = vsel %vm2101_vm1, %v5921_v20, %v5923_v19  ;;  %v11163_v5 = vld [vmem:[#allocation19_spill] sm:$0xff]  ;;  %v11164_v20 = vld [vmem:[#allocation16_spill] sm:$0xff] }
 0x1de   : > { %v8327_v10 = vpop.f32.mrb[110].mxu1  ;;  %v10591_v29 = vadd.f32 %v4151_v46, %v3896_v37  ;;  %v3897_v24 = vadd.f32 %v3696_v48, %v10300_v44  ;;  %v6574_v41 = vor.u32 %v6573_v3, %v6570_v50  ;;  %v6583_v44 = vor.u32 %v6582_v63, %v6579_v16  ;;  %v11162_v37 = vld [vmem:[#allocation15_spill] sm:$0xff] }
 0x1df   : > { %v4154_v33 = vpop.f32.mrb[111].mxu1  ;;  %v10596_v32 = vadd.f32 %v8327_v10, %v3899_v27  ;;  %8529 = vmatmul.mubr.bf16.gmra.mrb[216].mxu0 %v5920_v57  ;;  %v6591_v35 = vrot.slane %v11162_v37, 5  ;;  %v6597_v10 = vrot.slane %v11164_v20, 4  ;;  %v6600_v48 = vrot.slane %v11165_v52, 5  ;;  %v11168_v63 = vld [vmem:[#allocation23_spill] sm:$0xff]  ;;  %v11174_v52 = vld [vmem:[#allocation18_spill] sm:$0xff] }
 0x1e0   : > { %v10598_v6 = vadd.f32 %v4154_v33, %v3897_v24  ;;  %8532 = vmatprep.mubr.bf16.mxu0 %v5922_v53  ;;  %v6584_v27 = vsel %vm2634_vm2, %v6574_v41, %v6583_v44 }
 0x1e1   : > { %8593 = vmatmul.mubr.bf16.gmra.mrb[216].mxu1 %v6557_v8  ;;  %v6592_v3 = vor.u32 %v6591_v35, %v6588_v42  ;;  %v6601_v16 = vor.u32 %v6600_v48, %v6597_v10  ;;  %v5933_v48 = vrot.slane %v11174_v52, 4 }
 0x1e2   : > { %8596 = vmatprep.mubr.bf16.mxu1 %v6566_v43  ;;  %v8266_v23 = vpop.f32.mrb[112].mxu0  ;;  %v11166_v43 = vld [vmem:[#allocation13_spill] sm:$0xff] }
 0x1e3   : > { %v3902_v58 = vadd.f32 %v8266_v23, %v10324_v55  ;;  %v3709_v9 = vpop.f32.mrb[113].mxu0  ;;  %v6575_v55 = vsel %vm2634_vm2, %v6565_v61, %v6574_v41  ;;  %v5927_v15 = vrot.slane %v11166_v43, 4  ;;  %v11167_v61 = vld [vmem:[#allocation14_spill] sm:$0xff] }
 0x1e4   : > { %v8330_v28 = vpop.f32.mrb[112].mxu1  ;;  %v3900_v13 = vadd.f32 %v3709_v9, %v10331_v0  ;;  %v8267_v21 = vpop.f32.mrb[114].mxu0  ;;  %v5929_v24 = vrot.slane %v11167_v61, 4 }
 0x1e5   : > { %v4167_v56 = vpop.f32.mrb[113].mxu1  ;;  %v10607_v46 = vadd.f32 %v8330_v28, %v3902_v58  ;;  %v3903_v59 = vadd.f32 %v8267_v21, %v11163_v5  ;;  %v3712_v8 = vpop.f32.mrb[115].mxu0  ;;  %v5928_v9 = vsel %vm2101_vm1, %v5925_v62, %v5927_v15  ;;  %v11169_v21 = vld [vmem:[#allocation20_spill] sm:$0xff]  ;;  %v6602_v62 = vsel %vm2634_vm2, %v6592_v3, %v6601_v16 }
 0x1e6   : > { %v8331_v57 = vpop.f32.mrb[114].mxu1  ;;  %v10612_v50 = vadd.f32 %v4167_v56, %v3900_v13  ;;  %v6593_v13 = vsel %vm2634_vm2, %v6583_v44, %v6592_v3  ;;  %v6606_v56 = vrot.slane %v10344_v40, 4  ;;  %v5930_v5 = vsel %vm2101_vm1, %v5927_v15, %v5929_v24  ;;  %v11171_v8 = vld [vmem:[#allocation22_spill] sm:$0xff]  ;;  %v11173_v40 = vld [vmem:[#allocation9_spill] sm:$0xff] }
 0x1e7   : > { %v4170_v0 = vpop.f32.mrb[115].mxu1  ;;  %v10617_v53 = vadd.f32 %v8331_v57, %v3903_v59  ;;  %8533 = vmatmul.mubr.bf16.gmra.mrb[220].mxu0 %v5924_v25  ;;  %v6609_v25 = vrot.slane %v11169_v21, 5  ;;  %v11170_v59 = vld [vmem:[#allocation21_spill] sm:$0xff]  ;;  %v5931_v20 = vrot.slane %v11173_v40, 4 }
 0x1e8   : > { %8536 = vmatprep.mubr.bf16.mxu0 %v5926_v2  ;;  %v6615_v57 = vrot.slane %v11170_v59, 4  ;;  %v11172_v2 = vld [vmem:[#allocation24_spill] sm:$0xff]  ;;  %v6406_v59 = vld [vmem:[#allocation2 + $0xd8] sm:$0x1f] }
 0x1e9   : > { %8597 = vmatmul.mubr.bf16.gmra.mrb[220].mxu1 %v6575_v55  ;;  %v6618_v55 = vrot.slane %v11171_v8, 5  ;;  %v6610_v10 = vor.u32 %v6609_v25, %v6606_v56  ;;  %v5932_v3 = vsel %vm2101_vm1, %v5929_v24, %v5931_v20  ;;  %v11178_v8 = vld [vmem:[#allocation6_spill] sm:$0xff] }
 0x1ea   : > { %8600 = vmatprep.mubr.bf16.mxu1 %v6584_v27  ;;  %v8270_v33 = vpop.f32.mrb[116].mxu0 }
 0x1eb   : > { %v3906_v19 = vadd.f32 %v8270_v33, %v11168_v63  ;;  %v3725_v23 = vpop.f32.mrb[117].mxu0  ;;  %v6619_v43 = vor.u32 %v6618_v55, %v6615_v57  ;;  %v11175_v63 = vld [vmem:[#allocation11_spill] sm:$0xff]  ;;  %v6611_v25 = vsel %vm2634_vm2, %v6601_v16, %v6610_v10 }
 0x1ec   : > { %v8334_v41 = vpop.f32.mrb[116].mxu1  ;;  %v8271_v28 = vpop.f32.mrb[118].mxu0 }
 0x1ed   : > { %v4183_v58 = vpop.f32.mrb[117].mxu1  ;;  %v10626_v42 = vadd.f32 %v8334_v41, %v3906_v19  ;;  %v3728_v35 = vpop.f32.mrb[119].mxu0  ;;  %v11176_v28 = vld [vmem:[#allocation4_spill] sm:$0xff] }
 0x1ee   : > { %v8335_v37 = vpop.f32.mrb[118].mxu1  ;;  %v3905_v0 = vadd.f32 %v3728_v35, %v11172_v2  ;;  %v6624_v58 = vrot.slane %v10373_v38, 4  ;;  %v5934_v35 = vsel %vm2101_vm1, %v5931_v20, %v5933_v48  ;;  %v11179_v2 = vld [vmem:[#allocation25_spill] sm:$0xff]  ;;  %v11182_v20 = vld [vmem:[#allocation10_spill] sm:$0xff] }
 0x1ef   : > { %v4186_v27 = vpop.f32.mrb[119].mxu1  ;;  %8537 = vmatmul.mubr.bf16.gmra.mrb[224].mxu0 %v5928_v9  ;;  %v6627_v9 = vrot.slane %v11176_v28, 5  ;;  %v11180_v38 = vshrl.u32 %v11179_v2, 16 }
 0x1f0   : > { %v10633_v44 = vadd.f32 %v4186_v27, %v3905_v0  ;;  %8540 = vmatprep.mubr.bf16.mxu0 %v5930_v5  ;;  %v6620_v5 = vsel %vm2634_vm2, %v6610_v10, %v6619_v43  ;;  %v11181_v27 = vshll.u32 %v11179_v2, 16  ;;  %v5935_v10 = vrot.slane %v11182_v20, 4 }
 0x1f1   : > { %8601 = vmatmul.mubr.bf16.gmra.mrb[224].mxu1 %v6593_v13  ;;  %v11177_v13 = vld [vmem:[#allocation5_spill] sm:$0xff]  ;;  %v6633_v0 = vrot.slane %v11180_v38, 4  ;;  %v6628_v52 = vor.u32 %v6627_v9, %v6624_v58 }
 0x1f2   : > { %8604 = vmatprep.mubr.bf16.mxu1 %v6602_v62  ;;  %v8274_v15 = vpop.f32.mrb[120].mxu0  ;;  %v6636_v62 = vrot.slane %v11181_v27, 5 }
 0x1f3   : > { %v3741_v33 = vpop.f32.mrb[121].mxu0  ;;  %v6640_v15 = vshrl.u32 %v6406_v59, 16 }
 0x1f4   : > { %v8338_v61 = vpop.f32.mrb[120].mxu1  ;;  %v3908_v19 = vadd.f32 %v3741_v33, %v11175_v63  ;;  %v8275_v23 = vpop.f32.mrb[122].mxu0  ;;  %v6643_v33 = vshll.u32 %v6406_v59, 16 }
 0x1f5   : > { %v4199_v41 = vpop.f32.mrb[121].mxu1  ;;  %v3911_v21 = vadd.f32 %v8275_v23, %v11177_v13  ;;  %v3744_v56 = vpop.f32.mrb[123].mxu0  ;;  %v5937_v61 = vrot.slane %v11179_v2, 4  ;;  %v6642_v58 = vrot.slane %v6640_v15, 4 }
 0x1f6   : > { %v8339_v37 = vpop.f32.mrb[122].mxu1  ;;  %v10645_v57 = vadd.f32 %v4199_v41, %v3908_v19  ;;  %v3909_v55 = vadd.f32 %v3744_v56, %v11178_v8  ;;  %v6637_v19 = vor.u32 %v6636_v62, %v6633_v0  ;;  %v6629_v56 = vsel %vm2634_vm2, %v6619_v43, %v6628_v52 }
 0x1f7   : > { %v4202_v24 = vpop.f32.mrb[123].mxu1  ;;  %v10652_v40 = vadd.f32 %v8339_v37, %v3911_v21  ;;  %8541 = vmatmul.mubr.bf16.gmra.mrb[228].mxu0 %v5932_v3  ;;  %v5936_v37 = vsel %vm2101_vm1, %v5933_v48, %v5935_v10  ;;  %v5938_v59 = vsel %vm2101_vm1, %v5935_v10, %v5937_v61  ;;  %v6645_v8 = vrot.slane %v6643_v33, 5 }
 0x1f8   : > { %v10654_v16 = vadd.f32 %v4202_v24, %v3909_v55  ;;  %8544 = vmatprep.mubr.bf16.mxu0 %v5934_v35  ;;  %v6638_v24 = vsel %vm2634_vm2, %v6628_v52, %v6637_v19 }
 0x1f9   : > { %8605 = vmatmul.mubr.bf16.gmra.mrb[228].mxu1 %v6611_v25  ;;  %v6646_v43 = vor.u32 %v6645_v8, %v6642_v58 }
 0x1fa   : > { %8608 = vmatprep.mubr.bf16.mxu1 %v6620_v5  ;;  %v8278_v63 = vpop.f32.mrb[124].mxu0 }
 0x1fb   : > { %v3914_v41 = vadd.f32 %v8278_v63, %v10419_v1  ;;  %v3757_v28 = vpop.f32.mrb[125].mxu0  ;;  %v5849_v1 = vld [vmem:[#allocation2 + $0xd8] sm:$0xf]  ;;  %v6647_v63 = vsel %vm2634_vm2, %v6637_v19, %v6646_v43 }
 0x1fc   : > { %v8342_v23 = vpop.f32.mrb[124].mxu1  ;;  %v3912_v3 = vadd.f32 %v3757_v28, %v10424_v51  ;;  %v8279_v21 = vpop.f32.mrb[126].mxu0  ;;  %v5939_v48 = vrot.slane %v5849_v1, 4 }
 0x1fd   : > { %v4215_v13 = vpop.f32.mrb[125].mxu1  ;;  %v10662_v9 = vadd.f32 %v8342_v23, %v3914_v41  ;;  %v3915_v25 = vadd.f32 %v8279_v21, %v10429_v49  ;;  %v3760_v5 = vpop.f32.mrb[127].mxu0 }
 0x1fe   : > { %v8343_v35 = vpop.f32.mrb[126].mxu1  ;;  %v10666_v55 = vadd.f32 %v4215_v13, %v3912_v3  ;;  %v5940_v10 = vsel %vm2101_vm1, %v5937_v61, %v5939_v48 }
 0x1ff   : > { %v4218_v51 = vpop.f32.mrb[127].mxu1  ;;  %v10669_v2 = vadd.f32 %v8343_v35, %v3915_v25  ;;  %8545 = vmatmul.mubr.bf16.gmra.mrb[232].mxu0 %v5936_v37 }
 0x200   : > { %8548 = vmatprep.mubr.bf16.mxu0 %v5938_v59 }
 0x201   : > { %8609 = vmatmul.mubr.bf16.gmra.mrb[232].mxu1 %v6629_v56 }
 0x202   : > { %8612 = vmatprep.mubr.bf16.mxu1 %v6638_v24  ;;  %v8282_v49 = vpop.f32.mrb[128].mxu0 }
 0x203   : > { %v3918_v38 = vadd.f32 %v8282_v49, %v10440_v34  ;;  %v3773_v27 = vpop.f32.mrb[129].mxu0 }
 0x204   : > { %v8346_v0 = vpop.f32.mrb[128].mxu1  ;;  %v8283_v20 = vpop.f32.mrb[130].mxu0 }
 0x205   : > { %v4231_v62 = vpop.f32.mrb[129].mxu1  ;;  %v10673_v15 = vadd.f32 %v8346_v0, %v3918_v38  ;;  %v3776_v33 = vpop.f32.mrb[131].mxu0 }
 0x206   : > { %v8347_v52 = vpop.f32.mrb[130].mxu1  ;;  %v3917_v41 = vadd.f32 %v3776_v33, %v10449_v60 }
 0x207   : > { %v4234_v23 = vpop.f32.mrb[131].mxu1  ;;  %8549 = vmatmul.mubr.bf16.gmra.mrb[236].mxu0 %v5940_v10 }
 0x208   : > { %v10677_v28 = vadd.f32 %v4234_v23, %v3917_v41 }
 0x209   : > { %8613 = vmatmul.mubr.bf16.gmra.mrb[236].mxu1 %v6647_v63 }
 0x20a   : > { %v8286_v34 = vpop.f32.mrb[132].mxu0 }
 0x20b   : > { %v3789_v13 = vpop.f32.mrb[133].mxu0 }
 0x20c   : > { %v8350_v3 = vpop.f32.mrb[132].mxu1  ;;  %v3920_v21 = vadd.f32 %v3789_v13, %v10465_v4  ;;  %v8287_v61 = vpop.f32.mrb[134].mxu0 }
 0x20d   : > { %v4247_v37 = vpop.f32.mrb[133].mxu1  ;;  %v3923_v56 = vadd.f32 %v8287_v61, %v10468_v31  ;;  %v3792_v25 = vpop.f32.mrb[135].mxu0 }
 0x20e   : > { %v8351_v58 = vpop.f32.mrb[134].mxu1  ;;  %v10681_v35 = vadd.f32 %v4247_v37, %v3920_v21  ;;  %v3921_v60 = vadd.f32 %v3792_v25, %v10472_v39 }
 0x20f   : > { %v4250_v19 = vpop.f32.mrb[135].mxu1  ;;  %v10684_v5 = vadd.f32 %v8351_v58, %v3923_v56 }
 0x210   : > { %v10686_v59 = vadd.f32 %v4250_v19, %v3921_v60 }
 0x212   : > { %v8290_v1 = vpop.f32.mrb[136].mxu0 }
 0x213   : > { %v3926_v8 = vadd.f32 %v8290_v1, %v10483_v47  ;;  %v3805_v4 = vpop.f32.mrb[137].mxu0 }
 0x214   : > { %v8354_v51 = vpop.f32.mrb[136].mxu1  ;;  %v3924_v24 = vadd.f32 %v3805_v4, %v10490_v45  ;;  %v8291_v31 = vpop.f32.mrb[138].mxu0 }
 0x215   : > { %v4263_v48 = vpop.f32.mrb[137].mxu1  ;;  %v10690_v43 = vadd.f32 %v8354_v51, %v3926_v8  ;;  %v3927_v49 = vadd.f32 %v8291_v31, %v10495_v12  ;;  %v3808_v39 = vpop.f32.mrb[139].mxu0 }
 0x216   : > { %v8355_v38 = vpop.f32.mrb[138].mxu1  ;;  %v10693_v0 = vadd.f32 %v4263_v48, %v3924_v24 }
 0x217   : > { %v4266_v27 = vpop.f32.mrb[139].mxu1  ;;  %v10695_v62 = vadd.f32 %v8355_v38, %v3927_v49 }
 0x21a   : > { %v8294_v20 = vpop.f32.mrb[140].mxu0 }
 0x21b   : > { %v3930_v47 = vadd.f32 %v8294_v20, %v10506_v26  ;;  %v3821_v52 = vpop.f32.mrb[141].mxu0 }
 0x21c   : > { %v8358_v10 = vpop.f32.mrb[140].mxu1  ;;  %v8295_v45 = vpop.f32.mrb[142].mxu0 }
 0x21d   : > { %v4279_v33 = vpop.f32.mrb[141].mxu1  ;;  %v10698_v63 = vadd.f32 %v8358_v10, %v3930_v47  ;;  %v3824_v23 = vpop.f32.mrb[143].mxu0 }
 0x21e   : > { %v8359_v41 = vpop.f32.mrb[142].mxu1  ;;  %v3929_v12 = vadd.f32 %v3824_v23, %v10515_v30 }
 0x21f   : > { %v4282_v34 = vpop.f32.mrb[143].mxu1 }
 0x220   : > { %v10701_v3 = vadd.f32 %v4282_v34, %v3929_v12 }
 0x222   : > { %v8378_v13 = vpop.f32.mrb[144].mxu0 }
 0x223   : > { %v4783_v37 = vpop.f32.mrb[145].mxu0 }
 0x224   : > { %v8442_v21 = vpop.f32.mrb[144].mxu1  ;;  %v5022_v61 = vadd.f32 %v4783_v37, %v10531_v7  ;;  %v8379_v26 = vpop.f32.mrb[146].mxu0 }
 0x225   : > { %v5490_v56 = vpop.f32.mrb[145].mxu1  ;;  %v5025_v58 = vadd.f32 %v8379_v26, %v10534_v54  ;;  %v4786_v60 = vpop.f32.mrb[147].mxu0 }
 0x226   : > { %v8443_v25 = vpop.f32.mrb[146].mxu1  ;;  %v10705_v19 = vadd.f32 %v5490_v56, %v5022_v61  ;;  %v5023_v1 = vadd.f32 %v4786_v60, %v10538_v36 }
 0x227   : > { %v5493_v8 = vpop.f32.mrb[147].mxu1  ;;  %v10708_v30 = vadd.f32 %v8443_v25, %v5025_v58 }
 0x228   : > { %v10710_v51 = vadd.f32 %v5493_v8, %v5023_v1 }
 0x22a   : > { %v8382_v4 = vpop.f32.mrb[148].mxu0 }
 0x22b   : > { %v5028_v24 = vadd.f32 %v8382_v4, %v10549_v14  ;;  %v4799_v7 = vpop.f32.mrb[149].mxu0 }
 0x22c   : > { %v8446_v48 = vpop.f32.mrb[148].mxu1  ;;  %v5026_v31 = vadd.f32 %v4799_v7, %v10554_v17  ;;  %v8383_v54 = vpop.f32.mrb[150].mxu0 }
 0x22d   : > { %v5506_v49 = vpop.f32.mrb[149].mxu1  ;;  %v10714_v38 = vadd.f32 %v8446_v48, %v5028_v24  ;;  %v5029_v39 = vadd.f32 %v8383_v54, %v10557_v11  ;;  %v4802_v36 = vpop.f32.mrb[151].mxu0 }
 0x22e   : > { %v8447_v27 = vpop.f32.mrb[150].mxu1  ;;  %v10717_v20 = vadd.f32 %v5506_v49, %v5026_v31 }
 0x22f   : > { %v5509_v47 = vpop.f32.mrb[151].mxu1  ;;  %v10719_v10 = vadd.f32 %v8447_v27, %v5029_v39 }
 0x232   : > { %v8386_v52 = vpop.f32.mrb[152].mxu0 }
 0x233   : > { %v5032_v14 = vadd.f32 %v8386_v52, %v10568_v18  ;;  %v4815_v45 = vpop.f32.mrb[153].mxu0 }
 0x234   : > { %v8450_v33 = vpop.f32.mrb[152].mxu1  ;;  %v8387_v17 = vpop.f32.mrb[154].mxu0 }
 0x235   : > { %v5522_v41 = vpop.f32.mrb[153].mxu1  ;;  %v10722_v23 = vadd.f32 %v8450_v33, %v5032_v14  ;;  %v4818_v34 = vpop.f32.mrb[155].mxu0 }
 0x236   : > { %v8451_v12 = vpop.f32.mrb[154].mxu1  ;;  %v5031_v11 = vadd.f32 %v4818_v34, %v10577_v22 }
 0x237   : > { %v5525_v13 = vpop.f32.mrb[155].mxu1 }
 0x238   : > { %v10725_v21 = vadd.f32 %v5525_v13, %v5031_v11 }
 0x23a   : > { %v8390_v37 = vpop.f32.mrb[156].mxu0 }
 0x23b   : > { %v4831_v56 = vpop.f32.mrb[157].mxu0 }
 0x23c   : > { %v8454_v61 = vpop.f32.mrb[156].mxu1  ;;  %v5034_v26 = vadd.f32 %v4831_v56, %v10591_v29  ;;  %v8391_v18 = vpop.f32.mrb[158].mxu0 }
 0x23d   : > { %v5538_v58 = vpop.f32.mrb[157].mxu1  ;;  %v5037_v25 = vadd.f32 %v8391_v18, %v10596_v32  ;;  %v4834_v1 = vpop.f32.mrb[159].mxu0 }
 0x23e   : > { %v8455_v60 = vpop.f32.mrb[158].mxu1  ;;  %v10729_v8 = vadd.f32 %v5538_v58, %v5034_v26  ;;  %v5035_v4 = vadd.f32 %v4834_v1, %v10598_v6 }
 0x23f   : > { %v5541_v24 = vpop.f32.mrb[159].mxu1  ;;  %v10732_v22 = vadd.f32 %v8455_v60, %v5037_v25 }
 0x240   : > { %v10734_v48 = vadd.f32 %v5541_v24, %v5035_v4 }
 0x242   : > { %v8394_v7 = vpop.f32.mrb[160].mxu0 }
 0x243   : > { %v5040_v31 = vadd.f32 %v8394_v7, %v10607_v46  ;;  %v4847_v29 = vpop.f32.mrb[161].mxu0 }
 0x244   : > { %v8458_v49 = vpop.f32.mrb[160].mxu1  ;;  %v5038_v54 = vadd.f32 %v4847_v29, %v10612_v50  ;;  %v8395_v32 = vpop.f32.mrb[162].mxu0 }
 0x245   : > { %v5554_v39 = vpop.f32.mrb[161].mxu1  ;;  %v10738_v27 = vadd.f32 %v8458_v49, %v5040_v31  ;;  %v5041_v36 = vadd.f32 %v8395_v32, %v10617_v53  ;;  %v4850_v6 = vpop.f32.mrb[163].mxu0 }
 0x246   : > { %v8459_v47 = vpop.f32.mrb[162].mxu1  ;;  %v10741_v52 = vadd.f32 %v5554_v39, %v5038_v54 }
 0x247   : > { %v5557_v14 = vpop.f32.mrb[163].mxu1  ;;  %v10743_v33 = vadd.f32 %v8459_v47, %v5041_v36 }
 0x24a   : > { %v8398_v45 = vpop.f32.mrb[164].mxu0 }
 0x24b   : > { %v5044_v46 = vadd.f32 %v8398_v45, %v10626_v42  ;;  %v4863_v17 = vpop.f32.mrb[165].mxu0 }
 0x24c   : > { %v8462_v41 = vpop.f32.mrb[164].mxu1  ;;  %v8399_v50 = vpop.f32.mrb[166].mxu0 }
 0x24d   : > { %v5570_v12 = vpop.f32.mrb[165].mxu1  ;;  %v10746_v34 = vadd.f32 %v8462_v41, %v5044_v46  ;;  %v4866_v13 = vpop.f32.mrb[167].mxu0 }
 0x24e   : > { %v8463_v11 = vpop.f32.mrb[166].mxu1  ;;  %v5043_v53 = vadd.f32 %v4866_v13, %v10633_v44 }
 0x24f   : > { %v5573_v37 = vpop.f32.mrb[167].mxu1 }
 0x250   : > { %v10749_v61 = vadd.f32 %v5573_v37, %v5043_v53 }
 0x252   : > { %v8402_v56 = vpop.f32.mrb[168].mxu0 }
 0x253   : > { %v4879_v58 = vpop.f32.mrb[169].mxu0 }
 0x254   : > { %v8466_v26 = vpop.f32.mrb[168].mxu1  ;;  %v5046_v18 = vadd.f32 %v4879_v58, %v10645_v57  ;;  %v8403_v42 = vpop.f32.mrb[170].mxu0 }
 0x255   : > { %v5586_v25 = vpop.f32.mrb[169].mxu1  ;;  %v5049_v60 = vadd.f32 %v8403_v42, %v10652_v40  ;;  %v4882_v4 = vpop.f32.mrb[171].mxu0 }
 0x256   : > { %v8467_v1 = vpop.f32.mrb[170].mxu1  ;;  %v10753_v24 = vadd.f32 %v5586_v25, %v5046_v18  ;;  %v5047_v7 = vadd.f32 %v4882_v4, %v10654_v16 }
 0x257   : > { %v5589_v31 = vpop.f32.mrb[171].mxu1  ;;  %v10756_v44 = vadd.f32 %v8467_v1, %v5049_v60 }
 0x258   : > { %v10758_v49 = vadd.f32 %v5589_v31, %v5047_v7 }
 0x25a   : > { %v8406_v29 = vpop.f32.mrb[172].mxu0 }
 0x25b   : > { %v5052_v54 = vadd.f32 %v8406_v29, %v10662_v9  ;;  %v4895_v57 = vpop.f32.mrb[173].mxu0 }
 0x25c   : > { %v8470_v39 = vpop.f32.mrb[172].mxu1  ;;  %v5050_v32 = vadd.f32 %v4895_v57, %v10666_v55  ;;  %v8407_v40 = vpop.f32.mrb[174].mxu0 }
 0x25d   : > { %v5602_v36 = vpop.f32.mrb[173].mxu1  ;;  %v10762_v47 = vadd.f32 %v8470_v39, %v5052_v54  ;;  %v5053_v6 = vadd.f32 %v8407_v40, %v10669_v2  ;;  %v4898_v16 = vpop.f32.mrb[175].mxu0 }
 0x25e   : > { %v8471_v14 = vpop.f32.mrb[174].mxu1  ;;  %v10765_v45 = vadd.f32 %v5602_v36, %v5050_v32 }
 0x25f   : > { %v5605_v46 = vpop.f32.mrb[175].mxu1  ;;  %v10767_v41 = vadd.f32 %v8471_v14, %v5053_v6 }
 0x262   : > { %v8410_v17 = vpop.f32.mrb[176].mxu0 }
 0x263   : > { %v5056_v9 = vadd.f32 %v8410_v17, %v10673_v15  ;;  %v4911_v50 = vpop.f32.mrb[177].mxu0  ;;  %v8723_v15 = vmov 0.0  }
 0x264   : > { %v8474_v12 = vpop.f32.mrb[176].mxu1  ;;  %v8411_v11 = vpop.f32.mrb[178].mxu0  ;;  %7297 = vst [vmem:[%s10777_s30 + $0x10] sm:$0xff] %v8723_v15  ;;  %7300 = vst [vmem:[%s10777_s30 + $0x28] sm:$0xff] %v8723_v15 }
 0x265   : > { %v5618_v55 = vpop.f32.mrb[177].mxu1  ;;  %v10770_v13 = vadd.f32 %v8474_v12, %v5056_v9  ;;  %v4914_v37 = vpop.f32.mrb[179].mxu0  ;;  %7303 = vst [vmem:[%s10777_s30 + $0x40] sm:$0xff] %v8723_v15  ;;  %7306 = vst [vmem:[%s10777_s30 + $0x58] sm:$0xff] %v8723_v15 }
 0x266   : > { %v8475_v53 = vpop.f32.mrb[178].mxu1  ;;  %v5055_v2 = vadd.f32 %v4914_v37, %v10677_v28  ;;  %7309 = vst [vmem:[%s10777_s30 + $0x70] sm:$0xff] %v8723_v15  ;;  %7312 = vst [vmem:[%s10777_s30 + $0x88] sm:$0xff] %v8723_v15 }
 0x267   : > { %v5621_v56 = vpop.f32.mrb[179].mxu1  ;;  %7315 = vst [vmem:[%s10777_s30 + $0xa0] sm:$0xff] %v8723_v15  ;;  %7318 = vst [vmem:[%s10777_s30 + $0xb8] sm:$0xff] %v8723_v15 }
 0x268   : > { %7321 = vst [vmem:[%s10777_s30 + $0xd0] sm:$0xff] %v8723_v15  ;;  %7324 = vst [vmem:[%s10777_s30 + $0xe8] sm:$0xff] %v8723_v15  ;;  %v10795_v28 = vadd.f32 %v5621_v56, %v5055_v2 }
 0x269   : > { %7327 = vst [vmem:[%s10777_s30 + $0x100] sm:$0xff] %v8723_v15  ;;  %7330 = vst [vmem:[%s10777_s30 + $0x118] sm:$0xff] %v8723_v15 }
 0x26a   : > { %7333 = vst [vmem:[%s10777_s30 + $0x130] sm:$0xff] %v8723_v15  ;;  %7336 = vst [vmem:[%s10777_s30 + $0x148] sm:$0xff] %v8723_v15  ;;  %v8414_v26 = vpop.f32.mrb[180].mxu0 }
 0x26b   : > { %7339 = vst [vmem:[%s10777_s30 + $0x160] sm:$0xff] %v8723_v15  ;;  %7342 = vst [vmem:[%s10777_s30 + $0x178] sm:$0xff] %v8723_v15  ;;  %v4927_v18 = vpop.f32.mrb[181].mxu0 }
 0x26c   : > { %v8478_v58 = vpop.f32.mrb[180].mxu1  ;;  %v5058_v25 = vadd.f32 %v4927_v18, %v10681_v35  ;;  %v8415_v60 = vpop.f32.mrb[182].mxu0 }
 0x26d   : > { %v5634_v42 = vpop.f32.mrb[181].mxu1  ;;  %v5061_v1 = vadd.f32 %v8415_v60, %v10684_v5  ;;  %v4930_v7 = vpop.f32.mrb[183].mxu0 }
 0x26e   : > { %v8479_v4 = vpop.f32.mrb[182].mxu1  ;;  %v10799_v31 = vadd.f32 %v5634_v42, %v5058_v25  ;;  %v5059_v29 = vadd.f32 %v4930_v7, %v10686_v59 }
 0x26f   : > { %v5637_v54 = vpop.f32.mrb[183].mxu1  ;;  %v10802_v39 = vadd.f32 %v8479_v4, %v5061_v1  ;;  %v10825_v4 = vld [vmem:[%s10967_s5] ss:$0 sm:$0xff] }
 0x270   : > { %v10804_v57 = vadd.f32 %v5637_v54, %v5059_v29 }
 0x272   : > { %v8418_v32 = vpop.f32.mrb[184].mxu0 }
 0x273   : > { %v5064_v36 = vadd.f32 %v8418_v32, %v10690_v43  ;;  %v4943_v35 = vpop.f32.mrb[185].mxu0 }
 0x274   : > { %v8482_v40 = vpop.f32.mrb[184].mxu1  ;;  %v5062_v6 = vadd.f32 %v4943_v35, %v10693_v0  ;;  %v8419_v5 = vpop.f32.mrb[186].mxu0 }
 0x275   : > { %v5650_v14 = vpop.f32.mrb[185].mxu1  ;;  %v10808_v16 = vadd.f32 %v8482_v40, %v5064_v36  ;;  %v5065_v46 = vadd.f32 %v8419_v5, %v10695_v62  ;;  %v4946_v59 = vpop.f32.mrb[187].mxu0 }
 0x276   : > { %v8483_v17 = vpop.f32.mrb[186].mxu1  ;;  %v10811_v9 = vadd.f32 %v5650_v14, %v5062_v6 }
 0x277   : > { %v5653_v12 = vpop.f32.mrb[187].mxu1  ;;  %v10813_v50 = vadd.f32 %v8483_v17, %v5065_v46 }
 0x27a   : > { %v8422_v55 = vpop.f32.mrb[188].mxu0 }
 0x27b   : > { %v5068_v43 = vadd.f32 %v8422_v55, %v10698_v63  ;;  %v4959_v53 = vpop.f32.mrb[189].mxu0 }
 0x27c   : > { %v8486_v11 = vpop.f32.mrb[188].mxu1  ;;  %v8423_v0 = vpop.f32.mrb[190].mxu0 }
 0x27d   : > { %v5666_v37 = vpop.f32.mrb[189].mxu1  ;;  %v10816_v2 = vadd.f32 %v8486_v11, %v5068_v43  ;;  %v4962_v15 = vpop.f32.mrb[191].mxu0 }
 0x27e   : > { %v8487_v56 = vpop.f32.mrb[190].mxu1  ;;  %v5067_v62 = vadd.f32 %v4962_v15, %v10701_v3 }
 0x27f   : > { %v5669_v26 = vpop.f32.mrb[191].mxu1 }
 0x280   : > { %v10819_v58 = vadd.f32 %v5669_v26, %v5067_v62 }
 0x282   : > { %v8506_v18 = vpop.f32.mrb[192].mxu0 }
 0x283   : > { %v6047_v42 = vpop.f32.mrb[193].mxu0 }
 0x284   : > { %v8570_v25 = vpop.f32.mrb[192].mxu1  ;;  %v6286_v60 = vadd.f32 %v6047_v42, %v10705_v19  ;;  %v8507_v63 = vpop.f32.mrb[194].mxu0  ;;  %v10832_v19 = vld [vmem:[%s10969_s7] ss:$0 sm:$0xff] }
 0x285   : > { %v6754_v1 = vpop.f32.mrb[193].mxu1  ;;  %v6289_v7 = vadd.f32 %v8507_v63, %v10708_v30  ;;  %v6050_v54 = vpop.f32.mrb[195].mxu0 }
 0x286   : > { %v8571_v29 = vpop.f32.mrb[194].mxu1  ;;  %v6993_v3 = vadd.f32 %v6754_v1, %v6286_v60  ;;  %v6287_v32 = vadd.f32 %v6050_v54, %v10710_v51 }
 0x287   : > { %v6757_v36 = vpop.f32.mrb[195].mxu1  ;;  %v6996_v40 = vadd.f32 %v8571_v29, %v6289_v7 }
 0x288   : > { %v7144_v35 = vadd.f32 %v10825_v4, %v6993_v3  ;;  %v6994_v6 = vadd.f32 %v6757_v36, %v6287_v32 }
 0x289   : > { %v7147_v14 = vadd.f32 %v10825_v4, %v6996_v40 }
 0x28a   : > { %v7199_v30 = vadd.f32 %v10832_v19, %v7144_v35  ;;  %v7145_v5 = vadd.f32 %v10825_v4, %v6994_v6  ;;  %v8510_v46 = vpop.f32.mrb[196].mxu0 }
 0x28b   : > { %v7202_v51 = vadd.f32 %v10832_v19, %v7147_v14  ;;  %v6292_v17 = vadd.f32 %v8510_v46, %v10714_v38  ;;  %v6063_v12 = vpop.f32.mrb[197].mxu0 }
 0x28c   : > { %v8574_v59 = vpop.f32.mrb[196].mxu1  ;;  %7295 = vst [vmem:[%s10777_s30] sm:$0xff] %v7199_v30  ;;  %v7200_v55 = vadd.f32 %v10832_v19, %v7145_v5  ;;  %v6290_v43 = vadd.f32 %v6063_v12, %v10717_v20  ;;  %v8511_v53 = vpop.f32.mrb[198].mxu0 }
 0x28d   : > { %v6770_v11 = vpop.f32.mrb[197].mxu1  ;;  %7298 = vst [vmem:[%s10777_s30 + $0x18] sm:$0xff] %v7202_v51  ;;  %v6999_v37 = vadd.f32 %v8574_v59, %v6292_v17  ;;  %v6293_v0 = vadd.f32 %v8511_v53, %v10719_v10  ;;  %v6066_v15 = vpop.f32.mrb[199].mxu0 }
 0x28e   : > { %v8575_v56 = vpop.f32.mrb[198].mxu1  ;;  %7296 = vst [vmem:[%s10777_s30 + $0x8] sm:$0xff] %v7200_v55  ;;  %v6997_v62 = vadd.f32 %v6770_v11, %v6290_v43 }
 0x28f   : > { %v6773_v38 = vpop.f32.mrb[199].mxu1  ;;  %v7150_v26 = vadd.f32 %v10825_v4, %v6999_v37  ;;  %v7000_v18 = vadd.f32 %v8575_v56, %v6293_v0 }
 0x290   : > { %v7148_v25 = vadd.f32 %v10825_v4, %v6997_v62 }
 0x291   : > { %v7205_v20 = vadd.f32 %v10832_v19, %v7150_v26  ;;  %v7151_v42 = vadd.f32 %v10825_v4, %v7000_v18 }
 0x292   : > { %v7203_v60 = vadd.f32 %v10832_v19, %v7148_v25  ;;  %v8514_v1 = vpop.f32.mrb[200].mxu0 }
 0x293   : > { %7301 = vst [vmem:[%s10777_s30 + $0x30] sm:$0xff] %v7205_v20  ;;  %v7206_v10 = vadd.f32 %v10832_v19, %v7151_v42  ;;  %v6296_v63 = vadd.f32 %v8514_v1, %v10722_v23  ;;  %v6079_v29 = vpop.f32.mrb[201].mxu0 }
 0x294   : > { %v8578_v7 = vpop.f32.mrb[200].mxu1  ;;  %7299 = vst [vmem:[%s10777_s30 + $0x20] sm:$0xff] %v7203_v60  ;;  %v8515_v3 = vpop.f32.mrb[202].mxu0 }
 0x295   : > { %v6786_v54 = vpop.f32.mrb[201].mxu1  ;;  %7302 = vst [vmem:[%s10777_s30 + $0x38] sm:$0xff] %v7206_v10  ;;  %v7003_v32 = vadd.f32 %v8578_v7, %v6296_v63  ;;  %v6082_v40 = vpop.f32.mrb[203].mxu0 }
 0x296   : > { %v8579_v36 = vpop.f32.mrb[202].mxu1  ;;  %v6295_v35 = vadd.f32 %v6082_v40, %v10725_v21 }
 0x297   : > { %v6789_v6 = vpop.f32.mrb[203].mxu1  ;;  %v7154_v14 = vadd.f32 %v10825_v4, %v7003_v32 }
 0x298   : > { %v7002_v30 = vadd.f32 %v6789_v6, %v6295_v35 }
 0x299   : > { %v7209_v5 = vadd.f32 %v10832_v19, %v7154_v14 }
 0x29a   : > { %v7153_v23 = vadd.f32 %v10825_v4, %v7002_v30  ;;  %v8518_v46 = vpop.f32.mrb[204].mxu0 }
 0x29b   : > { %7305 = vst [vmem:[%s10777_s30 + $0x50] sm:$0xff] %v7209_v5  ;;  %v6095_v17 = vpop.f32.mrb[205].mxu0 }
 0x29c   : > { %v8582_v51 = vpop.f32.mrb[204].mxu1  ;;  %v7208_v59 = vadd.f32 %v10832_v19, %v7153_v23  ;;  %v6298_v12 = vadd.f32 %v6095_v17, %v10729_v8  ;;  %v8519_v43 = vpop.f32.mrb[206].mxu0 }
 0x29d   : > { %v6802_v55 = vpop.f32.mrb[205].mxu1  ;;  %v6301_v21 = vadd.f32 %v8519_v43, %v10732_v22  ;;  %v6098_v53 = vpop.f32.mrb[207].mxu0 }
 0x29e   : > { %v8583_v11 = vpop.f32.mrb[206].mxu1  ;;  %7304 = vst [vmem:[%s10777_s30 + $0x48] sm:$0xff] %v7208_v59  ;;  %v7005_v37 = vadd.f32 %v6802_v55, %v6298_v12  ;;  %v6299_v0 = vadd.f32 %v6098_v53, %v10734_v48 }
 0x29f   : > { %v6805_v56 = vpop.f32.mrb[207].mxu1  ;;  %v7008_v15 = vadd.f32 %v8583_v11, %v6301_v21 }
 0x2a0   : > { %v7156_v62 = vadd.f32 %v10825_v4, %v7005_v37  ;;  %v7006_v38 = vadd.f32 %v6805_v56, %v6299_v0 }
 0x2a1   : > { %v7159_v26 = vadd.f32 %v10825_v4, %v7008_v15 }
 0x2a2   : > { %v7211_v8 = vadd.f32 %v10832_v19, %v7156_v62  ;;  %v7157_v18 = vadd.f32 %v10825_v4, %v7006_v38  ;;  %v8522_v22 = vpop.f32.mrb[208].mxu0 }
 0x2a3   : > { %v7214_v25 = vadd.f32 %v10832_v19, %v7159_v26  ;;  %v6304_v20 = vadd.f32 %v8522_v22, %v10738_v27  ;;  %v6111_v48 = vpop.f32.mrb[209].mxu0 }
 0x2a4   : > { %v8586_v42 = vpop.f32.mrb[208].mxu1  ;;  %7307 = vst [vmem:[%s10777_s30 + $0x60] sm:$0xff] %v7211_v8  ;;  %v7212_v60 = vadd.f32 %v10832_v19, %v7157_v18  ;;  %v6302_v1 = vadd.f32 %v6111_v48, %v10741_v52  ;;  %v8523_v63 = vpop.f32.mrb[210].mxu0 }
 0x2a5   : > { %v6818_v10 = vpop.f32.mrb[209].mxu1  ;;  %7310 = vst [vmem:[%s10777_s30 + $0x78] sm:$0xff] %v7214_v25  ;;  %v7011_v7 = vadd.f32 %v8586_v42, %v6304_v20  ;;  %v6305_v29 = vadd.f32 %v8523_v63, %v10743_v33  ;;  %v6114_v3 = vpop.f32.mrb[211].mxu0 }
 0x2a6   : > { %v8587_v54 = vpop.f32.mrb[210].mxu1  ;;  %7308 = vst [vmem:[%s10777_s30 + $0x68] sm:$0xff] %v7212_v60  ;;  %v7009_v32 = vadd.f32 %v6818_v10, %v6302_v1 }
 0x2a7   : > { %v6821_v27 = vpop.f32.mrb[211].mxu1  ;;  %v7162_v36 = vadd.f32 %v10825_v4, %v7011_v7  ;;  %v7012_v40 = vadd.f32 %v8587_v54, %v6305_v29 }
 0x2a8   : > { %v7160_v35 = vadd.f32 %v10825_v4, %v7009_v32 }
 0x2a9   : > { %v7217_v52 = vadd.f32 %v10832_v19, %v7162_v36  ;;  %v7163_v6 = vadd.f32 %v10825_v4, %v7012_v40 }
 0x2aa   : > { %v7215_v14 = vadd.f32 %v10832_v19, %v7160_v35  ;;  %v8526_v30 = vpop.f32.mrb[212].mxu0 }
 0x2ab   : > { %7313 = vst [vmem:[%s10777_s30 + $0x90] sm:$0xff] %v7217_v52  ;;  %v7218_v33 = vadd.f32 %v10832_v19, %v7163_v6  ;;  %v6308_v5 = vadd.f32 %v8526_v30, %v10746_v34  ;;  %v6127_v46 = vpop.f32.mrb[213].mxu0 }
 0x2ac   : > { %v8590_v23 = vpop.f32.mrb[212].mxu1  ;;  %7311 = vst [vmem:[%s10777_s30 + $0x80] sm:$0xff] %v7215_v14  ;;  %v8527_v17 = vpop.f32.mrb[214].mxu0 }
 0x2ad   : > { %v6834_v51 = vpop.f32.mrb[213].mxu1  ;;  %7314 = vst [vmem:[%s10777_s30 + $0x98] sm:$0xff] %v7218_v33  ;;  %v7015_v59 = vadd.f32 %v8590_v23, %v6308_v5  ;;  %v6130_v55 = vpop.f32.mrb[215].mxu0 }
 0x2ae   : > { %v8591_v12 = vpop.f32.mrb[214].mxu1  ;;  %v6307_v43 = vadd.f32 %v6130_v55, %v10749_v61 }
 0x2af   : > { %v6837_v21 = vpop.f32.mrb[215].mxu1  ;;  %v7166_v11 = vadd.f32 %v10825_v4, %v7015_v59 }
 0x2b0   : > { %v7014_v53 = vadd.f32 %v6837_v21, %v6307_v43 }
 0x2b1   : > { %v7221_v37 = vadd.f32 %v10832_v19, %v7166_v11 }
 0x2b2   : > { %v7165_v34 = vadd.f32 %v10825_v4, %v7014_v53  ;;  %v8530_v0 = vpop.f32.mrb[216].mxu0 }
 0x2b3   : > { %7317 = vst [vmem:[%s10777_s30 + $0xb0] sm:$0xff] %v7221_v37  ;;  %v6143_v15 = vpop.f32.mrb[217].mxu0 }
 0x2b4   : > { %v8594_v56 = vpop.f32.mrb[216].mxu1  ;;  %v7220_v62 = vadd.f32 %v10832_v19, %v7165_v34  ;;  %v6310_v38 = vadd.f32 %v6143_v15, %v10753_v24  ;;  %v8531_v8 = vpop.f32.mrb[218].mxu0 }
 0x2b5   : > { %v6850_v26 = vpop.f32.mrb[217].mxu1  ;;  %v6313_v61 = vadd.f32 %v8531_v8, %v10756_v44  ;;  %v6146_v22 = vpop.f32.mrb[219].mxu0 }
 0x2b6   : > { %v8595_v18 = vpop.f32.mrb[218].mxu1  ;;  %7316 = vst [vmem:[%s10777_s30 + $0xa8] sm:$0xff] %v7220_v62  ;;  %v7017_v25 = vadd.f32 %v6850_v26, %v6310_v38  ;;  %v6311_v20 = vadd.f32 %v6146_v22, %v10758_v49 }
 0x2b7   : > { %v6853_v42 = vpop.f32.mrb[219].mxu1  ;;  %v7020_v48 = vadd.f32 %v8595_v18, %v6313_v61 }
 0x2b8   : > { %v7168_v60 = vadd.f32 %v10825_v4, %v7017_v25  ;;  %v7018_v1 = vadd.f32 %v6853_v42, %v6311_v20 }
 0x2b9   : > { %v7171_v10 = vadd.f32 %v10825_v4, %v7020_v48 }
 0x2ba   : > { %v7223_v24 = vadd.f32 %v10832_v19, %v7168_v60  ;;  %v7169_v63 = vadd.f32 %v10825_v4, %v7018_v1  ;;  %v8534_v44 = vpop.f32.mrb[220].mxu0 }
 0x2bb   : > { %v7226_v7 = vadd.f32 %v10832_v19, %v7171_v10  ;;  %v6316_v29 = vadd.f32 %v8534_v44, %v10762_v47  ;;  %v6159_v49 = vpop.f32.mrb[221].mxu0 }
 0x2bc   : > { %v8598_v54 = vpop.f32.mrb[220].mxu1  ;;  %7319 = vst [vmem:[%s10777_s30 + $0xc0] sm:$0xff] %v7223_v24  ;;  %v7224_v3 = vadd.f32 %v10832_v19, %v7169_v63  ;;  %v6314_v32 = vadd.f32 %v6159_v49, %v10765_v45  ;;  %v8535_v36 = vpop.f32.mrb[222].mxu0 }
 0x2bd   : > { %v6866_v27 = vpop.f32.mrb[221].mxu1  ;;  %7322 = vst [vmem:[%s10777_s30 + $0xd8] sm:$0xff] %v7226_v7  ;;  %v7023_v40 = vadd.f32 %v8598_v54, %v6316_v29  ;;  %v6317_v35 = vadd.f32 %v8535_v36, %v10767_v41  ;;  %v6162_v6 = vpop.f32.mrb[223].mxu0 }
 0x2be   : > { %v8599_v52 = vpop.f32.mrb[222].mxu1  ;;  %7320 = vst [vmem:[%s10777_s30 + $0xc8] sm:$0xff] %v7224_v3  ;;  %v7021_v14 = vadd.f32 %v6866_v27, %v6314_v32 }
 0x2bf   : > { %v6869_v47 = vpop.f32.mrb[223].mxu1  ;;  %v7174_v30 = vadd.f32 %v10825_v4, %v7023_v40  ;;  %v7024_v33 = vadd.f32 %v8599_v52, %v6317_v35 }
 0x2c0   : > { %v7172_v5 = vadd.f32 %v10825_v4, %v7021_v14 }
 0x2c1   : > { %v7229_v45 = vadd.f32 %v10832_v19, %v7174_v30  ;;  %v7175_v23 = vadd.f32 %v10825_v4, %v7024_v33 }
 0x2c2   : > { %v7227_v46 = vadd.f32 %v10832_v19, %v7172_v5  ;;  %v8538_v51 = vpop.f32.mrb[224].mxu0 }
 0x2c3   : > { %7325 = vst [vmem:[%s10777_s30 + $0xf0] sm:$0xff] %v7229_v45  ;;  %v7230_v41 = vadd.f32 %v10832_v19, %v7175_v23  ;;  %v6320_v17 = vadd.f32 %v8538_v51, %v10770_v13  ;;  %v6175_v12 = vpop.f32.mrb[225].mxu0 }
 0x2c4   : > { %v8602_v59 = vpop.f32.mrb[224].mxu1  ;;  %7323 = vst [vmem:[%s10777_s30 + $0xe0] sm:$0xff] %v7227_v46  ;;  %v8539_v43 = vpop.f32.mrb[226].mxu0 }
 0x2c5   : > { %v6882_v55 = vpop.f32.mrb[225].mxu1  ;;  %7326 = vst [vmem:[%s10777_s30 + $0xf8] sm:$0xff] %v7230_v41  ;;  %v7027_v21 = vadd.f32 %v8602_v59, %v6320_v17  ;;  %v6178_v53 = vpop.f32.mrb[227].mxu0 }
 0x2c6   : > { %v8603_v11 = vpop.f32.mrb[226].mxu1  ;;  %v6319_v37 = vadd.f32 %v6178_v53, %v10795_v28 }
 0x2c7   : > { %v6885_v34 = vpop.f32.mrb[227].mxu1  ;;  %v7178_v0 = vadd.f32 %v10825_v4, %v7027_v21 }
 0x2c8   : > { %v7026_v56 = vadd.f32 %v6885_v34, %v6319_v37 }
 0x2c9   : > { %v7233_v15 = vadd.f32 %v10832_v19, %v7178_v0 }
 0x2ca   : > { %v7177_v13 = vadd.f32 %v10825_v4, %v7026_v56  ;;  %v8542_v62 = vpop.f32.mrb[228].mxu0 }
 0x2cb   : > { %7329 = vst [vmem:[%s10777_s30 + $0x110] sm:$0xff] %v7233_v15  ;;  %v6191_v26 = vpop.f32.mrb[229].mxu0 }
 0x2cc   : > { %v8606_v38 = vpop.f32.mrb[228].mxu1  ;;  %v7232_v8 = vadd.f32 %v10832_v19, %v7177_v13  ;;  %v6322_v61 = vadd.f32 %v6191_v26, %v10799_v31  ;;  %v8543_v22 = vpop.f32.mrb[230].mxu0 }
 0x2cd   : > { %v6898_v18 = vpop.f32.mrb[229].mxu1  ;;  %v6325_v28 = vadd.f32 %v8543_v22, %v10802_v39  ;;  %v6194_v20 = vpop.f32.mrb[231].mxu0 }
 0x2ce   : > { %v8607_v25 = vpop.f32.mrb[230].mxu1  ;;  %7328 = vst [vmem:[%s10777_s30 + $0x108] sm:$0xff] %v7232_v8  ;;  %v7029_v42 = vadd.f32 %v6898_v18, %v6322_v61  ;;  %v6323_v48 = vadd.f32 %v6194_v20, %v10804_v57 }
 0x2cf   : > { %v6901_v60 = vpop.f32.mrb[231].mxu1  ;;  %v7032_v1 = vadd.f32 %v8607_v25, %v6325_v28 }
 0x2d0   : > { %v7180_v10 = vadd.f32 %v10825_v4, %v7029_v42  ;;  %v7030_v24 = vadd.f32 %v6901_v60, %v6323_v48 }
 0x2d1   : > { %v7183_v63 = vadd.f32 %v10825_v4, %v7032_v1 }
 0x2d2   : > { %v7235_v31 = vadd.f32 %v10832_v19, %v7180_v10  ;;  %v7181_v44 = vadd.f32 %v10825_v4, %v7030_v24  ;;  %v8546_v39 = vpop.f32.mrb[232].mxu0 }
 0x2d3   : > { %v7238_v7 = vadd.f32 %v10832_v19, %v7183_v63  ;;  %v6328_v29 = vadd.f32 %v8546_v39, %v10808_v16  ;;  %v6207_v57 = vpop.f32.mrb[233].mxu0 }
 0x2d4   : > { %v8610_v54 = vpop.f32.mrb[232].mxu1  ;;  %7331 = vst [vmem:[%s10777_s30 + $0x120] sm:$0xff] %v7235_v31  ;;  %v7236_v49 = vadd.f32 %v10832_v19, %v7181_v44  ;;  %v6326_v3 = vadd.f32 %v6207_v57, %v10811_v9  ;;  %v8547_v27 = vpop.f32.mrb[234].mxu0 }
 0x2d5   : > { %v6914_v32 = vpop.f32.mrb[233].mxu1  ;;  %7334 = vst [vmem:[%s10777_s30 + $0x138] sm:$0xff] %v7238_v7  ;;  %v7035_v36 = vadd.f32 %v8610_v54, %v6328_v29  ;;  %v6329_v40 = vadd.f32 %v8547_v27, %v10813_v50  ;;  %v6210_v52 = vpop.f32.mrb[235].mxu0 }
 0x2d6   : > { %v8611_v35 = vpop.f32.mrb[234].mxu1  ;;  %7332 = vst [vmem:[%s10777_s30 + $0x128] sm:$0xff] %v7236_v49  ;;  %v7033_v6 = vadd.f32 %v6914_v32, %v6326_v3 }
 0x2d7   : > { %v6917_v16 = vpop.f32.mrb[235].mxu1  ;;  %v7186_v14 = vadd.f32 %v10825_v4, %v7035_v36  ;;  %v7036_v47 = vadd.f32 %v8611_v35, %v6329_v40 }
 0x2d8   : > { %v7184_v30 = vadd.f32 %v10825_v4, %v7033_v6 }
 0x2d9   : > { %v7241_v9 = vadd.f32 %v10832_v19, %v7186_v14  ;;  %v7187_v33 = vadd.f32 %v10825_v4, %v7036_v47 }
 0x2da   : > { %v7239_v5 = vadd.f32 %v10832_v19, %v7184_v30  ;;  %v8550_v45 = vpop.f32.mrb[236].mxu0 }
 0x2db   : > { %7337 = vst [vmem:[%s10777_s30 + $0x150] sm:$0xff] %v7241_v9  ;;  %v7242_v50 = vadd.f32 %v10832_v19, %v7187_v33  ;;  %v6332_v23 = vadd.f32 %v8550_v45, %v10816_v2  ;;  %v6223_v51 = vpop.f32.mrb[237].mxu0 }
 0x2dc   : > { %v8614_v46 = vpop.f32.mrb[236].mxu1  ;;  %7335 = vst [vmem:[%s10777_s30 + $0x140] sm:$0xff] %v7239_v5  ;;  %v8551_v17 = vpop.f32.mrb[238].mxu0 }
 0x2dd   : > { %v6930_v41 = vpop.f32.mrb[237].mxu1  ;;  %7338 = vst [vmem:[%s10777_s30 + $0x158] sm:$0xff] %v7242_v50  ;;  %v7039_v59 = vadd.f32 %v8614_v46, %v6332_v23  ;;  %v6226_v55 = vpop.f32.mrb[239].mxu0 }
 0x2de   : > { %v8615_v12 = vpop.f32.mrb[238].mxu1  ;;  %v6331_v43 = vadd.f32 %v6226_v55, %v10819_v58 }
 0x2df   : > { %v6933_v21 = vpop.f32.mrb[239].mxu1  ;;  %v7190_v11 = vadd.f32 %v10825_v4, %v7039_v59 }
 0x2e0   : > { %v7038_v53 = vadd.f32 %v6933_v21, %v6331_v43 }
 0x2e1   : > { %v7245_v37 = vadd.f32 %v10832_v19, %v7190_v11 }
 0x2e2   : > { %v7189_v2 = vadd.f32 %v10825_v4, %v7038_v53 }
 0x2e3   : > { %7341 = vst [vmem:[%s10777_s30 + $0x170] sm:$0xff] %v7245_v37 }
 0x2e4   : > { %v7244_v34 = vadd.f32 %v10832_v19, %v7189_v2 }
 0x2e6   : > { %7340 = vst [vmem:[%s10777_s30 + $0x168] sm:$0xff] %v7244_v34 }
 0x2e7 PF: > { %s18_s27 = sadd.s32 1, %s8719_s27  }
 0x2e8   : > { %p15_p4 = scmp.ge.s32.totalorder %s18_s27, 4  }
 0x2ea   :  { %17 = sbr.rel (!%p15_p4) target bundleno = 1 (0x1), region = 93 }

</bundles_post_ra>
